<compile_context>
chip_gen: v7x
topology: tpu7x:2x2x1
jax: 0.10.0
libtpu: 0.0.40
codegen_flags: <defaults>
</compile_context>

<pallas_src>
import functools

import jax
import jax.numpy as jnp
from jax.experimental import pallas as pl
from jax.experimental.pallas import tpu as pltpu

# ---- scaled-down ViT hyper-parameters (structure matches vit_base_*) -------
IMG = 32            # image size          (224 in the real model)
PATCH = 8           # patch size          (16)
IN_CH = 3           # RGB
EMBED_DIM = 64      # backbone.num_features (768)
DEPTH = 2           # transformer blocks  (12)
NUM_HEADS = 4       # attention heads     (12)
MLP_RATIO = 4
NUM_CLASSES = 24
EPS_VIT = 1e-6      # timm ViT LayerNorm eps
EPS_HEAD = 1e-5     # nn.LayerNorm default eps (classifier head)

NP = (IMG // PATCH) ** 2            # 16 patches
CPP = IN_CH * PATCH * PATCH         # 192 = patch pixels per token
S_REAL = NP + 1                     # 17 tokens (cls + patches)
S_PAD = 24                          # token rows padded to a multiple of 8
HEAD_PAD = 128                      # lane-dense classifier output width
HEAD_DIM = EMBED_DIM // NUM_HEADS   # 16
MLP_DIM = EMBED_DIM * MLP_RATIO     # 256
BT_DEFAULT = 4                      # images per grid step (B//BT >= 2 keeps v7x busy)


# ----------------------------- fused kernel ---------------------------------
def _ln(x, g, b, eps):
    mean = jnp.mean(x, axis=-1, keepdims=True)
    xc = x - mean
    var = jnp.mean(xc * xc, axis=-1, keepdims=True)
    return xc * jax.lax.rsqrt(var + eps) * g + b


def _vit_kernel(bt, patches_ref, pos_ref, patch_w_ref,
                ln1_g_ref, ln1_b_ref, qkv_w_ref, qkv_b_ref,
                proj_w_ref, proj_b_ref, ln2_g_ref, ln2_b_ref,
                fc1_w_ref, fc1_b_ref, fc2_w_ref, fc2_b_ref,
                norm_g_ref, norm_b_ref, head_ln_g_ref, head_ln_b_ref,
                head_w_ref, head_b_ref, o_ref):
    f32, bf16 = jnp.float32, jnp.bfloat16
    D, Dh, H = EMBED_DIM, HEAD_DIM, NUM_HEADS
    M = bt * S_PAD

    # mask for padded key columns (tokens >= S_REAL); queries of padded rows are harmless
    # because nothing downstream mixes rows and only the cls row is read at the end.
    key_mask = jax.lax.broadcasted_iota(jnp.int32, (1, 1, S_PAD), 2) < S_REAL

    # ---- patch embed + cls/pos/patch-bias add (pre-folded into pos table) ------------
    patches = patches_ref[...]                                            # (M, CPP) f32
    x = jnp.dot(patches.astype(bf16), patch_w_ref[...],
                preferred_element_type=f32)                               # (M, D) f32
    x = x + jnp.tile(pos_ref[...], (bt, 1))

    # ---- transformer blocks (fully unrolled, everything resident in VMEM) -----------
    for d in range(DEPTH):
        # -- attention --
        h = _ln(x, ln1_g_ref[d], ln1_b_ref[d], EPS_VIT)
        qkv = jnp.dot(h.astype(bf16), qkv_w_ref[d],
                      preferred_element_type=f32) + qkv_b_ref[d]          # (M, 3D) f32
        qkv3 = qkv.reshape(bt, S_PAD, 3 * D)                              # per-image view

        heads = []
        for hh in range(H):           # head slices taken once per grid step (BT images)
            lo = hh * Dh
            q = qkv3[:, :, lo:lo + Dh].astype(bf16)          # scale already folded in
            k = qkv3[:, :, D + lo:D + lo + Dh].astype(bf16)
            v = qkv3[:, :, 2 * D + lo:2 * D + lo + Dh].astype(bf16)
            s = jnp.einsum('bqd,bkd->bqk', q, k,
                           preferred_element_type=f32)                    # (bt, S, S)
            s = jnp.where(key_mask, s, -1e30)                # mask padded key columns
            s = s - jnp.max(s, axis=-1, keepdims=True)
            p = jnp.exp(s)
            p = p * pl.reciprocal(jnp.sum(p, axis=-1, keepdims=True), approx=True)
            heads.append(jnp.einsum('bqk,bkd->bqd', p.astype(bf16), v,
                                    preferred_element_type=f32))          # (bt, S, Dh)

        # single K=64 output projection instead of four K=16 per-head matmuls
        attn = jnp.concatenate(heads, axis=-1).reshape(M, D)
        attn = jnp.dot(attn.astype(bf16), proj_w_ref[d], preferred_element_type=f32)
        x = x + attn + proj_b_ref[d]

        # -- MLP --
        h = _ln(x, ln2_g_ref[d], ln2_b_ref[d], EPS_VIT)
        m = jnp.dot(h.astype(bf16), fc1_w_ref[d],
                    preferred_element_type=f32) + fc1_b_ref[d]
        m = jax.nn.gelu(m, approximate=True)   # tanh GELU -> EUP (torch default is erf)
        x = x + jnp.dot(m.astype(bf16), fc2_w_ref[d],
                        preferred_element_type=f32) + fc2_b_ref[d]

    # ---- final norm + cls-token pooling + classifier head ---------------------------
    cls = x.reshape(bt, S_PAD, D)[:, 0:1, :].reshape(bt, D)               # cls rows
    feat = _ln(cls, norm_g_ref[...], norm_b_ref[...], EPS_VIT)
    hcls = _ln(feat, head_ln_g_ref[...], head_ln_b_ref[...], EPS_HEAD)
    logits = jnp.dot(hcls.astype(bf16), head_w_ref[...],
                     preferred_element_type=f32) + head_b_ref[...]        # (bt, 128)
    o_ref[0] = logits.astype(o_ref.dtype)


# ----------------------------- wrapper ---------------------------------------
_PARAM_ORDER = ("pos_full", "patch_w",
                "ln1_g", "ln1_b", "qkv_w", "qkv_b", "proj_w", "proj_b",
                "ln2_g", "ln2_b", "fc1_w", "fc1_b", "fc2_w", "fc2_b",
                "norm_g", "norm_b", "head_ln_g", "head_ln_b", "head_w", "head_b")


def _full_spec(shape):
    # whole array resident in VMEM; constant block index -> fetched once, not per step
    n = len(shape)
    return pl.BlockSpec(shape, lambda g, n=n: (0,) * n)


def _cost_estimate(batch, param_bytes):
    m = S_PAD
    fl = 2 * m * CPP * EMBED_DIM
    fl += DEPTH * (2 * m * EMBED_DIM * 3 * EMBED_DIM
                   + 2 * NUM_HEADS * m * m * HEAD_DIM * 2
                   + 2 * m * EMBED_DIM * EMBED_DIM
                   + 2 * m * EMBED_DIM * MLP_DIM
                   + 2 * m * MLP_DIM * EMBED_DIM)
    fl += 2 * EMBED_DIM * HEAD_PAD
    fl *= batch
    trans = batch * DEPTH * (NUM_HEADS * m * m + m * MLP_DIM)  # exp + tanh
    bytes_acc = batch * S_PAD * CPP * 4 + param_bytes + batch * HEAD_PAD * 4
    return pl.CostEstimate(flops=int(fl), transcendentals=int(trans),
                           bytes_accessed=int(bytes_acc))


def belove_thai_forward(params, x, bt=BT_DEFAULT):
    """x: (B, C, H, W) NCHW float32 -> logits (B, NUM_CLASSES)."""
    B, C, H, W = x.shape
    assert C == IN_CH and H == IMG and W == IMG
    assert B % bt == 0, "batch must be divisible by the per-step image count"
    p = PATCH
    # one-time XLA glue on the input: extract patches, reserve row 0 for cls, pad rows
    xp = x.reshape(B, C, H // p, p, W // p, p)
    xp = jnp.transpose(xp, (0, 2, 4, 1, 3, 5)).reshape(B, NP, CPP)
    patches = jnp.pad(xp, ((0, 0), (1, S_PAD - 1 - NP), (0, 0)))          # (B, 24, 192)
    patches = patches.reshape(B * S_PAD, CPP)                             # fused-M slab

    args = [params[k] for k in _PARAM_ORDER]
    param_bytes = sum(int(a.size) * a.dtype.itemsize for a in args)

    in_specs = [pl.BlockSpec((bt * S_PAD, CPP), lambda g: (g, 0))]
    in_specs += [_full_spec(a.shape) for a in args]

    out = pl.pallas_call(
        functools.partial(_vit_kernel, bt),
        out_shape=jax.ShapeDtypeStruct((B // bt, bt, HEAD_PAD), jnp.float32),
        grid=(B // bt,),
        in_specs=in_specs,
        out_specs=pl.BlockSpec((1, bt, HEAD_PAD), lambda g: (g, 0, 0)),
        compiler_params=pltpu.CompilerParams(dimension_semantics=("parallel",)),
        cost_estimate=_cost_estimate(B, param_bytes),
    )(patches, *args)
    return out.reshape(B, HEAD_PAD)[:, :NUM_CLASSES]


# ----------------------------- param init -----------------------------------
def init_params(key):
    # TODO(synk): pretrained timm checkpoint loading is not reproduced; deterministic
    # random init with the same tensor structure is used instead.
    D, MLP = EMBED_DIM, MLP_DIM
    bf16 = jnp.bfloat16
    ks = iter(jax.random.split(key, 16))

    def nrm(shape, scale=0.02):
        return (scale * jax.random.normal(next(ks), shape)).astype(jnp.float32)

    patch_w = nrm((CPP, D))
    patch_b = jnp.zeros((D,), jnp.float32)
    cls_token = nrm((1, 1, D))
    pos_embed = nrm((1, S_REAL, D))

    # fold cls token, positional embedding and patch-embed bias into one additive
    # (S_PAD, D) table; padded rows stay exactly zero.
    pos_full = jnp.zeros((S_PAD, D), jnp.float32)
    pos_full = pos_full.at[0].set(cls_token[0, 0] + pos_embed[0, 0])
    pos_full = pos_full.at[1:S_REAL].set(pos_embed[0, 1:] + patch_b)

    attn_scale = 1.0 / (HEAD_DIM ** 0.5)
    qkv_ws, proj_ws, fc1_ws, fc2_ws = [], [], [], []
    for _ in range(DEPTH):
        w = nrm((D, 3 * D))
        w = w.at[:, :D].multiply(attn_scale)     # fold 1/sqrt(Dh) into the Q columns
        qkv_ws.append(w)
        proj_ws.append(nrm((D, D)))
        fc1_ws.append(nrm((D, MLP)))
        fc2_ws.append(nrm((MLP, D)))

    head_w = nrm((D, NUM_CLASSES))
    head_w_pad = jnp.zeros((D, HEAD_PAD), jnp.float32).at[:, :NUM_CLASSES].set(head_w)
    head_b_pad = jnp.zeros((1, HEAD_PAD), jnp.float32)

    return {
        # matmul weights stored bf16 (MXU operands); everything else stays f32
        "patch_w": patch_w.astype(bf16),
        "pos_full": pos_full,
        "norm_g": jnp.ones((1, D), jnp.float32),
        "norm_b": jnp.zeros((1, D), jnp.float32),
        "head_ln_g": jnp.ones((1, D), jnp.float32),
        "head_ln_b": jnp.zeros((1, D), jnp.float32),
        "head_w": head_w_pad.astype(bf16),
        "head_b": head_b_pad,
        # per-block params stacked on a leading DEPTH axis (indexed statically in-kernel)
        "ln1_g": jnp.ones((DEPTH, 1, D), jnp.float32),
        "ln1_b": jnp.zeros((DEPTH, 1, D), jnp.float32),
        "qkv_w": jnp.stack(qkv_ws).astype(bf16),
        "qkv_b": jnp.zeros((DEPTH, 1, 3 * D), jnp.float32),  # Q-cols would also be scaled
        "proj_w": jnp.stack(proj_ws).astype(bf16),
        "proj_b": jnp.zeros((DEPTH, 1, D), jnp.float32),
        "ln2_g": jnp.ones((DEPTH, 1, D), jnp.float32),
        "ln2_b": jnp.zeros((DEPTH, 1, D), jnp.float32),
        "fc1_w": jnp.stack(fc1_ws).astype(bf16),
        "fc1_b": jnp.zeros((DEPTH, 1, MLP), jnp.float32),
        "fc2_w": jnp.stack(fc2_ws).astype(bf16),
        "fc2_b": jnp.zeros((DEPTH, 1, D), jnp.float32),
    }


# ----------------------------- main ------------------------------------------
if __name__ == "__main__":
    key = jax.random.PRNGKey(0)
    kx, kp = jax.random.split(key)
    B = 8                                                   # grid = B // BT = 2 steps
    x = jax.random.normal(kx, (B, IN_CH, IMG, IMG), dtype=jnp.float32)   # NCHW
    params = init_params(kp)

    fwd = jax.jit(functools.partial(belove_thai_forward, bt=BT_DEFAULT))
    logits = fwd(params, x)
    jax.block_until_ready(logits)
    assert logits.shape == (B, NUM_CLASSES), logits.shape
    assert bool(jnp.all(jnp.isfinite(logits)))
    print("KERNEL_OK")
</pallas_src>

<mosaic_0001>
module attributes {stable_mosaic.version = 11 : i64} {
  func.func @_vit_kernel(%arg0: i32, %arg1: memref<96x192xf32, #tpu.memory_space<vmem>>, %arg2: memref<24x64xf32, #tpu.memory_space<vmem>>, %arg3: memref<192x64xbf16, #tpu.memory_space<vmem>>, %arg4: memref<2x1x64xf32, #tpu.memory_space<vmem>>, %arg5: memref<2x1x64xf32, #tpu.memory_space<vmem>>, %arg6: memref<2x64x192xbf16, #tpu.memory_space<vmem>>, %arg7: memref<2x1x192xf32, #tpu.memory_space<vmem>>, %arg8: memref<2x64x64xbf16, #tpu.memory_space<vmem>>, %arg9: memref<2x1x64xf32, #tpu.memory_space<vmem>>, %arg10: memref<2x1x64xf32, #tpu.memory_space<vmem>>, %arg11: memref<2x1x64xf32, #tpu.memory_space<vmem>>, %arg12: memref<2x64x256xbf16, #tpu.memory_space<vmem>>, %arg13: memref<2x1x256xf32, #tpu.memory_space<vmem>>, %arg14: memref<2x256x64xbf16, #tpu.memory_space<vmem>>, %arg15: memref<2x1x64xf32, #tpu.memory_space<vmem>>, %arg16: memref<1x64xf32, #tpu.memory_space<vmem>>, %arg17: memref<1x64xf32, #tpu.memory_space<vmem>>, %arg18: memref<1x64xf32, #tpu.memory_space<vmem>>, %arg19: memref<1x64xf32, #tpu.memory_space<vmem>>, %arg20: memref<64x128xbf16, #tpu.memory_space<vmem>>, %arg21: memref<1x128xf32, #tpu.memory_space<vmem>>, %arg22: memref<1x4x128xf32, #tpu.memory_space<vmem>>) attributes {dimension_semantics = [#tpu.dimension_semantics<parallel>], iteration_bounds = array<i64: 2>, scalar_prefetch = 0 : i64, scratch_operands = 0 : i64, tpu.core_type = #tpu.core_type<tc>, window_params = [{transform_indices = @transform_0, window_bounds = array<i64: 96, 192>}, {pipeline_mode = #tpu.pipeline_mode<synchronous>, transform_indices = @transform_1, window_bounds = array<i64: 24, 64>}, {pipeline_mode = #tpu.pipeline_mode<synchronous>, transform_indices = @transform_2, window_bounds = array<i64: 192, 64>}, {pipeline_mode = #tpu.pipeline_mode<synchronous>, transform_indices = @transform_3, window_bounds = array<i64: 2, 1, 64>}, {pipeline_mode = #tpu.pipeline_mode<synchronous>, transform_indices = @transform_4, window_bounds = array<i64: 2, 1, 64>}, {pipeline_mode = #tpu.pipeline_mode<synchronous>, transform_indices = @transform_5, window_bounds = array<i64: 2, 64, 192>}, {pipeline_mode = #tpu.pipeline_mode<synchronous>, transform_indices = @transform_6, window_bounds = array<i64: 2, 1, 192>}, {pipeline_mode = #tpu.pipeline_mode<synchronous>, transform_indices = @transform_7, window_bounds = array<i64: 2, 64, 64>}, {pipeline_mode = #tpu.pipeline_mode<synchronous>, transform_indices = @transform_8, window_bounds = array<i64: 2, 1, 64>}, {pipeline_mode = #tpu.pipeline_mode<synchronous>, transform_indices = @transform_9, window_bounds = array<i64: 2, 1, 64>}, {pipeline_mode = #tpu.pipeline_mode<synchronous>, transform_indices = @transform_10, window_bounds = array<i64: 2, 1, 64>}, {pipeline_mode = #tpu.pipeline_mode<synchronous>, transform_indices = @transform_11, window_bounds = array<i64: 2, 64, 256>}, {pipeline_mode = #tpu.pipeline_mode<synchronous>, transform_indices = @transform_12, window_bounds = array<i64: 2, 1, 256>}, {pipeline_mode = #tpu.pipeline_mode<synchronous>, transform_indices = @transform_13, window_bounds = array<i64: 2, 256, 64>}, {pipeline_mode = #tpu.pipeline_mode<synchronous>, transform_indices = @transform_14, window_bounds = array<i64: 2, 1, 64>}, {pipeline_mode = #tpu.pipeline_mode<synchronous>, transform_indices = @transform_15, window_bounds = array<i64: 1, 64>}, {pipeline_mode = #tpu.pipeline_mode<synchronous>, transform_indices = @transform_16, window_bounds = array<i64: 1, 64>}, {pipeline_mode = #tpu.pipeline_mode<synchronous>, transform_indices = @transform_17, window_bounds = array<i64: 1, 64>}, {pipeline_mode = #tpu.pipeline_mode<synchronous>, transform_indices = @transform_18, window_bounds = array<i64: 1, 64>}, {pipeline_mode = #tpu.pipeline_mode<synchronous>, transform_indices = @transform_19, window_bounds = array<i64: 64, 128>}, {pipeline_mode = #tpu.pipeline_mode<synchronous>, transform_indices = @transform_20, window_bounds = array<i64: 1, 128>}, {transform_indices = @transform_21, window_bounds = array<i64: 1, 4, 128>}]} {
    %0 = tpu.iota {dimensions = array<i32: 2>} : vector<1x1x24xi32>
    %c17_i32 = arith.constant 17 : i32
    %1 = vector.broadcast %c17_i32 : i32 to vector<1x1x24xi32>
    %2 = arith.cmpi slt, %0, %1 : vector<1x1x24xi32>
    %c0 = arith.constant 0 : index
    %c0_0 = arith.constant 0 : index
    %3 = vector.load %arg1[%c0, %c0_0] : memref<96x192xf32, #tpu.memory_space<vmem>>, vector<96x192xf32>
    %4 = arith.truncf %3 : vector<96x192xf32> to vector<96x192xbf16>
    %c0_1 = arith.constant 0 : index
    %c0_2 = arith.constant 0 : index
    %5 = vector.load %arg3[%c0_1, %c0_2] : memref<192x64xbf16, #tpu.memory_space<vmem>>, vector<192x64xbf16>
    %cst = arith.constant dense<0.000000e+00> : vector<96x64xf32>
    %6 = tpu.matmul %4, %5, %cst {dimension_numbers = #tpu.dot_dimension_numbers<[1], [0], [0], [1], [0, 0, 1, 1], [], []>} : vector<96x192xbf16>, vector<192x64xbf16>, vector<96x64xf32> -> vector<96x64xf32>
    %c0_3 = arith.constant 0 : index
    %c0_4 = arith.constant 0 : index
    %7 = vector.load %arg2[%c0_3, %c0_4] : memref<24x64xf32, #tpu.memory_space<vmem>>, vector<24x64xf32>
    %8 = tpu.concatenate %7, %7, %7, %7 in 0 : vector<24x64xf32>, vector<24x64xf32>, vector<24x64xf32>, vector<24x64xf32> -> vector<96x64xf32>
    %9 = arith.addf %6, %8 : vector<96x64xf32>
    %c0_5 = arith.constant 0 : index
    %c0_6 = arith.constant 0 : index
    %c0_7 = arith.constant 0 : index
    %10 = vector.load %arg4[%c0_5, %c0_6, %c0_7] : memref<2x1x64xf32, #tpu.memory_space<vmem>>, vector<1x1x64xf32>
    %11 = vector.shape_cast %10 : vector<1x1x64xf32> to vector<1x64xf32>
    %c0_8 = arith.constant 0 : index
    %c0_9 = arith.constant 0 : index
    %c0_10 = arith.constant 0 : index
    %12 = vector.load %arg5[%c0_8, %c0_9, %c0_10] : memref<2x1x64xf32, #tpu.memory_space<vmem>>, vector<1x1x64xf32>
    %13 = vector.shape_cast %12 : vector<1x1x64xf32> to vector<1x64xf32>
    %cst_11 = arith.constant dense<0.000000e+00> : vector<96xf32>
    %14 = vector.multi_reduction <add>, %9, %cst_11 [1] : vector<96x64xf32> to vector<96xf32>
    %15 = vector.shape_cast %14 : vector<96xf32> to vector<96x1xf32>
    %cst_12 = arith.constant 6.400000e+01 : f32
    %16 = vector.broadcast %cst_12 : f32 to vector<96x1xf32>
    %17 = arith.divf %15, %16 : vector<96x1xf32>
    %18 = vector.broadcast %17 : vector<96x1xf32> to vector<96x64xf32>
    %19 = arith.subf %9, %18 : vector<96x64xf32>
    %20 = arith.mulf %19, %19 : vector<96x64xf32>
    %cst_13 = arith.constant dense<0.000000e+00> : vector<96xf32>
    %21 = vector.multi_reduction <add>, %20, %cst_13 [1] : vector<96x64xf32> to vector<96xf32>
    %22 = vector.shape_cast %21 : vector<96xf32> to vector<96x1xf32>
    %cst_14 = arith.constant 6.400000e+01 : f32
    %23 = vector.broadcast %cst_14 : f32 to vector<96x1xf32>
    %24 = arith.divf %22, %23 : vector<96x1xf32>
    %cst_15 = arith.constant 9.99999997E-7 : f32
    %25 = vector.broadcast %cst_15 : f32 to vector<96x1xf32>
    %26 = arith.addf %24, %25 : vector<96x1xf32>
    %27 = math.rsqrt %26 : vector<96x1xf32>
    %28 = vector.broadcast %27 : vector<96x1xf32> to vector<96x64xf32>
    %29 = arith.mulf %19, %28 : vector<96x64xf32>
    %30 = vector.broadcast %11 : vector<1x64xf32> to vector<96x64xf32>
    %31 = arith.mulf %29, %30 : vector<96x64xf32>
    %32 = vector.broadcast %13 : vector<1x64xf32> to vector<96x64xf32>
    %33 = arith.addf %31, %32 : vector<96x64xf32>
    %34 = arith.truncf %33 : vector<96x64xf32> to vector<96x64xbf16>
    %c0_16 = arith.constant 0 : index
    %c0_17 = arith.constant 0 : index
    %c0_18 = arith.constant 0 : index
    %35 = vector.load %arg6[%c0_16, %c0_17, %c0_18] : memref<2x64x192xbf16, #tpu.memory_space<vmem>>, vector<1x64x192xbf16>
    %36 = vector.shape_cast %35 : vector<1x64x192xbf16> to vector<64x192xbf16>
    %cst_19 = arith.constant dense<0.000000e+00> : vector<96x192xf32>
    %37 = tpu.matmul %34, %36, %cst_19 {dimension_numbers = #tpu.dot_dimension_numbers<[1], [0], [0], [1], [0, 0, 1, 1], [], []>} : vector<96x64xbf16>, vector<64x192xbf16>, vector<96x192xf32> -> vector<96x192xf32>
    %c0_20 = arith.constant 0 : index
    %c0_21 = arith.constant 0 : index
    %c0_22 = arith.constant 0 : index
    %38 = vector.load %arg7[%c0_20, %c0_21, %c0_22] : memref<2x1x192xf32, #tpu.memory_space<vmem>>, vector<1x1x192xf32>
    %39 = vector.shape_cast %38 : vector<1x1x192xf32> to vector<1x192xf32>
    %40 = vector.broadcast %39 : vector<1x192xf32> to vector<96x192xf32>
    %41 = arith.addf %37, %40 : vector<96x192xf32>
    %42 = vector.shape_cast %41 : vector<96x192xf32> to vector<4x24x192xf32>
    %43 = vector.extract_strided_slice %42 {offsets = [0, 0, 0], sizes = [4, 24, 16], strides = [1, 1, 1]} : vector<4x24x192xf32> to vector<4x24x16xf32>
    %44 = arith.truncf %43 : vector<4x24x16xf32> to vector<4x24x16xbf16>
    %45 = vector.extract_strided_slice %42 {offsets = [0, 0, 64], sizes = [4, 24, 16], strides = [1, 1, 1]} : vector<4x24x192xf32> to vector<4x24x16xf32>
    %46 = arith.truncf %45 : vector<4x24x16xf32> to vector<4x24x16xbf16>
    %47 = vector.extract_strided_slice %42 {offsets = [0, 0, 128], sizes = [4, 24, 16], strides = [1, 1, 1]} : vector<4x24x192xf32> to vector<4x24x16xf32>
    %48 = arith.truncf %47 : vector<4x24x16xf32> to vector<4x24x16xbf16>
    "tpu.trace_start"() <{level = 10 : i32, message = "bqd,bkd->bqk"}> : () -> ()
    %cst_23 = arith.constant dense<0.000000e+00> : vector<4x24x24xf32>
    %49 = tpu.matmul %44, %46, %cst_23 {dimension_numbers = #tpu.dot_dimension_numbers<[2], [2], [1], [1], [0, 0, 0, 1, 1, 1], [0], [0]>} : vector<4x24x16xbf16>, vector<4x24x16xbf16>, vector<4x24x24xf32> -> vector<4x24x24xf32>
    %cst_24 = arith.constant -1.000000e+30 : f32
    "tpu.trace_stop"() : () -> ()
    %50 = vector.shape_cast %2 : vector<1x1x24xi1> to vector<1x1x24xi1>
    %51 = vector.broadcast %50 : vector<1x1x24xi1> to vector<4x24x24xi1>
    %52 = vector.broadcast %cst_24 : f32 to vector<4x24x24xf32>
    %53 = arith.select %51, %49, %52 : vector<4x24x24xi1>, vector<4x24x24xf32>
    %cst_25 = arith.constant dense<0xFF800000> : vector<4x24xf32>
    %54 = vector.multi_reduction <maximumf>, %53, %cst_25 [2] : vector<4x24x24xf32> to vector<4x24xf32>
    %55 = vector.shape_cast %54 : vector<4x24xf32> to vector<4x24x1xf32>
    %56 = vector.broadcast %55 : vector<4x24x1xf32> to vector<4x24x24xf32>
    %57 = arith.subf %53, %56 : vector<4x24x24xf32>
    %58 = math.exp %57 : vector<4x24x24xf32>
    %cst_26 = arith.constant dense<0.000000e+00> : vector<4x24xf32>
    %59 = vector.multi_reduction <add>, %58, %cst_26 [2] : vector<4x24x24xf32> to vector<4x24xf32>
    %60 = vector.shape_cast %59 : vector<4x24xf32> to vector<4x24x1xf32>
    %61 = tpu.reciprocal %60 {approx = true} : vector<4x24x1xf32> -> vector<4x24x1xf32>
    %62 = vector.broadcast %61 : vector<4x24x1xf32> to vector<4x24x24xf32>
    %63 = arith.mulf %58, %62 : vector<4x24x24xf32>
    %64 = arith.truncf %63 : vector<4x24x24xf32> to vector<4x24x24xbf16>
    "tpu.trace_start"() <{level = 10 : i32, message = "bqk,bkd->bqd"}> : () -> ()
    %cst_27 = arith.constant dense<0.000000e+00> : vector<4x24x16xf32>
    %65 = tpu.matmul %64, %48, %cst_27 {dimension_numbers = #tpu.dot_dimension_numbers<[2], [1], [1], [2], [0, 0, 0, 1, 1, 2], [0], [0]>} : vector<4x24x24xbf16>, vector<4x24x16xbf16>, vector<4x24x16xf32> -> vector<4x24x16xf32>
    "tpu.trace_stop"() : () -> ()
    %66 = vector.extract_strided_slice %42 {offsets = [0, 0, 16], sizes = [4, 24, 16], strides = [1, 1, 1]} : vector<4x24x192xf32> to vector<4x24x16xf32>
    %67 = arith.truncf %66 : vector<4x24x16xf32> to vector<4x24x16xbf16>
    %68 = vector.extract_strided_slice %42 {offsets = [0, 0, 80], sizes = [4, 24, 16], strides = [1, 1, 1]} : vector<4x24x192xf32> to vector<4x24x16xf32>
    %69 = arith.truncf %68 : vector<4x24x16xf32> to vector<4x24x16xbf16>
    %70 = vector.extract_strided_slice %42 {offsets = [0, 0, 144], sizes = [4, 24, 16], strides = [1, 1, 1]} : vector<4x24x192xf32> to vector<4x24x16xf32>
    %71 = arith.truncf %70 : vector<4x24x16xf32> to vector<4x24x16xbf16>
    "tpu.trace_start"() <{level = 10 : i32, message = "bqd,bkd->bqk"}> : () -> ()
    %cst_28 = arith.constant dense<0.000000e+00> : vector<4x24x24xf32>
    %72 = tpu.matmul %67, %69, %cst_28 {dimension_numbers = #tpu.dot_dimension_numbers<[2], [2], [1], [1], [0, 0, 0, 1, 1, 1], [0], [0]>} : vector<4x24x16xbf16>, vector<4x24x16xbf16>, vector<4x24x24xf32> -> vector<4x24x24xf32>
    %cst_29 = arith.constant -1.000000e+30 : f32
    "tpu.trace_stop"() : () -> ()
    %73 = vector.shape_cast %2 : vector<1x1x24xi1> to vector<1x1x24xi1>
    %74 = vector.broadcast %73 : vector<1x1x24xi1> to vector<4x24x24xi1>
    %75 = vector.broadcast %cst_29 : f32 to vector<4x24x24xf32>
    %76 = arith.select %74, %72, %75 : vector<4x24x24xi1>, vector<4x24x24xf32>
    %cst_30 = arith.constant dense<0xFF800000> : vector<4x24xf32>
    %77 = vector.multi_reduction <maximumf>, %76, %cst_30 [2] : vector<4x24x24xf32> to vector<4x24xf32>
    %78 = vector.shape_cast %77 : vector<4x24xf32> to vector<4x24x1xf32>
    %79 = vector.broadcast %78 : vector<4x24x1xf32> to vector<4x24x24xf32>
    %80 = arith.subf %76, %79 : vector<4x24x24xf32>
    %81 = math.exp %80 : vector<4x24x24xf32>
    %cst_31 = arith.constant dense<0.000000e+00> : vector<4x24xf32>
    %82 = vector.multi_reduction <add>, %81, %cst_31 [2] : vector<4x24x24xf32> to vector<4x24xf32>
    %83 = vector.shape_cast %82 : vector<4x24xf32> to vector<4x24x1xf32>
    %84 = tpu.reciprocal %83 {approx = true} : vector<4x24x1xf32> -> vector<4x24x1xf32>
    %85 = vector.broadcast %84 : vector<4x24x1xf32> to vector<4x24x24xf32>
    %86 = arith.mulf %81, %85 : vector<4x24x24xf32>
    %87 = arith.truncf %86 : vector<4x24x24xf32> to vector<4x24x24xbf16>
    "tpu.trace_start"() <{level = 10 : i32, message = "bqk,bkd->bqd"}> : () -> ()
    %cst_32 = arith.constant dense<0.000000e+00> : vector<4x24x16xf32>
    %88 = tpu.matmul %87, %71, %cst_32 {dimension_numbers = #tpu.dot_dimension_numbers<[2], [1], [1], [2], [0, 0, 0, 1, 1, 2], [0], [0]>} : vector<4x24x24xbf16>, vector<4x24x16xbf16>, vector<4x24x16xf32> -> vector<4x24x16xf32>
    "tpu.trace_stop"() : () -> ()
    %89 = vector.extract_strided_slice %42 {offsets = [0, 0, 32], sizes = [4, 24, 16], strides = [1, 1, 1]} : vector<4x24x192xf32> to vector<4x24x16xf32>
    %90 = arith.truncf %89 : vector<4x24x16xf32> to vector<4x24x16xbf16>
    %91 = vector.extract_strided_slice %42 {offsets = [0, 0, 96], sizes = [4, 24, 16], strides = [1, 1, 1]} : vector<4x24x192xf32> to vector<4x24x16xf32>
    %92 = arith.truncf %91 : vector<4x24x16xf32> to vector<4x24x16xbf16>
    %93 = vector.extract_strided_slice %42 {offsets = [0, 0, 160], sizes = [4, 24, 16], strides = [1, 1, 1]} : vector<4x24x192xf32> to vector<4x24x16xf32>
    %94 = arith.truncf %93 : vector<4x24x16xf32> to vector<4x24x16xbf16>
    "tpu.trace_start"() <{level = 10 : i32, message = "bqd,bkd->bqk"}> : () -> ()
    %cst_33 = arith.constant dense<0.000000e+00> : vector<4x24x24xf32>
    %95 = tpu.matmul %90, %92, %cst_33 {dimension_numbers = #tpu.dot_dimension_numbers<[2], [2], [1], [1], [0, 0, 0, 1, 1, 1], [0], [0]>} : vector<4x24x16xbf16>, vector<4x24x16xbf16>, vector<4x24x24xf32> -> vector<4x24x24xf32>
    %cst_34 = arith.constant -1.000000e+30 : f32
    "tpu.trace_stop"() : () -> ()
    %96 = vector.shape_cast %2 : vector<1x1x24xi1> to vector<1x1x24xi1>
    %97 = vector.broadcast %96 : vector<1x1x24xi1> to vector<4x24x24xi1>
    %98 = vector.broadcast %cst_34 : f32 to vector<4x24x24xf32>
    %99 = arith.select %97, %95, %98 : vector<4x24x24xi1>, vector<4x24x24xf32>
    %cst_35 = arith.constant dense<0xFF800000> : vector<4x24xf32>
    %100 = vector.multi_reduction <maximumf>, %99, %cst_35 [2] : vector<4x24x24xf32> to vector<4x24xf32>
    %101 = vector.shape_cast %100 : vector<4x24xf32> to vector<4x24x1xf32>
    %102 = vector.broadcast %101 : vector<4x24x1xf32> to vector<4x24x24xf32>
    %103 = arith.subf %99, %102 : vector<4x24x24xf32>
    %104 = math.exp %103 : vector<4x24x24xf32>
    %cst_36 = arith.constant dense<0.000000e+00> : vector<4x24xf32>
    %105 = vector.multi_reduction <add>, %104, %cst_36 [2] : vector<4x24x24xf32> to vector<4x24xf32>
    %106 = vector.shape_cast %105 : vector<4x24xf32> to vector<4x24x1xf32>
    %107 = tpu.reciprocal %106 {approx = true} : vector<4x24x1xf32> -> vector<4x24x1xf32>
    %108 = vector.broadcast %107 : vector<4x24x1xf32> to vector<4x24x24xf32>
    %109 = arith.mulf %104, %108 : vector<4x24x24xf32>
    %110 = arith.truncf %109 : vector<4x24x24xf32> to vector<4x24x24xbf16>
    "tpu.trace_start"() <{level = 10 : i32, message = "bqk,bkd->bqd"}> : () -> ()
    %cst_37 = arith.constant dense<0.000000e+00> : vector<4x24x16xf32>
    %111 = tpu.matmul %110, %94, %cst_37 {dimension_numbers = #tpu.dot_dimension_numbers<[2], [1], [1], [2], [0, 0, 0, 1, 1, 2], [0], [0]>} : vector<4x24x24xbf16>, vector<4x24x16xbf16>, vector<4x24x16xf32> -> vector<4x24x16xf32>
    "tpu.trace_stop"() : () -> ()
    %112 = vector.extract_strided_slice %42 {offsets = [0, 0, 48], sizes = [4, 24, 16], strides = [1, 1, 1]} : vector<4x24x192xf32> to vector<4x24x16xf32>
    %113 = arith.truncf %112 : vector<4x24x16xf32> to vector<4x24x16xbf16>
    %114 = vector.extract_strided_slice %42 {offsets = [0, 0, 112], sizes = [4, 24, 16], strides = [1, 1, 1]} : vector<4x24x192xf32> to vector<4x24x16xf32>
    %115 = arith.truncf %114 : vector<4x24x16xf32> to vector<4x24x16xbf16>
    %116 = vector.extract_strided_slice %42 {offsets = [0, 0, 176], sizes = [4, 24, 16], strides = [1, 1, 1]} : vector<4x24x192xf32> to vector<4x24x16xf32>
    %117 = arith.truncf %116 : vector<4x24x16xf32> to vector<4x24x16xbf16>
    "tpu.trace_start"() <{level = 10 : i32, message = "bqd,bkd->bqk"}> : () -> ()
    %cst_38 = arith.constant dense<0.000000e+00> : vector<4x24x24xf32>
    %118 = tpu.matmul %113, %115, %cst_38 {dimension_numbers = #tpu.dot_dimension_numbers<[2], [2], [1], [1], [0, 0, 0, 1, 1, 1], [0], [0]>} : vector<4x24x16xbf16>, vector<4x24x16xbf16>, vector<4x24x24xf32> -> vector<4x24x24xf32>
    %cst_39 = arith.constant -1.000000e+30 : f32
    "tpu.trace_stop"() : () -> ()
    %119 = vector.shape_cast %2 : vector<1x1x24xi1> to vector<1x1x24xi1>
    %120 = vector.broadcast %119 : vector<1x1x24xi1> to vector<4x24x24xi1>
    %121 = vector.broadcast %cst_39 : f32 to vector<4x24x24xf32>
    %122 = arith.select %120, %118, %121 : vector<4x24x24xi1>, vector<4x24x24xf32>
    %cst_40 = arith.constant dense<0xFF800000> : vector<4x24xf32>
    %123 = vector.multi_reduction <maximumf>, %122, %cst_40 [2] : vector<4x24x24xf32> to vector<4x24xf32>
    %124 = vector.shape_cast %123 : vector<4x24xf32> to vector<4x24x1xf32>
    %125 = vector.broadcast %124 : vector<4x24x1xf32> to vector<4x24x24xf32>
    %126 = arith.subf %122, %125 : vector<4x24x24xf32>
    %127 = math.exp %126 : vector<4x24x24xf32>
    %cst_41 = arith.constant dense<0.000000e+00> : vector<4x24xf32>
    %128 = vector.multi_reduction <add>, %127, %cst_41 [2] : vector<4x24x24xf32> to vector<4x24xf32>
    %129 = vector.shape_cast %128 : vector<4x24xf32> to vector<4x24x1xf32>
    %130 = tpu.reciprocal %129 {approx = true} : vector<4x24x1xf32> -> vector<4x24x1xf32>
    %131 = vector.broadcast %130 : vector<4x24x1xf32> to vector<4x24x24xf32>
    %132 = arith.mulf %127, %131 : vector<4x24x24xf32>
    %133 = arith.truncf %132 : vector<4x24x24xf32> to vector<4x24x24xbf16>
    "tpu.trace_start"() <{level = 10 : i32, message = "bqk,bkd->bqd"}> : () -> ()
    %cst_42 = arith.constant dense<0.000000e+00> : vector<4x24x16xf32>
    %134 = tpu.matmul %133, %117, %cst_42 {dimension_numbers = #tpu.dot_dimension_numbers<[2], [1], [1], [2], [0, 0, 0, 1, 1, 2], [0], [0]>} : vector<4x24x24xbf16>, vector<4x24x16xbf16>, vector<4x24x16xf32> -> vector<4x24x16xf32>
    "tpu.trace_stop"() : () -> ()
    %135 = tpu.concatenate %65, %88, %111, %134 in 2 : vector<4x24x16xf32>, vector<4x24x16xf32>, vector<4x24x16xf32>, vector<4x24x16xf32> -> vector<4x24x64xf32>
    %136 = vector.shape_cast %135 : vector<4x24x64xf32> to vector<96x64xf32>
    %137 = arith.truncf %136 : vector<96x64xf32> to vector<96x64xbf16>
    %c0_43 = arith.constant 0 : index
    %c0_44 = arith.constant 0 : index
    %c0_45 = arith.constant 0 : index
    %138 = vector.load %arg8[%c0_43, %c0_44, %c0_45] : memref<2x64x64xbf16, #tpu.memory_space<vmem>>, vector<1x64x64xbf16>
    %139 = vector.shape_cast %138 : vector<1x64x64xbf16> to vector<64x64xbf16>
    %cst_46 = arith.constant dense<0.000000e+00> : vector<96x64xf32>
    %140 = tpu.matmul %137, %139, %cst_46 {dimension_numbers = #tpu.dot_dimension_numbers<[1], [0], [0], [1], [0, 0, 1, 1], [], []>} : vector<96x64xbf16>, vector<64x64xbf16>, vector<96x64xf32> -> vector<96x64xf32>
    %141 = arith.addf %9, %140 : vector<96x64xf32>
    %c0_47 = arith.constant 0 : index
    %c0_48 = arith.constant 0 : index
    %c0_49 = arith.constant 0 : index
    %142 = vector.load %arg9[%c0_47, %c0_48, %c0_49] : memref<2x1x64xf32, #tpu.memory_space<vmem>>, vector<1x1x64xf32>
    %143 = vector.shape_cast %142 : vector<1x1x64xf32> to vector<1x64xf32>
    %144 = vector.broadcast %143 : vector<1x64xf32> to vector<96x64xf32>
    %145 = arith.addf %141, %144 : vector<96x64xf32>
    %c0_50 = arith.constant 0 : index
    %c0_51 = arith.constant 0 : index
    %c0_52 = arith.constant 0 : index
    %146 = vector.load %arg10[%c0_50, %c0_51, %c0_52] : memref<2x1x64xf32, #tpu.memory_space<vmem>>, vector<1x1x64xf32>
    %147 = vector.shape_cast %146 : vector<1x1x64xf32> to vector<1x64xf32>
    %c0_53 = arith.constant 0 : index
    %c0_54 = arith.constant 0 : index
    %c0_55 = arith.constant 0 : index
    %148 = vector.load %arg11[%c0_53, %c0_54, %c0_55] : memref<2x1x64xf32, #tpu.memory_space<vmem>>, vector<1x1x64xf32>
    %149 = vector.shape_cast %148 : vector<1x1x64xf32> to vector<1x64xf32>
    %cst_56 = arith.constant dense<0.000000e+00> : vector<96xf32>
    %150 = vector.multi_reduction <add>, %145, %cst_56 [1] : vector<96x64xf32> to vector<96xf32>
    %151 = vector.shape_cast %150 : vector<96xf32> to vector<96x1xf32>
    %cst_57 = arith.constant 6.400000e+01 : f32
    %152 = vector.broadcast %cst_57 : f32 to vector<96x1xf32>
    %153 = arith.divf %151, %152 : vector<96x1xf32>
    %154 = vector.broadcast %153 : vector<96x1xf32> to vector<96x64xf32>
    %155 = arith.subf %145, %154 : vector<96x64xf32>
    %156 = arith.mulf %155, %155 : vector<96x64xf32>
    %cst_58 = arith.constant dense<0.000000e+00> : vector<96xf32>
    %157 = vector.multi_reduction <add>, %156, %cst_58 [1] : vector<96x64xf32> to vector<96xf32>
    %158 = vector.shape_cast %157 : vector<96xf32> to vector<96x1xf32>
    %cst_59 = arith.constant 6.400000e+01 : f32
    %159 = vector.broadcast %cst_59 : f32 to vector<96x1xf32>
    %160 = arith.divf %158, %159 : vector<96x1xf32>
    %cst_60 = arith.constant 9.99999997E-7 : f32
    %161 = vector.broadcast %cst_60 : f32 to vector<96x1xf32>
    %162 = arith.addf %160, %161 : vector<96x1xf32>
    %163 = math.rsqrt %162 : vector<96x1xf32>
    %164 = vector.broadcast %163 : vector<96x1xf32> to vector<96x64xf32>
    %165 = arith.mulf %155, %164 : vector<96x64xf32>
    %166 = vector.broadcast %147 : vector<1x64xf32> to vector<96x64xf32>
    %167 = arith.mulf %165, %166 : vector<96x64xf32>
    %168 = vector.broadcast %149 : vector<1x64xf32> to vector<96x64xf32>
    %169 = arith.addf %167, %168 : vector<96x64xf32>
    %170 = arith.truncf %169 : vector<96x64xf32> to vector<96x64xbf16>
    %c0_61 = arith.constant 0 : index
    %c0_62 = arith.constant 0 : index
    %c0_63 = arith.constant 0 : index
    %171 = vector.load %arg12[%c0_61, %c0_62, %c0_63] : memref<2x64x256xbf16, #tpu.memory_space<vmem>>, vector<1x64x256xbf16>
    %172 = vector.shape_cast %171 : vector<1x64x256xbf16> to vector<64x256xbf16>
    %cst_64 = arith.constant dense<0.000000e+00> : vector<96x256xf32>
    %173 = tpu.matmul %170, %172, %cst_64 {dimension_numbers = #tpu.dot_dimension_numbers<[1], [0], [0], [1], [0, 0, 1, 1], [], []>} : vector<96x64xbf16>, vector<64x256xbf16>, vector<96x256xf32> -> vector<96x256xf32>
    %c0_65 = arith.constant 0 : index
    %c0_66 = arith.constant 0 : index
    %c0_67 = arith.constant 0 : index
    %174 = vector.load %arg13[%c0_65, %c0_66, %c0_67] : memref<2x1x256xf32, #tpu.memory_space<vmem>>, vector<1x1x256xf32>
    %175 = vector.shape_cast %174 : vector<1x1x256xf32> to vector<1x256xf32>
    %176 = vector.broadcast %175 : vector<1x256xf32> to vector<96x256xf32>
    %177 = arith.addf %173, %176 : vector<96x256xf32>
    %178 = arith.mulf %177, %177 : vector<96x256xf32>
    %179 = arith.mulf %177, %178 : vector<96x256xf32>
    %cst_68 = arith.constant 4.471500e-02 : f32
    %180 = vector.broadcast %cst_68 : f32 to vector<96x256xf32>
    %181 = arith.mulf %180, %179 : vector<96x256xf32>
    %182 = arith.addf %177, %181 : vector<96x256xf32>
    %cst_69 = arith.constant 0.797884583 : f32
    %183 = vector.broadcast %cst_69 : f32 to vector<96x256xf32>
    %184 = arith.mulf %183, %182 : vector<96x256xf32>
    %185 = math.tanh %184 : vector<96x256xf32>
    %cst_70 = arith.constant 1.000000e+00 : f32
    %186 = vector.broadcast %cst_70 : f32 to vector<96x256xf32>
    %187 = arith.addf %186, %185 : vector<96x256xf32>
    %cst_71 = arith.constant 5.000000e-01 : f32
    %188 = vector.broadcast %cst_71 : f32 to vector<96x256xf32>
    %189 = arith.mulf %188, %187 : vector<96x256xf32>
    %190 = arith.mulf %177, %189 : vector<96x256xf32>
    %191 = arith.truncf %190 : vector<96x256xf32> to vector<96x256xbf16>
    %c0_72 = arith.constant 0 : index
    %c0_73 = arith.constant 0 : index
    %c0_74 = arith.constant 0 : index
    %192 = vector.load %arg14[%c0_72, %c0_73, %c0_74] : memref<2x256x64xbf16, #tpu.memory_space<vmem>>, vector<1x256x64xbf16>
    %193 = vector.shape_cast %192 : vector<1x256x64xbf16> to vector<256x64xbf16>
    %cst_75 = arith.constant dense<0.000000e+00> : vector<96x64xf32>
    %194 = tpu.matmul %191, %193, %cst_75 {dimension_numbers = #tpu.dot_dimension_numbers<[1], [0], [0], [1], [0, 0, 1, 1], [], []>} : vector<96x256xbf16>, vector<256x64xbf16>, vector<96x64xf32> -> vector<96x64xf32>
    %195 = arith.addf %145, %194 : vector<96x64xf32>
    %c0_76 = arith.constant 0 : index
    %c0_77 = arith.constant 0 : index
    %c0_78 = arith.constant 0 : index
    %196 = vector.load %arg15[%c0_76, %c0_77, %c0_78] : memref<2x1x64xf32, #tpu.memory_space<vmem>>, vector<1x1x64xf32>
    %197 = vector.shape_cast %196 : vector<1x1x64xf32> to vector<1x64xf32>
    %198 = vector.broadcast %197 : vector<1x64xf32> to vector<96x64xf32>
    %199 = arith.addf %195, %198 : vector<96x64xf32>
    %c1 = arith.constant 1 : index
    %c0_79 = arith.constant 0 : index
    %c0_80 = arith.constant 0 : index
    %200 = vector.load %arg4[%c1, %c0_79, %c0_80] : memref<2x1x64xf32, #tpu.memory_space<vmem>>, vector<1x1x64xf32>
    %201 = vector.shape_cast %200 : vector<1x1x64xf32> to vector<1x64xf32>
    %c1_81 = arith.constant 1 : index
    %c0_82 = arith.constant 0 : index
    %c0_83 = arith.constant 0 : index
    %202 = vector.load %arg5[%c1_81, %c0_82, %c0_83] : memref<2x1x64xf32, #tpu.memory_space<vmem>>, vector<1x1x64xf32>
    %203 = vector.shape_cast %202 : vector<1x1x64xf32> to vector<1x64xf32>
    %cst_84 = arith.constant dense<0.000000e+00> : vector<96xf32>
    %204 = vector.multi_reduction <add>, %199, %cst_84 [1] : vector<96x64xf32> to vector<96xf32>
    %205 = vector.shape_cast %204 : vector<96xf32> to vector<96x1xf32>
    %cst_85 = arith.constant 6.400000e+01 : f32
    %206 = vector.broadcast %cst_85 : f32 to vector<96x1xf32>
    %207 = arith.divf %205, %206 : vector<96x1xf32>
    %208 = vector.broadcast %207 : vector<96x1xf32> to vector<96x64xf32>
    %209 = arith.subf %199, %208 : vector<96x64xf32>
    %210 = arith.mulf %209, %209 : vector<96x64xf32>
    %cst_86 = arith.constant dense<0.000000e+00> : vector<96xf32>
    %211 = vector.multi_reduction <add>, %210, %cst_86 [1] : vector<96x64xf32> to vector<96xf32>
    %212 = vector.shape_cast %211 : vector<96xf32> to vector<96x1xf32>
    %cst_87 = arith.constant 6.400000e+01 : f32
    %213 = vector.broadcast %cst_87 : f32 to vector<96x1xf32>
    %214 = arith.divf %212, %213 : vector<96x1xf32>
    %cst_88 = arith.constant 9.99999997E-7 : f32
    %215 = vector.broadcast %cst_88 : f32 to vector<96x1xf32>
    %216 = arith.addf %214, %215 : vector<96x1xf32>
    %217 = math.rsqrt %216 : vector<96x1xf32>
    %218 = vector.broadcast %217 : vector<96x1xf32> to vector<96x64xf32>
    %219 = arith.mulf %209, %218 : vector<96x64xf32>
    %220 = vector.broadcast %201 : vector<1x64xf32> to vector<96x64xf32>
    %221 = arith.mulf %219, %220 : vector<96x64xf32>
    %222 = vector.broadcast %203 : vector<1x64xf32> to vector<96x64xf32>
    %223 = arith.addf %221, %222 : vector<96x64xf32>
    %224 = arith.truncf %223 : vector<96x64xf32> to vector<96x64xbf16>
    %c1_89 = arith.constant 1 : index
    %c0_90 = arith.constant 0 : index
    %c0_91 = arith.constant 0 : index
    %225 = vector.load %arg6[%c1_89, %c0_90, %c0_91] : memref<2x64x192xbf16, #tpu.memory_space<vmem>>, vector<1x64x192xbf16>
    %226 = vector.shape_cast %225 : vector<1x64x192xbf16> to vector<64x192xbf16>
    %cst_92 = arith.constant dense<0.000000e+00> : vector<96x192xf32>
    %227 = tpu.matmul %224, %226, %cst_92 {dimension_numbers = #tpu.dot_dimension_numbers<[1], [0], [0], [1], [0, 0, 1, 1], [], []>} : vector<96x64xbf16>, vector<64x192xbf16>, vector<96x192xf32> -> vector<96x192xf32>
    %c1_93 = arith.constant 1 : index
    %c0_94 = arith.constant 0 : index
    %c0_95 = arith.constant 0 : index
    %228 = vector.load %arg7[%c1_93, %c0_94, %c0_95] : memref<2x1x192xf32, #tpu.memory_space<vmem>>, vector<1x1x192xf32>
    %229 = vector.shape_cast %228 : vector<1x1x192xf32> to vector<1x192xf32>
    %230 = vector.broadcast %229 : vector<1x192xf32> to vector<96x192xf32>
    %231 = arith.addf %227, %230 : vector<96x192xf32>
    %232 = vector.shape_cast %231 : vector<96x192xf32> to vector<4x24x192xf32>
    %233 = vector.extract_strided_slice %232 {offsets = [0, 0, 0], sizes = [4, 24, 16], strides = [1, 1, 1]} : vector<4x24x192xf32> to vector<4x24x16xf32>
    %234 = arith.truncf %233 : vector<4x24x16xf32> to vector<4x24x16xbf16>
    %235 = vector.extract_strided_slice %232 {offsets = [0, 0, 64], sizes = [4, 24, 16], strides = [1, 1, 1]} : vector<4x24x192xf32> to vector<4x24x16xf32>
    %236 = arith.truncf %235 : vector<4x24x16xf32> to vector<4x24x16xbf16>
    %237 = vector.extract_strided_slice %232 {offsets = [0, 0, 128], sizes = [4, 24, 16], strides = [1, 1, 1]} : vector<4x24x192xf32> to vector<4x24x16xf32>
    %238 = arith.truncf %237 : vector<4x24x16xf32> to vector<4x24x16xbf16>
    "tpu.trace_start"() <{level = 10 : i32, message = "bqd,bkd->bqk"}> : () -> ()
    %cst_96 = arith.constant dense<0.000000e+00> : vector<4x24x24xf32>
    %239 = tpu.matmul %234, %236, %cst_96 {dimension_numbers = #tpu.dot_dimension_numbers<[2], [2], [1], [1], [0, 0, 0, 1, 1, 1], [0], [0]>} : vector<4x24x16xbf16>, vector<4x24x16xbf16>, vector<4x24x24xf32> -> vector<4x24x24xf32>
    %cst_97 = arith.constant -1.000000e+30 : f32
    "tpu.trace_stop"() : () -> ()
    %240 = vector.shape_cast %2 : vector<1x1x24xi1> to vector<1x1x24xi1>
    %241 = vector.broadcast %240 : vector<1x1x24xi1> to vector<4x24x24xi1>
    %242 = vector.broadcast %cst_97 : f32 to vector<4x24x24xf32>
    %243 = arith.select %241, %239, %242 : vector<4x24x24xi1>, vector<4x24x24xf32>
    %cst_98 = arith.constant dense<0xFF800000> : vector<4x24xf32>
    %244 = vector.multi_reduction <maximumf>, %243, %cst_98 [2] : vector<4x24x24xf32> to vector<4x24xf32>
    %245 = vector.shape_cast %244 : vector<4x24xf32> to vector<4x24x1xf32>
    %246 = vector.broadcast %245 : vector<4x24x1xf32> to vector<4x24x24xf32>
    %247 = arith.subf %243, %246 : vector<4x24x24xf32>
    %248 = math.exp %247 : vector<4x24x24xf32>
    %cst_99 = arith.constant dense<0.000000e+00> : vector<4x24xf32>
    %249 = vector.multi_reduction <add>, %248, %cst_99 [2] : vector<4x24x24xf32> to vector<4x24xf32>
    %250 = vector.shape_cast %249 : vector<4x24xf32> to vector<4x24x1xf32>
    %251 = tpu.reciprocal %250 {approx = true} : vector<4x24x1xf32> -> vector<4x24x1xf32>
    %252 = vector.broadcast %251 : vector<4x24x1xf32> to vector<4x24x24xf32>
    %253 = arith.mulf %248, %252 : vector<4x24x24xf32>
    %254 = arith.truncf %253 : vector<4x24x24xf32> to vector<4x24x24xbf16>
    "tpu.trace_start"() <{level = 10 : i32, message = "bqk,bkd->bqd"}> : () -> ()
    %cst_100 = arith.constant dense<0.000000e+00> : vector<4x24x16xf32>
    %255 = tpu.matmul %254, %238, %cst_100 {dimension_numbers = #tpu.dot_dimension_numbers<[2], [1], [1], [2], [0, 0, 0, 1, 1, 2], [0], [0]>} : vector<4x24x24xbf16>, vector<4x24x16xbf16>, vector<4x24x16xf32> -> vector<4x24x16xf32>
    "tpu.trace_stop"() : () -> ()
    %256 = vector.extract_strided_slice %232 {offsets = [0, 0, 16], sizes = [4, 24, 16], strides = [1, 1, 1]} : vector<4x24x192xf32> to vector<4x24x16xf32>
    %257 = arith.truncf %256 : vector<4x24x16xf32> to vector<4x24x16xbf16>
    %258 = vector.extract_strided_slice %232 {offsets = [0, 0, 80], sizes = [4, 24, 16], strides = [1, 1, 1]} : vector<4x24x192xf32> to vector<4x24x16xf32>
    %259 = arith.truncf %258 : vector<4x24x16xf32> to vector<4x24x16xbf16>
    %260 = vector.extract_strided_slice %232 {offsets = [0, 0, 144], sizes = [4, 24, 16], strides = [1, 1, 1]} : vector<4x24x192xf32> to vector<4x24x16xf32>
    %261 = arith.truncf %260 : vector<4x24x16xf32> to vector<4x24x16xbf16>
    "tpu.trace_start"() <{level = 10 : i32, message = "bqd,bkd->bqk"}> : () -> ()
    %cst_101 = arith.constant dense<0.000000e+00> : vector<4x24x24xf32>
    %262 = tpu.matmul %257, %259, %cst_101 {dimension_numbers = #tpu.dot_dimension_numbers<[2], [2], [1], [1], [0, 0, 0, 1, 1, 1], [0], [0]>} : vector<4x24x16xbf16>, vector<4x24x16xbf16>, vector<4x24x24xf32> -> vector<4x24x24xf32>
    %cst_102 = arith.constant -1.000000e+30 : f32
    "tpu.trace_stop"() : () -> ()
    %263 = vector.shape_cast %2 : vector<1x1x24xi1> to vector<1x1x24xi1>
    %264 = vector.broadcast %263 : vector<1x1x24xi1> to vector<4x24x24xi1>
    %265 = vector.broadcast %cst_102 : f32 to vector<4x24x24xf32>
    %266 = arith.select %264, %262, %265 : vector<4x24x24xi1>, vector<4x24x24xf32>
    %cst_103 = arith.constant dense<0xFF800000> : vector<4x24xf32>
    %267 = vector.multi_reduction <maximumf>, %266, %cst_103 [2] : vector<4x24x24xf32> to vector<4x24xf32>
    %268 = vector.shape_cast %267 : vector<4x24xf32> to vector<4x24x1xf32>
    %269 = vector.broadcast %268 : vector<4x24x1xf32> to vector<4x24x24xf32>
    %270 = arith.subf %266, %269 : vector<4x24x24xf32>
    %271 = math.exp %270 : vector<4x24x24xf32>
    %cst_104 = arith.constant dense<0.000000e+00> : vector<4x24xf32>
    %272 = vector.multi_reduction <add>, %271, %cst_104 [2] : vector<4x24x24xf32> to vector<4x24xf32>
    %273 = vector.shape_cast %272 : vector<4x24xf32> to vector<4x24x1xf32>
    %274 = tpu.reciprocal %273 {approx = true} : vector<4x24x1xf32> -> vector<4x24x1xf32>
    %275 = vector.broadcast %274 : vector<4x24x1xf32> to vector<4x24x24xf32>
    %276 = arith.mulf %271, %275 : vector<4x24x24xf32>
    %277 = arith.truncf %276 : vector<4x24x24xf32> to vector<4x24x24xbf16>
    "tpu.trace_start"() <{level = 10 : i32, message = "bqk,bkd->bqd"}> : () -> ()
    %cst_105 = arith.constant dense<0.000000e+00> : vector<4x24x16xf32>
    %278 = tpu.matmul %277, %261, %cst_105 {dimension_numbers = #tpu.dot_dimension_numbers<[2], [1], [1], [2], [0, 0, 0, 1, 1, 2], [0], [0]>} : vector<4x24x24xbf16>, vector<4x24x16xbf16>, vector<4x24x16xf32> -> vector<4x24x16xf32>
    "tpu.trace_stop"() : () -> ()
    %279 = vector.extract_strided_slice %232 {offsets = [0, 0, 32], sizes = [4, 24, 16], strides = [1, 1, 1]} : vector<4x24x192xf32> to vector<4x24x16xf32>
    %280 = arith.truncf %279 : vector<4x24x16xf32> to vector<4x24x16xbf16>
    %281 = vector.extract_strided_slice %232 {offsets = [0, 0, 96], sizes = [4, 24, 16], strides = [1, 1, 1]} : vector<4x24x192xf32> to vector<4x24x16xf32>
    %282 = arith.truncf %281 : vector<4x24x16xf32> to vector<4x24x16xbf16>
    %283 = vector.extract_strided_slice %232 {offsets = [0, 0, 160], sizes = [4, 24, 16], strides = [1, 1, 1]} : vector<4x24x192xf32> to vector<4x24x16xf32>
    %284 = arith.truncf %283 : vector<4x24x16xf32> to vector<4x24x16xbf16>
    "tpu.trace_start"() <{level = 10 : i32, message = "bqd,bkd->bqk"}> : () -> ()
    %cst_106 = arith.constant dense<0.000000e+00> : vector<4x24x24xf32>
    %285 = tpu.matmul %280, %282, %cst_106 {dimension_numbers = #tpu.dot_dimension_numbers<[2], [2], [1], [1], [0, 0, 0, 1, 1, 1], [0], [0]>} : vector<4x24x16xbf16>, vector<4x24x16xbf16>, vector<4x24x24xf32> -> vector<4x24x24xf32>
    %cst_107 = arith.constant -1.000000e+30 : f32
    "tpu.trace_stop"() : () -> ()
    %286 = vector.shape_cast %2 : vector<1x1x24xi1> to vector<1x1x24xi1>
    %287 = vector.broadcast %286 : vector<1x1x24xi1> to vector<4x24x24xi1>
    %288 = vector.broadcast %cst_107 : f32 to vector<4x24x24xf32>
    %289 = arith.select %287, %285, %288 : vector<4x24x24xi1>, vector<4x24x24xf32>
    %cst_108 = arith.constant dense<0xFF800000> : vector<4x24xf32>
    %290 = vector.multi_reduction <maximumf>, %289, %cst_108 [2] : vector<4x24x24xf32> to vector<4x24xf32>
    %291 = vector.shape_cast %290 : vector<4x24xf32> to vector<4x24x1xf32>
    %292 = vector.broadcast %291 : vector<4x24x1xf32> to vector<4x24x24xf32>
    %293 = arith.subf %289, %292 : vector<4x24x24xf32>
    %294 = math.exp %293 : vector<4x24x24xf32>
    %cst_109 = arith.constant dense<0.000000e+00> : vector<4x24xf32>
    %295 = vector.multi_reduction <add>, %294, %cst_109 [2] : vector<4x24x24xf32> to vector<4x24xf32>
    %296 = vector.shape_cast %295 : vector<4x24xf32> to vector<4x24x1xf32>
    %297 = tpu.reciprocal %296 {approx = true} : vector<4x24x1xf32> -> vector<4x24x1xf32>
    %298 = vector.broadcast %297 : vector<4x24x1xf32> to vector<4x24x24xf32>
    %299 = arith.mulf %294, %298 : vector<4x24x24xf32>
    %300 = arith.truncf %299 : vector<4x24x24xf32> to vector<4x24x24xbf16>
    "tpu.trace_start"() <{level = 10 : i32, message = "bqk,bkd->bqd"}> : () -> ()
    %cst_110 = arith.constant dense<0.000000e+00> : vector<4x24x16xf32>
    %301 = tpu.matmul %300, %284, %cst_110 {dimension_numbers = #tpu.dot_dimension_numbers<[2], [1], [1], [2], [0, 0, 0, 1, 1, 2], [0], [0]>} : vector<4x24x24xbf16>, vector<4x24x16xbf16>, vector<4x24x16xf32> -> vector<4x24x16xf32>
    "tpu.trace_stop"() : () -> ()
    %302 = vector.extract_strided_slice %232 {offsets = [0, 0, 48], sizes = [4, 24, 16], strides = [1, 1, 1]} : vector<4x24x192xf32> to vector<4x24x16xf32>
    %303 = arith.truncf %302 : vector<4x24x16xf32> to vector<4x24x16xbf16>
    %304 = vector.extract_strided_slice %232 {offsets = [0, 0, 112], sizes = [4, 24, 16], strides = [1, 1, 1]} : vector<4x24x192xf32> to vector<4x24x16xf32>
    %305 = arith.truncf %304 : vector<4x24x16xf32> to vector<4x24x16xbf16>
    %306 = vector.extract_strided_slice %232 {offsets = [0, 0, 176], sizes = [4, 24, 16], strides = [1, 1, 1]} : vector<4x24x192xf32> to vector<4x24x16xf32>
    %307 = arith.truncf %306 : vector<4x24x16xf32> to vector<4x24x16xbf16>
    "tpu.trace_start"() <{level = 10 : i32, message = "bqd,bkd->bqk"}> : () -> ()
    %cst_111 = arith.constant dense<0.000000e+00> : vector<4x24x24xf32>
    %308 = tpu.matmul %303, %305, %cst_111 {dimension_numbers = #tpu.dot_dimension_numbers<[2], [2], [1], [1], [0, 0, 0, 1, 1, 1], [0], [0]>} : vector<4x24x16xbf16>, vector<4x24x16xbf16>, vector<4x24x24xf32> -> vector<4x24x24xf32>
    %cst_112 = arith.constant -1.000000e+30 : f32
    "tpu.trace_stop"() : () -> ()
    %309 = vector.shape_cast %2 : vector<1x1x24xi1> to vector<1x1x24xi1>
    %310 = vector.broadcast %309 : vector<1x1x24xi1> to vector<4x24x24xi1>
    %311 = vector.broadcast %cst_112 : f32 to vector<4x24x24xf32>
    %312 = arith.select %310, %308, %311 : vector<4x24x24xi1>, vector<4x24x24xf32>
    %cst_113 = arith.constant dense<0xFF800000> : vector<4x24xf32>
    %313 = vector.multi_reduction <maximumf>, %312, %cst_113 [2] : vector<4x24x24xf32> to vector<4x24xf32>
    %314 = vector.shape_cast %313 : vector<4x24xf32> to vector<4x24x1xf32>
    %315 = vector.broadcast %314 : vector<4x24x1xf32> to vector<4x24x24xf32>
    %316 = arith.subf %312, %315 : vector<4x24x24xf32>
    %317 = math.exp %316 : vector<4x24x24xf32>
    %cst_114 = arith.constant dense<0.000000e+00> : vector<4x24xf32>
    %318 = vector.multi_reduction <add>, %317, %cst_114 [2] : vector<4x24x24xf32> to vector<4x24xf32>
    %319 = vector.shape_cast %318 : vector<4x24xf32> to vector<4x24x1xf32>
    %320 = tpu.reciprocal %319 {approx = true} : vector<4x24x1xf32> -> vector<4x24x1xf32>
    %321 = vector.broadcast %320 : vector<4x24x1xf32> to vector<4x24x24xf32>
    %322 = arith.mulf %317, %321 : vector<4x24x24xf32>
    %323 = arith.truncf %322 : vector<4x24x24xf32> to vector<4x24x24xbf16>
    "tpu.trace_start"() <{level = 10 : i32, message = "bqk,bkd->bqd"}> : () -> ()
    %cst_115 = arith.constant dense<0.000000e+00> : vector<4x24x16xf32>
    %324 = tpu.matmul %323, %307, %cst_115 {dimension_numbers = #tpu.dot_dimension_numbers<[2], [1], [1], [2], [0, 0, 0, 1, 1, 2], [0], [0]>} : vector<4x24x24xbf16>, vector<4x24x16xbf16>, vector<4x24x16xf32> -> vector<4x24x16xf32>
    "tpu.trace_stop"() : () -> ()
    %325 = tpu.concatenate %255, %278, %301, %324 in 2 : vector<4x24x16xf32>, vector<4x24x16xf32>, vector<4x24x16xf32>, vector<4x24x16xf32> -> vector<4x24x64xf32>
    %326 = vector.shape_cast %325 : vector<4x24x64xf32> to vector<96x64xf32>
    %327 = arith.truncf %326 : vector<96x64xf32> to vector<96x64xbf16>
    %c1_116 = arith.constant 1 : index
    %c0_117 = arith.constant 0 : index
    %c0_118 = arith.constant 0 : index
    %328 = vector.load %arg8[%c1_116, %c0_117, %c0_118] : memref<2x64x64xbf16, #tpu.memory_space<vmem>>, vector<1x64x64xbf16>
    %329 = vector.shape_cast %328 : vector<1x64x64xbf16> to vector<64x64xbf16>
    %cst_119 = arith.constant dense<0.000000e+00> : vector<96x64xf32>
    %330 = tpu.matmul %327, %329, %cst_119 {dimension_numbers = #tpu.dot_dimension_numbers<[1], [0], [0], [1], [0, 0, 1, 1], [], []>} : vector<96x64xbf16>, vector<64x64xbf16>, vector<96x64xf32> -> vector<96x64xf32>
    %331 = arith.addf %199, %330 : vector<96x64xf32>
    %c1_120 = arith.constant 1 : index
    %c0_121 = arith.constant 0 : index
    %c0_122 = arith.constant 0 : index
    %332 = vector.load %arg9[%c1_120, %c0_121, %c0_122] : memref<2x1x64xf32, #tpu.memory_space<vmem>>, vector<1x1x64xf32>
    %333 = vector.shape_cast %332 : vector<1x1x64xf32> to vector<1x64xf32>
    %334 = vector.broadcast %333 : vector<1x64xf32> to vector<96x64xf32>
    %335 = arith.addf %331, %334 : vector<96x64xf32>
    %c1_123 = arith.constant 1 : index
    %c0_124 = arith.constant 0 : index
    %c0_125 = arith.constant 0 : index
    %336 = vector.load %arg10[%c1_123, %c0_124, %c0_125] : memref<2x1x64xf32, #tpu.memory_space<vmem>>, vector<1x1x64xf32>
    %337 = vector.shape_cast %336 : vector<1x1x64xf32> to vector<1x64xf32>
    %c1_126 = arith.constant 1 : index
    %c0_127 = arith.constant 0 : index
    %c0_128 = arith.constant 0 : index
    %338 = vector.load %arg11[%c1_126, %c0_127, %c0_128] : memref<2x1x64xf32, #tpu.memory_space<vmem>>, vector<1x1x64xf32>
    %339 = vector.shape_cast %338 : vector<1x1x64xf32> to vector<1x64xf32>
    %cst_129 = arith.constant dense<0.000000e+00> : vector<96xf32>
    %340 = vector.multi_reduction <add>, %335, %cst_129 [1] : vector<96x64xf32> to vector<96xf32>
    %341 = vector.shape_cast %340 : vector<96xf32> to vector<96x1xf32>
    %cst_130 = arith.constant 6.400000e+01 : f32
    %342 = vector.broadcast %cst_130 : f32 to vector<96x1xf32>
    %343 = arith.divf %341, %342 : vector<96x1xf32>
    %344 = vector.broadcast %343 : vector<96x1xf32> to vector<96x64xf32>
    %345 = arith.subf %335, %344 : vector<96x64xf32>
    %346 = arith.mulf %345, %345 : vector<96x64xf32>
    %cst_131 = arith.constant dense<0.000000e+00> : vector<96xf32>
    %347 = vector.multi_reduction <add>, %346, %cst_131 [1] : vector<96x64xf32> to vector<96xf32>
    %348 = vector.shape_cast %347 : vector<96xf32> to vector<96x1xf32>
    %cst_132 = arith.constant 6.400000e+01 : f32
    %349 = vector.broadcast %cst_132 : f32 to vector<96x1xf32>
    %350 = arith.divf %348, %349 : vector<96x1xf32>
    %cst_133 = arith.constant 9.99999997E-7 : f32
    %351 = vector.broadcast %cst_133 : f32 to vector<96x1xf32>
    %352 = arith.addf %350, %351 : vector<96x1xf32>
    %353 = math.rsqrt %352 : vector<96x1xf32>
    %354 = vector.broadcast %353 : vector<96x1xf32> to vector<96x64xf32>
    %355 = arith.mulf %345, %354 : vector<96x64xf32>
    %356 = vector.broadcast %337 : vector<1x64xf32> to vector<96x64xf32>
    %357 = arith.mulf %355, %356 : vector<96x64xf32>
    %358 = vector.broadcast %339 : vector<1x64xf32> to vector<96x64xf32>
    %359 = arith.addf %357, %358 : vector<96x64xf32>
    %360 = arith.truncf %359 : vector<96x64xf32> to vector<96x64xbf16>
    %c1_134 = arith.constant 1 : index
    %c0_135 = arith.constant 0 : index
    %c0_136 = arith.constant 0 : index
    %361 = vector.load %arg12[%c1_134, %c0_135, %c0_136] : memref<2x64x256xbf16, #tpu.memory_space<vmem>>, vector<1x64x256xbf16>
    %362 = vector.shape_cast %361 : vector<1x64x256xbf16> to vector<64x256xbf16>
    %cst_137 = arith.constant dense<0.000000e+00> : vector<96x256xf32>
    %363 = tpu.matmul %360, %362, %cst_137 {dimension_numbers = #tpu.dot_dimension_numbers<[1], [0], [0], [1], [0, 0, 1, 1], [], []>} : vector<96x64xbf16>, vector<64x256xbf16>, vector<96x256xf32> -> vector<96x256xf32>
    %c1_138 = arith.constant 1 : index
    %c0_139 = arith.constant 0 : index
    %c0_140 = arith.constant 0 : index
    %364 = vector.load %arg13[%c1_138, %c0_139, %c0_140] : memref<2x1x256xf32, #tpu.memory_space<vmem>>, vector<1x1x256xf32>
    %365 = vector.shape_cast %364 : vector<1x1x256xf32> to vector<1x256xf32>
    %366 = vector.broadcast %365 : vector<1x256xf32> to vector<96x256xf32>
    %367 = arith.addf %363, %366 : vector<96x256xf32>
    %368 = arith.mulf %367, %367 : vector<96x256xf32>
    %369 = arith.mulf %367, %368 : vector<96x256xf32>
    %cst_141 = arith.constant 4.471500e-02 : f32
    %370 = vector.broadcast %cst_141 : f32 to vector<96x256xf32>
    %371 = arith.mulf %370, %369 : vector<96x256xf32>
    %372 = arith.addf %367, %371 : vector<96x256xf32>
    %cst_142 = arith.constant 0.797884583 : f32
    %373 = vector.broadcast %cst_142 : f32 to vector<96x256xf32>
    %374 = arith.mulf %373, %372 : vector<96x256xf32>
    %375 = math.tanh %374 : vector<96x256xf32>
    %cst_143 = arith.constant 1.000000e+00 : f32
    %376 = vector.broadcast %cst_143 : f32 to vector<96x256xf32>
    %377 = arith.addf %376, %375 : vector<96x256xf32>
    %cst_144 = arith.constant 5.000000e-01 : f32
    %378 = vector.broadcast %cst_144 : f32 to vector<96x256xf32>
    %379 = arith.mulf %378, %377 : vector<96x256xf32>
    %380 = arith.mulf %367, %379 : vector<96x256xf32>
    %381 = arith.truncf %380 : vector<96x256xf32> to vector<96x256xbf16>
    %c1_145 = arith.constant 1 : index
    %c0_146 = arith.constant 0 : index
    %c0_147 = arith.constant 0 : index
    %382 = vector.load %arg14[%c1_145, %c0_146, %c0_147] : memref<2x256x64xbf16, #tpu.memory_space<vmem>>, vector<1x256x64xbf16>
    %383 = vector.shape_cast %382 : vector<1x256x64xbf16> to vector<256x64xbf16>
    %cst_148 = arith.constant dense<0.000000e+00> : vector<96x64xf32>
    %384 = tpu.matmul %381, %383, %cst_148 {dimension_numbers = #tpu.dot_dimension_numbers<[1], [0], [0], [1], [0, 0, 1, 1], [], []>} : vector<96x256xbf16>, vector<256x64xbf16>, vector<96x64xf32> -> vector<96x64xf32>
    %385 = arith.addf %335, %384 : vector<96x64xf32>
    %c1_149 = arith.constant 1 : index
    %c0_150 = arith.constant 0 : index
    %c0_151 = arith.constant 0 : index
    %386 = vector.load %arg15[%c1_149, %c0_150, %c0_151] : memref<2x1x64xf32, #tpu.memory_space<vmem>>, vector<1x1x64xf32>
    %387 = vector.shape_cast %386 : vector<1x1x64xf32> to vector<1x64xf32>
    %388 = vector.broadcast %387 : vector<1x64xf32> to vector<96x64xf32>
    %389 = arith.addf %385, %388 : vector<96x64xf32>
    %390 = vector.shape_cast %389 : vector<96x64xf32> to vector<4x24x64xf32>
    %391 = vector.extract_strided_slice %390 {offsets = [0, 0, 0], sizes = [4, 1, 64], strides = [1, 1, 1]} : vector<4x24x64xf32> to vector<4x1x64xf32>
    %392 = vector.shape_cast %391 : vector<4x1x64xf32> to vector<4x64xf32>
    %c0_152 = arith.constant 0 : index
    %c0_153 = arith.constant 0 : index
    %393 = vector.load %arg16[%c0_152, %c0_153] : memref<1x64xf32, #tpu.memory_space<vmem>>, vector<1x64xf32>
    %c0_154 = arith.constant 0 : index
    %c0_155 = arith.constant 0 : index
    %394 = vector.load %arg17[%c0_154, %c0_155] : memref<1x64xf32, #tpu.memory_space<vmem>>, vector<1x64xf32>
    %cst_156 = arith.constant dense<0.000000e+00> : vector<4xf32>
    %395 = vector.multi_reduction <add>, %392, %cst_156 [1] : vector<4x64xf32> to vector<4xf32>
    %396 = vector.shape_cast %395 : vector<4xf32> to vector<4x1xf32>
    %cst_157 = arith.constant 6.400000e+01 : f32
    %397 = vector.broadcast %cst_157 : f32 to vector<4x1xf32>
    %398 = arith.divf %396, %397 : vector<4x1xf32>
    %399 = vector.broadcast %398 : vector<4x1xf32> to vector<4x64xf32>
    %400 = arith.subf %392, %399 : vector<4x64xf32>
    %401 = arith.mulf %400, %400 : vector<4x64xf32>
    %cst_158 = arith.constant dense<0.000000e+00> : vector<4xf32>
    %402 = vector.multi_reduction <add>, %401, %cst_158 [1] : vector<4x64xf32> to vector<4xf32>
    %403 = vector.shape_cast %402 : vector<4xf32> to vector<4x1xf32>
    %cst_159 = arith.constant 6.400000e+01 : f32
    %404 = vector.broadcast %cst_159 : f32 to vector<4x1xf32>
    %405 = arith.divf %403, %404 : vector<4x1xf32>
    %cst_160 = arith.constant 9.99999997E-7 : f32
    %406 = vector.broadcast %cst_160 : f32 to vector<4x1xf32>
    %407 = arith.addf %405, %406 : vector<4x1xf32>
    %408 = math.rsqrt %407 : vector<4x1xf32>
    %409 = vector.broadcast %408 : vector<4x1xf32> to vector<4x64xf32>
    %410 = arith.mulf %400, %409 : vector<4x64xf32>
    %411 = vector.broadcast %393 : vector<1x64xf32> to vector<4x64xf32>
    %412 = arith.mulf %410, %411 : vector<4x64xf32>
    %413 = vector.broadcast %394 : vector<1x64xf32> to vector<4x64xf32>
    %414 = arith.addf %412, %413 : vector<4x64xf32>
    %c0_161 = arith.constant 0 : index
    %c0_162 = arith.constant 0 : index
    %415 = vector.load %arg18[%c0_161, %c0_162] : memref<1x64xf32, #tpu.memory_space<vmem>>, vector<1x64xf32>
    %c0_163 = arith.constant 0 : index
    %c0_164 = arith.constant 0 : index
    %416 = vector.load %arg19[%c0_163, %c0_164] : memref<1x64xf32, #tpu.memory_space<vmem>>, vector<1x64xf32>
    %cst_165 = arith.constant dense<0.000000e+00> : vector<4xf32>
    %417 = vector.multi_reduction <add>, %414, %cst_165 [1] : vector<4x64xf32> to vector<4xf32>
    %418 = vector.shape_cast %417 : vector<4xf32> to vector<4x1xf32>
    %cst_166 = arith.constant 6.400000e+01 : f32
    %419 = vector.broadcast %cst_166 : f32 to vector<4x1xf32>
    %420 = arith.divf %418, %419 : vector<4x1xf32>
    %421 = vector.broadcast %420 : vector<4x1xf32> to vector<4x64xf32>
    %422 = arith.subf %414, %421 : vector<4x64xf32>
    %423 = arith.mulf %422, %422 : vector<4x64xf32>
    %cst_167 = arith.constant dense<0.000000e+00> : vector<4xf32>
    %424 = vector.multi_reduction <add>, %423, %cst_167 [1] : vector<4x64xf32> to vector<4xf32>
    %425 = vector.shape_cast %424 : vector<4xf32> to vector<4x1xf32>
    %cst_168 = arith.constant 6.400000e+01 : f32
    %426 = vector.broadcast %cst_168 : f32 to vector<4x1xf32>
    %427 = arith.divf %425, %426 : vector<4x1xf32>
    %cst_169 = arith.constant 9.99999974E-6 : f32
    %428 = vector.broadcast %cst_169 : f32 to vector<4x1xf32>
    %429 = arith.addf %427, %428 : vector<4x1xf32>
    %430 = math.rsqrt %429 : vector<4x1xf32>
    %431 = vector.broadcast %430 : vector<4x1xf32> to vector<4x64xf32>
    %432 = arith.mulf %422, %431 : vector<4x64xf32>
    %433 = vector.broadcast %415 : vector<1x64xf32> to vector<4x64xf32>
    %434 = arith.mulf %432, %433 : vector<4x64xf32>
    %435 = vector.broadcast %416 : vector<1x64xf32> to vector<4x64xf32>
    %436 = arith.addf %434, %435 : vector<4x64xf32>
    %437 = arith.truncf %436 : vector<4x64xf32> to vector<4x64xbf16>
    %c0_170 = arith.constant 0 : index
    %c0_171 = arith.constant 0 : index
    %438 = vector.load %arg20[%c0_170, %c0_171] : memref<64x128xbf16, #tpu.memory_space<vmem>>, vector<64x128xbf16>
    %cst_172 = arith.constant dense<0.000000e+00> : vector<4x128xf32>
    %439 = tpu.matmul %437, %438, %cst_172 {dimension_numbers = #tpu.dot_dimension_numbers<[1], [0], [0], [1], [0, 0, 1, 1], [], []>} : vector<4x64xbf16>, vector<64x128xbf16>, vector<4x128xf32> -> vector<4x128xf32>
    %c0_173 = arith.constant 0 : index
    %c0_174 = arith.constant 0 : index
    %440 = vector.load %arg21[%c0_173, %c0_174] : memref<1x128xf32, #tpu.memory_space<vmem>>, vector<1x128xf32>
    %441 = vector.broadcast %440 : vector<1x128xf32> to vector<4x128xf32>
    %442 = arith.addf %439, %441 : vector<4x128xf32>
    %c0_175 = arith.constant 0 : index
    %c0_176 = arith.constant 0 : index
    %c0_177 = arith.constant 0 : index
    %443 = vector.load %arg22[%c0_175, %c0_176, %c0_177] : memref<1x4x128xf32, #tpu.memory_space<vmem>>, vector<1x4x128xf32>
    %444 = vector.shape_cast %443 : vector<1x4x128xf32> to vector<4x128xf32>
    %445 = vector.shape_cast %442 : vector<4x128xf32> to vector<1x4x128xf32>
    tpu.vector_store %arg22[%c0_175, %c0_176, %c0_177], %445 {strides = array<i32>} : memref<1x4x128xf32, #tpu.memory_space<vmem>>, vector<1x4x128xf32>,
    return
  }
  func.func @transform_0(%arg0: i32) -> (i32, i32) {
    %c0_i32 = arith.constant 0 : i32
    %c0_i32_0 = arith.constant 0 : i32
    return %arg0, %c0_i32 : i32, i32
  }
  func.func @transform_1(%arg0: i32) -> (i32, i32) {
    %c0_i32 = arith.constant 0 : i32
    %c0_i32_0 = arith.constant 0 : i32
    %c0_i32_1 = arith.constant 0 : i32
    return %c0_i32, %c0_i32_0 : i32, i32
  }
  func.func @transform_2(%arg0: i32) -> (i32, i32) {
    %c0_i32 = arith.constant 0 : i32
    %c0_i32_0 = arith.constant 0 : i32
    %c0_i32_1 = arith.constant 0 : i32
    return %c0_i32, %c0_i32_0 : i32, i32
  }
  func.func @transform_3(%arg0: i32) -> (i32, i32, i32) {
    %c0_i32 = arith.constant 0 : i32
    %c0_i32_0 = arith.constant 0 : i32
    %c0_i32_1 = arith.constant 0 : i32
    %c0_i32_2 = arith.constant 0 : i32
    return %c0_i32, %c0_i32_0, %c0_i32_1 : i32, i32, i32
  }
  func.func @transform_4(%arg0: i32) -> (i32, i32, i32) {
    %c0_i32 = arith.constant 0 : i32
    %c0_i32_0 = arith.constant 0 : i32
    %c0_i32_1 = arith.constant 0 : i32
    %c0_i32_2 = arith.constant 0 : i32
    return %c0_i32, %c0_i32_0, %c0_i32_1 : i32, i32, i32
  }
  func.func @transform_5(%arg0: i32) -> (i32, i32, i32) {
    %c0_i32 = arith.constant 0 : i32
    %c0_i32_0 = arith.constant 0 : i32
    %c0_i32_1 = arith.constant 0 : i32
    %c0_i32_2 = arith.constant 0 : i32
    return %c0_i32, %c0_i32_0, %c0_i32_1 : i32, i32, i32
  }
  func.func @transform_6(%arg0: i32) -> (i32, i32, i32) {
    %c0_i32 = arith.constant 0 : i32
    %c0_i32_0 = arith.constant 0 : i32
    %c0_i32_1 = arith.constant 0 : i32
    %c0_i32_2 = arith.constant 0 : i32
    return %c0_i32, %c0_i32_0, %c0_i32_1 : i32, i32, i32
  }
  func.func @transform_7(%arg0: i32) -> (i32, i32, i32) {
    %c0_i32 = arith.constant 0 : i32
    %c0_i32_0 = arith.constant 0 : i32
    %c0_i32_1 = arith.constant 0 : i32
    %c0_i32_2 = arith.constant 0 : i32
    return %c0_i32, %c0_i32_0, %c0_i32_1 : i32, i32, i32
  }
  func.func @transform_8(%arg0: i32) -> (i32, i32, i32) {
    %c0_i32 = arith.constant 0 : i32
    %c0_i32_0 = arith.constant 0 : i32
    %c0_i32_1 = arith.constant 0 : i32
    %c0_i32_2 = arith.constant 0 : i32
    return %c0_i32, %c0_i32_0, %c0_i32_1 : i32, i32, i32
  }
  func.func @transform_9(%arg0: i32) -> (i32, i32, i32) {
    %c0_i32 = arith.constant 0 : i32
    %c0_i32_0 = arith.constant 0 : i32
    %c0_i32_1 = arith.constant 0 : i32
    %c0_i32_2 = arith.constant 0 : i32
    return %c0_i32, %c0_i32_0, %c0_i32_1 : i32, i32, i32
  }
  func.func @transform_10(%arg0: i32) -> (i32, i32, i32) {
    %c0_i32 = arith.constant 0 : i32
    %c0_i32_0 = arith.constant 0 : i32
    %c0_i32_1 = arith.constant 0 : i32
    %c0_i32_2 = arith.constant 0 : i32
    return %c0_i32, %c0_i32_0, %c0_i32_1 : i32, i32, i32
  }
  func.func @transform_11(%arg0: i32) -> (i32, i32, i32) {
    %c0_i32 = arith.constant 0 : i32
    %c0_i32_0 = arith.constant 0 : i32
    %c0_i32_1 = arith.constant 0 : i32
    %c0_i32_2 = arith.constant 0 : i32
    return %c0_i32, %c0_i32_0, %c0_i32_1 : i32, i32, i32
  }
  func.func @transform_12(%arg0: i32) -> (i32, i32, i32) {
    %c0_i32 = arith.constant 0 : i32
    %c0_i32_0 = arith.constant 0 : i32
    %c0_i32_1 = arith.constant 0 : i32
    %c0_i32_2 = arith.constant 0 : i32
    return %c0_i32, %c0_i32_0, %c0_i32_1 : i32, i32, i32
  }
  func.func @transform_13(%arg0: i32) -> (i32, i32, i32) {
    %c0_i32 = arith.constant 0 : i32
    %c0_i32_0 = arith.constant 0 : i32
    %c0_i32_1 = arith.constant 0 : i32
    %c0_i32_2 = arith.constant 0 : i32
    return %c0_i32, %c0_i32_0, %c0_i32_1 : i32, i32, i32
  }
  func.func @transform_14(%arg0: i32) -> (i32, i32, i32) {
    %c0_i32 = arith.constant 0 : i32
    %c0_i32_0 = arith.constant 0 : i32
    %c0_i32_1 = arith.constant 0 : i32
    %c0_i32_2 = arith.constant 0 : i32
    return %c0_i32, %c0_i32_0, %c0_i32_1 : i32, i32, i32
  }
  func.func @transform_15(%arg0: i32) -> (i32, i32) {
    %c0_i32 = arith.constant 0 : i32
    %c0_i32_0 = arith.constant 0 : i32
    %c0_i32_1 = arith.constant 0 : i32
    return %c0_i32, %c0_i32_0 : i32, i32
  }
  func.func @transform_16(%arg0: i32) -> (i32, i32) {
    %c0_i32 = arith.constant 0 : i32
    %c0_i32_0 = arith.constant 0 : i32
    %c0_i32_1 = arith.constant 0 : i32
    return %c0_i32, %c0_i32_0 : i32, i32
  }
  func.func @transform_17(%arg0: i32) -> (i32, i32) {
    %c0_i32 = arith.constant 0 : i32
    %c0_i32_0 = arith.constant 0 : i32
    %c0_i32_1 = arith.constant 0 : i32
    return %c0_i32, %c0_i32_0 : i32, i32
  }
  func.func @transform_18(%arg0: i32) -> (i32, i32) {
    %c0_i32 = arith.constant 0 : i32
    %c0_i32_0 = arith.constant 0 : i32
    %c0_i32_1 = arith.constant 0 : i32
    return %c0_i32, %c0_i32_0 : i32, i32
  }
  func.func @transform_19(%arg0: i32) -> (i32, i32) {
    %c0_i32 = arith.constant 0 : i32
    %c0_i32_0 = arith.constant 0 : i32
    %c0_i32_1 = arith.constant 0 : i32
    return %c0_i32, %c0_i32_0 : i32, i32
  }
  func.func @transform_20(%arg0: i32) -> (i32, i32) {
    %c0_i32 = arith.constant 0 : i32
    %c0_i32_0 = arith.constant 0 : i32
    %c0_i32_1 = arith.constant 0 : i32
    return %c0_i32, %c0_i32_0 : i32, i32
  }
  func.func @transform_21(%arg0: i32) -> (i32, i32, i32) {
    %c0_i32 = arith.constant 0 : i32
    %c0_i32_0 = arith.constant 0 : i32
    %c0_i32_1 = arith.constant 0 : i32
    return %arg0, %c0_i32, %c0_i32_0 : i32, i32, i32
  }
}

</mosaic_0001>

<bundles_post_ra>
// kernel: belove_thai_forward.1
= control target key start
LH: loop header
LB: loop body
LE: loop exit
PB: predicated region body
PF: predicated region fallthrough
CT: control target
= control target key end

     0   :  { %s16076_s0 = inlined_call_operand.vmem [shape: f32[192,192], index: 0, kind: input, shape index: {}]   ;;  %s16077_s1 = inlined_call_operand.vmem [shape: f32[24,64], index: 1, kind: input, shape index: {}]   ;;  %s16078_s2 = inlined_call_operand.vmem [shape: bf16[192,64], index: 2, kind: input, shape index: {}]   ;;  %s16079_s3 = inlined_call_operand.vmem [shape: f32[2,1,64], index: 3, kind: input, shape index: {}]   ;;  %s16080_s4 = inlined_call_operand.vmem [shape: f32[2,1,64], index: 4, kind: input, shape index: {}]   ;;  %s16081_s5 = inlined_call_operand.vmem [shape: bf16[2,64,192], index: 5, kind: input, shape index: {}]   ;;  %s16082_s6 = inlined_call_operand.vmem [shape: f32[2,1,192], index: 6, kind: input, shape index: {}]   ;;  %s16083_s7 = inlined_call_operand.vmem [shape: bf16[2,64,64], index: 7, kind: input, shape index: {}]   ;;  %s16084_s8 = inlined_call_operand.vmem [shape: f32[2,1,64], index: 8, kind: input, shape index: {}]   ;;  %s16085_s9 = inlined_call_operand.vmem [shape: f32[2,1,64], index: 9, kind: input, shape index: {}]   ;;  %s16086_s10 = inlined_call_operand.vmem [shape: f32[2,1,64], index: 10, kind: input, shape index: {}]   ;;  %s16087_s11 = inlined_call_operand.vmem [shape: bf16[2,64,256], index: 11, kind: input, shape index: {}]   ;;  %s16088_s12 = inlined_call_operand.vmem [shape: f32[2,1,256], index: 12, kind: input, shape index: {}]   ;;  %s16089_s13 = inlined_call_operand.vmem [shape: bf16[2,256,64], index: 13, kind: input, shape index: {}]   ;;  %s16090_s14 = inlined_call_operand.vmem [shape: f32[2,1,64], index: 14, kind: input, shape index: {}]   ;;  %s16091_s15 = inlined_call_operand.vmem [shape: f32[1,64], index: 15, kind: input, shape index: {}]   ;;  %s16092_s16 = inlined_call_operand.vmem [shape: f32[1,64], index: 16, kind: input, shape index: {}]   ;;  %s16093_s17 = inlined_call_operand.vmem [shape: f32[1,64], index: 17, kind: input, shape index: {}]   ;;  %s16094_s18 = inlined_call_operand.vmem [shape: f32[1,64], index: 18, kind: input, shape index: {}]   ;;  %s16095_s19 = inlined_call_operand.vmem [shape: bf16[64,128], index: 19, kind: input, shape index: {}]   ;;  %s16096_s20 = inlined_call_operand.vmem [shape: f32[1,128], index: 20, kind: input, shape index: {}]   ;;  %s16097_s21 = inlined_call_operand.hbm [shape: f32[2,4,128], index: 21, kind: output, shape index: {}]  }
   0x1   :  { %16163 = sst [smem:[#allocation32_spill]] %s16076_s0 }
   0x2   :  { %16164 = sst [smem:[#allocation33_spill]] %s16077_s1 }
   0x3   :  { %16165 = sst [smem:[#allocation34_spill]] %s16078_s2 }
   0x4   :  { %16166 = sst [smem:[#allocation35_spill]] %s16079_s3 }
   0x5   :  { %16167 = sst [smem:[#allocation36_spill]] %s16080_s4 }
   0x6   :  { %16168 = sst [smem:[#allocation37_spill]] %s16081_s5 }
   0x7   :  { %16169 = sst [smem:[#allocation38_spill]] %s16096_s20 }
   0x8   :  { %16170 = sst [smem:[#allocation39_spill]] %s16097_s21 }
   0x9   :  { %26 = vsyncpa [#allocation3], 0 }
   0xa   :  { %28 = vsyncpa [#allocation3 + $0x1], 0  ;;  %s12217_s2 = smov 0   ;;  %s12219_s25 = smov 0  }
   0xb   :  { %s12221_s26 = smov 0   ;;  %s12223_s27 = smov 0  }
   0xc LB: > { %16171 = sst [smem:[#allocation5_spill]] %s12082_s2  ;;  %s12238_s3 = sadd.s32 4294967295, %s12094_s27   ;;  %s12094_s27 = sphi %s12223_s27, %s16303_s27   ;;  %s12090_s26 = sphi %s12221_s26, %s16305_s26   ;;  %s12086_s25 = sphi %s12219_s25, %s16307_s25   ;;  %s12082_s2 = sphi %s12217_s2, %s16306_s2  }
   0xd   : > { %16172 = sst [smem:[#allocation6_spill]] %s12090_s26  ;;  %s9722_s28 = sadd.s32 4294967294, %s12094_s27  }
   0xe   : > { %16173 = sst [smem:[#allocation7_spill]] %s12094_s27  ;;  %s12242_s29 = sadd.s32 1, %s12094_s27  }
   0xf   : > { %16174 = sst [smem:[#allocation8_spill]] %s12242_s29  ;;  %s487_s0 = sadd.s32 1, %s12090_s26 }
  0x10   : > { %s484_s4 = ssub.s32 %s12094_s27, %s12242_s29  ;;  %p497_p0 = scmp.ne.s32.totalorder %s12090_s26, %s12086_s25 }
  0x11   : > { %p485_p1 = scmp.eq.s32.totalorder %s484_s4, 0  ;;  %p498_p2 = scmp.eq.s32.totalorder %s12238_s3, 1 }
  0x12   : > { %p503_p3 = scmp.ne.s32.totalorder %s12086_s25, %s12082_s2  ;;  %p504_p4 = scmp.eq.s32.totalorder %s9722_s28, 1 }
  0x13   : > { %s12253_s30 = scalar_select %p485_p1, %s12090_s26, %s487_s0  }
  0x14   : > { %p12255_p5 = por %p498_p2, %p497_p0  ;;  %p12259_p6 = por %p504_p4, %p503_p3 }
  0x15   : > { %16175 = sst [smem:[#allocation9_spill]] %s12253_s30  ;;  %p9725_p7 = scmp.ge.s32.totalorder %s12094_s27, 1 }
  0x16   : > { %s16176_s5 = scalar_select %p12255_p5, 1, 0 }
  0x17   : > { %s16178_s22 = scalar_select %p12259_p6, 1, 0 }
  0x18   : > { %16177 = sst [smem:[#allocation10_spill]] %s16176_s5  ;;  %p592_p8 = scmp.lt.s32.totalorder %s12094_s27, 3 }
  0x19   : > { %16179 = sst [smem:[#allocation11_spill]] %s16178_s22 }
  0x1a   : > { %p593_p9 = pnand %p9725_p7, %p592_p8 }
  0x1c   : > { %596 = sbr.rel (%p593_p9) target bundleno = 9955 (0x26e3), region = 104 }
  0x23   : > { %s16180_s24 = sld [smem:[#allocation34_spill]]  ;;  %v16108_v1 = vmov 0   ;;  %s653_s28 = smul.u32 12, %s12238_s3  ;;  %vm799_vm0 = vcmask 523264   ;;  %vm1293_vm1 = vcmask 130048   ;;  %vm1713_vm2 = vcmask 1043456  }
  0x24   : > { %818 = vmatprep.subr.bf16.mxu0 %v16108_v1  ;;  %1210 = vmatprep.mubr.bf16.mxu1 %v16108_v1  ;;  %s16181_s22 = sld [smem:[#allocation32_spill]]  ;;  %s16182_s30 = sld [smem:[#allocation33_spill]]  ;;  %vm1566_vm4 = vcmask 195584   ;;  %vm4116_vm5 = vcmask 261120   ;;  %vm4129_vm6 = vcmask 392192   ;;  %vm9386_vm7 = vcmask 1041409  }
  0x25   : > { %p654_p10 = scmp.lt.s32.totalorder %s653_s28, 23  ;;  %s16196_s0 = sld [smem:[#allocation35_spill]]  ;;  %vm9389_vm8 = vcmask 1042434   ;;  %vm9392_vm9 = vcmask 1043459   ;;  %vm9395_vm10 = vcmask 519168   ;;  %vm12105_vm11 = vmmov 0  }
  0x26   : > { %s16197_s26 = sld [smem:[#allocation36_spill]]  ;;  %s16134_s23 = smov 64  }
  0x27   : > { %s16309_s28 = smov (!%p654_p10, %s653_s28), 23  ;;  %s16142_s4 = smov 48  }
  0x28   : > { %s10073_s1 = sshll.u32 %s16309_s28, 4  ;;  %s16132_s28 = smov 112  }
  0x29   : > { %v11348_v0 = vld [vmem:[%s16180_s24] sm:$0xff]   ;;  %v11349_v2 = vld [vmem:[%s16180_s24 + $0x8] sm:$0xff]   ;;  %v11350_v3 = vld [vmem:[%s16180_s24 + $0x10] sm:$0xff]   ;;  %s16253_s20 = smov 64   ;;  %s16263_s21 = smov 96  }
  0x2a   : > { %819 = vmatpush1.bf16.msra.mxu0 %v11348_v0  ;;  %s12282_s2 = scalar_lea.vmem %s16181_s22, %s10073_s1  ;;  %v11351_v4 = vld [vmem:[%s16180_s24 + $0x18] sm:$0xff]   ;;  %v11352_v8 = vld [vmem:[%s16180_s24 + $0x20] sm:$0xff]   ;;  %v11353_v9 = vld [vmem:[%s16180_s24 + $0x28] sm:$0xff]   ;;  %s16195_s1 = sld [smem:[#allocation37_spill]] }
  0x2b   : > { %820 = vmatprep.subr.bf16.mxu0 %v16108_v1  ;;  %v665_v5 = vld [vmem:[%s12282_s2 + $0x8] sm:$0xff]  ;;  %v667_v6 = vld [vmem:[%s12282_s2 + $0x18] sm:$0xff]  ;;  %v11354_v10 = vld [vmem:[%s16180_s24 + $0x30] sm:$0xff]   ;;  %s16138_s22 = smov 16   ;;  %s16264_s27 = smov 80  }
  0x2c   : > { %v689_v7 = vpack.c.bf16 %v667_v6, %v665_v5  ;;  %v11355_v11 = vld [vmem:[%s16180_s24 + $0x38] sm:$0xff]   ;;  %v11356_v12 = vld [vmem:[%s16180_s24 + $0x40] sm:$0xff]   ;;  %v11357_v13 = vld [vmem:[%s16180_s24 + $0x48] sm:$0xff]   ;;  %s16198_s29 = smov %s16197_s26  ;;  %s16297_s5 = sld [smem:[#allocation38_spill]] }
  0x2d   : > { %v11358_v14 = vld [vmem:[%s16180_s24 + $0x50] sm:$0xff]   ;;  %v11359_v15 = vld [vmem:[%s16180_s24 + $0x58] sm:$0xff]   ;;  %v664_v16 = vld [vmem:[%s12282_s2] sm:$0xff] }
  0x2e   : > { %821 = vmatpush1.bf16.msra.mxu0 %v11349_v2  ;;  %9741 = vmatprep.mubr.msk.bf16.mxu0 %vm799_vm0, %v689_v7  ;;  %v666_v17 = vld [vmem:[%s12282_s2 + $0x10] sm:$0xff]  ;;  %v669_v18 = vld [vmem:[%s12282_s2 + $0x28] sm:$0xff]  ;;  %v671_v19 = vld [vmem:[%s12282_s2 + $0x38] sm:$0xff] }
  0x2f   : > { %822 = vmatprep.subr.bf16.mxu0 %v16108_v1  ;;  %v688_v20 = vpack.c.bf16 %v666_v17, %v664_v16  ;;  %v691_v21 = vpack.c.bf16 %v671_v19, %v669_v18  ;;  %v668_v22 = vld [vmem:[%s12282_s2 + $0x20] sm:$0xff]  ;;  %v670_v23 = vld [vmem:[%s12282_s2 + $0x30] sm:$0xff]  ;;  %v673_v24 = vld [vmem:[%s12282_s2 + $0x48] sm:$0xff] }
  0x30   : > { %v675_v25 = vld [vmem:[%s12282_s2 + $0x58] sm:$0xff]  ;;  %v690_v26 = vpack.c.bf16 %v670_v23, %v668_v22  ;;  %v672_v28 = vld [vmem:[%s12282_s2 + $0x40] sm:$0xff]  ;;  %v674_v29 = vld [vmem:[%s12282_s2 + $0x50] sm:$0xff] }
  0x31   : > { %v693_v27 = vpack.c.bf16 %v675_v25, %v673_v24  ;;  %v677_v30 = vld [vmem:[%s12282_s2 + $0x68] sm:$0xff]  ;;  %v679_v31 = vld [vmem:[%s12282_s2 + $0x78] sm:$0xff]  ;;  %v692_v32 = vpack.c.bf16 %v674_v29, %v672_v28  ;;  %v676_v34 = vld [vmem:[%s12282_s2 + $0x60] sm:$0xff] }
  0x32   : > { %823 = vmatpush1.bf16.msra.mxu0 %v11350_v3  ;;  %v695_v33 = vpack.c.bf16 %v679_v31, %v677_v30  ;;  %v678_v35 = vld [vmem:[%s12282_s2 + $0x70] sm:$0xff]  ;;  %v681_v36 = vld [vmem:[%s12282_s2 + $0x88] sm:$0xff]  ;;  %v683_v37 = vld [vmem:[%s12282_s2 + $0x98] sm:$0xff] }
  0x33   : > { %824 = vmatprep.subr.bf16.mxu0 %v16108_v1  ;;  %v694_v38 = vpack.c.bf16 %v678_v35, %v676_v34  ;;  %v697_v39 = vpack.c.bf16 %v683_v37, %v681_v36  ;;  %v680_v40 = vld [vmem:[%s12282_s2 + $0x80] sm:$0xff]  ;;  %v682_v41 = vld [vmem:[%s12282_s2 + $0x90] sm:$0xff]  ;;  %v685_v42 = vld [vmem:[%s12282_s2 + $0xa8] sm:$0xff] }
  0x34   : > { %v687_v43 = vld [vmem:[%s12282_s2 + $0xb8] sm:$0xff]  ;;  %v696_v44 = vpack.c.bf16 %v682_v41, %v680_v40  ;;  %v684_v46 = vld [vmem:[%s12282_s2 + $0xa0] sm:$0xff]  ;;  %v686_v47 = vld [vmem:[%s12282_s2 + $0xb0] sm:$0xff]  ;;  %s16126_s2 = smov 96  }
  0x35   : > { %v699_v45 = vpack.c.bf16 %v687_v43, %v685_v42  ;;  %v698_v48 = vpack.c.bf16 %v686_v47, %v684_v46  ;;  %v724_v49 = vld [vmem:[%s16182_s30] sm:$0xff]  ;;  %v725_v51 = vld [vmem:[%s16182_s30 + $0x8] sm:$0xff]  ;;  %v726_v58 = vld [vmem:[%s16182_s30 + $0x10] sm:$0xff]  ;;  %s16212_s30 = smov 16  }
  0x36   : > { %825 = vmatpush1.bf16.msra.mxu0 %v11351_v4 }
  0x37   : > { %826 = vmatprep.subr.bf16.mxu0 %v16108_v1 }
  0x3a   : > { %827 = vmatpush1.bf16.msra.mxu0 %v11352_v8 }
  0x3b   : > { %828 = vmatprep.subr.bf16.mxu0 %v16108_v1 }
  0x3e   : > { %829 = vmatpush1.bf16.msra.mxu0 %v11353_v9 }
  0x3f   : > { %830 = vmatprep.subr.bf16.mxu0 %v16108_v1 }
  0x42   : > { %831 = vmatpush1.bf16.msra.mxu0 %v11354_v10 }
  0x43   : > { %832 = vmatprep.subr.bf16.mxu0 %v16108_v1 }
  0x46   : > { %833 = vmatpush1.bf16.msra.mxu0 %v11355_v11 }
  0x47   : > { %834 = vmatprep.subr.bf16.mxu0 %v16108_v1 }
  0x4a   : > { %835 = vmatpush1.bf16.msra.mxu0 %v11356_v12 }
  0x4b   : > { %836 = vmatprep.subr.bf16.mxu0 %v16108_v1 }
  0x4e   : > { %837 = vmatpush1.bf16.msra.mxu0 %v11357_v13 }
  0x4f   : > { %838 = vmatprep.subr.bf16.mxu0 %v16108_v1 }
  0x52   : > { %839 = vmatpush1.bf16.msra.mxu0 %v11358_v14 }
  0x53   : > { %840 = vmatprep.subr.bf16.mxu0 %v16108_v1 }
  0x56   : > { %841 = vmatpush1.bf16.msra.mxu0 %v11359_v15 }
  0x59   : > { %851 = vmatmul.mubr.bf16.vlgmr.msra.gmra.mrb[0].mxu0 %v688_v20 }
  0x5a   : > { %9742 = vmatprep.mubr.msk.bf16.mxu0 %vm799_vm0, %v691_v21 }
  0x61   : > { %859 = vmatmul.mubr.bf16.gmra.mrb[4].mxu0 %v690_v26 }
  0x62   : > { %9743 = vmatprep.mubr.msk.bf16.mxu0 %vm799_vm0, %v693_v27 }
  0x69   : > { %867 = vmatmul.mubr.bf16.gmra.mrb[8].mxu0 %v692_v32 }
  0x6a   : > { %9744 = vmatprep.mubr.msk.bf16.mxu0 %vm799_vm0, %v695_v33 }
  0x71   : > { %875 = vmatmul.mubr.bf16.gmra.mrb[12].mxu0 %v694_v38 }
  0x72   : > { %9745 = vmatprep.mubr.msk.bf16.mxu0 %vm799_vm0, %v697_v39 }
  0x79   : > { %883 = vmatmul.mubr.bf16.gmra.mrb[16].mxu0 %v696_v44 }
  0x7a   : > { %9746 = vmatprep.mubr.msk.bf16.mxu0 %vm799_vm0, %v699_v45 }
  0x81   : > { %891 = vmatmul.mubr.bf16.gmra.mrb[20].mxu0 %v698_v48 }
 0x12c   : > { %v852_v50 = vpop.f32.mrb[0].mxu0 }
 0x12d   : > { %v12356_v52 = vadd.f32 %v852_v50, %v724_v49  ;;  %v854_v53 = vpop.f32.mrb[1].mxu0 }
 0x12e   : > { %v855_v54 = vpop.f32.mrb[2].mxu0 }
 0x12f   : > { %16183 = vst [vmem:[#allocation12_spill] sm:$0xff] %v12356_v52  ;;  %v12358_v55 = vadd.f32 %v855_v54, %v725_v51  ;;  %v857_v56 = vpop.f32.mrb[3].mxu0  ;;  %v901_v57 = vsel %vm799_vm0, %v12356_v52, 0.0 }
 0x130   : > { %902 = vadd.xlane.f32.xlu0 %v901_v57 }
 0x131   : > { %16184 = vst [vmem:[#allocation13_spill] sm:$0xff] %v12358_v55  ;;  %v904_v59 = vsel %vm799_vm0, %v12358_v55, 0.0 }
 0x134   : > { %v860_v60 = vpop.f32.mrb[4].mxu0  ;;  %905 = vadd.xlane.f32.xlu0 %v904_v59 }
 0x135   : > { %v12367_v61 = vadd.f32 %v860_v60, %v726_v58  ;;  %v862_v62 = vpop.f32.mrb[5].mxu0 }
 0x136   : > { %v863_v63 = vpop.f32.mrb[6].mxu0 }
 0x137   : > { %16185 = vst [vmem:[#allocation14_spill] sm:$0xff] %v12367_v61  ;;  %v12369_v0 = vadd.f32 %v863_v63, %v724_v49  ;;  %v907_v2 = vsel %vm799_vm0, %v12367_v61, 0.0  ;;  %v865_v3 = vpop.f32.mrb[7].mxu0 }
 0x138   : > { %908 = vadd.xlane.f32.xlu1 %v907_v2 }
 0x139   : > { %16186 = vst [vmem:[#allocation15_spill] sm:$0xff] %v12369_v0  ;;  %v910_v4 = vsel %vm799_vm0, %v12369_v0, 0.0 }
 0x13c   : > { %v868_v5 = vpop.f32.mrb[8].mxu0  ;;  %911 = vadd.xlane.f32.xlu1 %v910_v4 }
 0x13d   : > { %v12375_v6 = vadd.f32 %v868_v5, %v725_v51  ;;  %v870_v7 = vpop.f32.mrb[9].mxu0 }
 0x13e   : > { %v871_v8 = vpop.f32.mrb[10].mxu0 }
 0x13f   : > { %16187 = vst [vmem:[#allocation16_spill] sm:$0xff] %v12375_v6  ;;  %v12377_v9 = vadd.f32 %v871_v8, %v726_v58  ;;  %v913_v10 = vsel %vm799_vm0, %v12375_v6, 0.0  ;;  %v873_v11 = vpop.f32.mrb[11].mxu0 }
 0x140   : > { %914 = vadd.xlane.f32.xlu0 %v913_v10 }
 0x141   : > { %16188 = vst [vmem:[#allocation17_spill] sm:$0xff] %v12377_v9  ;;  %v916_v12 = vsel %vm799_vm0, %v12377_v9, 0.0 }
 0x142   : > { %917 = vadd.xlane.f32.xlu1 %v916_v12 }
 0x144   : > { %v876_v13 = vpop.f32.mrb[12].mxu0 }
 0x145   : > { %v12383_v14 = vadd.f32 %v876_v13, %v724_v49  ;;  %v878_v15 = vpop.f32.mrb[13].mxu0 }
 0x146   : > { %v879_v16 = vpop.f32.mrb[14].mxu0 }
 0x147   : > { %16189 = vst [vmem:[#allocation18_spill] sm:$0xff] %v12383_v14  ;;  %v12385_v17 = vadd.f32 %v879_v16, %v725_v51  ;;  %v919_v18 = vsel %vm799_vm0, %v12383_v14, 0.0  ;;  %v881_v19 = vpop.f32.mrb[15].mxu0 }
 0x148   : > { %920 = vadd.xlane.f32.xlu0 %v919_v18 }
 0x149   : > { %16190 = vst [vmem:[#allocation19_spill] sm:$0xff] %v12385_v17  ;;  %v922_v20 = vsel %vm799_vm0, %v12385_v17, 0.0 }
 0x14a   : > { %923 = vadd.xlane.f32.xlu1 %v922_v20 }
 0x14c   : > { %v884_v21 = vpop.f32.mrb[16].mxu0 }
 0x14d   : > { %v12391_v22 = vadd.f32 %v884_v21, %v726_v58  ;;  %v886_v23 = vpop.f32.mrb[17].mxu0  ;;  %v11360_v21 = vld [vmem:[%s16195_s1 + $0x4] ss:$8 sps:$4 sm:$0xff]  }
 0x14e   : > { %v887_v24 = vpop.f32.mrb[18].mxu0  ;;  %1178 = vmatprep.subr.bf16.mxu1 %v11360_v21 }
 0x14f   : > { %16191 = vst [vmem:[#allocation20_spill] sm:$0xff] %v12391_v22  ;;  %v12393_v25 = vadd.f32 %v887_v24, %v724_v49  ;;  %v925_v26 = vsel %vm799_vm0, %v12391_v22, 0.0  ;;  %v889_v27 = vpop.f32.mrb[19].mxu0  ;;  %v11362_v24 = vld [vmem:[%s16195_s1] ss:$8 sps:$4 sm:$0xff]  }
 0x150   : > { %926 = vadd.xlane.f32.xlu0 %v925_v26  ;;  %1179 = vmatpush1.bf16.msra.mxu1 %v11362_v24  ;;  %v12507_v24 = vld [vmem:[%s16196_s0] ss:$0 sm:$0xff] }
 0x151   : > { %16192 = vst [vmem:[#allocation21_spill] sm:$0xff] %v12393_v25  ;;  %v928_v28 = vsel %vm799_vm0, %v12393_v25, 0.0 }
 0x152   : > { %929 = vadd.xlane.f32.xlu1 %v928_v28 }
 0x154   : > { %v892_v29 = vpop.f32.mrb[20].mxu0 }
 0x155   : > { %v12399_v30 = vadd.f32 %v892_v29, %v725_v51  ;;  %v894_v31 = vpop.f32.mrb[21].mxu0 }
 0x156   : > { %v895_v32 = vpop.f32.mrb[22].mxu0 }
 0x157   : > { %16193 = vst [vmem:[#allocation22_spill] sm:$0xff] %v12399_v30  ;;  %v12401_v33 = vadd.f32 %v895_v32, %v726_v58  ;;  %v931_v34 = vsel %vm799_vm0, %v12399_v30, 0.0  ;;  %v897_v35 = vpop.f32.mrb[23].mxu0  ;;  %v11363_v32 = vld [vmem:[%s16195_s1 + $0x14] ss:$8 sps:$4 sm:$0xff]  }
 0x158   : > { %932 = vadd.xlane.f32.xlu0 %v931_v34  ;;  %v11365_v34 = vld [vmem:[%s16195_s1 + $0x10] ss:$8 sps:$4 sm:$0xff]   ;;  %1180 = vmatprep.subr.bf16.mxu1 %v11363_v32 }
 0x159   : > { %16194 = vst [vmem:[#allocation23_spill] sm:$0xff] %v12401_v33  ;;  %v934_v36 = vsel %vm799_vm0, %v12401_v33, 0.0  ;;  %1181 = vmatpush1.bf16.msra.mxu1 %v11365_v34 }
 0x15a   : > { %935 = vadd.xlane.f32.xlu1 %v934_v36 }
 0x1bd   : > { %v903_v37 = vpop.xlane.xlu0 %902 }
 0x1be   : > { %v938_v38 = vmul.f32 0.015625, %v903_v37 }
 0x1c0   : > { %v12408_v39 = vsub.f32 %v12356_v52, %v938_v38 }
 0x1c1   : > { %v906_v40 = vpop.xlane.xlu0 %905 }
 0x1c2   : > { %v939_v41 = vmul.f32 0.015625, %v906_v40  ;;  %v962_v42 = vmul.f32 %v12408_v39, %v12408_v39  ;;  %v11366_v40 = vld [vmem:[%s16195_s1 + $0x24] ss:$8 sps:$4 sm:$0xff]  }
 0x1c3   : > { %1182 = vmatprep.subr.bf16.mxu1 %v11366_v40 }
 0x1c4   : > { %v12413_v43 = vsub.f32 %v12358_v55, %v939_v41  ;;  %v974_v44 = vsel %vm799_vm0, %v962_v42, 0.0  ;;  %v11368_v42 = vld [vmem:[%s16195_s1 + $0x20] ss:$8 sps:$4 sm:$0xff]  }
 0x1c5   : > { %v909_v45 = vpop.xlane.xlu1 %908  ;;  %975 = vadd.xlane.f32.xlu0 %v974_v44  ;;  %1183 = vmatpush1.bf16.msra.mxu1 %v11368_v42 }
 0x1c6   : > { %v940_v46 = vmul.f32 0.015625, %v909_v45  ;;  %v963_v47 = vmul.f32 %v12413_v43, %v12413_v43 }
 0x1c8   : > { %v12419_v48 = vsub.f32 %v12367_v61, %v940_v46  ;;  %v977_v49 = vsel %vm799_vm0, %v963_v47, 0.0 }
 0x1c9   : > { %v912_v50 = vpop.xlane.xlu1 %911  ;;  %978 = vadd.xlane.f32.xlu1 %v977_v49 }
 0x1ca   : > { %v941_v51 = vmul.f32 0.015625, %v912_v50  ;;  %v964_v53 = vmul.f32 %v12419_v48, %v12419_v48  ;;  %v11369_v50 = vld [vmem:[%s16195_s1 + $0x34] ss:$8 sps:$4 sm:$0xff]  }
 0x1cb   : > { %1184 = vmatprep.subr.bf16.mxu1 %v11369_v50 }
 0x1cc   : > { %v12425_v54 = vsub.f32 %v12369_v0, %v941_v51  ;;  %v980_v56 = vsel %vm799_vm0, %v964_v53, 0.0  ;;  %v11371_v51 = vld [vmem:[%s16195_s1 + $0x30] ss:$8 sps:$4 sm:$0xff]  }
 0x1cd   : > { %981 = vadd.xlane.f32.xlu0 %v980_v56  ;;  %v915_v57 = vpop.xlane.xlu0 %914  ;;  %1185 = vmatpush1.bf16.msra.mxu1 %v11371_v51 }
 0x1ce   : > { %v942_v58 = vmul.f32 0.015625, %v915_v57  ;;  %v965_v59 = vmul.f32 %v12425_v54, %v12425_v54 }
 0x1cf   : > { %v918_v60 = vpop.xlane.xlu1 %917 }
 0x1d0   : > { %v12431_v62 = vsub.f32 %v12375_v6, %v942_v58  ;;  %v943_v63 = vmul.f32 0.015625, %v918_v60  ;;  %v983_v2 = vsel %vm799_vm0, %v965_v59, 0.0 }
 0x1d1   : > { %984 = vadd.xlane.f32.xlu1 %v983_v2 }
 0x1d2   : > { %v12435_v3 = vsub.f32 %v12377_v9, %v943_v63  ;;  %v966_v4 = vmul.f32 %v12431_v62, %v12431_v62 }
 0x1d4   : > { %v986_v5 = vsel %vm799_vm0, %v966_v4, 0.0  ;;  %v967_v7 = vmul.f32 %v12435_v3, %v12435_v3 }
 0x1d5   : > { %987 = vadd.xlane.f32.xlu0 %v986_v5  ;;  %v921_v8 = vpop.xlane.xlu0 %920 }
 0x1d6   : > { %v944_v10 = vmul.f32 0.015625, %v921_v8  ;;  %v989_v11 = vsel %vm799_vm0, %v967_v7, 0.0 }
 0x1d7   : > { %v924_v12 = vpop.xlane.xlu1 %923  ;;  %990 = vadd.xlane.f32.xlu1 %v989_v11 }
 0x1d8   : > { %v12444_v13 = vsub.f32 %v12383_v14, %v944_v10  ;;  %v945_v15 = vmul.f32 0.015625, %v924_v12 }
 0x1da   : > { %v12447_v16 = vsub.f32 %v12385_v17, %v945_v15  ;;  %v968_v18 = vmul.f32 %v12444_v13, %v12444_v13 }
 0x1dc   : > { %v992_v19 = vsel %vm799_vm0, %v968_v18, 0.0  ;;  %v969_v20 = vmul.f32 %v12447_v16, %v12447_v16 }
 0x1dd   : > { %993 = vadd.xlane.f32.xlu0 %v992_v19  ;;  %v927_v23 = vpop.xlane.xlu0 %926 }
 0x1de   : > { %v946_v26 = vmul.f32 0.015625, %v927_v23  ;;  %v995_v27 = vsel %vm799_vm0, %v969_v20, 0.0 }
 0x1df   : > { %v930_v28 = vpop.xlane.xlu1 %929  ;;  %996 = vadd.xlane.f32.xlu1 %v995_v27 }
 0x1e0   : > { %v12462_v29 = vsub.f32 %v12391_v22, %v946_v26  ;;  %v947_v31 = vmul.f32 0.015625, %v930_v28 }
 0x1e2   : > { %v12471_v35 = vsub.f32 %v12393_v25, %v947_v31  ;;  %v970_v36 = vmul.f32 %v12462_v29, %v12462_v29 }
 0x1e4   : > { %v998_v37 = vsel %vm799_vm0, %v970_v36, 0.0  ;;  %v971_v38 = vmul.f32 %v12471_v35, %v12471_v35 }
 0x1e5   : > { %999 = vadd.xlane.f32.xlu0 %v998_v37  ;;  %v933_v41 = vpop.xlane.xlu0 %932 }
 0x1e6   : > { %v948_v44 = vmul.f32 0.015625, %v933_v41  ;;  %v1001_v45 = vsel %vm799_vm0, %v971_v38, 0.0 }
 0x1e7   : > { %v936_v46 = vpop.xlane.xlu1 %935  ;;  %1002 = vadd.xlane.f32.xlu1 %v1001_v45 }
 0x1e8   : > { %v12486_v47 = vsub.f32 %v12399_v30, %v948_v44  ;;  %v949_v49 = vmul.f32 0.015625, %v936_v46 }
 0x1ea   : > { %v12495_v53 = vsub.f32 %v12401_v33, %v949_v49  ;;  %v972_v56 = vmul.f32 %v12486_v47, %v12486_v47 }
 0x1ec   : > { %v1004_v57 = vsel %vm799_vm0, %v972_v56, 0.0  ;;  %v973_v58 = vmul.f32 %v12495_v53, %v12495_v53 }
 0x1ed   : > { %1005 = vadd.xlane.f32.xlu0 %v1004_v57 }
 0x1ee   : > { %v1007_v59 = vsel %vm799_vm0, %v973_v58, 0.0 }
 0x1ef   : > { %1008 = vadd.xlane.f32.xlu1 %v1007_v59 }
 0x252   : > { %v976_v60 = vpop.xlane.xlu0 %975 }
 0x253   : > { %v1010_v63 = vmul.f32 0.015625, %v976_v60 }
 0x255   : > { %v1022_v2 = vadd.f32 1e-06, %v1010_v63 }
 0x256   : > { %v979_v4 = vpop.xlane.xlu1 %978 }
 0x257   : > { %11452 = vrsqrt.f32 %v1022_v2  ;;  %v1011_v5 = vmul.f32 0.015625, %v979_v4 }
 0x259   : > { %v1023_v7 = vadd.f32 1e-06, %v1011_v5 }
 0x25a   : > { %v982_v8 = vpop.xlane.xlu0 %981 }
 0x25b   : > { %11454 = vrsqrt.f32 %v1023_v7  ;;  %v1012_v10 = vmul.f32 0.015625, %v982_v8 }
 0x25d   : > { %v1024_v11 = vadd.f32 1e-06, %v1012_v10 }
 0x25e   : > { %v985_v12 = vpop.xlane.xlu1 %984 }
 0x25f   : > { %11456 = vrsqrt.f32 %v1024_v11  ;;  %v1013_v15 = vmul.f32 0.015625, %v985_v12 }
 0x261   : > { %v11453_v18 = vpop.eup %11452  ;;  %v1025_v19 = vadd.f32 1e-06, %v1013_v15 }
 0x262   : > { %v988_v20 = vpop.xlane.xlu0 %987  ;;  %v1046_v21 = vmul.f32 %v11453_v18, %v12408_v39  ;;  %v12514_v39 = vld [vmem:[%s16197_s26] ss:$0 sm:$0xff]  ;;  %s16136_s26 = smov 32  }
 0x263   : > { %11458 = vrsqrt.f32 %v1025_v19  ;;  %v1014_v23 = vmul.f32 0.015625, %v988_v20 }
 0x264   : > { %v991_v26 = vpop.xlane.xlu1 %990  ;;  %v1064_v34 = vmul.f32 %v12507_v24, %v1046_v21 }
 0x265   : > { %v11455_v27 = vpop.eup %11454  ;;  %v1026_v28 = vadd.f32 1e-06, %v1014_v23  ;;  %v1015_v31 = vmul.f32 0.015625, %v991_v26 }
 0x266   : > { %v1047_v32 = vmul.f32 %v11455_v27, %v12413_v43  ;;  %v1082_v41 = vadd.f32 %v12514_v39, %v1064_v34 }
 0x267   : > { %11460 = vrsqrt.f32 %v1026_v28  ;;  %v1027_v36 = vadd.f32 1e-06, %v1015_v31 }
 0x268   : > { %v1065_v37 = vmul.f32 %v12507_v24, %v1047_v32 }
 0x269   : > { %v11457_v38 = vpop.eup %11456  ;;  %11462 = vrsqrt.f32 %v1027_v36 }
 0x26a   : > { %v994_v40 = vpop.xlane.xlu0 %993  ;;  %v1083_v42 = vadd.f32 %v12514_v39, %v1065_v37  ;;  %v1048_v43 = vmul.f32 %v11457_v38, %v12419_v48 }
 0x26b   : > { %v1016_v44 = vmul.f32 0.015625, %v994_v40 }
 0x26c   : > { %v997_v45 = vpop.xlane.xlu1 %996  ;;  %v1094_v46 = vpack.c.bf16 %v1083_v42, %v1082_v41  ;;  %v1066_v57 = vmul.f32 %v12507_v24, %v1048_v43 }
 0x26d   : > { %v11459_v49 = vpop.eup %11458  ;;  %v1028_v50 = vadd.f32 1e-06, %v1016_v44  ;;  %v1017_v51 = vmul.f32 0.015625, %v997_v45 }
 0x26e   : > { %9757 = vmatmul.mubr.msk.bf16.vlgmr.msra.gmra.mrb[0].mxu1 %vm799_vm0, %v1094_v46  ;;  %v1049_v56 = vmul.f32 %v11459_v49, %v12425_v54  ;;  %v1084_v63 = vadd.f32 %v12514_v39, %v1066_v57 }
 0x26f   : > { %11464 = vrsqrt.f32 %v1028_v50  ;;  %v1029_v58 = vadd.f32 1e-06, %v1017_v51  ;;  %1220 = vmatprep.mubr.bf16.mxu1 %v16108_v1 }
 0x270   : > { %v1067_v59 = vmul.f32 %v12507_v24, %v1049_v56 }
 0x271   : > { %v11461_v60 = vpop.eup %11460  ;;  %11466 = vrsqrt.f32 %v1029_v58 }
 0x272   : > { %v1000_v48 = vpop.xlane.xlu0 %999  ;;  %v1085_v2 = vadd.f32 %v12514_v39, %v1067_v59  ;;  %v1050_v4 = vmul.f32 %v11461_v60, %v12431_v62 }
 0x273   : > { %v11463_v5 = vpop.eup %11462  ;;  %v1018_v7 = vmul.f32 0.015625, %v1000_v48 }
 0x274   : > { %v1003_v54 = vpop.xlane.xlu1 %1002  ;;  %v1095_v8 = vpack.c.bf16 %v1085_v2, %v1084_v63  ;;  %v1051_v10 = vmul.f32 %v11463_v5, %v12435_v3  ;;  %v1068_v15 = vmul.f32 %v12507_v24, %v1050_v4 }
 0x275   : > { %v1030_v11 = vadd.f32 1e-06, %v1018_v7  ;;  %v1019_v12 = vmul.f32 0.015625, %v1003_v54 }
 0x276   : > { %9758 = vmatmul.mubr.msk.bf16.gmra.mrb[4].mxu1 %vm799_vm0, %v1095_v8  ;;  %v1069_v18 = vmul.f32 %v12507_v24, %v1051_v10  ;;  %v1086_v23 = vadd.f32 %v12514_v39, %v1068_v15 }
 0x277   : > { %11468 = vrsqrt.f32 %v1030_v11  ;;  %v1031_v19 = vadd.f32 1e-06, %v1019_v12  ;;  %1230 = vmatprep.mubr.bf16.mxu1 %v16108_v1 }
 0x278   : > { %v1087_v62 = vadd.f32 %v12514_v39, %v1069_v18 }
 0x279   : > { %v11465_v20 = vpop.eup %11464  ;;  %11470 = vrsqrt.f32 %v1031_v19 }
 0x27a   : > { %v1006_v21 = vpop.xlane.xlu0 %1005  ;;  %v1052_v3 = vmul.f32 %v11465_v20, %v12444_v13  ;;  %v1096_v31 = vpack.c.bf16 %v1087_v62, %v1086_v23 }
 0x27b   : > { %v11467_v26 = vpop.eup %11466  ;;  %v1020_v27 = vmul.f32 0.015625, %v1006_v21 }
 0x27c   : > { %v1009_v28 = vpop.xlane.xlu1 %1008  ;;  %v1053_v32 = vmul.f32 %v11467_v26, %v12447_v16  ;;  %v1070_v37 = vmul.f32 %v12507_v24, %v1052_v3 }
 0x27d   : > { %v1032_v34 = vadd.f32 1e-06, %v1020_v27  ;;  %v1021_v36 = vmul.f32 0.015625, %v1009_v28 }
 0x27e   : > { %9759 = vmatmul.mubr.msk.bf16.gmra.mrb[8].mxu1 %vm799_vm0, %v1096_v31  ;;  %v1071_v38 = vmul.f32 %v12507_v24, %v1053_v32  ;;  %v1088_v42 = vadd.f32 %v12514_v39, %v1070_v37 }
 0x27f   : > { %11472 = vrsqrt.f32 %v1032_v34  ;;  %v1033_v40 = vadd.f32 1e-06, %v1021_v36  ;;  %1240 = vmatprep.mubr.bf16.mxu1 %v16108_v1 }
 0x280   : > { %v1089_v13 = vadd.f32 %v12514_v39, %v1071_v38 }
 0x281   : > { %v11469_v41 = vpop.eup %11468  ;;  %11474 = vrsqrt.f32 %v1033_v40 }
 0x282   : > { %v1054_v16 = vmul.f32 %v11469_v41, %v12462_v29  ;;  %v1097_v44 = vpack.c.bf16 %v1089_v13, %v1088_v42 }
 0x283   : > { %v11471_v43 = vpop.eup %11470 }
 0x284   : > { %v1055_v45 = vmul.f32 %v11471_v43, %v12471_v35  ;;  %v1072_v46 = vmul.f32 %v12507_v24, %v1054_v16 }
 0x286   : > { %9760 = vmatmul.mubr.msk.bf16.gmra.mrb[12].mxu1 %vm799_vm0, %v1097_v44  ;;  %v1073_v49 = vmul.f32 %v12507_v24, %v1055_v45  ;;  %v1090_v56 = vadd.f32 %v12514_v39, %v1072_v46 }
 0x287   : > { %1250 = vmatprep.mubr.bf16.mxu1 %v16108_v1 }
 0x288   : > { %v1091_v50 = vadd.f32 %v12514_v39, %v1073_v49 }
 0x289   : > { %v11473_v51 = vpop.eup %11472 }
 0x28a   : > { %v1056_v57 = vmul.f32 %v11473_v51, %v12486_v47  ;;  %v1098_v58 = vpack.c.bf16 %v1091_v50, %v1090_v56  ;;  %v661_v47 = vlaneseq }
 0x28b   : > { %v11475_v29 = vpop.eup %11474 }
 0x28c   : > { %v1057_v59 = vmul.f32 %v11475_v29, %v12495_v53  ;;  %v1074_v35 = vmul.f32 %v12507_v24, %v1056_v57  ;;  %v1111_v4 = vshrl.u32 %v661_v47, 7  ;;  %v1108_v53 = vld [vmem:[%s16082_s6] sm:$0x3] }
 0x28e   : > { %9761 = vmatmul.mubr.msk.bf16.gmra.mrb[16].mxu1 %vm799_vm0, %v1098_v58  ;;  %v1075_v60 = vmul.f32 %v12507_v24, %v1057_v59  ;;  %v1092_v63 = vadd.f32 %v12514_v39, %v1074_v35  ;;  %v12561_v5 = vsub.s32 0, %v1111_v4  ;;  %v12566_v7 = vsub.s32 1, %v1111_v4 }
 0x28f   : > { %1260 = vmatprep.mubr.bf16.mxu1 %v16108_v1 }
 0x290   : > { %v1093_v48 = vadd.f32 %v12514_v39, %v1075_v60  ;;  %16199 = vst [vmem:[#allocation24_spill] sm:$0xff] %v12561_v5  ;;  %16200 = vst [vmem:[#allocation25_spill] sm:$0xff] %v12566_v7  ;;  %v12569_v24 = vrot.slane %v1108_v53, %v12561_v5  ;;  %v12572_v39 = vrot.slane %v1108_v53, %v12566_v7 }
 0x292   : > { %v1099_v2 = vpack.c.bf16 %v1093_v48, %v1092_v63 }
 0x296   : > { %9762 = vmatmul.mubr.msk.bf16.gmra.mrb[20].mxu1 %vm799_vm0, %v1099_v2 }
 0x341   : > { %v1212_v54 = vpop.f32.mrb[0].mxu1 }
 0x342   : > { %v1214_v8 = vpop.f32.mrb[1].mxu1  ;;  %v1213_v11 = vadd.f32 %v1212_v54, %v12569_v24 }
 0x343   : > { %v1216_v10 = vpop.f32.mrb[2].mxu1  ;;  %v1215_v18 = vadd.f32 %v1214_v8, %v12572_v39 }
 0x344   : > { %v1217_v12 = vadd.f32 %v1216_v10, %v12569_v24  ;;  %v1218_v15 = vpop.f32.mrb[3].mxu1 }
 0x345   : > { %v1219_v19 = vadd.f32 %v1218_v15, %v12572_v39 }
 0x346   : > { %v12578_v62 = vpack.c.bf16 %v1217_v12, %v1213_v11 }
 0x347   : > { %v12580_v20 = vpack.c.bf16 %v1219_v19, %v1215_v18 }
 0x348   : > { %1289 = vrot.lane.b32.xlu0 %v12578_v62, %s16134_s23  ;;  %10463 = vmatprep.mubr.msk.bf16.mxu1 %vm1293_vm1, %v12578_v62 }
 0x349   : > { %v1222_v21 = vpop.f32.mrb[4].mxu1  ;;  %10491 = vmatprep.subr.bf16.mxu0 %v12580_v20 }
 0x34a   : > { %v1223_v23 = vadd.f32 %v1222_v21, %v12569_v24  ;;  %v1224_v3 = vpop.f32.mrb[5].mxu1  ;;  %10492 = vmatpush3.bf16.msra.mxu0 %v12580_v20 }
 0x34b   : > { %v1225_v26 = vadd.f32 %v1224_v3, %v12572_v39  ;;  %v1226_v27 = vpop.f32.mrb[6].mxu1 }
 0x34c   : > { %v12590_v28 = vpack.c.bf16 %v1223_v23, %v1223_v23  ;;  %v1228_v31 = vpop.f32.mrb[7].mxu1  ;;  %v1227_v38 = vadd.f32 %v1226_v27, %v12569_v24 }
 0x34d   : > { %v12592_v32 = vpack.c.bf16 %v1225_v26, %v1225_v26  ;;  %v1229_v34 = vadd.f32 %v1228_v31, %v12572_v39 }
 0x34e   : > { %1291 = vrot.lane.b32.xlu1 %v12590_v28, %s16134_s23 }
 0x34f   : > { %11031 = vmatprep.subr.msk.bf16.mxu0 %vm1713_vm2, %v12592_v32  ;;  %v1715_v36 = vsel %vm1713_vm2, %v12592_v32, 0 }
 0x350   : > { %10494 = vmatpush3.bf16.msra.mxu0 %v1715_v36 }
 0x351   : > { %v1232_v37 = vpop.f32.mrb[8].mxu1 }
 0x352   : > { %v1233_v40 = vadd.f32 %v1232_v37, %v12569_v24  ;;  %v1234_v13 = vpop.f32.mrb[9].mxu1 }
 0x353   : > { %v1235_v41 = vadd.f32 %v1234_v13, %v12572_v39  ;;  %v1236_v42 = vpop.f32.mrb[10].mxu1 }
 0x354   : > { %v12604_v16 = vpack.c.bf16 %v1233_v40, %v1227_v38  ;;  %v1237_v43 = vadd.f32 %v1236_v42, %v12569_v24  ;;  %v1238_v44 = vpop.f32.mrb[11].mxu1 }
 0x355   : > { %v12607_v45 = vpack.c.bf16 %v1235_v41, %v1229_v34  ;;  %v12610_v46 = vadd.f32 %v1238_v44, %v12572_v39 }
 0x356   : > { %1356 = vrot.lane.b32.xlu1 %v12604_v16, %s16134_s23  ;;  %v12614_v49 = vpack.c.bf16 %v1237_v43, %v1237_v43 }
 0x359   : > { %v1242_v50 = vpop.f32.mrb[12].mxu1 }
 0x35a   : > { %1358 = vrot.lane.b32.xlu1 %v12614_v49, %s16134_s23  ;;  %v1244_v51 = vpop.f32.mrb[13].mxu1  ;;  %v1243_v57 = vadd.f32 %v1242_v50, %v12569_v24 }
 0x35b   : > { %v1246_v56 = vpop.f32.mrb[14].mxu1  ;;  %v1245_v59 = vadd.f32 %v1244_v51, %v12572_v39 }
 0x35c   : > { %v1247_v29 = vadd.f32 %v1246_v56, %v12569_v24  ;;  %v1248_v58 = vpop.f32.mrb[15].mxu1 }
 0x35d   : > { %v1249_v35 = vadd.f32 %v1248_v58, %v12572_v39 }
 0x35e   : > { %v12622_v60 = vpack.c.bf16 %v1247_v29, %v1243_v57 }
 0x35f   : > { %v12624_v48 = vpack.c.bf16 %v1249_v35, %v1245_v59  ;;  %v12686_v59 = vpack.c.bf16 %v12610_v46, %v12610_v46 }
 0x360   : > { %1422 = vrot.lane.b32.xlu0 %v12622_v60, %s16134_s23 }
 0x361   : > { %v1252_v63 = vpop.f32.mrb[16].mxu1  ;;  %10507 = vmatprep.subr.bf16.mxu0 %v12624_v48  ;;  %v1772_v35 = vsel %vm1713_vm2, %v12686_v59, 0 }
 0x362   : > { %v1253_v2 = vadd.f32 %v1252_v63, %v12569_v24  ;;  %v1254_v4 = vpop.f32.mrb[17].mxu1  ;;  %v12697_v63 = vand.u32 127, %v661_v47 }
 0x363   : > { %v12631_v53 = vadd.f32 %v1254_v4, %v12572_v39  ;;  %v1256_v54 = vpop.f32.mrb[18].mxu1 }
 0x364   : > { %v12633_v8 = vpack.c.bf16 %v1253_v2, %v1253_v2  ;;  %v1258_v10 = vpop.f32.mrb[19].mxu1  ;;  %v1257_v15 = vadd.f32 %v1256_v54, %v12569_v24  ;;  %16201 = vst [vmem:[#allocation26_spill] sm:$0xff] %v12697_v63  ;;  %vm663_vm3 = vcmp.lt.s32.totalorder %v12697_v63, 17 }
 0x365   : > { %v1259_v11 = vadd.f32 %v1258_v10, %v12572_v39 }
 0x366   : > { %1424 = vrot.lane.b32.xlu1 %v12633_v8, %s16134_s23 }
 0x369   : > { %v1262_v12 = vpop.f32.mrb[20].mxu1 }
 0x36a   : > { %v1263_v18 = vadd.f32 %v1262_v12, %v12569_v24  ;;  %v1264_v19 = vpop.f32.mrb[21].mxu1 }
 0x36b   : > { %v1265_v21 = vadd.f32 %v1264_v19, %v12572_v39  ;;  %v1266_v23 = vpop.f32.mrb[22].mxu1 }
 0x36c   : > { %v12641_v3 = vpack.c.bf16 %v1263_v18, %v1257_v15  ;;  %v1267_v26 = vadd.f32 %v1266_v23, %v12569_v24  ;;  %v1268_v27 = vpop.f32.mrb[23].mxu1 }
 0x36d   : > { %v12644_v31 = vpack.c.bf16 %v1265_v21, %v1259_v11  ;;  %v12647_v34 = vadd.f32 %v1268_v27, %v12572_v39 }
 0x36e   : > { %v12649_v36 = vpack.c.bf16 %v1267_v26, %v1267_v26  ;;  %1488 = vrot.lane.b32.xlu0 %v12641_v3, %s16134_s23 }
 0x370   : > { %1490 = vrot.lane.b32.xlu1 %v12649_v36, %s16134_s23  ;;  %s16255_s23 = smov 48  }
 0x3ba   : > { %v1290_v37 = vpop.permute.xlu0 %1289 }
 0x3bb   : > { %11023 = vmatprep.subr.msk.bf16.mxu1 %vm1293_vm1, %v1290_v37  ;;  %v1301_v38 = vsel %vm1293_vm1, %v1290_v37, 0 }
 0x3bc   : > { %10460 = vmatpush3.bf16.xpose.msra.mxu1 %v1301_v38 }
 0x3c0   : > { %v1292_v24 = vpop.permute.xlu1 %1291 }
 0x3c1   : > { %11024 = vmatprep.subr.msk.bf16.mxu1 %vm1293_vm1, %v1292_v24  ;;  %v1304_v39 = vsel %vm1293_vm1, %v1292_v24, 0 }
 0x3c4   : > { %10462 = vmatpush3.bf16.xpose.msra.mxu1 %v1304_v39 }
 0x3c8   : > { %v1357_v40 = vpop.permute.xlu1 %1356 }
 0x3c9   : > { %11025 = vmatprep.subr.msk.bf16.mxu1 %vm1293_vm1, %v1357_v40  ;;  %v1367_v13 = vsel %vm1293_vm1, %v1357_v40, 0 }
 0x3cb   : > { %10464 = vmatmul.mubr.msk.bf16.vlgmr.msra.gmra.mrb[24].mxu1 %vm1293_vm1, %v12590_v28 }
 0x3cc   : > { %v1359_v41 = vpop.permute.xlu1 %1358  ;;  %10468 = vmatpush3.bf16.xpose.msra.mxu1 %v1367_v13  ;;  %10471 = vmatprep.mubr.msk.bf16.mxu1 %vm1293_vm1, %v12604_v16 }
 0x3cd   : > { %11026 = vmatprep.subr.msk.bf16.mxu1 %vm1293_vm1, %v1359_v41  ;;  %v1370_v42 = vsel %vm1293_vm1, %v1359_v41, 0 }
 0x3d2   : > { %v1423_v43 = vpop.permute.xlu0 %1422 }
 0x3d3   : > { %v1433_v44 = vsel %vm1293_vm1, %v1423_v43, 0 }
 0x3d4   : > { %10470 = vmatpush3.bf16.xpose.msra.mxu1 %v1370_v42 }
 0x3d5   : > { %11027 = vmatprep.subr.msk.bf16.mxu1 %vm1293_vm1, %v1423_v43 }
 0x3d8   : > { %v1425_v50 = vpop.permute.xlu1 %1424 }
 0x3d9   : > { %v1436_v51 = vsel %vm1293_vm1, %v1425_v50, 0 }
 0x3db   : > { %10472 = vmatmul.mubr.msk.bf16.vlgmr.msra.gmra.mrb[28].mxu1 %vm1293_vm1, %v12614_v49 }
 0x3dc   : > { %10476 = vmatpush3.bf16.xpose.msra.mxu1 %v1433_v44  ;;  %10479 = vmatprep.mubr.msk.bf16.mxu1 %vm1293_vm1, %v12622_v60 }
 0x3dd   : > { %11028 = vmatprep.subr.msk.bf16.mxu1 %vm1293_vm1, %v1425_v50 }
 0x3e0   : > { %v1489_v56 = vpop.permute.xlu0 %1488 }
 0x3e1   : > { %v1499_v57 = vsel %vm1293_vm1, %v1489_v56, 0 }
 0x3e2   : > { %v1491_v29 = vpop.permute.xlu1 %1490 }
 0x3e3   : > { %v1502_v58 = vsel %vm1293_vm1, %v1491_v29, 0 }
 0x3e4   : > { %10478 = vmatpush3.bf16.xpose.msra.mxu1 %v1436_v51 }
 0x3e5   : > { %11029 = vmatprep.subr.msk.bf16.mxu1 %vm1293_vm1, %v1489_v56 }
 0x3eb   : > { %10480 = vmatmul.mubr.msk.bf16.vlgmr.msra.gmra.mrb[32].mxu1 %vm1293_vm1, %v12633_v8 }
 0x3ec   : > { %10484 = vmatpush3.bf16.xpose.msra.mxu1 %v1499_v57  ;;  %10487 = vmatprep.mubr.msk.bf16.mxu1 %vm1293_vm1, %v12641_v3 }
 0x3ed   : > { %11030 = vmatprep.subr.msk.bf16.mxu1 %vm1293_vm1, %v1491_v29 }
 0x3f4   : > { %10486 = vmatpush3.bf16.xpose.msra.mxu1 %v1502_v58 }
 0x3f5   : > { %10499 = vmatprep.subr.bf16.mxu1 %v12607_v45 }
 0x3fb   : > { %10488 = vmatmul.mubr.msk.bf16.vlgmr.msra.gmra.mrb[36].mxu1 %vm1293_vm1, %v12649_v36 }
 0x3fc   : > { %10500 = vmatpush3.bf16.msra.mxu1 %v12607_v45 }
 0x3fd   : > { %11032 = vmatprep.subr.msk.bf16.mxu1 %vm1713_vm2, %v12686_v59 }
 0x400   : > { %10502 = vmatpush3.bf16.msra.mxu1 %v1772_v35 }
 0x401   : > { %10515 = vmatprep.subr.bf16.mxu1 %v12644_v31 }
 0x49e   : > { %v10465_v46 = vpop.f32.mrb[24].mxu1 }
 0x49f   : > { %v1556_v2 = vsel %vm663_vm3, %v10465_v46, -1e+30  ;;  %v1340_v4 = vpop.f32.mrb[25].mxu1 }
 0x4a0   : > { %v10466_v54 = vpop.f32.mrb[26].mxu1  ;;  %v1573_v10 = vsel %vm1566_vm4, %v1556_v2, -inf  ;;  %v1554_v11 = vsel %vm663_vm3, %v1340_v4, -1e+30 }
 0x4a1   : > { %1574 = vmax.xlane.f32.xlu0 %v1573_v10  ;;  %v1343_v12 = vpop.f32.mrb[27].mxu1  ;;  %v1567_v18 = vsel %vm1566_vm4, %v1554_v11, -inf }
 0x4a2   : > { %v1555_v47 = vsel %vm663_vm3, %v1343_v12, -1e+30 }
 0x4a3   : > { %v1570_v15 = vsel %vm1566_vm4, %v1555_v47, -inf }
 0x4a4   : > { %1571 = vmax.xlane.f32.xlu1 %v1570_v15 }
 0x4a5   : > { %1568 = vmax.xlane.f32.xlu0 %v1567_v18 }
 0x4ae   : > { %v10473_v19 = vpop.f32.mrb[28].mxu1 }
 0x4af   : > { %v1559_v21 = vsel %vm663_vm3, %v10473_v19, -1e+30  ;;  %v1406_v23 = vpop.f32.mrb[29].mxu1 }
 0x4b0   : > { %v1557_v26 = vsel %vm663_vm3, %v1406_v23, -1e+30  ;;  %v10474_v27 = vpop.f32.mrb[30].mxu1  ;;  %v1582_v37 = vsel %vm1566_vm4, %v1559_v21, -inf }
 0x4b1   : > { %1583 = vmax.xlane.f32.xlu1 %v1582_v37  ;;  %v1409_v38 = vpop.f32.mrb[31].mxu1  ;;  %v1576_v24 = vsel %vm1566_vm4, %v1557_v26, -inf }
 0x4b2   : > { %v1558_v39 = vsel %vm663_vm3, %v1409_v38, -1e+30  ;;  %1577 = vmax.xlane.f32.xlu0 %v1576_v24 }
 0x4b3   : > { %v1579_v40 = vsel %vm1566_vm4, %v1558_v39, -inf }
 0x4b6   : > { %1580 = vmax.xlane.f32.xlu0 %v1579_v40 }
 0x4be   : > { %v10481_v13 = vpop.f32.mrb[32].mxu1 }
 0x4bf   : > { %v12720_v41 = vsel %vm663_vm3, %v10481_v13, -1e+30  ;;  %v1472_v42 = vpop.f32.mrb[33].mxu1 }
 0x4c0   : > { %v10482_v43 = vpop.f32.mrb[34].mxu1  ;;  %v1591_v44 = vsel %vm1566_vm4, %v12720_v41, -inf  ;;  %v12726_v50 = vsel %vm663_vm3, %v1472_v42, -1e+30 }
 0x4c1   : > { %1592 = vmax.xlane.f32.xlu0 %v1591_v44  ;;  %v1475_v51 = vpop.f32.mrb[35].mxu1  ;;  %v1585_v29 = vsel %vm1566_vm4, %v12726_v50, -inf }
 0x4c2   : > { %v12730_v56 = vsel %vm663_vm3, %v1475_v51, -1e+30 }
 0x4c3   : > { %v1588_v57 = vsel %vm1566_vm4, %v12730_v56, -inf }
 0x4c4   : > { %1589 = vmax.xlane.f32.xlu1 %v1588_v57 }
 0x4c5   : > { %1586 = vmax.xlane.f32.xlu0 %v1585_v29 }
 0x4ce   : > { %v10489_v58 = vpop.f32.mrb[36].mxu1 }
 0x4cf   : > { %v1538_v35 = vpop.f32.mrb[37].mxu1  ;;  %v12744_v12 = vsel %vm663_vm3, %v10489_v58, -1e+30 }
 0x4d0   : > { %v12738_v46 = vsel %vm663_vm3, %v1538_v35, -1e+30  ;;  %v10490_v4 = vpop.f32.mrb[38].mxu1  ;;  %v1600_v19 = vsel %vm1566_vm4, %v12744_v12, -inf }
 0x4d1   : > { %v1541_v54 = vpop.f32.mrb[39].mxu1  ;;  %v1594_v10 = vsel %vm1566_vm4, %v12738_v46, -inf }
 0x4d2   : > { %v12748_v15 = vsel %vm663_vm3, %v1541_v54, -1e+30  ;;  %1595 = vmax.xlane.f32.xlu1 %v1594_v10 }
 0x4d3   : > { %v1597_v18 = vsel %vm1566_vm4, %v12748_v15, -inf }
 0x4d4   : > { %1598 = vmax.xlane.f32.xlu0 %v1597_v18 }
 0x4d6   : > { %1601 = vmax.xlane.f32.xlu1 %v1600_v19 }
 0x52e   : > { %v1575_v23 = vpop.xlane.xlu0 %1574 }
 0x52f   : > { %v1605_v27 = vsub.f32 %v1556_v2, %v1575_v23 }
 0x531   : > { %v1619_v37 = vmul.f32 1.442695, %v1605_v27  ;;  %v1572_v38 = vpop.xlane.xlu1 %1571 }
 0x532   : > { %v1604_v24 = vsub.f32 %v1555_v47, %v1572_v38  ;;  %v1569_v40 = vpop.xlane.xlu0 %1568 }
 0x533   : > { %11476 = vpow2.f32 %v1619_v37  ;;  %v1603_v13 = vsub.f32 %v1554_v11, %v1569_v40 }
 0x534   : > { %v1617_v42 = vmul.f32 1.442695, %v1604_v24 }
 0x535   : > { %v1615_v43 = vmul.f32 1.442695, %v1603_v13 }
 0x536   : > { %11478 = vpow2.f32 %v1617_v42 }
 0x537   : > { %11480 = vpow2.f32 %v1615_v43 }
 0x53d   : > { %v12754_v44 = vpop.eup %11476 }
 0x53e   : > { %v1584_v51 = vpop.xlane.xlu1 %1583  ;;  %v1645_v57 = vsel %vm1566_vm4, %v12754_v44, 0.0 }
 0x53f   : > { %v1608_v29 = vsub.f32 %v1559_v21, %v1584_v51  ;;  %1646 = vadd.xlane.f32.xlu0 %v1645_v57  ;;  %v1578_v58 = vpop.xlane.xlu0 %1577 }
 0x540   : > { %v12758_v2 = vpop.eup %11478  ;;  %v1606_v35 = vsub.f32 %v1557_v26, %v1578_v58 }
 0x541   : > { %v12760_v47 = vpop.eup %11480  ;;  %v1625_v4 = vmul.f32 1.442695, %v1608_v29  ;;  %v1642_v11 = vsel %vm1566_vm4, %v12758_v2, 0.0 }
 0x542   : > { %v1621_v54 = vmul.f32 1.442695, %v1606_v35  ;;  %1643 = vadd.xlane.f32.xlu1 %v1642_v11  ;;  %v1639_v10 = vsel %vm1566_vm4, %v12760_v47, 0.0 }
 0x543   : > { %11482 = vpow2.f32 %v1625_v4  ;;  %1640 = vadd.xlane.f32.xlu0 %v1639_v10  ;;  %v1581_v18 = vpop.xlane.xlu0 %1580 }
 0x544   : > { %v1607_v21 = vsub.f32 %v1558_v39, %v1581_v18  ;;  %11484 = vpow2.f32 %v1621_v54 }
 0x546   : > { %v1623_v19 = vmul.f32 1.442695, %v1607_v21 }
 0x548   : > { %11486 = vpow2.f32 %v1623_v19 }
 0x54d   : > { %v12766_v23 = vpop.eup %11482 }
 0x54e   : > { %v1593_v26 = vpop.xlane.xlu0 %1592  ;;  %v1654_v27 = vsel %vm1566_vm4, %v12766_v23, 0.0  ;;  %v12770_v37 = vpop.eup %11484 }
 0x54f   : > { %v1611_v38 = vsub.f32 %v12720_v41, %v1593_v26  ;;  %1655 = vadd.xlane.f32.xlu1 %v1654_v27  ;;  %v1648_v43 = vsel %vm1566_vm4, %v12770_v37, 0.0 }
 0x551   : > { %v1631_v24 = vmul.f32 1.442695, %v1611_v38  ;;  %v1590_v40 = vpop.xlane.xlu1 %1589 }
 0x552   : > { %v12773_v13 = vpop.eup %11486  ;;  %v1610_v39 = vsub.f32 %v12730_v56, %v1590_v40  ;;  %v1587_v42 = vpop.xlane.xlu0 %1586 }
 0x553   : > { %11488 = vpow2.f32 %v1631_v24  ;;  %v1609_v51 = vsub.f32 %v12726_v50, %v1587_v42  ;;  %1649 = vadd.xlane.f32.xlu1 %v1648_v43  ;;  %v1651_v57 = vsel %vm1566_vm4, %v12773_v13, 0.0 }
 0x554   : > { %v1629_v29 = vmul.f32 1.442695, %v1610_v39  ;;  %1652 = vadd.xlane.f32.xlu0 %v1651_v57 }
 0x555   : > { %v1627_v41 = vmul.f32 1.442695, %v1609_v51 }
 0x556   : > { %11490 = vpow2.f32 %v1629_v29 }
 0x557   : > { %11492 = vpow2.f32 %v1627_v41 }
 0x55d   : > { %v12781_v58 = vpop.eup %11488 }
 0x55e   : > { %v1663_v56 = vsel %vm1566_vm4, %v12781_v58, 0.0 }
 0x55f   : > { %v1596_v35 = vpop.xlane.xlu1 %1595  ;;  %1664 = vadd.xlane.f32.xlu0 %v1663_v56 }
 0x560   : > { %v12785_v4 = vpop.eup %11490  ;;  %v1612_v10 = vsub.f32 %v12738_v46, %v1596_v35 }
 0x561   : > { %v12787_v11 = vpop.eup %11492  ;;  %v1599_v50 = vpop.xlane.xlu0 %1598  ;;  %v1660_v54 = vsel %vm1566_vm4, %v12785_v4, 0.0 }
 0x562   : > { %v1613_v18 = vsub.f32 %v12748_v15, %v1599_v50  ;;  %1661 = vadd.xlane.f32.xlu1 %v1660_v54  ;;  %v1657_v21 = vsel %vm1566_vm4, %v12787_v11, 0.0  ;;  %v1633_v38 = vmul.f32 1.442695, %v1612_v10 }
 0x563   : > { %v1602_v19 = vpop.xlane.xlu1 %1601  ;;  %1658 = vadd.xlane.f32.xlu0 %v1657_v21 }
 0x564   : > { %v1635_v26 = vmul.f32 1.442695, %v1613_v18  ;;  %v1614_v27 = vsub.f32 %v12744_v12, %v1602_v19 }
 0x566   : > { %11494 = vpow2.f32 %v1635_v26  ;;  %v1637_v24 = vmul.f32 1.442695, %v1614_v27  ;;  %v12854_v26 = vpack.c.bf16 %v12631_v53, %v12631_v53 }
 0x568   : > { %11496 = vpow2.f32 %v1637_v24 }
 0x569   : > { %11498 = vpow2.f32 %v1633_v38 }
 0x570   : > { %v12796_v40 = vpop.eup %11494 }
 0x571   : > { %v1669_v46 = vsel %vm1566_vm4, %v12796_v40, 0.0 }
 0x572   : > { %v12800_v15 = vpop.eup %11496  ;;  %1670 = vadd.xlane.f32.xlu0 %v1669_v46 }
 0x573   : > { %v1672_v39 = vsel %vm1566_vm4, %v12800_v15, 0.0  ;;  %v12804_v42 = vpop.eup %11498 }
 0x574   : > { %1673 = vadd.xlane.f32.xlu1 %v1672_v39  ;;  %v1666_v12 = vsel %vm1566_vm4, %v12804_v42, 0.0 }
 0x578   : > { %1667 = vadd.xlane.f32.xlu1 %v1666_v12 }
 0x588   : > { %1940 = vrot.lane.b32.xlu0 %v12578_v62, %s16142_s4 }
 0x589   : > { %2008 = vrot.lane.b32.xlu1 %v12604_v16, %s16142_s4 }
 0x58c   : > { %1936 = vrot.lane.b32.xlu0 %v12578_v62, %s16132_s28 }
 0x58d   : > { %1942 = vrot.lane.b32.xlu1 %v12590_v28, %s16142_s4 }
 0x590   : > { %1938 = vrot.lane.b32.xlu0 %v12590_v28, %s16132_s28 }
 0x591   : > { %2010 = vrot.lane.b32.xlu1 %v12614_v49, %s16142_s4 }
 0x594   : > { %2144 = vrot.lane.b32.xlu0 %v12641_v3, %s16142_s4 }
 0x595   : > { %2076 = vrot.lane.b32.xlu1 %v12622_v60, %s16142_s4 }
 0x598   : > { %2078 = vrot.lane.b32.xlu0 %v12633_v8, %s16142_s4 }
 0x599   : > { %2004 = vrot.lane.b32.xlu1 %v12604_v16, %s16132_s28 }
 0x59c   : > { %2072 = vrot.lane.b32.xlu0 %v12622_v60, %s16132_s28 }
 0x59d   : > { %2006 = vrot.lane.b32.xlu1 %v12614_v49, %s16132_s28 }
 0x5a0   : > { %2140 = vrot.lane.b32.xlu0 %v12641_v3, %s16132_s28 }
 0x5a1   : > { %2146 = vrot.lane.b32.xlu1 %v12649_v36, %s16142_s4 }
 0x5a4   : > { %2362 = vrot.lane.b32.xlu0 %v12580_v20, %s16132_s28 }
 0x5a5   : > { %2074 = vrot.lane.b32.xlu1 %v12633_v8, %s16132_s28 }
 0x5a9   : > { %2142 = vrot.lane.b32.xlu1 %v12649_v36, %s16132_s28 }
 0x5ad   : > { %2426 = vrot.lane.b32.xlu1 %v12607_v45, %s16132_s28 }
 0x5b1   : > { %2364 = vrot.lane.b32.xlu1 %v12592_v32, %s16132_s28 }
 0x5b5   : > { %2428 = vrot.lane.b32.xlu1 %v12686_v59, %s16132_s28 }
 0x5cc   : > { %v1647_v43 = vpop.xlane.xlu0 %1646 }
 0x5cd   : > { %11500 = vrcp.f32 %v1647_v43 }
 0x5cf   : > { %v1644_v51 = vpop.xlane.xlu1 %1643 }
 0x5d0   : > { %11502 = vrcp.f32 %v1644_v51  ;;  %v1641_v57 = vpop.xlane.xlu0 %1640 }
 0x5d1   : > { %11504 = vrcp.f32 %v1641_v57 }
 0x5d7   : > { %v11501_v29 = vpop.eup %11500 }
 0x5d8   : > { %v1689_v35 = vmul.f32 %v11501_v29, %v12754_v44  ;;  %v1829_v44 = vsel %vm1713_vm2, %v12854_v26, 0  ;;  %v12868_v29 = vpack.c.bf16 %v12647_v34, %v12647_v34 }
 0x5da   : > { %v11503_v41 = vpop.eup %11502  ;;  %v1700_v21 = vpack.c.bf16 %v1689_v35, %v1689_v35 }
 0x5db   : > { %v11505_v56 = vpop.eup %11504  ;;  %v1688_v50 = vmul.f32 %v11503_v41, %v12758_v2 }
 0x5dc   : > { %v1656_v54 = vpop.xlane.xlu1 %1655  ;;  %v1687_v10 = vmul.f32 %v11505_v56, %v12760_v47 }
 0x5dd   : > { %11506 = vrcp.f32 %v1656_v54 }
 0x5de   : > { %v1699_v18 = vpack.c.bf16 %v1688_v50, %v1687_v10 }
 0x5e0   : > { %v1650_v19 = vpop.xlane.xlu1 %1649  ;;  %10495 = vmatprep.mubr.msk.bf16.mxu0 %vm1566_vm4, %v1699_v18 }
 0x5e1   : > { %11508 = vrcp.f32 %v1650_v19  ;;  %10496 = vmatmul.mubr.msk.bf16.vlgmr.msra.gmra.mrb[24].mxu0 %vm1566_vm4, %v1700_v21  ;;  %v1653_v27 = vpop.xlane.xlu0 %1652 }
 0x5e2   : > { %10508 = vmatpush3.bf16.msra.mxu0 %v12624_v48  ;;  %11510 = vrcp.f32 %v1653_v27 }
 0x5e3   : > { %11033 = vmatprep.subr.msk.bf16.mxu0 %vm1713_vm2, %v12854_v26 }
 0x5e6   : > { %10510 = vmatpush3.bf16.msra.mxu0 %v1829_v44 }
 0x5e7   : > { %v11507_v2 = vpop.eup %11506 }
 0x5e8   : > { %v1692_v46 = vmul.f32 %v11507_v2, %v12766_v23  ;;  %v1886_v23 = vsel %vm1713_vm2, %v12868_v29, 0 }
 0x5ea   : > { %v1702_v57 = vpack.c.bf16 %v1692_v46, %v1692_v46 }
 0x5eb   : > { %v11509_v47 = vpop.eup %11508 }
 0x5ec   : > { %v11511_v38 = vpop.eup %11510  ;;  %v1665_v24 = vpop.xlane.xlu0 %1664  ;;  %v1690_v53 = vmul.f32 %v11509_v47, %v12770_v37 }
 0x5ed   : > { %v1691_v39 = vmul.f32 %v11511_v38, %v12773_v13  ;;  %11512 = vrcp.f32 %v1665_v24 }
 0x5ef   : > { %v1662_v12 = vpop.xlane.xlu1 %1661  ;;  %v1701_v43 = vpack.c.bf16 %v1691_v39, %v1690_v53 }
 0x5f0   : > { %11514 = vrcp.f32 %v1662_v12  ;;  %v1659_v51 = vpop.xlane.xlu0 %1658 }
 0x5f1   : > { %11516 = vrcp.f32 %v1659_v51  ;;  %10503 = vmatprep.mubr.msk.bf16.mxu1 %vm1566_vm4, %v1701_v43 }
 0x5f2   : > { %10504 = vmatmul.mubr.msk.bf16.vlgmr.msra.gmra.mrb[40].mxu1 %vm1566_vm4, %v1702_v57 }
 0x5f3   : > { %10516 = vmatpush3.bf16.msra.mxu1 %v12644_v31 }
 0x5f4   : > { %11034 = vmatprep.subr.msk.bf16.mxu1 %vm1713_vm2, %v12868_v29 }
 0x5f7   : > { %10518 = vmatpush3.bf16.msra.mxu1 %v1886_v23  ;;  %v11513_v37 = vpop.eup %11512 }
 0x5f8   : > { %v1695_v35 = vmul.f32 %v11513_v37, %v12781_v58 }
 0x5fa   : > { %v11515_v13 = vpop.eup %11514  ;;  %v1704_v10 = vpack.c.bf16 %v1695_v35, %v1695_v35 }
 0x5fb   : > { %v11517_v41 = vpop.eup %11516  ;;  %v1694_v56 = vmul.f32 %v11515_v13, %v12785_v4 }
 0x5fc   : > { %v1693_v34 = vmul.f32 %v11517_v41, %v12787_v11 }
 0x5fe   : > { %v1703_v50 = vpack.c.bf16 %v1694_v56, %v1693_v34 }
 0x5ff   : > { %v1671_v54 = vpop.xlane.xlu0 %1670 }
 0x600   : > { %10511 = vmatprep.mubr.msk.bf16.mxu0 %vm1566_vm4, %v1703_v50 }
 0x601   : > { %v1674_v18 = vpop.xlane.xlu1 %1673  ;;  %10512 = vmatmul.mubr.msk.bf16.vlgmr.msra.gmra.mrb[28].mxu0 %vm1566_vm4, %v1704_v10 }
 0x602   : > { %11518 = vrcp.f32 %v1674_v18 }
 0x603   : > { %v1941_v21 = vpop.permute.xlu0 %1940  ;;  %11520 = vrcp.f32 %v1671_v54 }
 0x604   : > { %11035 = vmatprep.subr.msk.bf16.mxu0 %vm1293_vm1, %v1941_v21  ;;  %v1951_v19 = vsel %vm1293_vm1, %v1941_v21, 0 }
 0x605   : > { %v1668_v4 = vpop.xlane.xlu1 %1667  ;;  %10524 = vmatpush3.bf16.xpose.msra.mxu0 %v1951_v19 }
 0x606   : > { %11522 = vrcp.f32 %v1668_v4 }
 0x607   : > { %v1937_v58 = vpop.permute.xlu0 %1936 }
 0x608   : > { %10527 = vmatprep.mubr.msk.bf16.mxu0 %vm1293_vm1, %v1937_v58 }
 0x609   : > { %v2009_v11 = vpop.permute.xlu1 %2008 }
 0x60a   : > { %11037 = vmatprep.subr.msk.bf16.mxu1 %vm1293_vm1, %v2009_v11  ;;  %v2019_v13 = vsel %vm1293_vm1, %v2009_v11, 0 }
 0x60b   : > { %v1939_v27 = vpop.permute.xlu0 %1938 }
 0x60c   : > { %v11519_v44 = vpop.eup %11518 }
 0x60d   : > { %v1943_v2 = vpop.permute.xlu1 %1942  ;;  %v11521_v47 = vpop.eup %11520  ;;  %v1698_v46 = vmul.f32 %v11519_v44, %v12800_v15 }
 0x60e   : > { %11036 = vmatprep.subr.msk.bf16.mxu0 %vm1293_vm1, %v1943_v2  ;;  %v1954_v38 = vsel %vm1293_vm1, %v1943_v2, 0  ;;  %v1697_v43 = vmul.f32 %v11521_v47, %v12796_v40 }
 0x60f   : > { %10526 = vmatpush3.bf16.xpose.msra.mxu0 %v1954_v38  ;;  %v2145_v24 = vpop.permute.xlu0 %2144  ;;  %v1706_v23 = vpack.c.bf16 %v1698_v46, %v1698_v46 }
 0x610   : > { %v11523_v53 = vpop.eup %11522  ;;  %v2155_v18 = vsel %vm1293_vm1, %v2145_v24, 0 }
 0x611   : > { %v2011_v39 = vpop.permute.xlu1 %2010  ;;  %v1696_v12 = vmul.f32 %v11523_v53, %v12804_v42 }
 0x612   : > { %v2022_v35 = vsel %vm1293_vm1, %v2011_v39, 0 }
 0x613   : > { %v2079_v51 = vpop.permute.xlu0 %2078  ;;  %v1705_v57 = vpack.c.bf16 %v1697_v43, %v1696_v12 }
 0x614   : > { %v2090_v34 = vsel %vm1293_vm1, %v2079_v51, 0 }
 0x615   : > { %v2077_v37 = vpop.permute.xlu1 %2076  ;;  %10519 = vmatprep.mubr.msk.bf16.mxu1 %vm1566_vm4, %v1705_v57 }
 0x616   : > { %10520 = vmatmul.mubr.msk.bf16.vlgmr.msra.gmra.mrb[44].mxu1 %vm1566_vm4, %v1706_v23  ;;  %10528 = vmatmul.mubr.msk.bf16.vlgmr.msra.gmra.mrb[32].mxu0 %vm1293_vm1, %v1939_v27  ;;  %v2087_v41 = vsel %vm1293_vm1, %v2077_v37, 0 }
 0x617   : > { %10532 = vmatpush3.bf16.xpose.msra.mxu1 %v2019_v13  ;;  %11039 = vmatprep.subr.msk.bf16.mxu0 %vm1293_vm1, %v2077_v37  ;;  %v2073_v15 = vpop.permute.xlu0 %2072 }
 0x618   : > { %11038 = vmatprep.subr.msk.bf16.mxu1 %vm1293_vm1, %v2011_v39  ;;  %10540 = vmatpush3.bf16.xpose.msra.mxu0 %v2087_v41 }
 0x619   : > { %11040 = vmatprep.subr.msk.bf16.mxu0 %vm1293_vm1, %v2079_v51  ;;  %10543 = vmatprep.mubr.msk.bf16.mxu0 %vm1293_vm1, %v2073_v15  ;;  %v2005_v40 = vpop.permute.xlu1 %2004 }
 0x61a   : > { %10535 = vmatprep.mubr.msk.bf16.mxu1 %vm1293_vm1, %v2005_v40 }
 0x61b   : > { %v2141_v42 = vpop.permute.xlu0 %2140 }
 0x61d   : > { %v2007_v56 = vpop.permute.xlu1 %2006 }
 0x61f   : > { %10534 = vmatpush3.bf16.xpose.msra.mxu1 %v2022_v35  ;;  %v2363_v50 = vpop.permute.xlu0 %2362 }
 0x620   : > { %10542 = vmatpush3.bf16.xpose.msra.mxu0 %v2090_v34  ;;  %11041 = vmatprep.subr.msk.bf16.mxu1 %vm1293_vm1, %v2145_v24 }
 0x621   : > { %10555 = vmatprep.subr.bf16.mxu0 %v2363_v50  ;;  %v2147_v54 = vpop.permute.xlu1 %2146 }
 0x622   : > { %v2158_v4 = vsel %vm1293_vm1, %v2147_v54, 0 }
 0x625   : > { %v2075_v10 = vpop.permute.xlu1 %2074 }
 0x626   : > { %10536 = vmatmul.mubr.msk.bf16.vlgmr.msra.gmra.mrb[48].mxu1 %vm1293_vm1, %v2007_v56 }
 0x627   : > { %10544 = vmatmul.mubr.msk.bf16.vlgmr.msra.gmra.mrb[36].mxu0 %vm1293_vm1, %v2075_v10  ;;  %10548 = vmatpush3.bf16.xpose.msra.mxu1 %v2155_v18 }
 0x628   : > { %10551 = vmatprep.mubr.msk.bf16.mxu1 %vm1293_vm1, %v2141_v42  ;;  %11042 = vmatprep.subr.msk.bf16.mxu1 %vm1293_vm1, %v2147_v54 }
 0x629   : > { %10556 = vmatpush3.bf16.msra.mxu0 %v2363_v50  ;;  %v2143_v21 = vpop.permute.xlu1 %2142 }
 0x62d   : > { %v2427_v19 = vpop.permute.xlu1 %2426 }
 0x62f   : > { %10550 = vmatpush3.bf16.xpose.msra.mxu1 %v2158_v4 }
 0x630   : > { %10563 = vmatprep.subr.bf16.mxu1 %v2427_v19 }
 0x631   : > { %v2365_v58 = vpop.permute.xlu1 %2364 }
 0x632   : > { %11043 = vmatprep.subr.msk.bf16.mxu0 %vm1713_vm2, %v2365_v58  ;;  %v2374_v11 = vsel %vm1713_vm2, %v2365_v58, 0 }
 0x633   : > { %10558 = vmatpush3.bf16.msra.mxu0 %v2374_v11 }
 0x635   : > { %v2429_v27 = vpop.permute.xlu1 %2428 }
 0x636   : > { %10552 = vmatmul.mubr.msk.bf16.vlgmr.msra.gmra.mrb[52].mxu1 %vm1293_vm1, %v2143_v21  ;;  %v2438_v44 = vsel %vm1713_vm2, %v2429_v27, 0 }
 0x637   : > { %10564 = vmatpush3.bf16.msra.mxu1 %v2427_v19 }
 0x638   : > { %11044 = vmatprep.subr.msk.bf16.mxu1 %vm1713_vm2, %v2429_v27 }
 0x63b   : > { %10566 = vmatpush3.bf16.msra.mxu1 %v2438_v44 }
 0x6b4   : > { %v12914_v2 = vpop.f32.mrb[24].mxu0 }
 0x6b5   : > { %v12916_v47 = vpop.f32.mrb[25].mxu0 }
 0x6b6   : > { %v10498_v38 = vpop.f32.mrb[26].mxu0 }
 0x6b7   : > { %v12918_v24 = vpop.f32.mrb[27].mxu0 }
 0x6c5   : > { %v12920_v53 = vpop.f32.mrb[40].mxu1 }
 0x6c6   : > { %v12922_v46 = vpop.f32.mrb[41].mxu1 }
 0x6c7   : > { %v10506_v39 = vpop.f32.mrb[42].mxu1 }
 0x6c8   : > { %v12924_v12 = vpop.f32.mrb[43].mxu1 }
 0x6d4   : > { %v12926_v43 = vpop.f32.mrb[28].mxu0 }
 0x6d5   : > { %16202 = vst [vmem:[#allocation27_spill] sm:$0xff] %v12926_v43  ;;  %v12928_v51 = vpop.f32.mrb[29].mxu0 }
 0x6d6   : > { %16203 = vst [vmem:[#allocation28_spill] sm:$0xff] %v12928_v51  ;;  %v10514_v57 = vpop.f32.mrb[30].mxu0 }
 0x6d7   : > { %v12930_v23 = vpop.f32.mrb[31].mxu0 }
 0x6e9   : > { %v12932_v37 = vpop.f32.mrb[44].mxu1  ;;  %v10529_v13 = vpop.f32.mrb[32].mxu0 }
 0x6ea   : > { %16204 = vst [vmem:[#allocation29_spill] sm:$0xff] %v12932_v37  ;;  %v2210_v41 = vsel %vm663_vm3, %v10529_v13, -1e+30  ;;  %v12936_v15 = vpop.f32.mrb[45].mxu1  ;;  %v1990_v40 = vpop.f32.mrb[33].mxu0 }
 0x6eb   : > { %16205 = vst [vmem:[#allocation30_spill] sm:$0xff] %v12936_v15  ;;  %v10522_v42 = vpop.f32.mrb[46].mxu1  ;;  %v10530_v56 = vpop.f32.mrb[34].mxu0  ;;  %v2226_v35 = vsel %vm1566_vm4, %v2210_v41, -inf  ;;  %v2208_v34 = vsel %vm663_vm3, %v1990_v40, -1e+30 }
 0x6ec   : > { %v12941_v50 = vpop.f32.mrb[47].mxu1  ;;  %2227 = vmax.xlane.f32.xlu0 %v2226_v35  ;;  %v1993_v54 = vpop.f32.mrb[35].mxu0  ;;  %v2220_v21 = vsel %vm1566_vm4, %v2208_v34, -inf }
 0x6ed   : > { %16206 = vst [vmem:[#allocation31_spill] sm:$0xff] %v12941_v50  ;;  %v2209_v10 = vsel %vm663_vm3, %v1993_v54, -1e+30 }
 0x6ee   : > { %v2223_v18 = vsel %vm1566_vm4, %v2209_v10, -inf }
 0x6ef   : > { %2224 = vmax.xlane.f32.xlu1 %v2223_v18 }
 0x6f0   : > { %2221 = vmax.xlane.f32.xlu0 %v2220_v21 }
 0x6f9   : > { %v10537_v19 = vpop.f32.mrb[48].mxu1 }
 0x6fa   : > { %v2213_v4 = vsel %vm663_vm3, %v10537_v19, -1e+30  ;;  %v2058_v58 = vpop.f32.mrb[49].mxu1  ;;  %v10545_v11 = vpop.f32.mrb[36].mxu0 }
 0x6fb   : > { %v2216_v27 = vsel %vm663_vm3, %v10545_v11, -1e+30  ;;  %v10538_v44 = vpop.f32.mrb[50].mxu1  ;;  %v2126_v38 = vpop.f32.mrb[37].mxu0  ;;  %v2235_v57 = vsel %vm1566_vm4, %v2213_v4, -inf }
 0x6fc   : > { %v2061_v39 = vpop.f32.mrb[51].mxu1  ;;  %v10546_v13 = vpop.f32.mrb[38].mxu0  ;;  %v2244_v40 = vsel %vm1566_vm4, %v2216_v27, -inf  ;;  %v2211_v42 = vsel %vm663_vm3, %v2058_v58, -1e+30  ;;  %2236 = vmax.xlane.f32.xlu1 %v2235_v57 }
 0x6fd   : > { %2245 = vmax.xlane.f32.xlu0 %v2244_v40  ;;  %v2129_v56 = vpop.f32.mrb[39].mxu0  ;;  %v2229_v18 = vsel %vm1566_vm4, %v2211_v42, -inf  ;;  %v2214_v21 = vsel %vm663_vm3, %v2126_v38, -1e+30  ;;  %v2212_v58 = vsel %vm663_vm3, %v2061_v39, -1e+30 }
 0x6fe   : > { %v12957_v35 = vsel %vm663_vm3, %v2129_v56, -1e+30  ;;  %v2238_v19 = vsel %vm1566_vm4, %v2214_v21, -inf  ;;  %v2232_v11 = vsel %vm1566_vm4, %v2212_v58, -inf }
 0x6ff   : > { %v2241_v54 = vsel %vm1566_vm4, %v12957_v35, -inf }
 0x700   : > { %2242 = vmax.xlane.f32.xlu1 %v2241_v54 }
 0x701   : > { %2230 = vmax.xlane.f32.xlu0 %v2229_v18 }
 0x705   : > { %2239 = vmax.xlane.f32.xlu0 %v2238_v19 }
 0x709   : > { %2233 = vmax.xlane.f32.xlu0 %v2232_v11  ;;  %v10553_v44 = vpop.f32.mrb[52].mxu1 }
 0x70a   : > { %v12970_v57 = vsel %vm663_vm3, %v10553_v44, -1e+30  ;;  %v2194_v13 = vpop.f32.mrb[53].mxu1 }
 0x70b   : > { %v10554_v40 = vpop.f32.mrb[54].mxu1  ;;  %v2253_v38 = vsel %vm1566_vm4, %v12970_v57, -inf  ;;  %v12976_v56 = vsel %vm663_vm3, %v2194_v13, -1e+30 }
 0x70c   : > { %2254 = vmax.xlane.f32.xlu1 %v2253_v38  ;;  %v2197_v39 = vpop.f32.mrb[55].mxu1  ;;  %v2247_v19 = vsel %vm1566_vm4, %v12976_v56, -inf }
 0x70d   : > { %v12980_v54 = vsel %vm663_vm3, %v2197_v39, -1e+30 }
 0x70e   : > { %v2250_v18 = vsel %vm1566_vm4, %v12980_v54, -inf }
 0x70f   : > { %2251 = vmax.xlane.f32.xlu0 %v2250_v18 }
 0x710   : > { %2248 = vmax.xlane.f32.xlu1 %v2247_v19 }
 0x721   : > { %2554 = vrot.lane.b32.xlu1 %v12644_v31, %s16132_s28 }
 0x725   : > { %2490 = vrot.lane.b32.xlu0 %v12624_v48, %s16132_s28 }
 0x779   : > { %v2228_v11 = vpop.xlane.xlu0 %2227 }
 0x77a   : > { %v2258_v44 = vsub.f32 %v2210_v41, %v2228_v11 }
 0x77c   : > { %v2272_v13 = vmul.f32 1.442695, %v2258_v44  ;;  %v2225_v40 = vpop.xlane.xlu1 %2224 }
 0x77d   : > { %v2257_v38 = vsub.f32 %v2209_v10, %v2225_v40  ;;  %v2222_v39 = vpop.xlane.xlu0 %2221 }
 0x77e   : > { %11524 = vpow2.f32 %v2272_v13  ;;  %v2256_v1 = vsub.f32 %v2208_v34, %v2222_v39 }
 0x77f   : > { %v2270_v7 = vmul.f32 1.442695, %v2257_v38 }
 0x780   : > { %v2268_v18 = vmul.f32 1.442695, %v2256_v1 }
 0x781   : > { %11526 = vpow2.f32 %v2270_v7 }
 0x782   : > { %11528 = vpow2.f32 %v2268_v18 }
 0x788   : > { %v12990_v5 = vpop.eup %11524 }
 0x789   : > { %v2298_v19 = vsel %vm1566_vm4, %v12990_v5, 0.0  ;;  %v2237_v25 = vpop.xlane.xlu1 %2236 }
 0x78a   : > { %v2246_v33 = vpop.xlane.xlu0 %2245  ;;  %2299 = vadd.xlane.f32.xlu0 %v2298_v19  ;;  %v2261_v41 = vsub.f32 %v2213_v4, %v2237_v25 }
 0x78b   : > { %v12994_v22 = vpop.eup %11526  ;;  %v2264_v11 = vsub.f32 %v2216_v27, %v2246_v33 }
 0x78c   : > { %v12996_v10 = vpop.eup %11528  ;;  %v2295_v34 = vsel %vm1566_vm4, %v12994_v22, 0.0  ;;  %v2278_v1 = vmul.f32 1.442695, %v2261_v41 }
 0x78d   : > { %v2284_v7 = vmul.f32 1.442695, %v2264_v11  ;;  %2296 = vadd.xlane.f32.xlu1 %v2295_v34  ;;  %v2292_v44 = vsel %vm1566_vm4, %v12996_v10, 0.0  ;;  %v2243_v33 = vpop.xlane.xlu1 %2242 }
 0x78e   : > { %v2231_v13 = vpop.xlane.xlu0 %2230  ;;  %2293 = vadd.xlane.f32.xlu0 %v2292_v44  ;;  %11530 = vpow2.f32 %v2278_v1 }
 0x78f   : > { %v2259_v40 = vsub.f32 %v2211_v42, %v2231_v13  ;;  %11532 = vpow2.f32 %v2284_v7 }
 0x791   : > { %v2274_v38 = vmul.f32 1.442695, %v2259_v40 }
 0x792   : > { %v2240_v39 = vpop.xlane.xlu0 %2239 }
 0x793   : > { %v2262_v25 = vsub.f32 %v2214_v21, %v2240_v39  ;;  %11534 = vpow2.f32 %v2274_v38 }
 0x795   : > { %v2280_v4 = vmul.f32 1.442695, %v2262_v25 }
 0x796   : > { %v2234_v27 = vpop.xlane.xlu0 %2233 }
 0x797   : > { %11536 = vpow2.f32 %v2280_v4  ;;  %v2260_v18 = vsub.f32 %v2212_v58, %v2234_v27  ;;  %v2263_v27 = vsub.f32 %v12957_v35, %v2243_v33 }
 0x798   : > { %v13002_v19 = vpop.eup %11530 }
 0x799   : > { %v2276_v41 = vmul.f32 1.442695, %v2260_v18  ;;  %v2255_v11 = vpop.xlane.xlu1 %2254  ;;  %v13004_v34 = vpop.eup %11532  ;;  %v2307_v1 = vsel %vm1566_vm4, %v13002_v19, 0.0  ;;  %v2282_v18 = vmul.f32 1.442695, %v2263_v27 }
 0x79a   : > { %2308 = vadd.xlane.f32.xlu1 %v2307_v1  ;;  %v2316_v42 = vsel %vm1566_vm4, %v13004_v34, 0.0 }
 0x79b   : > { %11538 = vpow2.f32 %v2276_v41  ;;  %2317 = vadd.xlane.f32.xlu0 %v2316_v42  ;;  %v2267_v41 = vsub.f32 %v12970_v57, %v2255_v11 }
 0x79c   : > { %v2252_v21 = vpop.xlane.xlu0 %2251  ;;  %11540 = vpow2.f32 %v2282_v18 }
 0x79d   : > { %v2249_v7 = vpop.xlane.xlu1 %2248  ;;  %v13010_v44 = vpop.eup %11534  ;;  %v2266_v1 = vsub.f32 %v12980_v54, %v2252_v21  ;;  %v2290_v42 = vmul.f32 1.442695, %v2267_v41 }
 0x79e   : > { %v2301_v58 = vsel %vm1566_vm4, %v13010_v44, 0.0 }
 0x79f   : > { %2302 = vadd.xlane.f32.xlu1 %v2301_v58  ;;  %v2265_v58 = vsub.f32 %v12976_v56, %v2249_v7  ;;  %11542 = vpow2.f32 %v2290_v42 }
 0x7a0   : > { %v13014_v13 = vpop.permute.xlu0 %2490 }
 0x7a1   : > { %v13016_v40 = vpop.eup %11536  ;;  %v13018_v38 = vpop.permute.xlu1 %2554  ;;  %10571 = vmatprep.subr.bf16.mxu0 %v13014_v13 }
 0x7a2   : > { %10579 = vmatprep.subr.bf16.mxu1 %v13018_v38  ;;  %v2310_v39 = vsel %vm1566_vm4, %v13016_v40, 0.0 }
 0x7a3   : > { %2311 = vadd.xlane.f32.xlu0 %v2310_v39  ;;  %v2288_v39 = vmul.f32 1.442695, %v2266_v1 }
 0x7a5   : > { %v13024_v25 = vpop.eup %11538  ;;  %11544 = vpow2.f32 %v2288_v39 }
 0x7a6   : > { %v2304_v4 = vsel %vm1566_vm4, %v13024_v25, 0.0  ;;  %v13036_v30 = vpop.eup %11540 }
 0x7a7   : > { %2305 = vadd.xlane.f32.xlu0 %v2304_v4  ;;  %v2286_v4 = vmul.f32 1.442695, %v2265_v58  ;;  %v2313_v9 = vsel %vm1566_vm4, %v13036_v30, 0.0 }
 0x7a9   : > { %11546 = vpow2.f32 %v2286_v4  ;;  %v13040_v35 = vpop.eup %11542 }
 0x7aa   : > { %v2325_v54 = vsel %vm1566_vm4, %v13040_v35, 0.0 }
 0x7af   : > { %v13042_v57 = vpop.eup %11544 }
 0x7b0   : > { %2556 = vrot.lane.b32.xlu1 %v12868_v29, %s16132_s28  ;;  %v2322_v56 = vsel %vm1566_vm4, %v13042_v57, 0.0 }
 0x7b3   : > { %v13046_v33 = vpop.eup %11546 }
 0x7b4   : > { %v2319_v11 = vsel %vm1566_vm4, %v13046_v33, 0.0 }
 0x7bd   : > { %2492 = vrot.lane.b32.xlu0 %v12854_v26, %s16132_s28  ;;  %s16214_s28 = smov 32  }
 0x7d4   : > { %2314 = vadd.xlane.f32.xlu1 %v2313_v9 }
 0x7d8   : > { %2326 = vadd.xlane.f32.xlu1 %v2325_v54 }
 0x7dc   : > { %2323 = vadd.xlane.f32.xlu0 %v2322_v56  ;;  %2320 = vadd.xlane.f32.xlu1 %v2319_v11 }
 0x7ed   : > { %2688 = vrot.lane.b32.xlu1 %v12604_v16, %s16136_s26 }
 0x7f1   : > { %2690 = vrot.lane.b32.xlu1 %v12614_v49, %s16136_s26 }
 0x7f2   : > { %2620 = vrot.lane.b32.xlu0 %v12578_v62, %s16136_s26 }
 0x7f5   : > { %2756 = vrot.lane.b32.xlu1 %v12622_v60, %s16136_s26 }
 0x7f6   : > { %2622 = vrot.lane.b32.xlu0 %v12590_v28, %s16136_s26 }
 0x7f9   : > { %2684 = vrot.lane.b32.xlu1 %v12604_v16, %s16126_s2 }
 0x7fa   : > { %2616 = vrot.lane.b32.xlu0 %v12578_v62, %s16126_s2 }
 0x7fd   : > { %2686 = vrot.lane.b32.xlu1 %v12614_v49, %s16126_s2 }
 0x7fe   : > { %2618 = vrot.lane.b32.xlu0 %v12590_v28, %s16126_s2 }
 0x801   : > { %2826 = vrot.lane.b32.xlu1 %v12649_v36, %s16136_s26 }
 0x802   : > { %2824 = vrot.lane.b32.xlu0 %v12641_v3, %s16136_s26 }
 0x805   : > { %2754 = vrot.lane.b32.xlu1 %v12633_v8, %s16126_s2 }
 0x806   : > { %2758 = vrot.lane.b32.xlu0 %v12633_v8, %s16136_s26 }
 0x809   : > { %2822 = vrot.lane.b32.xlu1 %v12649_v36, %s16126_s2 }
 0x80a   : > { %2752 = vrot.lane.b32.xlu0 %v12622_v60, %s16126_s2 }
 0x80d   : > { %3102 = vrot.lane.b32.xlu1 %v12607_v45, %s16126_s2 }
 0x80e   : > { %2820 = vrot.lane.b32.xlu0 %v12641_v3, %s16126_s2 }
 0x811   : > { %3042 = vrot.lane.b32.xlu1 %v12592_v32, %s16126_s2 }
 0x812   : > { %3040 = vrot.lane.b32.xlu0 %v12580_v20, %s16126_s2 }
 0x815   : > { %3104 = vrot.lane.b32.xlu1 %v12686_v59, %s16126_s2 }
 0x817   : > { %v2300_v9 = vpop.xlane.xlu0 %2299 }
 0x818   : > { %11548 = vrcp.f32 %v2300_v9 }
 0x81a   : > { %v2297_v21 = vpop.xlane.xlu1 %2296 }
 0x81b   : > { %11550 = vrcp.f32 %v2297_v21  ;;  %v2294_v7 = vpop.xlane.xlu0 %2293 }
 0x81c   : > { %11552 = vrcp.f32 %v2294_v7 }
 0x822   : > { %v11549_v27 = vpop.eup %11548 }
 0x823   : > { %v2342_v42 = vmul.f32 %v11549_v27, %v12990_v5 }
 0x825   : > { %v11551_v18 = vpop.eup %11550  ;;  %v2353_v54 = vpack.c.bf16 %v2342_v42, %v2342_v42 }
 0x826   : > { %v11553_v41 = vpop.eup %11552  ;;  %v2341_v1 = vmul.f32 %v11551_v18, %v12994_v22 }
 0x827   : > { %v2340_v58 = vmul.f32 %v11553_v41, %v12996_v10  ;;  %v2309_v4 = vpop.xlane.xlu1 %2308 }
 0x828   : > { %v2318_v56 = vpop.xlane.xlu0 %2317  ;;  %11554 = vrcp.f32 %v2309_v4 }
 0x829   : > { %v2352_v39 = vpack.c.bf16 %v2341_v1, %v2340_v58 }
 0x82b   : > { %10559 = vmatprep.mubr.msk.bf16.mxu0 %vm1566_vm4, %v2352_v39 }
 0x82c   : > { %10560 = vmatmul.mubr.msk.bf16.vlgmr.msra.gmra.mrb[40].mxu0 %vm1566_vm4, %v2353_v54  ;;  %v2303_v11 = vpop.xlane.xlu1 %2302 }
 0x82d   : > { %10572 = vmatpush3.bf16.msra.mxu0 %v13014_v13  ;;  %11556 = vrcp.f32 %v2303_v11 }
 0x830   : > { %v2312_v9 = vpop.xlane.xlu0 %2311  ;;  %v2557_v58 = vpop.permute.xlu1 %2556 }
 0x831   : > { %v2566_v39 = vsel %vm1713_vm2, %v2557_v58, 0 }
 0x832   : > { %v11555_v10 = vpop.eup %11554 }
 0x833   : > { %v2345_v18 = vmul.f32 %v11555_v10, %v13002_v19 }
 0x834   : > { %v2306_v21 = vpop.xlane.xlu0 %2305 }
 0x835   : > { %11558 = vrcp.f32 %v2306_v21  ;;  %v2355_v42 = vpack.c.bf16 %v2345_v18, %v2345_v18 }
 0x836   : > { %11560 = vrcp.f32 %v2318_v56 }
 0x837   : > { %v11557_v7 = vpop.eup %11556  ;;  %11562 = vrcp.f32 %v2312_v9 }
 0x838   : > { %v2493_v22 = vpop.permute.xlu0 %2492  ;;  %v2343_v41 = vmul.f32 %v11557_v7, %v13010_v44 }
 0x839   : > { %11045 = vmatprep.subr.msk.bf16.mxu0 %vm1713_vm2, %v2493_v22  ;;  %v2502_v5 = vsel %vm1713_vm2, %v2493_v22, 0 }
 0x83a   : > { %10574 = vmatpush3.bf16.msra.mxu0 %v2502_v5 }
 0x83f   : > { %v11559_v27 = vpop.eup %11558 }
 0x840   : > { %v2344_v13 = vmul.f32 %v11559_v27, %v13024_v25  ;;  %v11561_v4 = vpop.eup %11560 }
 0x841   : > { %v11563_v11 = vpop.eup %11562 }
 0x842   : > { %v2354_v1 = vpack.c.bf16 %v2344_v13, %v2343_v41  ;;  %v2346_v56 = vmul.f32 %v11563_v11, %v13016_v40 }
 0x844   : > { %10567 = vmatprep.mubr.msk.bf16.mxu1 %vm1566_vm4, %v2354_v1 }
 0x845   : > { %10568 = vmatmul.mubr.msk.bf16.vlgmr.msra.gmra.mrb[56].mxu1 %vm1566_vm4, %v2355_v42 }
 0x846   : > { %10580 = vmatpush3.bf16.msra.mxu1 %v13018_v38  ;;  %v2348_v38 = vmul.f32 %v11561_v4, %v13004_v34 }
 0x847   : > { %11046 = vmatprep.subr.msk.bf16.mxu1 %vm1713_vm2, %v2557_v58 }
 0x848   : > { %v2357_v27 = vpack.c.bf16 %v2348_v38, %v2348_v38 }
 0x84a   : > { %10582 = vmatpush3.bf16.msra.mxu1 %v2566_v39 }
 0x861   : > { %v2315_v19 = vpop.xlane.xlu1 %2314 }
 0x862   : > { %11564 = vrcp.f32 %v2315_v19 }
 0x865   : > { %v2327_v44 = vpop.xlane.xlu1 %2326 }
 0x866   : > { %11566 = vrcp.f32 %v2327_v44 }
 0x869   : > { %v2324_v25 = vpop.xlane.xlu0 %2323  ;;  %v2321_v54 = vpop.xlane.xlu1 %2320 }
 0x86a   : > { %11568 = vrcp.f32 %v2324_v25 }
 0x86b   : > { %11570 = vrcp.f32 %v2321_v54 }
 0x86c   : > { %v11565_v21 = vpop.eup %11564 }
 0x86d   : > { %v2621_v22 = vpop.permute.xlu0 %2620  ;;  %v2689_v5 = vpop.permute.xlu1 %2688  ;;  %v2347_v9 = vmul.f32 %v11565_v21, %v13036_v30 }
 0x86e   : > { %11047 = vmatprep.subr.msk.bf16.mxu0 %vm1293_vm1, %v2621_v22  ;;  %11049 = vmatprep.subr.msk.bf16.mxu1 %vm1293_vm1, %v2689_v5  ;;  %v2631_v34 = vsel %vm1293_vm1, %v2621_v22, 0  ;;  %v2699_v11 = vsel %vm1293_vm1, %v2689_v5, 0 }
 0x86f   : > { %v2356_v10 = vpack.c.bf16 %v2347_v9, %v2346_v56 }
 0x870   : > { %v11567_v18 = vpop.eup %11566 }
 0x871   : > { %v2623_v7 = vpop.permute.xlu0 %2622  ;;  %v2691_v41 = vpop.permute.xlu1 %2690  ;;  %10575 = vmatprep.mubr.msk.bf16.mxu0 %vm1566_vm4, %v2356_v10  ;;  %v2351_v42 = vmul.f32 %v11567_v18, %v13040_v35 }
 0x872   : > { %10576 = vmatmul.mubr.msk.bf16.vlgmr.msra.gmra.mrb[44].mxu0 %vm1566_vm4, %v2357_v27  ;;  %v2634_v54 = vsel %vm1293_vm1, %v2623_v7, 0  ;;  %v2702_v22 = vsel %vm1293_vm1, %v2691_v41, 0 }
 0x873   : > { %10588 = vmatpush3.bf16.xpose.msra.mxu0 %v2631_v34  ;;  %v2359_v25 = vpack.c.bf16 %v2351_v42, %v2351_v42 }
 0x874   : > { %v11569_v13 = vpop.eup %11568  ;;  %11048 = vmatprep.subr.msk.bf16.mxu0 %vm1293_vm1, %v2623_v7 }
 0x875   : > { %v11571_v1 = vpop.eup %11570  ;;  %v2617_v40 = vpop.permute.xlu0 %2616  ;;  %v2350_v30 = vmul.f32 %v11569_v13, %v13042_v57 }
 0x876   : > { %v2757_v58 = vpop.permute.xlu1 %2756  ;;  %10591 = vmatprep.mubr.msk.bf16.mxu0 %vm1293_vm1, %v2617_v40  ;;  %v2349_v39 = vmul.f32 %v11571_v1, %v13046_v33 }
 0x877   : > { %v2767_v38 = vsel %vm1293_vm1, %v2757_v58, 0 }
 0x878   : > { %v2358_v19 = vpack.c.bf16 %v2350_v30, %v2349_v39 }
 0x879   : > { %v2619_v44 = vpop.permute.xlu0 %2618 }
 0x87a   : > { %v2685_v4 = vpop.permute.xlu1 %2684  ;;  %10583 = vmatprep.mubr.msk.bf16.mxu1 %vm1566_vm4, %v2358_v19 }
 0x87b   : > { %10584 = vmatmul.mubr.msk.bf16.vlgmr.msra.gmra.mrb[60].mxu1 %vm1566_vm4, %v2359_v25  ;;  %10590 = vmatpush3.bf16.xpose.msra.mxu0 %v2634_v54 }
 0x87c   : > { %10596 = vmatpush3.bf16.xpose.msra.mxu1 %v2699_v11  ;;  %10599 = vmatprep.mubr.msk.bf16.mxu1 %vm1293_vm1, %v2685_v4 }
 0x87d   : > { %11050 = vmatprep.subr.msk.bf16.mxu1 %vm1293_vm1, %v2691_v41  ;;  %v2825_v35 = vpop.permute.xlu0 %2824  ;;  %11051 = vmatprep.subr.msk.bf16.mxu0 %vm1293_vm1, %v2757_v58 }
 0x87e   : > { %v2687_v57 = vpop.permute.xlu1 %2686  ;;  %v2835_v27 = vsel %vm1293_vm1, %v2825_v35, 0 }
 0x881   : > { %v2759_v33 = vpop.permute.xlu0 %2758 }
 0x882   : > { %v2827_v21 = vpop.permute.xlu1 %2826  ;;  %10592 = vmatmul.mubr.msk.bf16.vlgmr.msra.gmra.mrb[48].mxu0 %vm1293_vm1, %v2619_v44  ;;  %v2770_v7 = vsel %vm1293_vm1, %v2759_v33, 0 }
 0x883   : > { %10604 = vmatpush3.bf16.xpose.msra.mxu0 %v2767_v38  ;;  %v2838_v13 = vsel %vm1293_vm1, %v2827_v21, 0 }
 0x884   : > { %10598 = vmatpush3.bf16.xpose.msra.mxu1 %v2702_v22  ;;  %11052 = vmatprep.subr.msk.bf16.mxu0 %vm1293_vm1, %v2759_v33 }
 0x885   : > { %11053 = vmatprep.subr.msk.bf16.mxu1 %vm1293_vm1, %v2825_v35  ;;  %v2753_v5 = vpop.permute.xlu0 %2752 }
 0x886   : > { %v2755_v56 = vpop.permute.xlu1 %2754  ;;  %10607 = vmatprep.mubr.msk.bf16.mxu0 %vm1293_vm1, %v2753_v5 }
 0x889   : > { %v2821_v9 = vpop.permute.xlu0 %2820 }
 0x88a   : > { %v2823_v10 = vpop.permute.xlu1 %2822 }
 0x88b   : > { %10600 = vmatmul.mubr.msk.bf16.vlgmr.msra.gmra.mrb[64].mxu1 %vm1293_vm1, %v2687_v57  ;;  %10606 = vmatpush3.bf16.xpose.msra.mxu0 %v2770_v7 }
 0x88c   : > { %10612 = vmatpush3.bf16.xpose.msra.mxu1 %v2835_v27  ;;  %10615 = vmatprep.mubr.msk.bf16.mxu1 %vm1293_vm1, %v2821_v9 }
 0x88d   : > { %11054 = vmatprep.subr.msk.bf16.mxu1 %vm1293_vm1, %v2827_v21  ;;  %v3041_v18 = vpop.permute.xlu0 %3040 }
 0x88e   : > { %v3103_v41 = vpop.permute.xlu1 %3102  ;;  %10619 = vmatprep.subr.bf16.mxu0 %v3041_v18 }
 0x892   : > { %v3043_v34 = vpop.permute.xlu1 %3042  ;;  %10608 = vmatmul.mubr.msk.bf16.vlgmr.msra.gmra.mrb[52].mxu0 %vm1293_vm1, %v2755_v56 }
 0x893   : > { %10620 = vmatpush3.bf16.msra.mxu0 %v3041_v18  ;;  %v3052_v1 = vsel %vm1713_vm2, %v3043_v34, 0 }
 0x894   : > { %10614 = vmatpush3.bf16.xpose.msra.mxu1 %v2838_v13  ;;  %11055 = vmatprep.subr.msk.bf16.mxu0 %vm1713_vm2, %v3043_v34 }
 0x895   : > { %10627 = vmatprep.subr.bf16.mxu1 %v3103_v41 }
 0x896   : > { %v3105_v40 = vpop.permute.xlu1 %3104 }
 0x897   : > { %10622 = vmatpush3.bf16.msra.mxu0 %v3052_v1  ;;  %v3114_v30 = vsel %vm1713_vm2, %v3105_v40, 0 }
 0x89b   : > { %10616 = vmatmul.mubr.msk.bf16.vlgmr.msra.gmra.mrb[68].mxu1 %vm1293_vm1, %v2823_v10 }
 0x89c   : > { %10628 = vmatpush3.bf16.msra.mxu1 %v3103_v41 }
 0x89d   : > { %11056 = vmatprep.subr.msk.bf16.mxu1 %vm1713_vm2, %v3105_v40 }
 0x8a0   : > { %10630 = vmatpush3.bf16.msra.mxu1 %v3114_v30 }
 0x8ff   : > { %v13146_v42 = vpop.f32.mrb[40].mxu0 }
 0x900   : > { %v13148_v58 = vpop.f32.mrb[41].mxu0 }
 0x901   : > { %v10562_v39 = vpop.f32.mrb[42].mxu0 }
 0x902   : > { %v13150_v19 = vpop.f32.mrb[43].mxu0 }
 0x918   : > { %v13154_v25 = vpop.f32.mrb[56].mxu1 }
 0x919   : > { %v13156_v4 = vpop.f32.mrb[57].mxu1 }
 0x91a   : > { %v10570_v11 = vpop.f32.mrb[58].mxu1 }
 0x91b   : > { %v13160_v35 = vpop.f32.mrb[59].mxu1 }
 0x945   : > { %v13164_v33 = vpop.f32.mrb[44].mxu0 }
 0x946   : > { %v13166_v21 = vpop.f32.mrb[45].mxu0 }
 0x947   : > { %v10578_v22 = vpop.f32.mrb[46].mxu0 }
 0x948   : > { %v13168_v38 = vpop.f32.mrb[47].mxu0 }
 0x94e   : > { %v13172_v56 = vpop.f32.mrb[60].mxu1 }
 0x94f   : > { %v13174_v9 = vpop.f32.mrb[61].mxu1 }
 0x950   : > { %v10586_v7 = vpop.f32.mrb[62].mxu1 }
 0x951   : > { %v13178_v27 = vpop.f32.mrb[63].mxu1 }
 0x955   : > { %v10593_v41 = vpop.f32.mrb[48].mxu0 }
 0x956   : > { %v2890_v34 = vsel %vm663_vm3, %v10593_v41, -1e+30  ;;  %v2670_v13 = vpop.f32.mrb[49].mxu0 }
 0x957   : > { %v2906_v1 = vsel %vm1566_vm4, %v2890_v34, -inf  ;;  %v10594_v40 = vpop.f32.mrb[50].mxu0  ;;  %v2888_v30 = vsel %vm663_vm3, %v2670_v13, -1e+30 }
 0x958   : > { %2907 = vmax.xlane.f32.xlu0 %v2906_v1  ;;  %v2673_v39 = vpop.f32.mrb[51].mxu0  ;;  %v2900_v7 = vsel %vm1566_vm4, %v2888_v30, -inf }
 0x959   : > { %v2889_v11 = vsel %vm663_vm3, %v2673_v39, -1e+30 }
 0x95a   : > { %v2903_v22 = vsel %vm1566_vm4, %v2889_v11, -inf }
 0x95b   : > { %2904 = vmax.xlane.f32.xlu1 %v2903_v22 }
 0x95c   : > { %2901 = vmax.xlane.f32.xlu0 %v2900_v7 }
 0x95e   : > { %v10601_v18 = vpop.f32.mrb[64].mxu1 }
 0x95f   : > { %v2893_v41 = vsel %vm663_vm3, %v10601_v18, -1e+30  ;;  %v2738_v10 = vpop.f32.mrb[65].mxu1 }
 0x960   : > { %v2915_v40 = vsel %vm1566_vm4, %v2893_v41, -inf  ;;  %v10602_v5 = vpop.f32.mrb[66].mxu1  ;;  %v2891_v22 = vsel %vm663_vm3, %v2738_v10, -1e+30 }
 0x961   : > { %v2741_v13 = vpop.f32.mrb[67].mxu1  ;;  %2916 = vmax.xlane.f32.xlu1 %v2915_v40  ;;  %v2909_v40 = vsel %vm1566_vm4, %v2891_v22, -inf }
 0x962   : > { %v2892_v14 = vsel %vm663_vm3, %v2741_v13, -1e+30 }
 0x965   : > { %v10609_v1 = vpop.f32.mrb[52].mxu0 }
 0x966   : > { %v2896_v39 = vsel %vm663_vm3, %v10609_v1, -1e+30  ;;  %v2806_v57 = vpop.f32.mrb[53].mxu0 }
 0x967   : > { %v2924_v54 = vsel %vm1566_vm4, %v2896_v39, -inf  ;;  %v10610_v44 = vpop.f32.mrb[54].mxu0  ;;  %v2894_v1 = vsel %vm663_vm3, %v2806_v57, -1e+30 }
 0x968   : > { %2925 = vmax.xlane.f32.xlu0 %v2924_v54  ;;  %v2809_v7 = vpop.f32.mrb[55].mxu0  ;;  %v2918_v17 = vsel %vm1566_vm4, %v2894_v1, -inf }
 0x969   : > { %v13201_v18 = vsel %vm663_vm3, %v2809_v7, -1e+30 }
 0x96a   : > { %v2921_v5 = vsel %vm1566_vm4, %v13201_v18, -inf }
 0x96b   : > { %2922 = vmax.xlane.f32.xlu1 %v2921_v5 }
 0x96c   : > { %2910 = vmax.xlane.f32.xlu0 %v2909_v40  ;;  %v2912_v40 = vsel %vm1566_vm4, %v2892_v14, -inf }
 0x96e   : > { %v10617_v44 = vpop.f32.mrb[68].mxu1 }
 0x96f   : > { %v13210_v10 = vsel %vm663_vm3, %v10617_v44, -1e+30  ;;  %v2874_v54 = vpop.f32.mrb[69].mxu1 }
 0x970   : > { %v2933_v7 = vsel %vm1566_vm4, %v13210_v10, -inf  ;;  %v10618_v6 = vpop.f32.mrb[70].mxu1  ;;  %v13219_v5 = vsel %vm663_vm3, %v2874_v54, -1e+30  ;;  %2919 = vmax.xlane.f32.xlu0 %v2918_v17 }
 0x971   : > { %2934 = vmax.xlane.f32.xlu1 %v2933_v7  ;;  %v2877_v57 = vpop.f32.mrb[71].mxu1  ;;  %v2927_v44 = vsel %vm1566_vm4, %v13219_v5, -inf }
 0x972   : > { %v13226_v0 = vsel %vm663_vm3, %v2877_v57, -1e+30 }
 0x973   : > { %v2930_v6 = vsel %vm1566_vm4, %v13226_v0, -inf }
 0x974   : > { %2913 = vmax.xlane.f32.xlu0 %v2912_v40 }
 0x975   : > { %2928 = vmax.xlane.f32.xlu1 %v2927_v44 }
 0x978   : > { %2931 = vmax.xlane.f32.xlu0 %v2930_v6 }
 0x986   : > { %3226 = vrot.lane.b32.xlu1 %v12644_v31, %s16126_s2 }
 0x98e   : > { %3164 = vrot.lane.b32.xlu0 %v12624_v48, %s16126_s2 }
 0x9e5   : > { %v2908_v17 = vpop.xlane.xlu0 %2907 }
 0x9e6   : > { %v2938_v13 = vsub.f32 %v2890_v34, %v2908_v17 }
 0x9e8   : > { %v2952_v54 = vmul.f32 1.442695, %v2938_v13  ;;  %v2905_v7 = vpop.xlane.xlu1 %2904 }
 0x9e9   : > { %v2937_v55 = vsub.f32 %v2889_v11, %v2905_v7  ;;  %v2902_v52 = vpop.xlane.xlu0 %2901 }
 0x9ea   : > { %11572 = vpow2.f32 %v2952_v54  ;;  %v2936_v57 = vsub.f32 %v2888_v30, %v2902_v52 }
 0x9eb   : > { %v2950_v40 = vmul.f32 1.442695, %v2937_v55 }
 0x9ec   : > { %v2948_v44 = vmul.f32 1.442695, %v2936_v57 }
 0x9ed   : > { %11574 = vpow2.f32 %v2950_v40 }
 0x9ee   : > { %v2917_v61 = vpop.xlane.xlu1 %2916  ;;  %11576 = vpow2.f32 %v2948_v44 }
 0x9ef   : > { %v2941_v6 = vsub.f32 %v2893_v41, %v2917_v61 }
 0x9f1   : > { %v2958_v50 = vmul.f32 1.442695, %v2941_v6 }
 0x9f3   : > { %11578 = vpow2.f32 %v2958_v50 }
 0x9f4   : > { %v13234_v37 = vpop.eup %11572 }
 0x9f5   : > { %v2926_v43 = vpop.xlane.xlu0 %2925  ;;  %v2978_v34 = vsel %vm1566_vm4, %v13234_v37, 0.0 }
 0x9f6   : > { %v2944_v17 = vsub.f32 %v2896_v39, %v2926_v43  ;;  %2979 = vadd.xlane.f32.xlu0 %v2978_v34 }
 0x9f7   : > { %v13238_v11 = vpop.eup %11574 }
 0x9f8   : > { %v13240_v13 = vpop.eup %11576  ;;  %v2964_v52 = vmul.f32 1.442695, %v2944_v17  ;;  %v2923_v55 = vpop.xlane.xlu1 %2922  ;;  %v2975_v30 = vsel %vm1566_vm4, %v13238_v11, 0.0 }
 0x9f9   : > { %2976 = vadd.xlane.f32.xlu1 %v2975_v30  ;;  %v2911_v61 = vpop.xlane.xlu0 %2910  ;;  %v2972_v50 = vsel %vm1566_vm4, %v13240_v13, 0.0 }
 0x9fa   : > { %11580 = vpow2.f32 %v2964_v52  ;;  %v2939_v41 = vsub.f32 %v2891_v22, %v2911_v61  ;;  %2973 = vadd.xlane.f32.xlu0 %v2972_v50 }
 0x9fc   : > { %v2954_v43 = vmul.f32 1.442695, %v2939_v41 }
 0x9fd   : > { %v13246_v54 = vpop.eup %11578  ;;  %v2920_v7 = vpop.xlane.xlu0 %2919 }
 0x9fe   : > { %v2935_v39 = vpop.xlane.xlu1 %2934  ;;  %v2987_v57 = vsel %vm1566_vm4, %v13246_v54, 0.0  ;;  %11582 = vpow2.f32 %v2954_v43  ;;  %v2942_v40 = vsub.f32 %v2894_v1, %v2920_v7 }
 0x9ff   : > { %2988 = vadd.xlane.f32.xlu1 %v2987_v57 }
 0xa00   : > { %v2960_v44 = vmul.f32 1.442695, %v2942_v40 }
 0xa01   : > { %v2914_v34 = vpop.xlane.xlu0 %2913 }
 0xa02   : > { %v2929_v6 = vpop.xlane.xlu1 %2928  ;;  %v2940_v17 = vsub.f32 %v2892_v14, %v2914_v34  ;;  %11584 = vpow2.f32 %v2960_v44  ;;  %v2943_v44 = vsub.f32 %v13201_v18, %v2923_v55 }
 0xa04   : > { %v13250_v30 = vpop.eup %11580  ;;  %v2956_v22 = vmul.f32 1.442695, %v2940_v17  ;;  %v2962_v34 = vmul.f32 1.442695, %v2943_v44  ;;  %v2947_v17 = vsub.f32 %v13210_v10, %v2935_v39 }
 0xa05   : > { %v2932_v61 = vpop.xlane.xlu0 %2931  ;;  %v2996_v50 = vsel %vm1566_vm4, %v13250_v30, 0.0 }
 0xa06   : > { %v13252_v52 = vpop.permute.xlu1 %3226  ;;  %2997 = vadd.xlane.f32.xlu0 %v2996_v50  ;;  %11586 = vpow2.f32 %v2956_v22  ;;  %v2970_v22 = vmul.f32 1.442695, %v2947_v17  ;;  %v2945_v50 = vsub.f32 %v13219_v5, %v2929_v6 }
 0xa07   : > { %10643 = vmatprep.subr.bf16.mxu1 %v13252_v52  ;;  %11588 = vpow2.f32 %v2962_v34 }
 0xa08   : > { %v13257_v1 = vpop.eup %11582  ;;  %11590 = vpow2.f32 %v2970_v22 }
 0xa09   : > { %v13259_v41 = vpop.permute.xlu0 %3164  ;;  %v2981_v14 = vsel %vm1566_vm4, %v13257_v1, 0.0 }
 0xa0a   : > { %2982 = vadd.xlane.f32.xlu1 %v2981_v14  ;;  %10635 = vmatprep.subr.bf16.mxu0 %v13259_v41  ;;  %v2946_v14 = vsub.f32 %v13226_v0, %v2932_v61 }
 0xa0c   : > { %v13264_v43 = vpop.eup %11584 }
 0xa0d   : > { %v2990_v7 = vsel %vm1566_vm4, %v13264_v43, 0.0 }
 0xa0e   : > { %2991 = vadd.xlane.f32.xlu0 %v2990_v7  ;;  %v2966_v7 = vmul.f32 1.442695, %v2945_v50 }
 0xa10   : > { %v13268_v57 = vpop.eup %11586  ;;  %11592 = vpow2.f32 %v2966_v7 }
 0xa11   : > { %v2984_v40 = vsel %vm1566_vm4, %v13268_v57, 0.0  ;;  %v13280_v15 = vpop.eup %11588 }
 0xa12   : > { %2985 = vadd.xlane.f32.xlu0 %v2984_v40  ;;  %v2968_v40 = vmul.f32 1.442695, %v2946_v14  ;;  %v2993_v18 = vsel %vm1566_vm4, %v13280_v15, 0.0  ;;  %v13284_v55 = vpop.eup %11590 }
 0xa13   : > { %v3005_v10 = vsel %vm1566_vm4, %v13284_v55, 0.0 }
 0xa14   : > { %11594 = vpow2.f32 %v2968_v40 }
 0xa1a   : > { %v13288_v39 = vpop.eup %11592 }
 0xa1b   : > { %3228 = vrot.lane.b32.xlu1 %v12868_v29, %s16126_s2  ;;  %v2999_v5 = vsel %vm1566_vm4, %v13288_v39, 0.0 }
 0xa1e   : > { %v13290_v0 = vpop.eup %11594 }
 0xa1f   : > { %v3002_v6 = vsel %vm1566_vm4, %v13290_v0, 0.0 }
 0xa28   : > { %3166 = vrot.lane.b32.xlu0 %v12854_v26, %s16126_s2  ;;  %s16130_s2 = smov 80  }
 0xa3f   : > { %2994 = vadd.xlane.f32.xlu1 %v2993_v18 }
 0xa43   : > { %3006 = vadd.xlane.f32.xlu1 %v3005_v10 }
 0xa47   : > { %3000 = vadd.xlane.f32.xlu1 %v2999_v5  ;;  %3003 = vadd.xlane.f32.xlu0 %v3002_v6 }
 0xa58   : > { %3360 = vrot.lane.b32.xlu1 %v12604_v16, %s16138_s22 }
 0xa5c   : > { %3362 = vrot.lane.b32.xlu1 %v12614_v49, %s16138_s22 }
 0xa5d   : > { %3292 = vrot.lane.b32.xlu0 %v12578_v62, %s16138_s22 }
 0xa60   : > { %3290 = vrot.lane.b32.xlu1 %v12590_v28, %s16130_s2 }
 0xa61   : > { %3294 = vrot.lane.b32.xlu0 %v12590_v28, %s16138_s22 }
 0xa64   : > { %3356 = vrot.lane.b32.xlu1 %v12604_v16, %s16130_s2 }
 0xa65   : > { %3288 = vrot.lane.b32.xlu0 %v12578_v62, %s16130_s2 }
 0xa68   : > { %3430 = vrot.lane.b32.xlu1 %v12633_v8, %s16138_s22 }
 0xa69   : > { %3428 = vrot.lane.b32.xlu0 %v12622_v60, %s16138_s22 }
 0xa6c   : > { %3426 = vrot.lane.b32.xlu1 %v12633_v8, %s16130_s2 }
 0xa6d   : > { %3358 = vrot.lane.b32.xlu0 %v12614_v49, %s16130_s2 }
 0xa70   : > { %3498 = vrot.lane.b32.xlu1 %v12649_v36, %s16138_s22 }
 0xa71   : > { %3424 = vrot.lane.b32.xlu0 %v12622_v60, %s16130_s2 }
 0xa74   : > { %3494 = vrot.lane.b32.xlu1 %v12649_v36, %s16130_s2 }
 0xa75   : > { %3496 = vrot.lane.b32.xlu0 %v12641_v3, %s16138_s22 }
 0xa79   : > { %3492 = vrot.lane.b32.xlu0 %v12641_v3, %s16130_s2 }
 0xa83   : > { %v2980_v62 = vpop.xlane.xlu0 %2979 }
 0xa84   : > { %11596 = vrcp.f32 %v2980_v62 }
 0xa86   : > { %v2977_v28 = vpop.xlane.xlu1 %2976 }
 0xa87   : > { %11598 = vrcp.f32 %v2977_v28  ;;  %v2974_v16 = vpop.xlane.xlu0 %2973 }
 0xa88   : > { %11600 = vrcp.f32 %v2974_v16 }
 0xa8c   : > { %v2989_v3 = vpop.xlane.xlu1 %2988 }
 0xa8d   : > { %11602 = vrcp.f32 %v2989_v3 }
 0xa8e   : > { %v11597_v49 = vpop.eup %11596 }
 0xa8f   : > { %v3022_v44 = vmul.f32 %v11597_v49, %v13234_v37 }
 0xa91   : > { %v11599_v8 = vpop.eup %11598  ;;  %v3033_v17 = vpack.c.bf16 %v3022_v44, %v3022_v44 }
 0xa92   : > { %v11601_v61 = vpop.eup %11600  ;;  %v3021_v60 = vmul.f32 %v11599_v8, %v13238_v11 }
 0xa93   : > { %v3020_v36 = vmul.f32 %v11601_v61, %v13240_v13  ;;  %v2998_v22 = vpop.xlane.xlu0 %2997 }
 0xa95   : > { %v3032_v34 = vpack.c.bf16 %v3021_v60, %v3020_v36 }
 0xa97   : > { %10623 = vmatprep.mubr.msk.bf16.mxu0 %vm1566_vm4, %v3032_v34  ;;  %v2983_v50 = vpop.xlane.xlu1 %2982  ;;  %v11603_v13 = vpop.eup %11602 }
 0xa98   : > { %10624 = vmatmul.mubr.msk.bf16.vlgmr.msra.gmra.mrb[56].mxu0 %vm1566_vm4, %v3033_v17  ;;  %11604 = vrcp.f32 %v2983_v50  ;;  %v3025_v10 = vmul.f32 %v11603_v13, %v13246_v54 }
 0xa99   : > { %10636 = vmatpush3.bf16.msra.mxu0 %v13259_v41 }
 0xa9a   : > { %v3035_v62 = vpack.c.bf16 %v3025_v10, %v3025_v10 }
 0xa9b   : > { %v2992_v14 = vpop.xlane.xlu0 %2991  ;;  %v3229_v28 = vpop.permute.xlu1 %3228 }
 0xa9c   : > { %v3238_v16 = vsel %vm1713_vm2, %v3229_v28, 0 }
 0xa9f   : > { %v2986_v7 = vpop.xlane.xlu0 %2985 }
 0xaa0   : > { %11606 = vrcp.f32 %v2986_v7 }
 0xaa1   : > { %11608 = vrcp.f32 %v2998_v22 }
 0xaa2   : > { %v11605_v40 = vpop.eup %11604  ;;  %11610 = vrcp.f32 %v2992_v14 }
 0xaa3   : > { %v3167_v11 = vpop.permute.xlu0 %3166  ;;  %v3023_v5 = vmul.f32 %v11605_v40, %v13257_v1 }
 0xaa4   : > { %11057 = vmatprep.subr.msk.bf16.mxu0 %vm1713_vm2, %v3167_v11  ;;  %v3176_v37 = vsel %vm1713_vm2, %v3167_v11, 0 }
 0xaa5   : > { %10638 = vmatpush3.bf16.msra.mxu0 %v3176_v37 }
 0xaaa   : > { %v11607_v18 = vpop.eup %11606 }
 0xaab   : > { %v3024_v41 = vmul.f32 %v11607_v18, %v13268_v57  ;;  %v11609_v57 = vpop.eup %11608 }
 0xaac   : > { %v11611_v8 = vpop.eup %11610 }
 0xaad   : > { %v3034_v6 = vpack.c.bf16 %v3024_v41, %v3023_v5  ;;  %v3026_v36 = vmul.f32 %v11611_v8, %v13264_v43 }
 0xaaf   : > { %10631 = vmatprep.mubr.msk.bf16.mxu1 %vm1566_vm4, %v3034_v6 }
 0xab0   : > { %10632 = vmatmul.mubr.msk.bf16.vlgmr.msra.gmra.mrb[72].mxu1 %vm1566_vm4, %v3035_v62 }
 0xab1   : > { %10644 = vmatpush3.bf16.msra.mxu1 %v13252_v52  ;;  %v3028_v52 = vmul.f32 %v11609_v57, %v13250_v30 }
 0xab2   : > { %11058 = vmatprep.subr.msk.bf16.mxu1 %vm1713_vm2, %v3229_v28 }
 0xab3   : > { %v3037_v22 = vpack.c.bf16 %v3028_v52, %v3028_v52 }
 0xab5   : > { %10646 = vmatpush3.bf16.msra.mxu1 %v3238_v16 }
 0xacc   : > { %v2995_v54 = vpop.xlane.xlu1 %2994 }
 0xacd   : > { %11612 = vrcp.f32 %v2995_v54 }
 0xad0   : > { %v3007_v1 = vpop.xlane.xlu1 %3006 }
 0xad1   : > { %11614 = vrcp.f32 %v3007_v1 }
 0xad4   : > { %v3001_v49 = vpop.xlane.xlu1 %3000  ;;  %v3004_v61 = vpop.xlane.xlu0 %3003 }
 0xad5   : > { %11616 = vrcp.f32 %v3001_v49 }
 0xad6   : > { %11618 = vrcp.f32 %v3004_v61 }
 0xad7   : > { %v11613_v60 = vpop.eup %11612 }
 0xad8   : > { %v3361_v44 = vpop.permute.xlu1 %3360  ;;  %v3027_v34 = vmul.f32 %v11613_v60, %v13280_v15  ;;  %v3293_v17 = vpop.permute.xlu0 %3292 }
 0xad9   : > { %11061 = vmatprep.subr.msk.bf16.mxu1 %vm1293_vm1, %v3361_v44  ;;  %11059 = vmatprep.subr.msk.bf16.mxu0 %vm1293_vm1, %v3293_v17  ;;  %v3303_v30 = vsel %vm1293_vm1, %v3293_v17, 0 }
 0xada   : > { %v3036_v3 = vpack.c.bf16 %v3027_v34, %v3026_v36 }
 0xadb   : > { %v11615_v14 = vpop.eup %11614 }
 0xadc   : > { %v3363_v50 = vpop.permute.xlu1 %3362  ;;  %10639 = vmatprep.mubr.msk.bf16.mxu0 %vm1566_vm4, %v3036_v3  ;;  %v3295_v7 = vpop.permute.xlu0 %3294  ;;  %v3031_v13 = vmul.f32 %v11615_v14, %v13284_v55 }
 0xadd   : > { %10640 = vmatmul.mubr.msk.bf16.vlgmr.msra.gmra.mrb[60].mxu0 %vm1566_vm4, %v3037_v22  ;;  %v3306_v62 = vsel %vm1293_vm1, %v3295_v7, 0  ;;  %v3374_v54 = vsel %vm1293_vm1, %v3363_v50, 0 }
 0xade   : > { %10652 = vmatpush3.bf16.xpose.msra.mxu0 %v3303_v30  ;;  %v3039_v41 = vpack.c.bf16 %v3031_v13, %v3031_v13 }
 0xadf   : > { %v11617_v43 = vpop.eup %11616  ;;  %11060 = vmatprep.subr.msk.bf16.mxu0 %vm1293_vm1, %v3295_v7 }
 0xae0   : > { %v11619_v15 = vpop.eup %11618  ;;  %v3291_v11 = vpop.permute.xlu1 %3290  ;;  %v3029_v37 = vmul.f32 %v11617_v43, %v13288_v39  ;;  %v3371_v39 = vsel %vm1293_vm1, %v3361_v44, 0 }
 0xae1   : > { %v3289_v40 = vpop.permute.xlu0 %3288  ;;  %v3030_v18 = vmul.f32 %v11619_v15, %v13290_v0 }
 0xae2   : > { %10655 = vmatprep.mubr.msk.bf16.mxu0 %vm1293_vm1, %v3289_v40 }
 0xae3   : > { %v3038_v10 = vpack.c.bf16 %v3030_v18, %v3029_v37 }
 0xae4   : > { %v3357_v5 = vpop.permute.xlu1 %3356 }
 0xae5   : > { %10647 = vmatprep.mubr.msk.bf16.mxu1 %vm1566_vm4, %v3038_v10  ;;  %v3429_v6 = vpop.permute.xlu0 %3428 }
 0xae6   : > { %10648 = vmatmul.mubr.msk.bf16.vlgmr.msra.gmra.mrb[76].mxu1 %vm1566_vm4, %v3039_v41  ;;  %10654 = vmatpush3.bf16.xpose.msra.mxu0 %v3306_v62  ;;  %v3439_v16 = vsel %vm1293_vm1, %v3429_v6, 0 }
 0xae7   : > { %10660 = vmatpush3.bf16.xpose.msra.mxu1 %v3371_v39  ;;  %10663 = vmatprep.mubr.msk.bf16.mxu1 %vm1293_vm1, %v3357_v5 }
 0xae8   : > { %11062 = vmatprep.subr.msk.bf16.mxu1 %vm1293_vm1, %v3363_v50  ;;  %11063 = vmatprep.subr.msk.bf16.mxu0 %vm1293_vm1, %v3429_v6  ;;  %v3431_v0 = vpop.permute.xlu1 %3430 }
 0xae9   : > { %v3359_v55 = vpop.permute.xlu0 %3358  ;;  %v3442_v8 = vsel %vm1293_vm1, %v3431_v0, 0 }
 0xaec   : > { %v3427_v1 = vpop.permute.xlu1 %3426 }
 0xaed   : > { %10656 = vmatmul.mubr.msk.bf16.vlgmr.msra.gmra.mrb[64].mxu0 %vm1293_vm1, %v3291_v11  ;;  %v3425_v28 = vpop.permute.xlu0 %3424 }
 0xaee   : > { %10668 = vmatpush3.bf16.xpose.msra.mxu0 %v3439_v16  ;;  %10671 = vmatprep.mubr.msk.bf16.mxu0 %vm1293_vm1, %v3425_v28 }
 0xaef   : > { %10662 = vmatpush3.bf16.xpose.msra.mxu1 %v3374_v54  ;;  %11064 = vmatprep.subr.msk.bf16.mxu0 %vm1293_vm1, %v3431_v0 }
 0xaf0   : > { %v3499_v60 = vpop.permute.xlu1 %3498 }
 0xaf1   : > { %v3497_v57 = vpop.permute.xlu0 %3496  ;;  %v3510_v52 = vsel %vm1293_vm1, %v3499_v60, 0 }
 0xaf2   : > { %11065 = vmatprep.subr.msk.bf16.mxu1 %vm1293_vm1, %v3497_v57  ;;  %v3507_v61 = vsel %vm1293_vm1, %v3497_v57, 0 }
 0xaf4   : > { %v3495_v44 = vpop.permute.xlu1 %3494 }
 0xaf5   : > { %v3493_v49 = vpop.permute.xlu0 %3492 }
 0xaf6   : > { %10664 = vmatmul.mubr.msk.bf16.vlgmr.msra.gmra.mrb[80].mxu1 %vm1293_vm1, %v3359_v55  ;;  %10670 = vmatpush3.bf16.xpose.msra.mxu0 %v3442_v8 }
 0xaf7   : > { %10676 = vmatpush3.bf16.xpose.msra.mxu1 %v3507_v61  ;;  %10679 = vmatprep.mubr.msk.bf16.mxu1 %vm1293_vm1, %v3493_v49 }
 0xaf8   : > { %11066 = vmatprep.subr.msk.bf16.mxu1 %vm1293_vm1, %v3499_v60 }
 0xafd   : > { %10672 = vmatmul.mubr.msk.bf16.vlgmr.msra.gmra.mrb[68].mxu0 %vm1293_vm1, %v3427_v1 }
 0xaff   : > { %10678 = vmatpush3.bf16.xpose.msra.mxu1 %v3510_v52 }
 0xb06   : > { %10680 = vmatmul.mubr.msk.bf16.vlgmr.msra.gmra.mrb[84].mxu1 %vm1293_vm1, %v3495_v44 }
 0xb6b   : > { %v13378_v36 = vpop.f32.mrb[56].mxu0 }
 0xb6c   : > { %v13380_v34 = vpop.f32.mrb[57].mxu0 }
 0xb6d   : > { %v10626_v17 = vpop.f32.mrb[58].mxu0 }
 0xb6e   : > { %v13382_v3 = vpop.f32.mrb[59].mxu0 }
 0xb83   : > { %v13386_v50 = vpop.f32.mrb[72].mxu1 }
 0xb84   : > { %v13388_v14 = vpop.f32.mrb[73].mxu1 }
 0xb85   : > { %v10634_v30 = vpop.f32.mrb[74].mxu1 }
 0xb86   : > { %v13392_v43 = vpop.f32.mrb[75].mxu1 }
 0xbb0   : > { %v13396_v11 = vpop.f32.mrb[60].mxu0 }
 0xbb1   : > { %v13398_v37 = vpop.f32.mrb[61].mxu0 }
 0xbb2   : > { %v10642_v13 = vpop.f32.mrb[62].mxu0 }
 0xbb3   : > { %v13400_v40 = vpop.f32.mrb[63].mxu0 }
 0xbb9   : > { %v13404_v10 = vpop.f32.mrb[76].mxu1 }
 0xbba   : > { %v13406_v5 = vpop.f32.mrb[77].mxu1 }
 0xbbb   : > { %v10650_v6 = vpop.f32.mrb[78].mxu1 }
 0xbbc   : > { %v13410_v62 = vpop.f32.mrb[79].mxu1 }
 0xbc0   : > { %v10657_v55 = vpop.f32.mrb[64].mxu0 }
 0xbc1   : > { %v3562_v0 = vsel %vm663_vm3, %v10657_v55, -1e+30  ;;  %v3342_v28 = vpop.f32.mrb[65].mxu0 }
 0xbc2   : > { %v3578_v16 = vsel %vm1566_vm4, %v3562_v0, -inf  ;;  %v10658_v54 = vpop.f32.mrb[66].mxu0  ;;  %v3560_v1 = vsel %vm663_vm3, %v3342_v28, -1e+30 }
 0xbc3   : > { %3579 = vmax.xlane.f32.xlu0 %v3578_v16  ;;  %v3345_v57 = vpop.f32.mrb[67].mxu0  ;;  %v3572_v61 = vsel %vm1566_vm4, %v3560_v1, -inf }
 0xbc4   : > { %v3561_v49 = vsel %vm663_vm3, %v3345_v57, -1e+30 }
 0xbc5   : > { %v3575_v8 = vsel %vm1566_vm4, %v3561_v49, -inf }
 0xbc6   : > { %3576 = vmax.xlane.f32.xlu1 %v3575_v8 }
 0xbc7   : > { %3573 = vmax.xlane.f32.xlu0 %v3572_v61 }
 0xbc9   : > { %v10665_v60 = vpop.f32.mrb[80].mxu1 }
 0xbca   : > { %v3565_v52 = vsel %vm663_vm3, %v10665_v60, -1e+30  ;;  %v3410_v44 = vpop.f32.mrb[81].mxu1 }
 0xbcb   : > { %v3587_v17 = vsel %vm1566_vm4, %v3565_v52, -inf  ;;  %v3563_v30 = vsel %vm663_vm3, %v3410_v44, -1e+30  ;;  %v10666_v13 = vpop.f32.mrb[82].mxu1 }
 0xbcc   : > { %v3581_v6 = vsel %vm1566_vm4, %v3563_v30, -inf  ;;  %3588 = vmax.xlane.f32.xlu1 %v3587_v17  ;;  %v3413_v55 = vpop.f32.mrb[83].mxu1 }
 0xbcd   : > { %v13431_v28 = vsel %vm663_vm3, %v3413_v55, -1e+30  ;;  %3582 = vmax.xlane.f32.xlu0 %v3581_v6 }
 0xbce   : > { %v3584_v16 = vsel %vm1566_vm4, %v13431_v28, -inf }
 0xbd0   : > { %v10673_v54 = vpop.f32.mrb[68].mxu0 }
 0xbd1   : > { %3585 = vmax.xlane.f32.xlu0 %v3584_v16  ;;  %v3478_v57 = vpop.f32.mrb[69].mxu0  ;;  %v13443_v17 = vsel %vm663_vm3, %v10673_v54, -1e+30 }
 0xbd2   : > { %v13437_v8 = vsel %vm663_vm3, %v3478_v57, -1e+30  ;;  %v10674_v61 = vpop.f32.mrb[70].mxu0  ;;  %v3596_v13 = vsel %vm1566_vm4, %v13443_v17, -inf }
 0xbd3   : > { %v3590_v60 = vsel %vm1566_vm4, %v13437_v8, -inf  ;;  %v3481_v44 = vpop.f32.mrb[71].mxu0 }
 0xbd4   : > { %v13459_v61 = vsel %vm663_vm3, %v3481_v44, -1e+30 }
 0xbd5   : > { %3591 = vmax.xlane.f32.xlu0 %v3590_v60  ;;  %v3593_v60 = vsel %vm1566_vm4, %v13459_v61, -inf }
 0xbd9   : > { %3597 = vmax.xlane.f32.xlu0 %v3596_v13  ;;  %v10681_v6 = vpop.f32.mrb[84].mxu1 }
 0xbda   : > { %v3546_v55 = vpop.f32.mrb[85].mxu1 }
 0xbdb   : > { %v10682_v16 = vpop.f32.mrb[86].mxu1  ;;  %v13471_v13 = vsel %vm663_vm3, %v3546_v55, -1e+30 }
 0xbdc   : > { %v3549_v39 = vpop.f32.mrb[87].mxu1 }
 0xbdd   : > { %v13449_v57 = vsel %vm663_vm3, %v3549_v39, -1e+30  ;;  %3712 = vrot.lane.b32.xlu1 %v12580_v20, %s16130_s2  ;;  %v13465_v39 = vsel %vm663_vm3, %v10681_v6, -1e+30 }
 0xbde   : > { %v3602_v54 = vsel %vm1566_vm4, %v13449_v57, -inf  ;;  %v3605_v20 = vsel %vm1566_vm4, %v13465_v39, -inf }
 0xbdf   : > { %3603 = vmax.xlane.f32.xlu0 %v3602_v54 }
 0xbf5   : > { %3774 = vrot.lane.b32.xlu0 %v12607_v45, %s16130_s2  ;;  %v3599_v45 = vsel %vm1566_vm4, %v13471_v13, -inf }
 0xc01   : > { %3594 = vmax.xlane.f32.xlu1 %v3593_v60 }
 0xc05   : > { %3606 = vmax.xlane.f32.xlu1 %v3605_v20 }
 0xc09   : > { %3600 = vmax.xlane.f32.xlu1 %v3599_v45 }
 0xc1a   : > { %3714 = vrot.lane.b32.xlu1 %v12592_v32, %s16130_s2 }
 0xc1e   : > { %3776 = vrot.lane.b32.xlu1 %v12686_v59, %s16130_s2 }
 0xc50   : > { %v3580_v44 = vpop.xlane.xlu0 %3579 }
 0xc51   : > { %v3610_v6 = vsub.f32 %v3562_v0, %v3580_v44 }
 0xc53   : > { %v3624_v16 = vmul.f32 1.442695, %v3610_v6  ;;  %v3577_v54 = vpop.xlane.xlu1 %3576 }
 0xc54   : > { %v3609_v60 = vsub.f32 %v3561_v49, %v3577_v54  ;;  %v3574_v41 = vpop.xlane.xlu0 %3573 }
 0xc55   : > { %11620 = vpow2.f32 %v3624_v16  ;;  %v3608_v55 = vsub.f32 %v3560_v1, %v3574_v41 }
 0xc56   : > { %v3622_v18 = vmul.f32 1.442695, %v3609_v60 }
 0xc57   : > { %v3620_v20 = vmul.f32 1.442695, %v3608_v55 }
 0xc58   : > { %11622 = vpow2.f32 %v3622_v18 }
 0xc59   : > { %11624 = vpow2.f32 %v3620_v20  ;;  %v3589_v15 = vpop.xlane.xlu1 %3588 }
 0xc5a   : > { %v3613_v45 = vsub.f32 %v3565_v52, %v3589_v15  ;;  %v3583_v7 = vpop.xlane.xlu0 %3582 }
 0xc5b   : > { %v3611_v22 = vsub.f32 %v3563_v30, %v3583_v7 }
 0xc5c   : > { %v3630_v32 = vmul.f32 1.442695, %v3613_v45 }
 0xc5d   : > { %v3626_v63 = vmul.f32 1.442695, %v3611_v22  ;;  %v3713_v51 = vpop.permute.xlu1 %3712 }
 0xc5e   : > { %11626 = vpow2.f32 %v3630_v32  ;;  %10683 = vmatprep.subr.bf16.mxu0 %v3713_v51  ;;  %v3586_v59 = vpop.xlane.xlu0 %3585 }
 0xc5f   : > { %v13479_v0 = vpop.eup %11620  ;;  %10684 = vmatpush3.bf16.msra.mxu0 %v3713_v51  ;;  %11628 = vpow2.f32 %v3626_v63  ;;  %v3612_v30 = vsub.f32 %v13431_v28, %v3586_v59 }
 0xc60   : > { %v3650_v41 = vsel %vm1566_vm4, %v13479_v0, 0.0 }
 0xc61   : > { %3651 = vadd.xlane.f32.xlu0 %v3650_v41  ;;  %v3628_v55 = vmul.f32 1.442695, %v3612_v30 }
 0xc62   : > { %v13483_v18 = vpop.eup %11622  ;;  %v3592_v1 = vpop.xlane.xlu0 %3591 }
 0xc63   : > { %v13485_v15 = vpop.eup %11624  ;;  %v3647_v22 = vsel %vm1566_vm4, %v13483_v18, 0.0  ;;  %v3614_v49 = vsub.f32 %v13437_v8, %v3592_v1 }
 0xc64   : > { %3648 = vadd.xlane.f32.xlu1 %v3647_v22  ;;  %v3644_v7 = vsel %vm1566_vm4, %v13485_v15, 0.0 }
 0xc65   : > { %3645 = vadd.xlane.f32.xlu0 %v3644_v7  ;;  %v3632_v44 = vmul.f32 1.442695, %v3614_v49 }
 0xc66   : > { %v3598_v63 = vpop.xlane.xlu0 %3597 }
 0xc67   : > { %v3616_v51 = vsub.f32 %v13443_v17, %v3598_v63 }
 0xc68   : > { %v13493_v52 = vpop.eup %11626 }
 0xc69   : > { %v3636_v6 = vmul.f32 1.442695, %v3616_v51  ;;  %v3659_v16 = vsel %vm1566_vm4, %v13493_v52, 0.0  ;;  %v13498_v54 = vpop.eup %11628 }
 0xc6a   : > { %3660 = vadd.xlane.f32.xlu1 %v3659_v16  ;;  %v3653_v8 = vsel %vm1566_vm4, %v13498_v54, 0.0 }
 0xc6b   : > { %11630 = vpow2.f32 %v3636_v6 }
 0xc6c   : > { %v3604_v60 = vpop.xlane.xlu0 %3603  ;;  %11632 = vpow2.f32 %v3632_v44 }
 0xc6d   : > { %11634 = vpow2.f32 %v3628_v55  ;;  %v3618_v7 = vsub.f32 %v13449_v57, %v3604_v60 }
 0xc6e   : > { %3654 = vadd.xlane.f32.xlu1 %v3653_v8 }
 0xc6f   : > { %v3640_v30 = vmul.f32 1.442695, %v3618_v7  ;;  %v16207_v7 = vpack.i.bf16 %v13150_v19, %v13148_v58 }
 0xc70   : > { %v3775_v17 = vpop.permute.xlu0 %3774 }
 0xc71   : > { %10691 = vmatprep.subr.bf16.mxu1 %v3775_v17 }
 0xc72   : > { %10692 = vmatpush3.bf16.msra.mxu1 %v3775_v17 }
 0xc75   : > { %v13502_v28 = vpop.eup %11630 }
 0xc76   : > { %v3668_v20 = vsel %vm1566_vm4, %v13502_v28, 0.0  ;;  %v13506_v45 = vpop.eup %11632 }
 0xc77   : > { %3669 = vadd.xlane.f32.xlu0 %v3668_v20  ;;  %v3662_v32 = vsel %vm1566_vm4, %v13506_v45, 0.0  ;;  %v13510_v59 = vpop.eup %11634 }
 0xc78   : > { %v3656_v41 = vsel %vm1566_vm4, %v13510_v59, 0.0 }
 0xc7b   : > { %3663 = vadd.xlane.f32.xlu0 %v3662_v32 }
 0xc7f   : > { %3657 = vadd.xlane.f32.xlu0 %v3656_v41 }
 0xc8e   : > { %v3595_v1 = vpop.xlane.xlu1 %3594 }
 0xc8f   : > { %v3615_v22 = vsub.f32 %v13459_v61, %v3595_v1 }
 0xc91   : > { %v3634_v49 = vmul.f32 1.442695, %v3615_v22 }
 0xc92   : > { %v3607_v63 = vpop.xlane.xlu1 %3606 }
 0xc93   : > { %11636 = vpow2.f32 %v3634_v49  ;;  %v3619_v51 = vsub.f32 %v13465_v39, %v3607_v63  ;;  %v16208_v49 = vpack.i.bf16 %v13156_v4, %v13146_v42 }
 0xc95   : > { %v3642_v44 = vmul.f32 1.442695, %v3619_v51 }
 0xc96   : > { %v3601_v6 = vpop.xlane.xlu1 %3600 }
 0xc97   : > { %11638 = vpow2.f32 %v3642_v44  ;;  %v3617_v16 = vsub.f32 %v13471_v13, %v3601_v6 }
 0xc98   : > { %11640 = vpow2.f32 %v3640_v30 }
 0xc99   : > { %v3638_v55 = vmul.f32 1.442695, %v3617_v16 }
 0xc9a   : > { %v3715_v8 = vpop.permute.xlu1 %3714 }
 0xc9b   : > { %11642 = vpow2.f32 %v3638_v55  ;;  %11067 = vmatprep.subr.msk.bf16.mxu0 %vm1713_vm2, %v3715_v8  ;;  %v3724_v61 = vsel %vm1713_vm2, %v3715_v8, 0 }
 0xc9c   : > { %10686 = vmatpush3.bf16.msra.mxu0 %v3724_v61 }
 0xc9d   : > { %v13520_v57 = vpop.eup %11636 }
 0xc9e   : > { %v3777_v60 = vpop.permute.xlu1 %3776  ;;  %v3665_v39 = vsel %vm1566_vm4, %v13520_v57, 0.0 }
 0xc9f   : > { %3666 = vadd.xlane.f32.xlu1 %v3665_v39  ;;  %11068 = vmatprep.subr.msk.bf16.mxu1 %vm1713_vm2, %v3777_v60  ;;  %v3786_v13 = vsel %vm1713_vm2, %v3777_v60, 0 }
 0xca0   : > { %10694 = vmatpush3.bf16.msra.mxu1 %v3786_v13 }
 0xca1   : > { %v13526_v17 = vpop.eup %11638 }
 0xca2   : > { %v3677_v20 = vsel %vm1566_vm4, %v13526_v17, 0.0  ;;  %v13530_v32 = vpop.eup %11640 }
 0xca3   : > { %3678 = vadd.xlane.f32.xlu0 %v3677_v20  ;;  %v3674_v22 = vsel %vm1566_vm4, %v13530_v32, 0.0 }
 0xca5   : > { %v13532_v41 = vpop.eup %11642 }
 0xca6   : > { %v3671_v1 = vsel %vm1566_vm4, %v13532_v41, 0.0 }
 0xca7   : > { %3672 = vadd.xlane.f32.xlu1 %v3671_v1  ;;  %3675 = vadd.xlane.f32.xlu0 %v3674_v22 }
 0xcb8   : > { %3838 = vrot.lane.b32.xlu1 %v12854_v26, %s16130_s2 }
 0xcbc   : > { %3898 = vrot.lane.b32.xlu1 %v12644_v31, %s16130_s2  ;;  %v16209_v31 = vpack.i.bf16 %v13382_v3, %v13380_v34 }
 0xcbd   : > { %3836 = vrot.lane.b32.xlu0 %v12624_v48, %s16130_s2  ;;  %v16210_v48 = vpack.i.bf16 %v13388_v14, %v13378_v36 }
 0xcc0   : > { %3900 = vrot.lane.b32.xlu1 %v12868_v29, %s16130_s2 }
 0xcc1   : > { %11169 = vrot.lane.b32.xlu0 %v16207_v7, %s16138_s22 }
 0xcc4   : > { %11174 = vrot.lane.b32.xlu1 %v16208_v49, %s16138_s22  ;;  %s10070_s22 = sshll.u32 %s12238_s3, 6 }
 0xcc5   : > { %11179 = vrot.lane.b32.xlu0 %v16209_v31, %s16136_s26 }
 0xcc8   : > { %11184 = vrot.lane.b32.xlu1 %v16210_v48, %s16136_s26  ;;  %s16256_s26 = smov 112  }
 0xcee   : > { %v3652_v26 = vpop.xlane.xlu0 %3651 }
 0xcef   : > { %11644 = vrcp.f32 %v3652_v26 }
 0xcf1   : > { %v3649_v29 = vpop.xlane.xlu1 %3648 }
 0xcf2   : > { %11646 = vrcp.f32 %v3649_v29  ;;  %v3646_v58 = vpop.xlane.xlu0 %3645 }
 0xcf3   : > { %11648 = vrcp.f32 %v3646_v58 }
 0xcf7   : > { %v3661_v44 = vpop.xlane.xlu1 %3660 }
 0xcf8   : > { %11650 = vrcp.f32 %v3661_v44 }
 0xcf9   : > { %v11645_v19 = vpop.eup %11644 }
 0xcfa   : > { %v3694_v51 = vmul.f32 %v11645_v19, %v13479_v0 }
 0xcfb   : > { %v3655_v14 = vpop.xlane.xlu1 %3654 }
 0xcfc   : > { %v11647_v63 = vpop.eup %11646  ;;  %v3705_v30 = vpack.c.bf16 %v3694_v51, %v3694_v51  ;;  %11652 = vrcp.f32 %v3655_v14 }
 0xcfd   : > { %v11649_v42 = vpop.eup %11648  ;;  %v3693_v4 = vmul.f32 %v11647_v63, %v13483_v18 }
 0xcfe   : > { %v3692_v34 = vmul.f32 %v11649_v42, %v13485_v15 }
 0xd00   : > { %v3704_v3 = vpack.c.bf16 %v3693_v4, %v3692_v34 }
 0xd02   : > { %10687 = vmatprep.mubr.msk.bf16.mxu0 %vm1566_vm4, %v3704_v3  ;;  %v11651_v55 = vpop.eup %11650 }
 0xd03   : > { %10688 = vmatmul.mubr.msk.bf16.vlgmr.msra.gmra.mrb[72].mxu0 %vm1566_vm4, %v3705_v30  ;;  %v3697_v0 = vmul.f32 %v11651_v55, %v13493_v52 }
 0xd04   : > { %v3670_v36 = vpop.xlane.xlu0 %3669 }
 0xd05   : > { %v3707_v39 = vpack.c.bf16 %v3697_v0, %v3697_v0  ;;  %v16215_v0 = vpack.i.bf16 %v13386_v50, %v13392_v43  ;;  %v16216_v50 = vpack.i.bf16 %v13168_v38, %v13166_v21  ;;  %v16217_v43 = vpack.i.bf16 %v13174_v9, %v13164_v33 }
 0xd06   : > { %v11653_v18 = vpop.eup %11652 }
 0xd07   : > { %v3695_v15 = vmul.f32 %v11653_v18, %v13498_v54  ;;  %v11374_v18 = vld [vmem:[%s16083_s7 + $0x10] sm:$0xff]  }
 0xd08   : > { %v3664_v6 = vpop.xlane.xlu0 %3663 }
 0xd0c   : > { %v3658_v16 = vpop.xlane.xlu0 %3657 }
 0xd0d   : > { %11654 = vrcp.f32 %v3658_v16  ;;  %v11372_v16 = vld [vmem:[%s16083_s7] sm:$0xff]  }
 0xd0e   : > { %11656 = vrcp.f32 %v3664_v6 }
 0xd17   : > { %v11655_v8 = vpop.eup %11654 }
 0xd18   : > { %v3696_v61 = vmul.f32 %v11655_v8, %v13510_v59  ;;  %v11657_v7 = vpop.eup %11656  ;;  %v16213_v8 = vpack.i.bf16 %v13154_v25, %v13160_v35 }
 0xd19   : > { %v3698_v31 = vmul.f32 %v11657_v7, %v13506_v45 }
 0xd1a   : > { %v3706_v60 = vpack.c.bf16 %v3696_v61, %v3695_v15  ;;  %v11375_v15 = vld [vmem:[%s16083_s7 + $0x18] sm:$0xff]  }
 0xd1c   : > { %10695 = vmatprep.mubr.msk.bf16.mxu1 %vm1566_vm4, %v3706_v60 }
 0xd1d   : > { %10696 = vmatmul.mubr.msk.bf16.vlgmr.msra.gmra.mrb[88].mxu1 %vm1566_vm4, %v3707_v39 }
 0xd2c   : > { %v3667_v13 = vpop.xlane.xlu1 %3666 }
 0xd2d   : > { %11658 = vrcp.f32 %v3667_v13 }
 0xd2e   : > { %11660 = vrcp.f32 %v3670_v36  ;;  %v16211_v36 = vmov 0  }
 0xd30   : > { %v3679_v20 = vpop.xlane.xlu0 %3678 }
 0xd31   : > { %11662 = vrcp.f32 %v3679_v20  ;;  %v16218_v20 = vpack.i.bf16 %v13400_v40, %v13398_v37  ;;  %v16221_v37 = vpack.i.bf16 %v13404_v10, %v13410_v62 }
 0xd34   : > { %v3673_v1 = vpop.xlane.xlu1 %3672  ;;  %v3676_v22 = vpop.xlane.xlu0 %3675 }
 0xd35   : > { %11664 = vrcp.f32 %v3673_v1  ;;  %v16219_v1 = vpack.i.bf16 %v13406_v5, %v13396_v11  ;;  %v16220_v11 = vpack.i.bf16 %v13172_v56, %v13178_v27 }
 0xd36   : > { %11666 = vrcp.f32 %v3676_v22 }
 0xd37   : > { %v11659_v52 = vpop.eup %11658 }
 0xd38   : > { %v11661_v54 = vpop.eup %11660  ;;  %v3839_v59 = vpop.permute.xlu1 %3838  ;;  %v3699_v48 = vmul.f32 %v11659_v52, %v13520_v57 }
 0xd39   : > { %v3837_v49 = vpop.permute.xlu0 %3836  ;;  %v3700_v29 = vmul.f32 %v11661_v54, %v13502_v28  ;;  %v3848_v63 = vsel %vm1713_vm2, %v3839_v59, 0 }
 0xd3a   : > { %10699 = vmatprep.subr.bf16.mxu0 %v3837_v49  ;;  %v3708_v26 = vpack.c.bf16 %v3699_v48, %v3698_v31 }
 0xd3b   : > { %10700 = vmatpush3.bf16.msra.mxu0 %v3837_v49  ;;  %v11663_v19 = vpop.eup %11662  ;;  %v3709_v45 = vpack.c.bf16 %v3700_v29, %v3700_v29 }
 0xd3c   : > { %11069 = vmatprep.subr.msk.bf16.mxu0 %vm1713_vm2, %v3839_v59  ;;  %v3899_v58 = vpop.permute.xlu1 %3898  ;;  %10703 = vmatprep.mubr.msk.bf16.mxu0 %vm1566_vm4, %v3708_v26  ;;  %v3703_v34 = vmul.f32 %v11663_v19, %v13526_v17 }
 0xd3d   : > { %10707 = vmatprep.subr.bf16.mxu1 %v3899_v58  ;;  %v11170_v40 = vpop.permute.xlu0 %11169 }
 0xd3e   : > { %10708 = vmatpush3.bf16.msra.mxu1 %v3899_v58  ;;  %v3711_v44 = vpack.c.bf16 %v3703_v34, %v3703_v34  ;;  %v11172_v48 = vunpack.i.h.bf16 %v11170_v40  ;;  %v11171_v26 = vunpack.i.l.bf16 %v11170_v40 }
 0xd3f   : > { %10702 = vmatpush3.bf16.msra.mxu0 %v3848_v63  ;;  %v11665_v42 = vpop.eup %11664 }
 0xd40   : > { %v11667_v4 = vpop.eup %11666  ;;  %v3901_v57 = vpop.permute.xlu1 %3900  ;;  %v3701_v51 = vmul.f32 %v11665_v42, %v13532_v41  ;;  %10715 = vmatprep.subr.bf16.mxu0 %v11372_v16  ;;  %v4105_v56 = vsel %vm1293_vm1, %v12918_v24, %v11172_v48  ;;  %v4104_v27 = vsel %vm1293_vm1, %v12916_v47, %v11171_v26 }
 0xd41   : > { %11070 = vmatprep.subr.msk.bf16.mxu1 %vm1713_vm2, %v3901_v57  ;;  %v3910_v28 = vsel %vm1713_vm2, %v3901_v57, 0  ;;  %v3702_v3 = vmul.f32 %v11667_v4, %v13530_v32  ;;  %v11373_v32 = vld [vmem:[%s16083_s7 + $0x8] sm:$0xff]   ;;  %v11180_v5 = vpop.permute.xlu0 %11179 }
 0xd42   : > { %10704 = vmatmul.mubr.msk.bf16.vlgmr.msra.gmra.mrb[76].mxu0 %vm1566_vm4, %v3709_v45  ;;  %10710 = vmatpush3.bf16.msra.mxu1 %v3910_v28  ;;  %v11182_v29 = vunpack.i.h.bf16 %v11180_v5  ;;  %v11181_v58 = vunpack.i.l.bf16 %v11180_v5 }
 0xd43   : > { %v3710_v30 = vpack.c.bf16 %v3702_v3, %v3701_v51  ;;  %10716 = vmatpush3.bf16.msra.mxu0 %v11372_v16 }
 0xd44   : > { %10717 = vmatprep.subr.bf16.mxu0 %v11373_v32  ;;  %v4117_v62 = vsel %vm4116_vm5, %v4104_v27, %v11181_v58  ;;  %v4118_v42 = vsel %vm4116_vm5, %v4105_v56, %v11182_v29  ;;  %v11175_v51 = vpop.permute.xlu1 %11174 }
 0xd45   : > { %10711 = vmatprep.mubr.msk.bf16.mxu1 %vm1566_vm4, %v3710_v30  ;;  %v11177_v24 = vunpack.i.h.bf16 %v11175_v51  ;;  %v11176_v3 = vunpack.i.l.bf16 %v11175_v51 }
 0xd46   : > { %10712 = vmatmul.mubr.msk.bf16.vlgmr.msra.gmra.mrb[92].mxu1 %vm1566_vm4, %v3711_v44 }
 0xd47   : > { %4620 = vmatprep.mubr.bf16.mxu1 %v16211_v36  ;;  %10718 = vmatpush3.bf16.msra.mxu0 %v11373_v32  ;;  %v4107_v32 = vsel %vm1293_vm1, %v12922_v46, %v11177_v24 }
 0xd48   : > { %10719 = vmatprep.subr.bf16.mxu0 %v11374_v18  ;;  %v11185_v28 = vpop.permute.xlu1 %11184 }
 0xd49   : > { %v11187_v47 = vunpack.i.h.bf16 %v11185_v28  ;;  %v11186_v44 = vunpack.i.l.bf16 %v11185_v28 }
 0xd4b   : > { %10720 = vmatpush3.bf16.msra.mxu0 %v11374_v18 }
 0xd4c   : > { %10721 = vmatprep.subr.bf16.mxu0 %v11375_v15 }
 0xd4f   : > { %10722 = vmatpush3.bf16.msra.mxu0 %v11375_v15  ;;  %v4120_v15 = vsel %vm4116_vm5, %v4107_v32, %v11187_v47  ;;  %v16226_v32 = vld [vmem:[#allocation31_spill] sm:$0xff] }
 0xdd6   : > { %v10689_v41 = vpop.f32.mrb[72].mxu0 }
 0xdd7   : > { %v3760_v14 = vpop.f32.mrb[73].mxu0 }
 0xdd8   : > { %v10690_v17 = vpop.f32.mrb[74].mxu0 }
 0xdd9   : > { %v3763_v6 = vpop.f32.mrb[75].mxu0 }
 0xdda   : > { %v11188_v55 = vpack.i.bf16 %v3763_v6, %v3760_v14 }
 0xddc   : > { %11189 = vrot.lane.b32.xlu0 %v11188_v55, %s16142_s4  ;;  %v4106_v55 = vsel %vm1293_vm1, %v12914_v2, %v11176_v3 }
 0xde0   : > { %11199 = vrot.lane.b32.xlu0 %v16213_v8, %s16212_s30 }
 0xde4   : > { %11209 = vrot.lane.b32.xlu0 %v16215_v0, %s16214_s28  ;;  %v4119_v0 = vsel %vm4116_vm5, %v4106_v55, %v11186_v44 }
 0xdf0   : > { %v10697_v61 = vpop.f32.mrb[88].mxu1 }
 0xdf1   : > { %v3822_v60 = vpop.f32.mrb[89].mxu1 }
 0xdf2   : > { %v11193_v39 = vpack.i.bf16 %v3822_v60, %v10689_v41  ;;  %v10698_v13 = vpop.f32.mrb[90].mxu1 }
 0xdf3   : > { %v3825_v25 = vpop.f32.mrb[91].mxu1 }
 0xdf4   : > { %v11218_v35 = vpack.i.bf16 %v10697_v61, %v3825_v25  ;;  %11194 = vrot.lane.b32.xlu1 %v11193_v39, %s16142_s4 }
 0xdf6   : > { %11219 = vrot.lane.b32.xlu0 %v11218_v35, %s16142_s4 }
 0xdf8   : > { %11204 = vrot.lane.b32.xlu1 %v16216_v50, %s16212_s30 }
 0xdfa   : > { %11229 = vrot.lane.b32.xlu0 %v16217_v43, %s16212_s30 }
 0xdfc   : > { %11214 = vrot.lane.b32.xlu1 %v16218_v20, %s16214_s28 }
 0xdfe   : > { %11239 = vrot.lane.b32.xlu0 %v16219_v1, %s16214_s28 }
 0xe15   : > { %v10705_v22 = vpop.f32.mrb[76].mxu0 }
 0xe16   : > { %v3884_v7 = vpop.f32.mrb[77].mxu0 }
 0xe17   : > { %v10706_v52 = vpop.f32.mrb[78].mxu0 }
 0xe18   : > { %v3887_v21 = vpop.f32.mrb[79].mxu0 }
 0xe19   : > { %v11223_v38 = vpack.i.bf16 %v3887_v21, %v3884_v7  ;;  %v10713_v54 = vpop.f32.mrb[92].mxu1 }
 0xe1a   : > { %v3946_v59 = vpop.f32.mrb[93].mxu1 }
 0xe1b   : > { %11224 = vrot.lane.b32.xlu1 %v11223_v38, %s16142_s4  ;;  %v11248_v33 = vpack.i.bf16 %v3946_v59, %v10705_v22  ;;  %v10714_v9 = vpop.f32.mrb[94].mxu1 }
 0xe1c   : > { %v3949_v49 = vpop.f32.mrb[95].mxu1 }
 0xe1d   : > { %v11253_v31 = vpack.i.bf16 %v10713_v54, %v3949_v49  ;;  %11249 = vrot.lane.b32.xlu0 %v11248_v33, %s16142_s4  ;;  %v16222_v49 = vld [vmem:[#allocation28_spill] sm:$0xff] }
 0xe1f   : > { %11234 = vrot.lane.b32.xlu1 %v16220_v11, %s16212_s30 }
 0xe23   : > { %11244 = vrot.lane.b32.xlu1 %v16221_v37, %s16214_s28 }
 0xe27   : > { %11254 = vrot.lane.b32.xlu1 %v11253_v31, %s16142_s4 }
 0xe4e   : > { %v11190_v19 = vpop.permute.xlu0 %11189 }
 0xe4f   : > { %v11192_v63 = vunpack.i.h.bf16 %v11190_v19  ;;  %v11191_v10 = vunpack.i.l.bf16 %v11190_v19  ;;  %v16223_v19 = vld [vmem:[#allocation30_spill] sm:$0xff] }
 0xe51   : > { %v4130_v45 = vsel %vm4129_vm6, %v4117_v62, %v11191_v10  ;;  %v4131_v4 = vsel %vm4129_vm6, %v4118_v42, %v11192_v63  ;;  %v16224_v10 = vld [vmem:[#allocation27_spill] sm:$0xff] }
 0xe52   : > { %v4142_v57 = vpack.c.bf16 %v4131_v4, %v4130_v45  ;;  %v11200_v34 = vpop.permute.xlu0 %11199 }
 0xe53   : > { %v11202_v41 = vunpack.i.h.bf16 %v11200_v34  ;;  %v11201_v14 = vunpack.i.l.bf16 %v11200_v34 }
 0xe54   : > { %10723 = vmatprep.mubr.msk.bf16.mxu0 %vm799_vm0, %v4142_v57 }
 0xe55   : > { %v4109_v61 = vsel %vm1293_vm1, %v12920_v53, %v11202_v41  ;;  %v4108_v60 = vsel %vm1293_vm1, %v12924_v12, %v11201_v14 }
 0xe56   : > { %v11210_v30 = vpop.permute.xlu0 %11209 }
 0xe57   : > { %v11212_v17 = vunpack.i.h.bf16 %v11210_v30  ;;  %v11211_v6 = vunpack.i.l.bf16 %v11210_v30 }
 0xe59   : > { %v4121_v2 = vsel %vm4116_vm5, %v4108_v60, %v11211_v6  ;;  %v4122_v50 = vsel %vm4116_vm5, %v4109_v61, %v11212_v17  ;;  %v16225_v6 = vld [vmem:[#allocation29_spill] sm:$0xff] }
 0xe66   : > { %v11195_v16 = vpop.permute.xlu1 %11194 }
 0xe67   : > { %v11197_v18 = vunpack.i.h.bf16 %v11195_v16  ;;  %v11196_v8 = vunpack.i.l.bf16 %v11195_v16 }
 0xe68   : > { %v11220_v39 = vpop.permute.xlu0 %11219 }
 0xe69   : > { %v4133_v13 = vsel %vm4129_vm6, %v4120_v15, %v11197_v18  ;;  %v4132_v46 = vsel %vm4129_vm6, %v4119_v0, %v11196_v8  ;;  %v11222_v25 = vunpack.i.h.bf16 %v11220_v39  ;;  %v11221_v35 = vunpack.i.l.bf16 %v11220_v39 }
 0xe6a   : > { %v4143_v43 = vpack.c.bf16 %v4133_v13, %v4132_v46  ;;  %v11205_v12 = vpop.permute.xlu1 %11204  ;;  %v9837_v46 = vld [vmem:[%s16084_s8] ss:$0 sm:$0xff] }
 0xe6b   : > { %v4134_v20 = vsel %vm4129_vm6, %v4121_v2, %v11221_v35  ;;  %v4135_v1 = vsel %vm4129_vm6, %v4122_v50, %v11222_v25  ;;  %v11207_v52 = vunpack.i.h.bf16 %v11205_v12  ;;  %v11206_v21 = vunpack.i.l.bf16 %v11205_v12  ;;  %v16227_v35 = vld [vmem:[#allocation14_spill] sm:$0xff]  ;;  %v16228_v50 = vld [vmem:[#allocation12_spill] sm:$0xff]  ;;  %v16229_v12 = vld [vmem:[#allocation13_spill] sm:$0xff] }
 0xe6c   : > { %10724 = vmatmul.mubr.msk.bf16.vlgmr.msra.gmra.mrb[80].mxu0 %vm799_vm0, %v4143_v43  ;;  %v4144_v53 = vpack.c.bf16 %v4135_v1, %v4134_v20  ;;  %v11230_v22 = vpop.permute.xlu0 %11229 }
 0xe6d   : > { %v11232_v33 = vunpack.i.h.bf16 %v11230_v22  ;;  %v4111_v9 = vsel %vm1293_vm1, %v12930_v23, %v11207_v52  ;;  %v4110_v31 = vsel %vm1293_vm1, %v16222_v49, %v11206_v21  ;;  %v11231_v11 = vunpack.i.l.bf16 %v11230_v22  ;;  %v16230_v52 = vld [vmem:[#allocation15_spill] sm:$0xff] }
 0xe6e   : > { %10727 = vmatprep.mubr.msk.bf16.mxu0 %vm799_vm0, %v4144_v53  ;;  %v11215_v7 = vpop.permute.xlu1 %11214 }
 0xe6f   : > { %v11217_v38 = vunpack.i.h.bf16 %v11215_v7  ;;  %v11216_v54 = vunpack.i.l.bf16 %v11215_v7  ;;  %v4113_v56 = vsel %vm1293_vm1, %v16223_v19, %v11232_v33  ;;  %v4112_v62 = vsel %vm1293_vm1, %v16224_v10, %v11231_v11  ;;  %v16233_v19 = vld [vmem:[#allocation19_spill] sm:$0xff] }
 0xe70   : > { %v11240_v59 = vpop.permute.xlu0 %11239 }
 0xe71   : > { %v11242_v40 = vunpack.i.h.bf16 %v11240_v59  ;;  %v11241_v5 = vunpack.i.l.bf16 %v11240_v59  ;;  %v4123_v29 = vsel %vm4116_vm5, %v4110_v31, %v11216_v54  ;;  %v4124_v58 = vsel %vm4116_vm5, %v4111_v9, %v11217_v38 }
 0xe73   : > { %v4125_v51 = vsel %vm4116_vm5, %v4112_v62, %v11241_v5  ;;  %v4126_v34 = vsel %vm4116_vm5, %v4113_v56, %v11242_v40  ;;  %v16232_v5 = vld [vmem:[#allocation16_spill] sm:$0xff] }
 0xe8d   : > { %v11225_v37 = vpop.permute.xlu1 %11224 }
 0xe8e   : > { %v11227_v48 = vunpack.i.h.bf16 %v11225_v37  ;;  %v11226_v26 = vunpack.i.l.bf16 %v11225_v37  ;;  %v16231_v37 = vld [vmem:[#allocation18_spill] sm:$0xff] }
 0xe8f   : > { %v11250_v63 = vpop.permute.xlu0 %11249 }
 0xe90   : > { %v4137_v27 = vsel %vm4129_vm6, %v4124_v58, %v11227_v48  ;;  %v4136_v23 = vsel %vm4129_vm6, %v4123_v29, %v11226_v26  ;;  %v11252_v42 = vunpack.i.h.bf16 %v11250_v63  ;;  %v11251_v45 = vunpack.i.l.bf16 %v11250_v63 }
 0xe91   : > { %v11235_v4 = vpop.permute.xlu1 %11234  ;;  %v4145_v57 = vpack.c.bf16 %v4137_v27, %v4136_v23  ;;  %v16234_v27 = vld [vmem:[#allocation17_spill] sm:$0xff] }
 0xe92   : > { %v4138_v28 = vsel %vm4129_vm6, %v4125_v51, %v11251_v45  ;;  %v4139_v24 = vsel %vm4129_vm6, %v4126_v34, %v11252_v42  ;;  %v11237_v47 = vunpack.i.h.bf16 %v11235_v4  ;;  %v11236_v44 = vunpack.i.l.bf16 %v11235_v4 }
 0xe93   : > { %10728 = vmatmul.mubr.msk.bf16.gmra.mrb[84].mxu0 %vm799_vm0, %v4145_v57  ;;  %v4146_v3 = vpack.c.bf16 %v4139_v24, %v4138_v28  ;;  %v16235_v28 = vld [vmem:[#allocation22_spill] sm:$0xff] }
 0xe94   : > { %v4115_v16 = vsel %vm1293_vm1, %v16225_v6, %v11237_v47  ;;  %v4114_v55 = vsel %vm1293_vm1, %v16226_v32, %v11236_v44  ;;  %v16238_v6 = vld [vmem:[#allocation21_spill] sm:$0xff] }
 0xe95   : > { %v11245_v30 = vpop.permute.xlu1 %11244  ;;  %10731 = vmatprep.mubr.msk.bf16.mxu0 %vm799_vm0, %v4146_v3  ;;  %v16236_v3 = vld [vmem:[#allocation20_spill] sm:$0xff] }
 0xe96   : > { %v11247_v41 = vunpack.i.h.bf16 %v11245_v30  ;;  %v11246_v14 = vunpack.i.l.bf16 %v11245_v30 }
 0xe98   : > { %v4127_v0 = vsel %vm4116_vm5, %v4114_v55, %v11246_v14  ;;  %v4128_v15 = vsel %vm4116_vm5, %v4115_v16, %v11247_v41  ;;  %v16237_v14 = vld [vmem:[#allocation23_spill] sm:$0xff] }
 0xe99   : > { %v11255_v17 = vpop.permute.xlu1 %11254 }
 0xe9a   : > { %v11257_v18 = vunpack.i.h.bf16 %v11255_v17  ;;  %v11256_v8 = vunpack.i.l.bf16 %v11255_v17 }
 0xe9c   : > { %v4140_v61 = vsel %vm4129_vm6, %v4127_v0, %v11256_v8  ;;  %v4141_v60 = vsel %vm4129_vm6, %v4128_v15, %v11257_v18 }
 0xe9d   : > { %v4147_v39 = vpack.c.bf16 %v4141_v60, %v4140_v61 }
 0xe9f   : > { %10732 = vmatmul.mubr.msk.bf16.gmra.mrb[88].mxu0 %vm799_vm0, %v4147_v39 }
 0xf3f   : > { %v10725_v13 = vpop.f32.mrb[80].mxu0 }
 0xf40   : > { %v4232_v25 = vpop.f32.mrb[81].mxu0  ;;  %v4281_v2 = vadd.f32 %v10725_v13, %v16227_v35 }
 0xf41   : > { %v4279_v43 = vadd.f32 %v4232_v25, %v16228_v50  ;;  %v10726_v20 = vpop.f32.mrb[82].mxu0 }
 0xf42   : > { %v4235_v1 = vpop.f32.mrb[83].mxu0  ;;  %v13699_v7 = vadd.f32 %v9837_v46, %v4281_v2  ;;  %v4282_v21 = vadd.f32 %v10726_v20, %v16230_v52 }
 0xf43   : > { %v13696_v53 = vadd.f32 %v9837_v46, %v4279_v43  ;;  %v4280_v22 = vadd.f32 %v4235_v1, %v16229_v12 }
 0xf44   : > { %v13708_v33 = vadd.f32 %v9837_v46, %v4282_v21  ;;  %v4318_v9 = vsel %vm799_vm0, %v13699_v7, 0.0 }
 0xf45   : > { %v13702_v38 = vadd.f32 %v9837_v46, %v4280_v22  ;;  %v4312_v54 = vsel %vm799_vm0, %v13696_v53, 0.0 }
 0xf46   : > { %4313 = vadd.xlane.f32.xlu0 %v4312_v54  ;;  %v4321_v49 = vsel %vm799_vm0, %v13708_v33, 0.0 }
 0xf47   : > { %v4315_v59 = vsel %vm799_vm0, %v13702_v38, 0.0 }
 0xf48   : > { %4316 = vadd.xlane.f32.xlu1 %v4315_v59 }
 0xf4a   : > { %4319 = vadd.xlane.f32.xlu0 %v4318_v9 }
 0xf4e   : > { %4322 = vadd.xlane.f32.xlu0 %v4321_v49 }
 0xf66   : > { %v10729_v31 = vpop.f32.mrb[84].mxu0 }
 0xf67   : > { %v4248_v11 = vpop.f32.mrb[85].mxu0  ;;  %v4285_v40 = vadd.f32 %v10729_v31, %v16231_v37  ;;  %v11376_v37 = vld [vmem:[%s16087_s11] ss:$8 sps:$4 sm:$0xff]  }
 0xf68   : > { %v4283_v48 = vadd.f32 %v4248_v11, %v16232_v5  ;;  %v10730_v26 = vpop.f32.mrb[86].mxu0  ;;  %v11378_v11 = vld [vmem:[%s16087_s11 + $0x4] ss:$8 sps:$4 sm:$0xff]   ;;  %v11379_v5 = vld [vmem:[%s16087_s11 + $0x10] ss:$8 sps:$4 sm:$0xff]  }
 0xf69   : > { %v4251_v29 = vpop.f32.mrb[87].mxu0  ;;  %v4286_v56 = vadd.f32 %v10730_v26, %v16233_v19  ;;  %v13720_v63 = vadd.f32 %v9837_v46, %v4285_v40  ;;  %4588 = vmatprep.subr.bf16.mxu1 %v11378_v11  ;;  %v11381_v40 = vld [vmem:[%s16087_s11 + $0x14] ss:$8 sps:$4 sm:$0xff]   ;;  %v11384_v26 = vld [vmem:[%s16087_s11 + $0x24] ss:$8 sps:$4 sm:$0xff]  }
 0xf6a   : > { %v13716_v58 = vadd.f32 %v9837_v46, %v4283_v48  ;;  %v4284_v23 = vadd.f32 %v4251_v29, %v16234_v27  ;;  %4589 = vmatpush1.bf16.msra.mxu1 %v11376_v37  ;;  %v11382_v19 = vld [vmem:[%s16087_s11 + $0x20] ss:$8 sps:$4 sm:$0xff]  }
 0xf6b   : > { %v13726_v42 = vadd.f32 %v9837_v46, %v4286_v56  ;;  %v4330_v4 = vsel %vm799_vm0, %v13720_v63, 0.0  ;;  %4590 = vmatprep.subr.bf16.mxu1 %v11381_v40 }
 0xf6c   : > { %v13722_v10 = vadd.f32 %v9837_v46, %v4284_v23  ;;  %v4324_v62 = vsel %vm799_vm0, %v13716_v58, 0.0 }
 0xf6d   : > { %4325 = vadd.xlane.f32.xlu0 %v4324_v62  ;;  %v4333_v51 = vsel %vm799_vm0, %v13726_v42, 0.0  ;;  %v11385_v62 = vld [vmem:[%s16087_s11 + $0x30] ss:$8 sps:$4 sm:$0xff]  }
 0xf6e   : > { %v4327_v45 = vsel %vm799_vm0, %v13722_v10, 0.0  ;;  %4591 = vmatpush1.bf16.msra.mxu1 %v11379_v5 }
 0xf6f   : > { %4328 = vadd.xlane.f32.xlu1 %v4327_v45  ;;  %4592 = vmatprep.subr.bf16.mxu1 %v11384_v26  ;;  %v11387_v45 = vld [vmem:[%s16087_s11 + $0x34] ss:$8 sps:$4 sm:$0xff]  }
 0xf71   : > { %4331 = vadd.xlane.f32.xlu0 %v4330_v4 }
 0xf72   : > { %v10733_v57 = vpop.f32.mrb[88].mxu0  ;;  %4593 = vmatpush1.bf16.msra.mxu1 %v11382_v19 }
 0xf73   : > { %4334 = vadd.xlane.f32.xlu1 %v4333_v51  ;;  %v4264_v34 = vpop.f32.mrb[89].mxu0  ;;  %v4289_v24 = vadd.f32 %v10733_v57, %v16235_v28  ;;  %4594 = vmatprep.subr.bf16.mxu1 %v11387_v45 }
 0xf74   : > { %v4287_v30 = vadd.f32 %v4264_v34, %v16236_v3  ;;  %v10734_v47 = vpop.f32.mrb[90].mxu0 }
 0xf75   : > { %v4267_v44 = vpop.f32.mrb[91].mxu0  ;;  %v4290_v17 = vadd.f32 %v10734_v47, %v16237_v14  ;;  %v13740_v32 = vadd.f32 %v9837_v46, %v4289_v24 }
 0xf76   : > { %v13736_v41 = vadd.f32 %v9837_v46, %v4287_v30  ;;  %v4288_v16 = vadd.f32 %v4267_v44, %v16238_v6  ;;  %4595 = vmatpush1.bf16.msra.mxu1 %v11385_v62 }
 0xf77   : > { %v13746_v8 = vadd.f32 %v9837_v46, %v4290_v17  ;;  %v4342_v15 = vsel %vm799_vm0, %v13740_v32, 0.0 }
 0xf78   : > { %v13742_v55 = vadd.f32 %v9837_v46, %v4288_v16  ;;  %v4336_v18 = vsel %vm799_vm0, %v13736_v41, 0.0 }
 0xf79   : > { %4337 = vadd.xlane.f32.xlu0 %v4336_v18  ;;  %v4345_v61 = vsel %vm799_vm0, %v13746_v8, 0.0 }
 0xf7a   : > { %v4339_v0 = vsel %vm799_vm0, %v13742_v55, 0.0 }
 0xf7b   : > { %4340 = vadd.xlane.f32.xlu1 %v4339_v0 }
 0xf7d   : > { %4343 = vadd.xlane.f32.xlu0 %v4342_v15 }
 0xf7f   : > { %4346 = vadd.xlane.f32.xlu1 %v4345_v61 }
 0xfd3   : > { %v4314_v60 = vpop.xlane.xlu0 %4313 }
 0xfd4   : > { %v4348_v39 = vmul.f32 0.015625, %v4314_v60 }
 0xfd5   : > { %v4317_v13 = vpop.xlane.xlu1 %4316 }
 0xfd6   : > { %v13755_v25 = vsub.f32 %v13696_v53, %v4348_v39  ;;  %v4349_v46 = vmul.f32 0.015625, %v4317_v13 }
 0xfd7   : > { %v4320_v35 = vpop.xlane.xlu0 %4319 }
 0xfd8   : > { %v13758_v2 = vsub.f32 %v13702_v38, %v4349_v46  ;;  %v4350_v50 = vmul.f32 0.015625, %v4320_v35  ;;  %v4372_v43 = vmul.f32 %v13755_v25, %v13755_v25 }
 0xfda   : > { %v13763_v20 = vsub.f32 %v13699_v7, %v4350_v50  ;;  %v4384_v1 = vsel %vm799_vm0, %v4372_v43, 0.0  ;;  %v4373_v12 = vmul.f32 %v13758_v2, %v13758_v2 }
 0xfdb   : > { %v4323_v22 = vpop.xlane.xlu0 %4322  ;;  %4385 = vadd.xlane.f32.xlu0 %v4384_v1 }
 0xfdc   : > { %v4351_v52 = vmul.f32 0.015625, %v4323_v22  ;;  %v4387_v21 = vsel %vm799_vm0, %v4373_v12, 0.0  ;;  %v4374_v54 = vmul.f32 %v13763_v20, %v13763_v20 }
 0xfdd   : > { %4388 = vadd.xlane.f32.xlu1 %v4387_v21 }
 0xfde   : > { %v13772_v59 = vsub.f32 %v13708_v33, %v4351_v52  ;;  %v4390_v9 = vsel %vm799_vm0, %v4374_v54, 0.0 }
 0xfdf   : > { %4391 = vadd.xlane.f32.xlu0 %v4390_v9 }
 0xfe0   : > { %v4375_v49 = vmul.f32 %v13772_v59, %v13772_v59 }
 0xfe2   : > { %v4393_v31 = vsel %vm799_vm0, %v4375_v49, 0.0 }
 0xfe3   : > { %4394 = vadd.xlane.f32.xlu1 %v4393_v31 }
 0xffa   : > { %v4326_v48 = vpop.xlane.xlu0 %4325 }
 0xffb   : > { %v4352_v29 = vmul.f32 0.015625, %v4326_v48 }
 0xffc   : > { %v4329_v56 = vpop.xlane.xlu1 %4328 }
 0xffd   : > { %v13797_v27 = vsub.f32 %v13716_v58, %v4352_v29  ;;  %v4353_v23 = vmul.f32 0.015625, %v4329_v56 }
 0xffe   : > { %v4332_v4 = vpop.xlane.xlu0 %4331 }
 0xfff   : > { %v13806_v57 = vsub.f32 %v13722_v10, %v4353_v23  ;;  %v4354_v51 = vmul.f32 0.015625, %v4332_v4  ;;  %v4376_v34 = vmul.f32 %v13797_v27, %v13797_v27 }
0x1000   : > { %v4335_v28 = vpop.xlane.xlu1 %4334 }
0x1001   : > { %v13811_v24 = vsub.f32 %v13720_v63, %v4354_v51  ;;  %v4355_v3 = vmul.f32 0.015625, %v4335_v28  ;;  %v4396_v30 = vsel %vm799_vm0, %v4376_v34, 0.0  ;;  %v4377_v47 = vmul.f32 %v13806_v57, %v13806_v57  ;;  %v13853_v34 = vld [vmem:[%s16085_s9] ss:$0 sm:$0xff] }
0x1002   : > { %4397 = vadd.xlane.f32.xlu0 %v4396_v30 }
0x1003   : > { %v13817_v44 = vsub.f32 %v13726_v42, %v4355_v3  ;;  %v4399_v14 = vsel %vm799_vm0, %v4377_v47, 0.0  ;;  %v4378_v17 = vmul.f32 %v13811_v24, %v13811_v24 }
0x1004   : > { %4400 = vadd.xlane.f32.xlu1 %v4399_v14 }
0x1005   : > { %v4402_v6 = vsel %vm799_vm0, %v4378_v17, 0.0  ;;  %v4379_v16 = vmul.f32 %v13817_v44, %v13817_v44  ;;  %v13861_v17 = vld [vmem:[%s16086_s10] ss:$0 sm:$0xff] }
0x1006   : > { %4403 = vadd.xlane.f32.xlu0 %v4402_v6  ;;  %v4338_v18 = vpop.xlane.xlu0 %4337 }
0x1007   : > { %v4356_v0 = vmul.f32 0.015625, %v4338_v18  ;;  %v4405_v15 = vsel %vm799_vm0, %v4379_v16, 0.0 }
0x1008   : > { %4406 = vadd.xlane.f32.xlu1 %v4405_v15  ;;  %v4341_v61 = vpop.xlane.xlu1 %4340 }
0x1009   : > { %v13827_v60 = vsub.f32 %v13736_v41, %v4356_v0  ;;  %v4357_v39 = vmul.f32 0.015625, %v4341_v61 }
0x100a   : > { %v4344_v13 = vpop.xlane.xlu0 %4343 }
0x100b   : > { %v13830_v46 = vsub.f32 %v13742_v55, %v4357_v39  ;;  %v4358_v35 = vmul.f32 0.015625, %v4344_v13  ;;  %v4380_v50 = vmul.f32 %v13827_v60, %v13827_v60 }
0x100c   : > { %v4347_v43 = vpop.xlane.xlu1 %4346 }
0x100d   : > { %v13835_v1 = vsub.f32 %v13740_v32, %v4358_v35  ;;  %v4359_v12 = vmul.f32 0.015625, %v4347_v43  ;;  %v4408_v22 = vsel %vm799_vm0, %v4380_v50, 0.0  ;;  %v4381_v52 = vmul.f32 %v13830_v46, %v13830_v46 }
0x100e   : > { %4409 = vadd.xlane.f32.xlu0 %v4408_v22 }
0x100f   : > { %v13841_v21 = vsub.f32 %v13746_v8, %v4359_v12  ;;  %v4411_v54 = vsel %vm799_vm0, %v4381_v52, 0.0  ;;  %v4382_v9 = vmul.f32 %v13835_v1, %v13835_v1 }
0x1010   : > { %4412 = vadd.xlane.f32.xlu1 %v4411_v54 }
0x1011   : > { %v4414_v49 = vsel %vm799_vm0, %v4382_v9, 0.0  ;;  %v4383_v31 = vmul.f32 %v13841_v21, %v13841_v21 }
0x1012   : > { %4415 = vadd.xlane.f32.xlu0 %v4414_v49 }
0x1013   : > { %v4417_v11 = vsel %vm799_vm0, %v4383_v31, 0.0 }
0x1014   : > { %4418 = vadd.xlane.f32.xlu1 %v4417_v11 }
0x1068   : > { %v4386_v37 = vpop.xlane.xlu0 %4385 }
0x1069   : > { %v4420_v40 = vmul.f32 0.015625, %v4386_v37 }
0x106a   : > { %v4389_v5 = vpop.xlane.xlu1 %4388 }
0x106b   : > { %v4432_v48 = vadd.f32 1e-06, %v4420_v40  ;;  %v4421_v26 = vmul.f32 0.015625, %v4389_v5 }
0x106c   : > { %v4392_v29 = vpop.xlane.xlu0 %4391 }
0x106d   : > { %11668 = vrsqrt.f32 %v4432_v48  ;;  %v4433_v19 = vadd.f32 1e-06, %v4421_v26  ;;  %v4422_v56 = vmul.f32 0.015625, %v4392_v29 }
0x106f   : > { %11670 = vrsqrt.f32 %v4433_v19  ;;  %v4434_v23 = vadd.f32 1e-06, %v4422_v56 }
0x1070   : > { %v4395_v62 = vpop.xlane.xlu1 %4394 }
0x1071   : > { %11672 = vrsqrt.f32 %v4434_v23  ;;  %v4423_v45 = vmul.f32 0.015625, %v4395_v62 }
0x1073   : > { %v4435_v4 = vadd.f32 1e-06, %v4423_v45 }
0x1075   : > { %11674 = vrsqrt.f32 %v4435_v4 }
0x1077   : > { %v11669_v51 = vpop.eup %11668 }
0x1078   : > { %v4456_v28 = vmul.f32 %v11669_v51, %v13755_v25 }
0x1079   : > { %v11671_v3 = vpop.eup %11670 }
0x107a   : > { %v4474_v30 = vmul.f32 %v13853_v34, %v4456_v28  ;;  %v4457_v47 = vmul.f32 %v11671_v3, %v13758_v2 }
0x107b   : > { %v11673_v14 = vpop.eup %11672 }
0x107c   : > { %v4475_v6 = vmul.f32 %v13853_v34, %v4457_v47  ;;  %v4492_v16 = vadd.f32 %v13861_v17, %v4474_v30  ;;  %v4458_v0 = vmul.f32 %v11673_v14, %v13763_v20 }
0x107e   : > { %v4493_v18 = vadd.f32 %v13861_v17, %v4475_v6  ;;  %v4476_v2 = vmul.f32 %v13853_v34, %v4458_v0 }
0x107f   : > { %v11675_v25 = vpop.eup %11674 }
0x1080   : > { %v4504_v15 = vpack.c.bf16 %v4493_v18, %v4492_v16  ;;  %v4459_v61 = vmul.f32 %v11675_v25, %v13772_v59  ;;  %v4494_v35 = vadd.f32 %v13861_v17, %v4476_v2 }
0x1082   : > { %9848 = vmatmul.mubr.msk.bf16.vlgmr.msra.gmra.mrb[96].mxu1 %vm799_vm0, %v4504_v15  ;;  %v4477_v39 = vmul.f32 %v13853_v34, %v4459_v61 }
0x1083   : > { %4630 = vmatprep.mubr.bf16.mxu1 %v16211_v36 }
0x1084   : > { %v4495_v13 = vadd.f32 %v13861_v17, %v4477_v39 }
0x1086   : > { %v4505_v50 = vpack.c.bf16 %v4495_v13, %v4494_v35 }
0x108a   : > { %9849 = vmatmul.mubr.msk.bf16.gmra.mrb[100].mxu1 %vm799_vm0, %v4505_v50 }
0x108b   : > { %4640 = vmatprep.mubr.bf16.mxu1 %v16211_v36 }
0x108f   : > { %v4398_v20 = vpop.xlane.xlu0 %4397 }
0x1090   : > { %v4424_v43 = vmul.f32 0.015625, %v4398_v20 }
0x1091   : > { %v4401_v59 = vpop.xlane.xlu1 %4400 }
0x1092   : > { %v4436_v12 = vadd.f32 1e-06, %v4424_v43  ;;  %v4425_v22 = vmul.f32 0.015625, %v4401_v59 }
0x1093   : > { %v4404_v52 = vpop.xlane.xlu0 %4403 }
0x1094   : > { %11676 = vrsqrt.f32 %v4436_v12  ;;  %v4437_v54 = vadd.f32 1e-06, %v4425_v22  ;;  %v4426_v9 = vmul.f32 0.015625, %v4404_v52 }
0x1095   : > { %v4407_v49 = vpop.xlane.xlu1 %4406 }
0x1096   : > { %11678 = vrsqrt.f32 %v4437_v54  ;;  %v4438_v31 = vadd.f32 1e-06, %v4426_v9  ;;  %v4427_v11 = vmul.f32 0.015625, %v4407_v49 }
0x1098   : > { %11680 = vrsqrt.f32 %v4438_v31  ;;  %v4439_v37 = vadd.f32 1e-06, %v4427_v11 }
0x109a   : > { %11682 = vrsqrt.f32 %v4439_v37 }
0x109b   : > { %v4410_v40 = vpop.xlane.xlu0 %4409 }
0x109c   : > { %v4428_v5 = vmul.f32 0.015625, %v4410_v40 }
0x109d   : > { %v4413_v48 = vpop.xlane.xlu1 %4412 }
0x109e   : > { %v11677_v26 = vpop.eup %11676  ;;  %v4440_v29 = vadd.f32 1e-06, %v4428_v5  ;;  %v4429_v19 = vmul.f32 0.015625, %v4413_v48  ;;  %v11392_v5 = vld [vmem:[%s16089_s13 + $0x50] sm:$0xff]  }
0x109f   : > { %v4416_v56 = vpop.xlane.xlu0 %4415  ;;  %v4460_v23 = vmul.f32 %v11677_v26, %v13797_v27  ;;  %v11393_v48 = vld [vmem:[%s16089_s13 + $0x10] sm:$0xff]   ;;  %v11394_v26 = vld [vmem:[%s16089_s13 + $0x58] sm:$0xff]  }
0x10a0   : > { %v11679_v62 = vpop.eup %11678  ;;  %11684 = vrsqrt.f32 %v4440_v29  ;;  %v4441_v45 = vadd.f32 1e-06, %v4429_v19  ;;  %v4430_v4 = vmul.f32 0.015625, %v4416_v56  ;;  %v11395_v29 = vld [vmem:[%s16089_s13 + $0x18] sm:$0xff]   ;;  %v11396_v19 = vld [vmem:[%s16089_s13 + $0x60] sm:$0xff]  }
0x10a1   : > { %v4419_v51 = vpop.xlane.xlu1 %4418  ;;  %v4461_v28 = vmul.f32 %v11679_v62, %v13806_v57  ;;  %v4478_v3 = vmul.f32 %v13853_v34, %v4460_v23  ;;  %v11397_v56 = vld [vmem:[%s16089_s13 + $0x20] sm:$0xff]   ;;  %v11398_v23 = vld [vmem:[%s16089_s13 + $0x68] sm:$0xff]  }
0x10a2   : > { %v11681_v30 = vpop.eup %11680  ;;  %11686 = vrsqrt.f32 %v4441_v45  ;;  %v4431_v47 = vmul.f32 0.015625, %v4419_v51  ;;  %v4442_v16 = vadd.f32 1e-06, %v4430_v4  ;;  %v11399_v62 = vld [vmem:[%s16089_s13 + $0x28] sm:$0xff]   ;;  %v11400_v45 = vld [vmem:[%s16089_s13 + $0x70] sm:$0xff]   ;;  %v11402_v51 = vld [vmem:[%s16089_s13 + $0x78] sm:$0xff]  }
0x10a3   : > { %v4479_v14 = vmul.f32 %v13853_v34, %v4461_v28  ;;  %v4496_v0 = vadd.f32 %v13861_v17, %v4478_v3  ;;  %v4462_v25 = vmul.f32 %v11681_v30, %v13811_v24  ;;  %v11401_v4 = vld [vmem:[%s16089_s13 + $0x30] sm:$0xff]   ;;  %v11403_v28 = vld [vmem:[%s16089_s13 + $0x38] sm:$0xff]   ;;  %v4518_v3 = vld [vmem:[%s16088_s12] sm:$0x3] }
0x10a4   : > { %v11683_v6 = vpop.eup %11682  ;;  %v4443_v18 = vadd.f32 1e-06, %v4431_v47  ;;  %v16239_v30 = vld [vmem:[#allocation24_spill] sm:$0xff] }
0x10a5   : > { %v4497_v27 = vadd.f32 %v13861_v17, %v4479_v14  ;;  %v4463_v15 = vmul.f32 %v11683_v6, %v13817_v44  ;;  %v4480_v2 = vmul.f32 %v13853_v34, %v4462_v25  ;;  %v13960_v47 = vrot.slane %v4518_v3, %v16239_v30  ;;  %v16240_v14 = vld [vmem:[#allocation25_spill] sm:$0xff] }
0x10a6   : > { %11688 = vrsqrt.f32 %v4443_v18  ;;  %v13963_v6 = vrot.slane %v4518_v3, %v16240_v14 }
0x10a7   : > { %v4506_v57 = vpack.c.bf16 %v4497_v27, %v4496_v0  ;;  %v4481_v61 = vmul.f32 %v13853_v34, %v4463_v15  ;;  %11690 = vrsqrt.f32 %v4442_v16  ;;  %v4498_v50 = vadd.f32 %v13861_v17, %v4480_v2 }
0x10a9   : > { %9850 = vmatmul.mubr.msk.bf16.gmra.mrb[104].mxu1 %vm799_vm0, %v4506_v57  ;;  %v4499_v13 = vadd.f32 %v13861_v17, %v4481_v61 }
0x10aa   : > { %v11685_v39 = vpop.eup %11684  ;;  %4650 = vmatprep.mubr.bf16.mxu1 %v16211_v36 }
0x10ab   : > { %v4464_v24 = vmul.f32 %v11685_v39, %v13827_v60  ;;  %v4507_v20 = vpack.c.bf16 %v4499_v13, %v4498_v50 }
0x10ac   : > { %v11687_v35 = vpop.eup %11686 }
0x10ad   : > { %v4465_v44 = vmul.f32 %v11687_v35, %v13830_v46  ;;  %v4482_v12 = vmul.f32 %v13853_v34, %v4464_v24 }
0x10af   : > { %v4483_v43 = vmul.f32 %v13853_v34, %v4465_v44  ;;  %v4500_v9 = vadd.f32 %v13861_v17, %v4482_v12 }
0x10b0   : > { %v11689_v59 = vpop.eup %11688 }
0x10b1   : > { %9851 = vmatmul.mubr.msk.bf16.gmra.mrb[108].mxu1 %vm799_vm0, %v4507_v20  ;;  %v11691_v22 = vpop.eup %11690  ;;  %v4501_v52 = vadd.f32 %v13861_v17, %v4483_v43  ;;  %v4467_v54 = vmul.f32 %v11689_v59, %v13841_v21  ;;  %v11389_v21 = vld [vmem:[%s16089_s13] sm:$0xff]  }
0x10b2   : > { %4660 = vmatprep.mubr.bf16.mxu1 %v16211_v36  ;;  %v4466_v60 = vmul.f32 %v11691_v22, %v13835_v1  ;;  %v11388_v1 = vld [vmem:[%s16089_s13 + $0x40] sm:$0xff]  }
0x10b3   : > { %v4508_v46 = vpack.c.bf16 %v4501_v52, %v4500_v9  ;;  %v4485_v49 = vmul.f32 %v13853_v34, %v4467_v54  ;;  %10212 = vmatprep.subr.bf16.mxu0 %v11388_v1 }
0x10b4   : > { %v4484_v31 = vmul.f32 %v13853_v34, %v4466_v60  ;;  %10213 = vmatpush3.bf16.msra.mxu0 %v11389_v21  ;;  %v11390_v34 = vld [vmem:[%s16089_s13 + $0x48] sm:$0xff]  }
0x10b5   : > { %v4503_v11 = vadd.f32 %v13861_v17, %v4485_v49  ;;  %10214 = vmatprep.subr.bf16.mxu0 %v11390_v34 }
0x10b6   : > { %v4502_v37 = vadd.f32 %v13861_v17, %v4484_v31  ;;  %v11391_v17 = vld [vmem:[%s16089_s13 + $0x8] sm:$0xff]  }
0x10b8   : > { %v4509_v40 = vpack.c.bf16 %v4503_v11, %v4502_v37  ;;  %10215 = vmatpush3.bf16.msra.mxu0 %v11391_v17 }
0x10b9   : > { %9852 = vmatmul.mubr.msk.bf16.gmra.mrb[112].mxu1 %vm799_vm0, %v4508_v46  ;;  %10216 = vmatprep.subr.bf16.mxu0 %v11392_v5 }
0x10ba   : > { %4670 = vmatprep.mubr.bf16.mxu1 %v16211_v36 }
0x10bc   : > { %10217 = vmatpush3.bf16.msra.mxu0 %v11393_v48 }
0x10bd   : > { %10218 = vmatprep.subr.bf16.mxu0 %v11394_v26 }
0x10c0   : > { %10219 = vmatpush3.bf16.msra.mxu0 %v11395_v29 }
0x10c1   : > { %9853 = vmatmul.mubr.msk.bf16.gmra.mrb[116].mxu1 %vm799_vm0, %v4509_v40  ;;  %10220 = vmatprep.subr.bf16.mxu0 %v11396_v19 }
0x10c2   : > { %5463 = vmatprep.mubr.bf16.mxu1 %v16211_v36 }
0x10c4   : > { %10221 = vmatpush3.bf16.msra.mxu0 %v11397_v56 }
0x10c5   : > { %10222 = vmatprep.subr.bf16.mxu0 %v11398_v23 }
0x10c8   : > { %10223 = vmatpush3.bf16.msra.mxu0 %v11399_v62 }
0x10c9   : > { %10224 = vmatprep.subr.bf16.mxu0 %v11400_v45 }
0x10cc   : > { %10225 = vmatpush3.bf16.msra.mxu0 %v11401_v4 }
0x10cd   : > { %10226 = vmatprep.subr.bf16.mxu0 %v11402_v51 }
0x10d0   : > { %10227 = vmatpush3.bf16.msra.mxu0 %v11403_v28 }
0x1155   : > { %v4622_v16 = vpop.f32.mrb[96].mxu1 }
0x1156   : > { %v13966_v18 = vadd.f32 %v4622_v16, %v13960_v47  ;;  %v4624_v0 = vpop.f32.mrb[97].mxu1 }
0x1157   : > { %v13969_v27 = vadd.f32 %v4624_v0, %v13963_v6  ;;  %v4626_v25 = vpop.f32.mrb[98].mxu1 }
0x1158   : > { %v4681_v15 = vmul.f32 %v13966_v18, %v13966_v18  ;;  %v13974_v57 = vadd.f32 %v4626_v25, %v13960_v47  ;;  %v4628_v61 = vpop.f32.mrb[99].mxu1 }
0x1159   : > { %v4682_v2 = vmul.f32 %v13969_v27, %v13969_v27  ;;  %v13979_v39 = vadd.f32 %v4628_v61, %v13963_v6 }
0x115a   : > { %v4705_v13 = vmul.f32 %v4681_v15, %v13966_v18  ;;  %v4683_v35 = vmul.f32 %v13974_v57, %v13974_v57 }
0x115b   : > { %v4706_v50 = vmul.f32 %v4682_v2, %v13969_v27  ;;  %v4684_v24 = vmul.f32 %v13979_v39, %v13979_v39 }
0x115c   : > { %v4729_v44 = vmul.f32 0.044715, %v4705_v13  ;;  %v4707_v20 = vmul.f32 %v4683_v35, %v13974_v57 }
0x115d   : > { %v4730_v43 = vmul.f32 0.044715, %v4706_v50  ;;  %v4708_v59 = vmul.f32 %v4684_v24, %v13979_v39  ;;  %v4632_v12 = vpop.f32.mrb[100].mxu1 }
0x115e   : > { %v4753_v22 = vadd.f32 %v4729_v44, %v13966_v18  ;;  %v4731_v52 = vmul.f32 0.044715, %v4707_v20  ;;  %v13991_v54 = vadd.f32 %v4632_v12, %v13960_v47  ;;  %v4634_v9 = vpop.f32.mrb[101].mxu1 }
0x115f   : > { %v4754_v60 = vadd.f32 %v4730_v43, %v13969_v27  ;;  %v4732_v46 = vmul.f32 0.044715, %v4708_v59  ;;  %v13995_v49 = vadd.f32 %v4634_v9, %v13963_v6  ;;  %v4636_v31 = vpop.f32.mrb[102].mxu1 }
0x1160   : > { %v4777_v11 = vmul.f32 0.7978846, %v4753_v22  ;;  %v4755_v37 = vadd.f32 %v4731_v52, %v13974_v57  ;;  %v4685_v40 = vmul.f32 %v13991_v54, %v13991_v54  ;;  %v14001_v1 = vadd.f32 %v4636_v31, %v13960_v47  ;;  %v4638_v21 = vpop.f32.mrb[103].mxu1 }
0x1161   : > { %v4778_v34 = vmul.f32 0.7978846, %v4754_v60  ;;  %v4756_v17 = vadd.f32 %v4732_v46, %v13979_v39  ;;  %v4686_v5 = vmul.f32 %v13995_v49, %v13995_v49  ;;  %v14007_v48 = vadd.f32 %v4638_v21, %v13963_v6 }
0x1162   : > { %11692 = vtanh.f32 %v4777_v11  ;;  %v4779_v26 = vmul.f32 0.7978846, %v4755_v37  ;;  %v4709_v29 = vmul.f32 %v4685_v40, %v13991_v54  ;;  %v4687_v19 = vmul.f32 %v14001_v1, %v14001_v1 }
0x1163   : > { %11694 = vtanh.f32 %v4778_v34  ;;  %v4780_v56 = vmul.f32 0.7978846, %v4756_v17  ;;  %v4710_v23 = vmul.f32 %v4686_v5, %v13995_v49  ;;  %v4688_v62 = vmul.f32 %v14007_v48, %v14007_v48 }
0x1164   : > { %11696 = vtanh.f32 %v4779_v26  ;;  %v4733_v45 = vmul.f32 0.044715, %v4709_v29  ;;  %v4711_v4 = vmul.f32 %v4687_v19, %v14001_v1 }
0x1165   : > { %11698 = vtanh.f32 %v4780_v56  ;;  %v4734_v51 = vmul.f32 0.044715, %v4710_v23  ;;  %v4712_v28 = vmul.f32 %v4688_v62, %v14007_v48 }
0x1166   : > { %v4757_v3 = vadd.f32 %v4733_v45, %v13991_v54  ;;  %v4735_v16 = vmul.f32 0.044715, %v4711_v4 }
0x1167   : > { %v4758_v0 = vadd.f32 %v4734_v51, %v13995_v49  ;;  %v4736_v25 = vmul.f32 0.044715, %v4712_v28 }
0x1168   : > { %v4781_v15 = vmul.f32 0.7978846, %v4757_v3  ;;  %v4759_v61 = vadd.f32 %v4735_v16, %v14001_v1 }
0x1169   : > { %v4782_v2 = vmul.f32 0.7978846, %v4758_v0  ;;  %v4760_v13 = vadd.f32 %v4736_v25, %v14007_v48 }
0x116a   : > { %11700 = vtanh.f32 %v4781_v15  ;;  %v4783_v35 = vmul.f32 0.7978846, %v4759_v61 }
0x116b   : > { %11702 = vtanh.f32 %v4782_v2  ;;  %v4784_v50 = vmul.f32 0.7978846, %v4760_v13 }
0x116c   : > { %v11693_v24 = vpop.eup %11692  ;;  %11704 = vtanh.f32 %v4783_v35 }
0x116d   : > { %v11695_v44 = vpop.eup %11694  ;;  %v4825_v20 = vadd.f32 1.0, %v11693_v24  ;;  %11706 = vtanh.f32 %v4784_v50 }
0x116e   : > { %v11697_v43 = vpop.eup %11696  ;;  %v4826_v59 = vadd.f32 1.0, %v11695_v44 }
0x116f   : > { %v11699_v12 = vpop.eup %11698  ;;  %v4849_v22 = vmul.f32 0.5, %v4825_v20  ;;  %v4827_v52 = vadd.f32 1.0, %v11697_v43 }
0x1170   : > { %v4828_v9 = vadd.f32 1.0, %v11699_v12  ;;  %v4850_v60 = vmul.f32 0.5, %v4826_v59 }
0x1171   : > { %v4851_v46 = vmul.f32 0.5, %v4827_v52  ;;  %v4873_v11 = vmul.f32 %v4849_v22, %v13966_v18 }
0x1172   : > { %v4852_v31 = vmul.f32 0.5, %v4828_v9  ;;  %v4874_v21 = vmul.f32 %v4850_v60, %v13969_v27 }
0x1173   : > { %v4875_v37 = vmul.f32 %v4851_v46, %v13974_v57 }
0x1174   : > { %v11701_v40 = vpop.eup %11700  ;;  %v4876_v34 = vmul.f32 %v4852_v31, %v13979_v39 }
0x1175   : > { %v11703_v17 = vpop.eup %11702  ;;  %v4897_v5 = vpack.c.bf16 %v4875_v37, %v4873_v11  ;;  %v4829_v26 = vadd.f32 1.0, %v11701_v40 }
0x1176   : > { %v11705_v29 = vpop.eup %11704  ;;  %v4898_v19 = vpack.c.bf16 %v4876_v34, %v4874_v21  ;;  %v4830_v56 = vadd.f32 1.0, %v11703_v17 }
0x1177   : > { %v11707_v23 = vpop.eup %11706  ;;  %v4831_v62 = vadd.f32 1.0, %v11705_v29  ;;  %v4853_v45 = vmul.f32 0.5, %v4829_v26 }
0x1178   : > { %5069 = vmatprep.mubr.bf16.mxu0 %v4898_v19  ;;  %v4832_v4 = vadd.f32 1.0, %v11707_v23  ;;  %v4854_v51 = vmul.f32 0.5, %v4830_v56 }
0x1179   : > { %5070 = vmatmul.mubr.bf16.vlgmr.msra.gmra.mrb[92].mxu0 %v4897_v5  ;;  %v4855_v18 = vmul.f32 0.5, %v4831_v62  ;;  %v4877_v27 = vmul.f32 %v4853_v45, %v13991_v54 }
0x117a   : > { %v4856_v57 = vmul.f32 0.5, %v4832_v4  ;;  %v4878_v0 = vmul.f32 %v4854_v51, %v13995_v49 }
0x117b   : > { %v4879_v39 = vmul.f32 %v4855_v18, %v14001_v1 }
0x117c   : > { %v4642_v28 = vpop.f32.mrb[104].mxu1  ;;  %v4880_v25 = vmul.f32 %v4856_v57, %v14007_v48 }
0x117d   : > { %v14028_v3 = vadd.f32 %v4642_v28, %v13960_v47  ;;  %v4644_v16 = vpop.f32.mrb[105].mxu1  ;;  %v4899_v2 = vpack.c.bf16 %v4879_v39, %v4877_v27 }
0x117e   : > { %v14033_v15 = vadd.f32 %v4644_v16, %v13963_v6  ;;  %v4646_v61 = vpop.f32.mrb[106].mxu1  ;;  %v4900_v35 = vpack.c.bf16 %v4880_v25, %v4878_v0 }
0x117f   : > { %v4689_v13 = vmul.f32 %v14028_v3, %v14028_v3  ;;  %v14038_v54 = vadd.f32 %v4646_v61, %v13960_v47  ;;  %v4648_v1 = vpop.f32.mrb[107].mxu1 }
0x1180   : > { %v4690_v50 = vmul.f32 %v14033_v15, %v14033_v15  ;;  %v14043_v49 = vadd.f32 %v4648_v1, %v13963_v6  ;;  %5077 = vmatprep.mubr.bf16.mxu0 %v4900_v35 }
0x1181   : > { %v4713_v48 = vmul.f32 %v4689_v13, %v14028_v3  ;;  %v4691_v24 = vmul.f32 %v14038_v54, %v14038_v54  ;;  %5078 = vmatmul.mubr.bf16.gmra.mrb[96].mxu0 %v4899_v2 }
0x1182   : > { %v4714_v44 = vmul.f32 %v4690_v50, %v14033_v15  ;;  %v4692_v20 = vmul.f32 %v14043_v49, %v14043_v49 }
0x1183   : > { %v4737_v43 = vmul.f32 0.044715, %v4713_v48  ;;  %v4715_v59 = vmul.f32 %v4691_v24, %v14038_v54 }
0x1184   : > { %v4738_v12 = vmul.f32 0.044715, %v4714_v44  ;;  %v4716_v22 = vmul.f32 %v4692_v20, %v14043_v49  ;;  %v4652_v52 = vpop.f32.mrb[108].mxu1 }
0x1185   : > { %v4761_v9 = vadd.f32 %v4737_v43, %v14028_v3  ;;  %v4739_v60 = vmul.f32 0.044715, %v4715_v59  ;;  %v14055_v46 = vadd.f32 %v4652_v52, %v13960_v47  ;;  %v4654_v31 = vpop.f32.mrb[109].mxu1 }
0x1186   : > { %v4762_v11 = vadd.f32 %v4738_v12, %v14033_v15  ;;  %v4740_v37 = vmul.f32 0.044715, %v4716_v22  ;;  %v14059_v40 = vadd.f32 %v4654_v31, %v13963_v6  ;;  %v4656_v21 = vpop.f32.mrb[110].mxu1 }
0x1187   : > { %v4785_v34 = vmul.f32 0.7978846, %v4761_v9  ;;  %v4763_v17 = vadd.f32 %v4739_v60, %v14038_v54  ;;  %v4693_v5 = vmul.f32 %v14055_v46, %v14055_v46  ;;  %v14065_v26 = vadd.f32 %v4656_v21, %v13960_v47  ;;  %v4658_v29 = vpop.f32.mrb[111].mxu1 }
0x1188   : > { %v4786_v19 = vmul.f32 0.7978846, %v4762_v11  ;;  %v4764_v56 = vadd.f32 %v4740_v37, %v14043_v49  ;;  %v4694_v23 = vmul.f32 %v14059_v40, %v14059_v40  ;;  %v14071_v62 = vadd.f32 %v4658_v29, %v13963_v6 }
0x1189   : > { %11708 = vtanh.f32 %v4785_v34  ;;  %v4787_v45 = vmul.f32 0.7978846, %v4763_v17  ;;  %v4717_v4 = vmul.f32 %v4693_v5, %v14055_v46  ;;  %v4695_v51 = vmul.f32 %v14065_v26, %v14065_v26 }
0x118a   : > { %11710 = vtanh.f32 %v4786_v19  ;;  %v4788_v18 = vmul.f32 0.7978846, %v4764_v56  ;;  %v4718_v57 = vmul.f32 %v4694_v23, %v14059_v40  ;;  %v4696_v28 = vmul.f32 %v14071_v62, %v14071_v62 }
0x118b   : > { %11712 = vtanh.f32 %v4787_v45  ;;  %v4741_v27 = vmul.f32 0.044715, %v4717_v4  ;;  %v4719_v39 = vmul.f32 %v4695_v51, %v14065_v26 }
0x118c   : > { %v4742_v16 = vmul.f32 0.044715, %v4718_v57  ;;  %v4720_v0 = vmul.f32 %v4696_v28, %v14071_v62  ;;  %v4662_v25 = vpop.f32.mrb[112].mxu1  ;;  %11714 = vtanh.f32 %v4788_v18 }
0x118d   : > { %v4765_v61 = vadd.f32 %v4741_v27, %v14055_v46  ;;  %v4743_v2 = vmul.f32 0.044715, %v4719_v39  ;;  %v14083_v13 = vadd.f32 %v4662_v25, %v13960_v47  ;;  %v4664_v1 = vpop.f32.mrb[113].mxu1 }
0x118e   : > { %v4766_v35 = vadd.f32 %v4742_v16, %v14059_v40  ;;  %v4744_v50 = vmul.f32 0.044715, %v4720_v0  ;;  %v14087_v48 = vadd.f32 %v4664_v1, %v13963_v6  ;;  %v4666_v24 = vpop.f32.mrb[114].mxu1 }
0x118f   : > { %v4789_v44 = vmul.f32 0.7978846, %v4765_v61  ;;  %v4767_v20 = vadd.f32 %v4743_v2, %v14065_v26  ;;  %v4697_v43 = vmul.f32 %v14083_v13, %v14083_v13  ;;  %v14093_v59 = vadd.f32 %v4666_v24, %v13960_v47  ;;  %v4668_v12 = vpop.f32.mrb[115].mxu1 }
0x1190   : > { %v4790_v22 = vmul.f32 0.7978846, %v4766_v35  ;;  %v4768_v52 = vadd.f32 %v4744_v50, %v14071_v62  ;;  %v4698_v9 = vmul.f32 %v14087_v48, %v14087_v48  ;;  %v14099_v60 = vadd.f32 %v4668_v12, %v13963_v6 }
0x1191   : > { %11716 = vtanh.f32 %v4789_v44  ;;  %v4791_v31 = vmul.f32 0.7978846, %v4767_v20  ;;  %v4721_v11 = vmul.f32 %v4697_v43, %v14083_v13  ;;  %v4699_v37 = vmul.f32 %v14093_v59, %v14093_v59 }
0x1192   : > { %11718 = vtanh.f32 %v4790_v22  ;;  %v4792_v21 = vmul.f32 0.7978846, %v4768_v52  ;;  %v4722_v34 = vmul.f32 %v4698_v9, %v14087_v48  ;;  %v4700_v17 = vmul.f32 %v14099_v60, %v14099_v60 }
0x1193   : > { %v11709_v5 = vpop.eup %11708  ;;  %11720 = vtanh.f32 %v4791_v31  ;;  %v4745_v29 = vmul.f32 0.044715, %v4721_v11  ;;  %v4723_v19 = vmul.f32 %v4699_v37, %v14093_v59 }
0x1194   : > { %v11711_v56 = vpop.eup %11710  ;;  %11722 = vtanh.f32 %v4792_v21  ;;  %v4746_v23 = vmul.f32 0.044715, %v4722_v34  ;;  %v4724_v45 = vmul.f32 %v4700_v17, %v14099_v60  ;;  %v4672_v4 = vpop.f32.mrb[116].mxu1  ;;  %v4833_v51 = vadd.f32 1.0, %v11709_v5 }
0x1195   : > { %v11713_v18 = vpop.eup %11712  ;;  %v4769_v57 = vadd.f32 %v4745_v29, %v14083_v13  ;;  %v4747_v28 = vmul.f32 0.044715, %v4723_v19  ;;  %v14111_v27 = vadd.f32 %v4672_v4, %v13960_v47  ;;  %v4674_v39 = vpop.f32.mrb[117].mxu1  ;;  %v4834_v16 = vadd.f32 1.0, %v11711_v56 }
0x1196   : > { %v4770_v0 = vadd.f32 %v4746_v23, %v14087_v48  ;;  %v4748_v25 = vmul.f32 0.044715, %v4724_v45  ;;  %v14115_v61 = vadd.f32 %v4674_v39, %v13963_v6  ;;  %v4676_v2 = vpop.f32.mrb[118].mxu1  ;;  %v4835_v1 = vadd.f32 1.0, %v11713_v18  ;;  %v11715_v43 = vpop.eup %11714 }
0x1197   : > { %v4793_v35 = vmul.f32 0.7978846, %v4769_v57  ;;  %v4771_v50 = vadd.f32 %v4747_v28, %v14093_v59  ;;  %v4701_v24 = vmul.f32 %v14111_v27, %v14111_v27  ;;  %v14121_v44 = vadd.f32 %v4676_v2, %v13960_v47  ;;  %v4678_v20 = vpop.f32.mrb[119].mxu1 }
0x1198   : > { %v4794_v12 = vmul.f32 0.7978846, %v4770_v0  ;;  %v4772_v22 = vadd.f32 %v4748_v25, %v14099_v60  ;;  %v4702_v52 = vmul.f32 %v14115_v61, %v14115_v61  ;;  %v14127_v9 = vadd.f32 %v4678_v20, %v13963_v6 }
0x1199   : > { %11724 = vtanh.f32 %v4793_v35  ;;  %v4795_v31 = vmul.f32 0.7978846, %v4771_v50  ;;  %v4725_v11 = vmul.f32 %v4701_v24, %v14111_v27  ;;  %v4703_v37 = vmul.f32 %v14121_v44, %v14121_v44 }
0x119a   : > { %11726 = vtanh.f32 %v4794_v12  ;;  %v4796_v47 = vmul.f32 0.7978846, %v4772_v22  ;;  %v4726_v21 = vmul.f32 %v4702_v52, %v14115_v61  ;;  %v4704_v34 = vmul.f32 %v14127_v9, %v14127_v9 }
0x119b   : > { %v11717_v17 = vpop.eup %11716  ;;  %11728 = vtanh.f32 %v4795_v31  ;;  %v4749_v5 = vmul.f32 0.044715, %v4725_v11  ;;  %v4727_v6 = vmul.f32 %v4703_v37, %v14121_v44  ;;  %v4836_v29 = vadd.f32 1.0, %v11715_v43 }
0x119c   : > { %v11719_v19 = vpop.eup %11718  ;;  %11730 = vtanh.f32 %v4796_v47  ;;  %v4750_v56 = vmul.f32 0.044715, %v4726_v21  ;;  %v4728_v23 = vmul.f32 %v4704_v34, %v14127_v9  ;;  %v4858_v45 = vmul.f32 0.5, %v4834_v16 }
0x119d   : > { %v11721_v4 = vpop.eup %11720  ;;  %v4773_v18 = vadd.f32 %v4749_v5, %v14111_v27  ;;  %v4751_v57 = vmul.f32 0.044715, %v4727_v6  ;;  %v4860_v28 = vmul.f32 0.5, %v4836_v29  ;;  %v4857_v39 = vmul.f32 0.5, %v4833_v51 }
0x119e   : > { %v11723_v0 = vpop.eup %11722  ;;  %v4774_v25 = vadd.f32 %v4750_v56, %v14115_v61  ;;  %v4752_v2 = vmul.f32 0.044715, %v4728_v23  ;;  %v4882_v35 = vmul.f32 %v4858_v45, %v14033_v15  ;;  %v4859_v50 = vmul.f32 0.5, %v4835_v1 }
0x119f   : > { %v4797_v24 = vmul.f32 0.7978846, %v4773_v18  ;;  %v4775_v20 = vadd.f32 %v4751_v57, %v14121_v44  ;;  %v4884_v43 = vmul.f32 %v4860_v28, %v14043_v49  ;;  %v4881_v16 = vmul.f32 %v4857_v39, %v14028_v3 }
0x11a0   : > { %v4798_v12 = vmul.f32 0.7978846, %v4774_v25  ;;  %v4776_v22 = vadd.f32 %v4752_v2, %v14127_v9  ;;  %v4883_v52 = vmul.f32 %v4859_v50, %v14038_v54  ;;  %v4838_v51 = vadd.f32 1.0, %v11719_v19 }
0x11a1   : > { %11732 = vtanh.f32 %v4797_v24  ;;  %v4799_v31 = vmul.f32 0.7978846, %v4775_v20  ;;  %v4902_v11 = vpack.c.bf16 %v4884_v43, %v4882_v35  ;;  %v4840_v37 = vadd.f32 1.0, %v11723_v0 }
0x11a2   : > { %11734 = vtanh.f32 %v4798_v12  ;;  %v4800_v15 = vmul.f32 0.7978846, %v4776_v22  ;;  %v4901_v1 = vpack.c.bf16 %v4883_v52, %v4881_v16  ;;  %v4862_v47 = vmul.f32 0.5, %v4838_v51 }
0x11a3   : > { %v11725_v21 = vpop.eup %11724  ;;  %11736 = vtanh.f32 %v4799_v31  ;;  %5085 = vmatprep.mubr.bf16.mxu0 %v4902_v11  ;;  %v4864_v49 = vmul.f32 0.5, %v4840_v37  ;;  %v4837_v34 = vadd.f32 1.0, %v11717_v17  ;;  %v4839_v3 = vadd.f32 1.0, %v11721_v4 }
0x11a4   : > { %v11727_v5 = vpop.eup %11726  ;;  %11738 = vtanh.f32 %v4800_v15  ;;  %5086 = vmatmul.mubr.bf16.gmra.mrb[100].mxu0 %v4901_v1  ;;  %v4886_v54 = vmul.f32 %v4862_v47, %v14059_v40  ;;  %v4841_v6 = vadd.f32 1.0, %v11725_v21 }
0x11a5   : > { %v11729_v29 = vpop.eup %11728  ;;  %v4888_v19 = vmul.f32 %v4864_v49, %v14071_v62  ;;  %v4861_v56 = vmul.f32 0.5, %v4837_v34  ;;  %v4863_v23 = vmul.f32 0.5, %v4839_v3  ;;  %v4842_v45 = vadd.f32 1.0, %v11727_v5 }
0x11a6   : > { %v11731_v18 = vpop.eup %11730  ;;  %v4843_v57 = vadd.f32 1.0, %v11729_v29  ;;  %v4865_v28 = vmul.f32 0.5, %v4841_v6  ;;  %v14160_v6 = vld [vmem:[%s16090_s14] ss:$0 sm:$0xff] }
0x11a7   : > { %v4904_v39 = vpack.c.bf16 %v4888_v19, %v4886_v54  ;;  %v4885_v0 = vmul.f32 %v4861_v56, %v14055_v46  ;;  %v4887_v17 = vmul.f32 %v4863_v23, %v14065_v26  ;;  %v4844_v4 = vadd.f32 1.0, %v11731_v18 }
0x11a8   : > { %v4866_v25 = vmul.f32 0.5, %v4842_v45  ;;  %v4867_v2 = vmul.f32 0.5, %v4843_v57  ;;  %v4889_v50 = vmul.f32 %v4865_v28, %v14083_v13 }
0x11a9   : > { %5093 = vmatprep.mubr.bf16.mxu0 %v4904_v39  ;;  %v4903_v40 = vpack.c.bf16 %v4887_v17, %v4885_v0  ;;  %v4868_v35 = vmul.f32 0.5, %v4844_v4 }
0x11aa   : > { %v4891_v62 = vmul.f32 %v4867_v2, %v14093_v59  ;;  %v4890_v20 = vmul.f32 %v4866_v25, %v14087_v48 }
0x11ab   : > { %v11733_v24 = vpop.eup %11732  ;;  %v4892_v43 = vmul.f32 %v4868_v35, %v14099_v60 }
0x11ac   : > { %v11735_v16 = vpop.eup %11734  ;;  %5094 = vmatmul.mubr.bf16.gmra.mrb[104].mxu0 %v4903_v40  ;;  %v4905_v46 = vpack.c.bf16 %v4891_v62, %v4889_v50  ;;  %v4845_v12 = vadd.f32 1.0, %v11733_v24 }
0x11ad   : > { %v11737_v26 = vpop.eup %11736  ;;  %v4906_v22 = vpack.c.bf16 %v4892_v43, %v4890_v20  ;;  %v4846_v52 = vadd.f32 1.0, %v11735_v16 }
0x11ae   : > { %v11739_v51 = vpop.eup %11738  ;;  %v4847_v31 = vadd.f32 1.0, %v11737_v26  ;;  %v4869_v11 = vmul.f32 0.5, %v4845_v12 }
0x11af   : > { %5101 = vmatprep.mubr.bf16.mxu0 %v4906_v22  ;;  %v4848_v37 = vadd.f32 1.0, %v11739_v51  ;;  %v4870_v13 = vmul.f32 0.5, %v4846_v52 }
0x11b0   : > { %v4871_v15 = vmul.f32 0.5, %v4847_v31  ;;  %v4893_v1 = vmul.f32 %v4869_v11, %v14111_v27 }
0x11b1   : > { %v4872_v59 = vmul.f32 0.5, %v4848_v37  ;;  %v4894_v60 = vmul.f32 %v4870_v13, %v14115_v61 }
0x11b2   : > { %v4895_v48 = vmul.f32 %v4871_v15, %v14121_v44 }
0x11b3   : > { %v4896_v47 = vmul.f32 %v4872_v59, %v14127_v9 }
0x11b4   : > { %5102 = vmatmul.mubr.bf16.gmra.mrb[108].mxu0 %v4905_v46  ;;  %v4907_v21 = vpack.c.bf16 %v4895_v48, %v4893_v1 }
0x11b5   : > { %v4908_v49 = vpack.c.bf16 %v4896_v47, %v4894_v60 }
0x11b7   : > { %5109 = vmatprep.mubr.bf16.mxu0 %v4908_v49 }
0x11bc   : > { %5110 = vmatmul.mubr.bf16.gmra.mrb[112].mxu0 %v4907_v21 }
0x124c   : > { %v10228_v34 = vpop.f32.mrb[92].mxu0 }
0x124d   : > { %v10229_v3 = vpop.f32.mrb[93].mxu0 }
0x124e   : > { %v10230_v5 = vadd.f32 %v10229_v3, %v10228_v34  ;;  %v10231_v54 = vpop.f32.mrb[94].mxu0 }
0x124f   : > { %v10232_v27 = vpop.f32.mrb[95].mxu0 }
0x1250   : > { %v5118_v44 = vadd.f32 %v10230_v5, %v13696_v53  ;;  %v10233_v61 = vadd.f32 %v10232_v27, %v10231_v54 }
0x1252   : > { %v14164_v9 = vadd.f32 %v14160_v6, %v5118_v44  ;;  %v5119_v29 = vadd.f32 %v10233_v61, %v13702_v38 }
0x1254   : > { %16241 = vst [vmem:[#allocation28_spill] sm:$0xff] %v14164_v9  ;;  %v14168_v19 = vadd.f32 %v14160_v6, %v5119_v29  ;;  %v10234_v56 = vpop.f32.mrb[96].mxu0  ;;  %v5153_v23 = vsel %vm799_vm0, %v14164_v9, 0.0 }
0x1255   : > { %5154 = vadd.xlane.f32.xlu0 %v5153_v23  ;;  %v10235_v45 = vpop.f32.mrb[97].mxu0 }
0x1256   : > { %16242 = vst [vmem:[#allocation30_spill] sm:$0xff] %v14168_v19  ;;  %v10236_v18 = vadd.f32 %v10235_v45, %v10234_v56  ;;  %v10237_v57 = vpop.f32.mrb[98].mxu0  ;;  %v5156_v53 = vsel %vm799_vm0, %v14168_v19, 0.0 }
0x1257   : > { %5157 = vadd.xlane.f32.xlu1 %v5156_v53  ;;  %v10238_v28 = vpop.f32.mrb[99].mxu0 }
0x1258   : > { %v5120_v39 = vadd.f32 %v10236_v18, %v13699_v7  ;;  %v10239_v0 = vadd.f32 %v10238_v28, %v10237_v57 }
0x125a   : > { %v14176_v38 = vadd.f32 %v14160_v6, %v5120_v39  ;;  %v5121_v17 = vadd.f32 %v10239_v0, %v13708_v33 }
0x125c   : > { %16243 = vst [vmem:[#allocation27_spill] sm:$0xff] %v14176_v38  ;;  %v14180_v4 = vadd.f32 %v14160_v6, %v5121_v17  ;;  %v5159_v25 = vsel %vm799_vm0, %v14176_v38, 0.0 }
0x125d   : > { %5160 = vadd.xlane.f32.xlu0 %v5159_v25 }
0x125e   : > { %16244 = vst [vmem:[#allocation29_spill] sm:$0xff] %v14180_v4  ;;  %v5162_v2 = vsel %vm799_vm0, %v14180_v4, 0.0 }
0x125f   : > { %5163 = vadd.xlane.f32.xlu1 %v5162_v2 }
0x1277   : > { %v10240_v40 = vpop.f32.mrb[100].mxu0 }
0x1278   : > { %v10241_v35 = vpop.f32.mrb[101].mxu0 }
0x1279   : > { %v10242_v7 = vadd.f32 %v10241_v35, %v10240_v40  ;;  %v10243_v50 = vpop.f32.mrb[102].mxu0 }
0x127a   : > { %v10244_v62 = vpop.f32.mrb[103].mxu0 }
0x127b   : > { %v5122_v24 = vadd.f32 %v10242_v7, %v13716_v58  ;;  %v10245_v20 = vadd.f32 %v10244_v62, %v10243_v50 }
0x127d   : > { %v14188_v33 = vadd.f32 %v14160_v6, %v5122_v24  ;;  %v5123_v43 = vadd.f32 %v10245_v20, %v13722_v10 }
0x127f   : > { %16245 = vst [vmem:[#allocation31_spill] sm:$0xff] %v14188_v33  ;;  %v14192_v16 = vadd.f32 %v14160_v6, %v5123_v43  ;;  %v10246_v46 = vpop.f32.mrb[104].mxu0  ;;  %v5165_v12 = vsel %vm799_vm0, %v14188_v33, 0.0 }
0x1280   : > { %5166 = vadd.xlane.f32.xlu0 %v5165_v12  ;;  %v10247_v26 = vpop.f32.mrb[105].mxu0 }
0x1281   : > { %16246 = vst [vmem:[#allocation14_spill] sm:$0xff] %v14192_v16  ;;  %v10248_v22 = vadd.f32 %v10247_v26, %v10246_v46  ;;  %v10249_v52 = vpop.f32.mrb[106].mxu0  ;;  %v5168_v58 = vsel %vm799_vm0, %v14192_v16, 0.0 }
0x1282   : > { %5169 = vadd.xlane.f32.xlu1 %v5168_v58  ;;  %v10250_v51 = vpop.f32.mrb[107].mxu0  ;;  %v11409_v58 = vld [vmem:[%s16195_s1 + $0x54] ss:$8 sps:$4 sm:$0xff]  }
0x1283   : > { %v5124_v31 = vadd.f32 %v10248_v22, %v13720_v63  ;;  %v10251_v11 = vadd.f32 %v10250_v51, %v10249_v52  ;;  %v11406_v22 = vld [vmem:[%s16195_s1 + $0x44] ss:$8 sps:$4 sm:$0xff]   ;;  %v11404_v52 = vld [vmem:[%s16195_s1 + $0x40] ss:$8 sps:$4 sm:$0xff]   ;;  %v11407_v51 = vld [vmem:[%s16195_s1 + $0x50] ss:$8 sps:$4 sm:$0xff]  }
0x1284   : > { %5431 = vmatprep.subr.bf16.mxu1 %v11406_v22 }
0x1285   : > { %v14200_v10 = vadd.f32 %v14160_v6, %v5124_v31  ;;  %v5125_v37 = vadd.f32 %v10251_v11, %v13726_v42  ;;  %5432 = vmatpush1.bf16.msra.mxu1 %v11404_v52 }
0x1286   : > { %5433 = vmatprep.subr.bf16.mxu1 %v11409_v58 }
0x1287   : > { %16247 = vst [vmem:[#allocation12_spill] sm:$0xff] %v14200_v10  ;;  %v14204_v13 = vadd.f32 %v14160_v6, %v5125_v37  ;;  %v10252_v15 = vpop.f32.mrb[108].mxu0  ;;  %v5171_v59 = vsel %vm799_vm0, %v14200_v10, 0.0  ;;  %v11410_v37 = vld [vmem:[%s16195_s1 + $0x60] ss:$8 sps:$4 sm:$0xff]  }
0x1288   : > { %5172 = vadd.xlane.f32.xlu0 %v5171_v59  ;;  %v10253_v1 = vpop.f32.mrb[109].mxu0 }
0x1289   : > { %16248 = vst [vmem:[#allocation13_spill] sm:$0xff] %v14204_v13  ;;  %v10254_v48 = vadd.f32 %v10253_v1, %v10252_v15  ;;  %v10255_v60 = vpop.f32.mrb[110].mxu0  ;;  %v5174_v63 = vsel %vm799_vm0, %v14204_v13, 0.0  ;;  %5434 = vmatpush1.bf16.msra.mxu1 %v11407_v51  ;;  %v11412_v15 = vld [vmem:[%s16195_s1 + $0x64] ss:$8 sps:$4 sm:$0xff]  }
0x128a   : > { %5175 = vadd.xlane.f32.xlu1 %v5174_v63  ;;  %v10256_v47 = vpop.f32.mrb[111].mxu0  ;;  %v11415_v1 = vld [vmem:[%s16195_s1 + $0x74] ss:$8 sps:$4 sm:$0xff]   ;;  %5435 = vmatprep.subr.bf16.mxu1 %v11412_v15 }
0x128b   : > { %v5126_v21 = vadd.f32 %v10254_v48, %v13736_v41  ;;  %v10257_v49 = vadd.f32 %v10256_v47, %v10255_v60 }
0x128d   : > { %v14212_v42 = vadd.f32 %v14160_v6, %v5126_v21  ;;  %v5127_v34 = vadd.f32 %v10257_v49, %v13742_v55  ;;  %5436 = vmatpush1.bf16.msra.mxu1 %v11410_v37  ;;  %v11413_v21 = vld [vmem:[%s16195_s1 + $0x70] ss:$8 sps:$4 sm:$0xff]  }
0x128e   : > { %5437 = vmatprep.subr.bf16.mxu1 %v11415_v1 }
0x128f   : > { %16249 = vst [vmem:[#allocation15_spill] sm:$0xff] %v14212_v42  ;;  %v14216_v3 = vadd.f32 %v14160_v6, %v5127_v34  ;;  %v10258_v5 = vpop.f32.mrb[112].mxu0  ;;  %v5177_v54 = vsel %vm799_vm0, %v14212_v42, 0.0 }
0x1290   : > { %5178 = vadd.xlane.f32.xlu0 %v5177_v54  ;;  %v10259_v27 = vpop.f32.mrb[113].mxu0 }
0x1291   : > { %16250 = vst [vmem:[#allocation18_spill] sm:$0xff] %v14216_v3  ;;  %v10260_v44 = vadd.f32 %v10259_v27, %v10258_v5  ;;  %v10261_v61 = vpop.f32.mrb[114].mxu0  ;;  %v5180_v41 = vsel %vm799_vm0, %v14216_v3, 0.0  ;;  %5438 = vmatpush1.bf16.msra.mxu1 %v11413_v21 }
0x1292   : > { %5181 = vadd.xlane.f32.xlu1 %v5180_v41  ;;  %v10262_v29 = vpop.f32.mrb[115].mxu0 }
0x1293   : > { %v5128_v56 = vadd.f32 %v10260_v44, %v13740_v32  ;;  %v10263_v23 = vadd.f32 %v10262_v29, %v10261_v61 }
0x1295   : > { %v14224_v55 = vadd.f32 %v14160_v6, %v5128_v56  ;;  %v5129_v45 = vadd.f32 %v10263_v23, %v13746_v8 }
0x1297   : > { %16251 = vst [vmem:[#allocation16_spill] sm:$0xff] %v14224_v55  ;;  %v14228_v18 = vadd.f32 %v14160_v6, %v5129_v45  ;;  %v5183_v57 = vsel %vm799_vm0, %v14224_v55, 0.0 }
0x1298   : > { %5184 = vadd.xlane.f32.xlu0 %v5183_v57 }
0x1299   : > { %16252 = vst [vmem:[#allocation19_spill] sm:$0xff] %v14228_v18  ;;  %v5186_v53 = vsel %vm799_vm0, %v14228_v18, 0.0 }
0x129a   : > { %5187 = vadd.xlane.f32.xlu1 %v5186_v53 }
0x12e2   : > { %v5155_v28 = vpop.xlane.xlu0 %5154 }
0x12e3   : > { %v5189_v39 = vmul.f32 0.015625, %v5155_v28 }
0x12e4   : > { %v5158_v32 = vpop.xlane.xlu1 %5157 }
0x12e5   : > { %v14235_v0 = vsub.f32 %v14164_v9, %v5189_v39  ;;  %v5190_v17 = vmul.f32 0.015625, %v5158_v32 }
0x12e7   : > { %v14238_v8 = vsub.f32 %v14168_v19, %v5190_v17  ;;  %v5213_v6 = vmul.f32 %v14235_v0, %v14235_v0 }
0x12e9   : > { %v5225_v25 = vsel %vm799_vm0, %v5213_v6, 0.0  ;;  %v5214_v2 = vmul.f32 %v14238_v8, %v14238_v8 }
0x12ea   : > { %v5161_v40 = vpop.xlane.xlu0 %5160  ;;  %5226 = vadd.xlane.f32.xlu0 %v5225_v25 }
0x12eb   : > { %v5191_v35 = vmul.f32 0.015625, %v5161_v40  ;;  %v5228_v7 = vsel %vm799_vm0, %v5214_v2, 0.0 }
0x12ec   : > { %5229 = vadd.xlane.f32.xlu1 %v5228_v7  ;;  %v5164_v50 = vpop.xlane.xlu1 %5163 }
0x12ed   : > { %v14247_v62 = vsub.f32 %v14176_v38, %v5191_v35  ;;  %v5192_v24 = vmul.f32 0.015625, %v5164_v50 }
0x12ef   : > { %v14250_v20 = vsub.f32 %v14180_v4, %v5192_v24  ;;  %v5215_v43 = vmul.f32 %v14247_v62, %v14247_v62 }
0x12f1   : > { %v5231_v46 = vsel %vm799_vm0, %v5215_v43, 0.0  ;;  %v5216_v12 = vmul.f32 %v14250_v20, %v14250_v20 }
0x12f2   : > { %5232 = vadd.xlane.f32.xlu0 %v5231_v46 }
0x12f3   : > { %v5234_v26 = vsel %vm799_vm0, %v5216_v12, 0.0 }
0x12f4   : > { %5235 = vadd.xlane.f32.xlu1 %v5234_v26 }
0x130d   : > { %v5167_v31 = vpop.xlane.xlu0 %5166 }
0x130e   : > { %v5193_v11 = vmul.f32 0.015625, %v5167_v31 }
0x130f   : > { %v5170_v59 = vpop.xlane.xlu1 %5169 }
0x1310   : > { %v14280_v48 = vsub.f32 %v14188_v33, %v5193_v11  ;;  %v5194_v60 = vmul.f32 0.015625, %v5170_v59 }
0x1312   : > { %v14283_v63 = vsub.f32 %v14192_v16, %v5194_v60  ;;  %v5217_v47 = vmul.f32 %v14280_v48, %v14280_v48 }
0x1314   : > { %v5237_v49 = vsel %vm799_vm0, %v5217_v47, 0.0  ;;  %v5218_v34 = vmul.f32 %v14283_v63, %v14283_v63 }
0x1315   : > { %v5173_v5 = vpop.xlane.xlu0 %5172  ;;  %5238 = vadd.xlane.f32.xlu0 %v5237_v49 }
0x1316   : > { %v5195_v54 = vmul.f32 0.015625, %v5173_v5  ;;  %v5240_v27 = vsel %vm799_vm0, %v5218_v34, 0.0 }
0x1317   : > { %5241 = vadd.xlane.f32.xlu1 %v5240_v27  ;;  %v5176_v44 = vpop.xlane.xlu1 %5175 }
0x1318   : > { %v14295_v61 = vsub.f32 %v14200_v10, %v5195_v54  ;;  %v5196_v41 = vmul.f32 0.015625, %v5176_v44  ;;  %v14333_v54 = vld [vmem:[%s16196_s0 + $0x1] ss:$0 sm:$0xff] }
0x131a   : > { %v14298_v29 = vsub.f32 %v14204_v13, %v5196_v41  ;;  %v5219_v56 = vmul.f32 %v14295_v61, %v14295_v61 }
0x131c   : > { %v5243_v23 = vsel %vm799_vm0, %v5219_v56, 0.0  ;;  %v5220_v45 = vmul.f32 %v14298_v29, %v14298_v29 }
0x131d   : > { %v5179_v57 = vpop.xlane.xlu0 %5178  ;;  %5244 = vadd.xlane.f32.xlu0 %v5243_v23  ;;  %v14341_v23 = vld [vmem:[%s16198_s29 + $0x1] ss:$0 sm:$0xff] }
0x131e   : > { %v5197_v53 = vmul.f32 0.015625, %v5179_v57  ;;  %v5246_v28 = vsel %vm799_vm0, %v5220_v45, 0.0 }
0x131f   : > { %5247 = vadd.xlane.f32.xlu1 %v5246_v28  ;;  %v5182_v39 = vpop.xlane.xlu1 %5181 }
0x1320   : > { %v14307_v32 = vsub.f32 %v14212_v42, %v5197_v53  ;;  %v5198_v17 = vmul.f32 0.015625, %v5182_v39 }
0x1322   : > { %v14310_v6 = vsub.f32 %v14216_v3, %v5198_v17  ;;  %v5221_v25 = vmul.f32 %v14307_v32, %v14307_v32 }
0x1324   : > { %v5249_v2 = vsel %vm799_vm0, %v5221_v25, 0.0  ;;  %v5222_v40 = vmul.f32 %v14310_v6, %v14310_v6 }
0x1325   : > { %5250 = vadd.xlane.f32.xlu0 %v5249_v2  ;;  %v5185_v35 = vpop.xlane.xlu0 %5184 }
0x1326   : > { %v5199_v7 = vmul.f32 0.015625, %v5185_v35  ;;  %v5252_v50 = vsel %vm799_vm0, %v5222_v40, 0.0 }
0x1327   : > { %5253 = vadd.xlane.f32.xlu1 %v5252_v50  ;;  %v5188_v24 = vpop.xlane.xlu1 %5187 }
0x1328   : > { %v14319_v43 = vsub.f32 %v14224_v55, %v5199_v7  ;;  %v5200_v46 = vmul.f32 0.015625, %v5188_v24 }
0x132a   : > { %v14322_v12 = vsub.f32 %v14228_v18, %v5200_v46  ;;  %v5223_v26 = vmul.f32 %v14319_v43, %v14319_v43 }
0x132c   : > { %v5255_v22 = vsel %vm799_vm0, %v5223_v26, 0.0  ;;  %v5224_v52 = vmul.f32 %v14322_v12, %v14322_v12 }
0x132d   : > { %5256 = vadd.xlane.f32.xlu0 %v5255_v22 }
0x132e   : > { %v5258_v58 = vsel %vm799_vm0, %v5224_v52, 0.0 }
0x132f   : > { %5259 = vadd.xlane.f32.xlu1 %v5258_v58 }
0x1377   : > { %v5227_v51 = vpop.xlane.xlu0 %5226 }
0x1378   : > { %v5261_v31 = vmul.f32 0.015625, %v5227_v51 }
0x1379   : > { %v5230_v11 = vpop.xlane.xlu1 %5229 }
0x137a   : > { %v5273_v37 = vadd.f32 1e-06, %v5261_v31  ;;  %v5262_v15 = vmul.f32 0.015625, %v5230_v11 }
0x137c   : > { %11740 = vrsqrt.f32 %v5273_v37  ;;  %v5274_v59 = vadd.f32 1e-06, %v5262_v15 }
0x137e   : > { %11742 = vrsqrt.f32 %v5274_v59 }
0x137f   : > { %v5233_v1 = vpop.xlane.xlu0 %5232 }
0x1380   : > { %v5263_v60 = vmul.f32 0.015625, %v5233_v1 }
0x1381   : > { %v5236_v47 = vpop.xlane.xlu1 %5235 }
0x1382   : > { %v5275_v21 = vadd.f32 1e-06, %v5263_v60  ;;  %v5264_v49 = vmul.f32 0.015625, %v5236_v47 }
0x1384   : > { %11744 = vrsqrt.f32 %v5275_v21  ;;  %v5276_v34 = vadd.f32 1e-06, %v5264_v49 }
0x1386   : > { %v11741_v5 = vpop.eup %11740  ;;  %11746 = vrsqrt.f32 %v5276_v34 }
0x1387   : > { %v5297_v27 = vmul.f32 %v11741_v5, %v14235_v0 }
0x1388   : > { %v11743_v44 = vpop.eup %11742 }
0x1389   : > { %v5315_v41 = vmul.f32 %v14333_v54, %v5297_v27  ;;  %v5298_v56 = vmul.f32 %v11743_v44, %v14238_v8 }
0x138b   : > { %v5316_v45 = vmul.f32 %v14333_v54, %v5298_v56  ;;  %v5333_v57 = vadd.f32 %v14341_v23, %v5315_v41 }
0x138d   : > { %v5334_v53 = vadd.f32 %v14341_v23, %v5316_v45 }
0x138e   : > { %v11745_v28 = vpop.eup %11744 }
0x138f   : > { %v5345_v39 = vpack.c.bf16 %v5334_v53, %v5333_v57  ;;  %v5299_v0 = vmul.f32 %v11745_v28, %v14247_v62 }
0x1390   : > { %v11747_v17 = vpop.eup %11746 }
0x1391   : > { %9892 = vmatmul.mubr.msk.bf16.vlgmr.msra.gmra.mrb[120].mxu1 %vm799_vm0, %v5345_v39  ;;  %v5300_v8 = vmul.f32 %v11747_v17, %v14250_v20  ;;  %v5317_v25 = vmul.f32 %v14333_v54, %v5299_v0 }
0x1392   : > { %5473 = vmatprep.mubr.bf16.mxu1 %v16211_v36 }
0x1393   : > { %v5318_v2 = vmul.f32 %v14333_v54, %v5300_v8  ;;  %v5335_v40 = vadd.f32 %v14341_v23, %v5317_v25 }
0x1395   : > { %v5336_v35 = vadd.f32 %v14341_v23, %v5318_v2 }
0x1397   : > { %v5346_v7 = vpack.c.bf16 %v5336_v35, %v5335_v40 }
0x1399   : > { %9893 = vmatmul.mubr.msk.bf16.gmra.mrb[124].mxu1 %vm799_vm0, %v5346_v7 }
0x139a   : > { %5483 = vmatprep.mubr.bf16.mxu1 %v16211_v36 }
0x13a2   : > { %v5239_v62 = vpop.xlane.xlu0 %5238 }
0x13a3   : > { %v5265_v50 = vmul.f32 0.015625, %v5239_v62 }
0x13a4   : > { %v5242_v24 = vpop.xlane.xlu1 %5241 }
0x13a5   : > { %v5277_v46 = vadd.f32 1e-06, %v5265_v50  ;;  %v5266_v20 = vmul.f32 0.015625, %v5242_v24 }
0x13a7   : > { %11748 = vrsqrt.f32 %v5277_v46  ;;  %v5278_v26 = vadd.f32 1e-06, %v5266_v20 }
0x13a9   : > { %11750 = vrsqrt.f32 %v5278_v26 }
0x13aa   : > { %v5245_v22 = vpop.xlane.xlu0 %5244 }
0x13ab   : > { %v5267_v52 = vmul.f32 0.015625, %v5245_v22 }
0x13ac   : > { %v5248_v58 = vpop.xlane.xlu1 %5247 }
0x13ad   : > { %v5279_v51 = vadd.f32 1e-06, %v5267_v52  ;;  %v5268_v31 = vmul.f32 0.015625, %v5248_v58 }
0x13af   : > { %11752 = vrsqrt.f32 %v5279_v51  ;;  %v5280_v11 = vadd.f32 1e-06, %v5268_v31 }
0x13b1   : > { %v11749_v37 = vpop.eup %11748  ;;  %11754 = vrsqrt.f32 %v5280_v11 }
0x13b2   : > { %v5251_v15 = vpop.xlane.xlu0 %5250  ;;  %v5301_v59 = vmul.f32 %v11749_v37, %v14280_v48 }
0x13b3   : > { %v11751_v1 = vpop.eup %11750  ;;  %v5269_v60 = vmul.f32 0.015625, %v5251_v15 }
0x13b4   : > { %v5254_v47 = vpop.xlane.xlu1 %5253  ;;  %v5302_v21 = vmul.f32 %v11751_v1, %v14283_v63  ;;  %v5319_v49 = vmul.f32 %v14333_v54, %v5301_v59 }
0x13b5   : > { %v5281_v34 = vadd.f32 1e-06, %v5269_v60  ;;  %v5270_v5 = vmul.f32 0.015625, %v5254_v47 }
0x13b6   : > { %v5320_v27 = vmul.f32 %v14333_v54, %v5302_v21  ;;  %v5337_v41 = vadd.f32 %v14341_v23, %v5319_v49 }
0x13b7   : > { %11756 = vrsqrt.f32 %v5281_v34  ;;  %v5282_v44 = vadd.f32 1e-06, %v5270_v5 }
0x13b8   : > { %v5338_v56 = vadd.f32 %v14341_v23, %v5320_v27 }
0x13b9   : > { %v11753_v45 = vpop.eup %11752  ;;  %11758 = vrsqrt.f32 %v5282_v44 }
0x13ba   : > { %v5257_v48 = vpop.xlane.xlu0 %5256  ;;  %v5347_v57 = vpack.c.bf16 %v5338_v56, %v5337_v41  ;;  %v5303_v53 = vmul.f32 %v11753_v45, %v14295_v61 }
0x13bb   : > { %v11755_v28 = vpop.eup %11754  ;;  %v5271_v63 = vmul.f32 0.015625, %v5257_v48 }
0x13bc   : > { %9894 = vmatmul.mubr.msk.bf16.gmra.mrb[128].mxu1 %vm799_vm0, %v5347_v57  ;;  %v5260_v39 = vpop.xlane.xlu1 %5259  ;;  %v5304_v0 = vmul.f32 %v11755_v28, %v14298_v29  ;;  %v5321_v17 = vmul.f32 %v14333_v54, %v5303_v53 }
0x13bd   : > { %v5283_v8 = vadd.f32 1e-06, %v5271_v63  ;;  %v5272_v25 = vmul.f32 0.015625, %v5260_v39  ;;  %5493 = vmatprep.mubr.bf16.mxu1 %v16211_v36 }
0x13be   : > { %v5322_v2 = vmul.f32 %v14333_v54, %v5304_v0  ;;  %v5339_v35 = vadd.f32 %v14341_v23, %v5321_v17 }
0x13bf   : > { %11760 = vrsqrt.f32 %v5283_v8  ;;  %v5284_v40 = vadd.f32 1e-06, %v5272_v25 }
0x13c0   : > { %v5340_v61 = vadd.f32 %v14341_v23, %v5322_v2 }
0x13c1   : > { %v11757_v7 = vpop.eup %11756  ;;  %11762 = vrsqrt.f32 %v5284_v40 }
0x13c2   : > { %v5348_v62 = vpack.c.bf16 %v5340_v61, %v5339_v35  ;;  %v5305_v50 = vmul.f32 %v11757_v7, %v14307_v32 }
0x13c3   : > { %v11759_v29 = vpop.eup %11758 }
0x13c4   : > { %9895 = vmatmul.mubr.msk.bf16.gmra.mrb[132].mxu1 %vm799_vm0, %v5348_v62  ;;  %v5306_v24 = vmul.f32 %v11759_v29, %v14310_v6  ;;  %v5323_v46 = vmul.f32 %v14333_v54, %v5305_v50 }
0x13c5   : > { %5503 = vmatprep.mubr.bf16.mxu1 %v16211_v36 }
0x13c6   : > { %v5324_v20 = vmul.f32 %v14333_v54, %v5306_v24  ;;  %v5341_v26 = vadd.f32 %v14341_v23, %v5323_v46 }
0x13c8   : > { %v5342_v22 = vadd.f32 %v14341_v23, %v5324_v20 }
0x13c9   : > { %v11761_v52 = vpop.eup %11760 }
0x13ca   : > { %v5349_v58 = vpack.c.bf16 %v5342_v22, %v5341_v26  ;;  %v5307_v51 = vmul.f32 %v11761_v52, %v14319_v43  ;;  %v9883_v43 = vld [vmem:[%s16082_s6 + $0x2] sm:$0x3] }
0x13cb   : > { %v11763_v32 = vpop.eup %11762  ;;  %v5366_v1 = vrot.slane %v9883_v43, %v16239_v30  ;;  %v14392_v60 = vrot.slane %v9883_v43, %v16240_v14 }
0x13cc   : > { %9896 = vmatmul.mubr.msk.bf16.gmra.mrb[136].mxu1 %vm799_vm0, %v5349_v58  ;;  %v5308_v31 = vmul.f32 %v11763_v32, %v14322_v12  ;;  %v5325_v6 = vmul.f32 %v14333_v54, %v5307_v51 }
0x13cd   : > { %5513 = vmatprep.mubr.bf16.mxu1 %v16211_v36 }
0x13ce   : > { %v5326_v11 = vmul.f32 %v14333_v54, %v5308_v31  ;;  %v5343_v37 = vadd.f32 %v14341_v23, %v5325_v6 }
0x13d0   : > { %v5344_v15 = vadd.f32 %v14341_v23, %v5326_v11 }
0x13d2   : > { %v5350_v59 = vpack.c.bf16 %v5344_v15, %v5343_v37 }
0x13d4   : > { %9897 = vmatmul.mubr.msk.bf16.gmra.mrb[140].mxu1 %vm799_vm0, %v5350_v59 }
0x1464   : > { %v5465_v12 = vpop.f32.mrb[120].mxu1 }
0x1465   : > { %v5467_v47 = vpop.f32.mrb[121].mxu1  ;;  %v5466_v54 = vadd.f32 %v5465_v12, %v5366_v1 }
0x1466   : > { %v5469_v21 = vpop.f32.mrb[122].mxu1  ;;  %v5468_v23 = vadd.f32 %v5467_v47, %v14392_v60 }
0x1467   : > { %v5470_v49 = vadd.f32 %v5469_v21, %v5366_v1  ;;  %v5471_v34 = vpop.f32.mrb[123].mxu1 }
0x1468   : > { %v5472_v5 = vadd.f32 %v5471_v34, %v14392_v60 }
0x1469   : > { %v14396_v27 = vpack.c.bf16 %v5470_v49, %v5466_v54 }
0x146a   : > { %v14398_v44 = vpack.c.bf16 %v5472_v5, %v5468_v23 }
0x146b   : > { %5542 = vrot.lane.b32.xlu0 %v14396_v27, %s16253_s20  ;;  %10739 = vmatprep.mubr.msk.bf16.mxu0 %vm1293_vm1, %v14396_v27 }
0x146c   : > { %v5475_v41 = vpop.f32.mrb[124].mxu1 }
0x146d   : > { %v5476_v56 = vadd.f32 %v5475_v41, %v5366_v1  ;;  %v14404_v45 = vpop.f32.mrb[125].mxu1 }
0x146e   : > { %v5479_v48 = vpop.f32.mrb[126].mxu1 }
0x146f   : > { %v14406_v57 = vpack.c.bf16 %v5476_v56, %v5476_v56  ;;  %v5481_v53 = vpop.f32.mrb[127].mxu1  ;;  %v5480_v63 = vadd.f32 %v5479_v48, %v5366_v1 }
0x1470   : > { %v5482_v17 = vadd.f32 %v5481_v53, %v14392_v60 }
0x1471   : > { %5544 = vrot.lane.b32.xlu1 %v14406_v57, %s16253_s20 }
0x148f   : > { %v5485_v28 = vpop.f32.mrb[128].mxu1 }
0x1490   : > { %v5486_v39 = vadd.f32 %v5485_v28, %v5366_v1  ;;  %v5487_v0 = vpop.f32.mrb[129].mxu1 }
0x1491   : > { %v5488_v8 = vadd.f32 %v5487_v0, %v14392_v60  ;;  %v5489_v25 = vpop.f32.mrb[130].mxu1 }
0x1492   : > { %v14412_v2 = vpack.c.bf16 %v5486_v39, %v5480_v63  ;;  %v5490_v40 = vadd.f32 %v5489_v25, %v5366_v1  ;;  %v14414_v35 = vpop.f32.mrb[131].mxu1 }
0x1493   : > { %v14416_v61 = vpack.c.bf16 %v5488_v8, %v5482_v17 }
0x1494   : > { %5608 = vrot.lane.b32.xlu1 %v14412_v2, %s16253_s20  ;;  %v14420_v7 = vpack.c.bf16 %v5490_v40, %v5490_v40 }
0x1497   : > { %v5495_v62 = vpop.f32.mrb[132].mxu1 }
0x1498   : > { %5610 = vrot.lane.b32.xlu1 %v14420_v7, %s16253_s20  ;;  %v5497_v50 = vpop.f32.mrb[133].mxu1  ;;  %v5496_v24 = vadd.f32 %v5495_v62, %v5366_v1  ;;  %v5478_v62 = vadd.f32 %v14404_v45, %v14392_v60 }
0x1499   : > { %v5499_v29 = vpop.f32.mrb[134].mxu1  ;;  %v5498_v26 = vadd.f32 %v5497_v50, %v14392_v60 }
0x149a   : > { %v5500_v46 = vadd.f32 %v5499_v29, %v5366_v1  ;;  %v5501_v20 = vpop.f32.mrb[135].mxu1 }
0x149b   : > { %v5502_v22 = vadd.f32 %v5501_v20, %v14392_v60 }
0x149c   : > { %v14426_v52 = vpack.c.bf16 %v5500_v46, %v5496_v24  ;;  %v14479_v24 = vpack.c.bf16 %v5478_v62, %v5478_v62 }
0x149d   : > { %v14428_v58 = vpack.c.bf16 %v5502_v22, %v5498_v26 }
0x149e   : > { %5674 = vrot.lane.b32.xlu0 %v14426_v52, %s16253_s20  ;;  %10755 = vmatprep.mubr.msk.bf16.mxu1 %vm1293_vm1, %v14426_v52  ;;  %v5963_v45 = vsel %vm1713_vm2, %v14479_v24, 0 }
0x149f   : > { %v5505_v51 = vpop.f32.mrb[136].mxu1 }
0x14a0   : > { %v5506_v32 = vadd.f32 %v5505_v51, %v5366_v1  ;;  %v14434_v31 = vpop.f32.mrb[137].mxu1 }
0x14a1   : > { %v5509_v6 = vpop.f32.mrb[138].mxu1  ;;  %v5508_v26 = vadd.f32 %v14434_v31, %v14392_v60 }
0x14a2   : > { %v14436_v11 = vpack.c.bf16 %v5506_v32, %v5506_v32  ;;  %v5511_v37 = vpop.f32.mrb[139].mxu1  ;;  %v5510_v59 = vadd.f32 %v5509_v6, %v5366_v1 }
0x14a3   : > { %v5512_v47 = vadd.f32 %v5511_v37, %v14392_v60  ;;  %v14494_v22 = vpack.c.bf16 %v5508_v26, %v5508_v26 }
0x14a4   : > { %5676 = vrot.lane.b32.xlu0 %v14436_v11, %s16253_s20 }
0x14a5   : > { %v6077_v51 = vsel %vm1713_vm2, %v14494_v22, 0 }
0x14a7   : > { %v5515_v15 = vpop.f32.mrb[140].mxu1 }
0x14a8   : > { %v5516_v43 = vadd.f32 %v5515_v15, %v5366_v1  ;;  %v5517_v12 = vpop.f32.mrb[141].mxu1 }
0x14a9   : > { %v5518_v21 = vadd.f32 %v5517_v12, %v14392_v60  ;;  %v5519_v54 = vpop.f32.mrb[142].mxu1 }
0x14aa   : > { %v14442_v49 = vpack.c.bf16 %v5516_v43, %v5510_v59  ;;  %v5520_v34 = vadd.f32 %v5519_v54, %v5366_v1  ;;  %v14444_v23 = vpop.f32.mrb[143].mxu1 }
0x14ab   : > { %v14446_v5 = vpack.c.bf16 %v5518_v21, %v5512_v47 }
0x14ac   : > { %5740 = vrot.lane.b32.xlu1 %v14442_v49, %s16253_s20  ;;  %v14450_v41 = vpack.c.bf16 %v5520_v34, %v5520_v34 }
0x14b0   : > { %5742 = vrot.lane.b32.xlu1 %v14450_v41, %s16253_s20 }
0x14dd   : > { %v5543_v56 = vpop.permute.xlu0 %5542 }
0x14de   : > { %11071 = vmatprep.subr.msk.bf16.mxu0 %vm1293_vm1, %v5543_v56  ;;  %v5553_v48 = vsel %vm1293_vm1, %v5543_v56, 0 }
0x14df   : > { %10736 = vmatpush3.bf16.xpose.msra.mxu0 %v5553_v48 }
0x14e3   : > { %v5545_v53 = vpop.permute.xlu1 %5544 }
0x14e4   : > { %11072 = vmatprep.subr.msk.bf16.mxu0 %vm1293_vm1, %v5545_v53  ;;  %v5556_v1 = vsel %vm1293_vm1, %v5545_v53, 0 }
0x14e7   : > { %10738 = vmatpush3.bf16.xpose.msra.mxu0 %v5556_v1 }
0x14ee   : > { %10740 = vmatmul.mubr.msk.bf16.vlgmr.msra.gmra.mrb[116].mxu0 %vm1293_vm1, %v14406_v57 }
0x14ef   : > { %10747 = vmatprep.mubr.msk.bf16.mxu0 %vm1293_vm1, %v14412_v2 }
0x1506   : > { %v5609_v28 = vpop.permute.xlu1 %5608 }
0x1507   : > { %11073 = vmatprep.subr.msk.bf16.mxu0 %vm1293_vm1, %v5609_v28  ;;  %v5619_v63 = vsel %vm1293_vm1, %v5609_v28, 0 }
0x1508   : > { %10744 = vmatpush3.bf16.xpose.msra.mxu0 %v5619_v63 }
0x150a   : > { %v5611_v39 = vpop.permute.xlu1 %5610 }
0x150b   : > { %11074 = vmatprep.subr.msk.bf16.mxu0 %vm1293_vm1, %v5611_v39  ;;  %v5622_v0 = vsel %vm1293_vm1, %v5611_v39, 0 }
0x1510   : > { %v5675_v17 = vpop.permute.xlu0 %5674  ;;  %10746 = vmatpush3.bf16.xpose.msra.mxu0 %v5622_v0 }
0x1511   : > { %11075 = vmatprep.subr.msk.bf16.mxu1 %vm1293_vm1, %v5675_v17  ;;  %v5685_v8 = vsel %vm1293_vm1, %v5675_v17, 0 }
0x1512   : > { %10752 = vmatpush3.bf16.xpose.msra.mxu1 %v5685_v8 }
0x1516   : > { %v5677_v25 = vpop.permute.xlu0 %5676 }
0x1517   : > { %10748 = vmatmul.mubr.msk.bf16.vlgmr.msra.gmra.mrb[120].mxu0 %vm1293_vm1, %v14420_v7  ;;  %11076 = vmatprep.subr.msk.bf16.mxu1 %vm1293_vm1, %v5677_v25  ;;  %v5688_v40 = vsel %vm1293_vm1, %v5677_v25, 0 }
0x1518   : > { %10763 = vmatprep.mubr.msk.bf16.mxu0 %vm1293_vm1, %v14442_v49 }
0x151a   : > { %10754 = vmatpush3.bf16.xpose.msra.mxu1 %v5688_v40 }
0x151b   : > { %10767 = vmatprep.subr.bf16.mxu1 %v14398_v44 }
0x151e   : > { %v5741_v50 = vpop.permute.xlu1 %5740 }
0x151f   : > { %11077 = vmatprep.subr.msk.bf16.mxu0 %vm1293_vm1, %v5741_v50  ;;  %v5751_v29 = vsel %vm1293_vm1, %v5741_v50, 0 }
0x1520   : > { %10760 = vmatpush3.bf16.xpose.msra.mxu0 %v5751_v29 }
0x1521   : > { %10756 = vmatmul.mubr.msk.bf16.vlgmr.msra.gmra.mrb[144].mxu1 %vm1293_vm1, %v14436_v11 }
0x1522   : > { %10768 = vmatpush3.bf16.msra.mxu1 %v14398_v44  ;;  %v5743_v46 = vpop.permute.xlu1 %5742 }
0x1523   : > { %11078 = vmatprep.subr.msk.bf16.mxu0 %vm1293_vm1, %v5743_v46  ;;  %11079 = vmatprep.subr.msk.bf16.mxu1 %vm1713_vm2, %v14479_v24  ;;  %v5754_v20 = vsel %vm1293_vm1, %v5743_v46, 0 }
0x1526   : > { %10770 = vmatpush3.bf16.msra.mxu1 %v5963_v45 }
0x1527   : > { %10775 = vmatprep.subr.bf16.mxu1 %v14416_v61 }
0x1528   : > { %10762 = vmatpush3.bf16.xpose.msra.mxu0 %v5754_v20 }
0x1529   : > { %10783 = vmatprep.subr.bf16.mxu0 %v14428_v58 }
0x152f   : > { %10764 = vmatmul.mubr.msk.bf16.vlgmr.msra.gmra.mrb[124].mxu0 %vm1293_vm1, %v14450_v41 }
0x1530   : > { %10784 = vmatpush3.bf16.msra.mxu0 %v14428_v58 }
0x1531   : > { %11081 = vmatprep.subr.msk.bf16.mxu0 %vm1713_vm2, %v14494_v22 }
0x1534   : > { %10786 = vmatpush3.bf16.msra.mxu0 %v6077_v51 }
0x15c1   : > { %v10741_v32 = vpop.f32.mrb[116].mxu0 }
0x15c2   : > { %v5592_v6 = vpop.f32.mrb[117].mxu0  ;;  %v5806_v12 = vsel %vm663_vm3, %v10741_v32, -1e+30 }
0x15c3   : > { %v5804_v15 = vsel %vm663_vm3, %v5592_v6, -1e+30  ;;  %v10742_v31 = vpop.f32.mrb[118].mxu0  ;;  %v5822_v54 = vsel %vm1566_vm4, %v5806_v12, -inf }
0x15c4   : > { %v5816_v59 = vsel %vm1566_vm4, %v5804_v15, -inf  ;;  %v5595_v43 = vpop.f32.mrb[119].mxu0 }
0x15c5   : > { %v5805_v47 = vsel %vm663_vm3, %v5595_v43, -1e+30  ;;  %5817 = vmax.xlane.f32.xlu0 %v5816_v59 }
0x15c6   : > { %v5819_v21 = vsel %vm1566_vm4, %v5805_v47, -inf }
0x15c7   : > { %5820 = vmax.xlane.f32.xlu1 %v5819_v21 }
0x15c9   : > { %5823 = vmax.xlane.f32.xlu0 %v5822_v54 }
0x15ea   : > { %v10749_v34 = vpop.f32.mrb[120].mxu0 }
0x15eb   : > { %v14514_v56 = vsel %vm663_vm3, %v10749_v34, -1e+30  ;;  %v5658_v48 = vpop.f32.mrb[121].mxu0 }
0x15ec   : > { %v5831_v53 = vsel %vm1566_vm4, %v14514_v56, -inf  ;;  %v5807_v1 = vsel %vm663_vm3, %v5658_v48, -1e+30  ;;  %v10750_v28 = vpop.f32.mrb[122].mxu0 }
0x15ed   : > { %v5825_v63 = vsel %vm1566_vm4, %v5807_v1, -inf  ;;  %5832 = vmax.xlane.f32.xlu1 %v5831_v53  ;;  %v5661_v39 = vpop.f32.mrb[123].mxu0 }
0x15ee   : > { %v5808_v0 = vsel %vm663_vm3, %v5661_v39, -1e+30  ;;  %5826 = vmax.xlane.f32.xlu0 %v5825_v63 }
0x15ef   : > { %v5828_v17 = vsel %vm1566_vm4, %v5808_v0, -inf }
0x15f2   : > { %5829 = vmax.xlane.f32.xlu0 %v5828_v17 }
0x15f4   : > { %v10757_v8 = vpop.f32.mrb[144].mxu1 }
0x15f5   : > { %v5812_v25 = vsel %vm663_vm3, %v10757_v8, -1e+30  ;;  %v5724_v40 = vpop.f32.mrb[145].mxu1 }
0x15f6   : > { %v5840_v62 = vsel %vm1566_vm4, %v5812_v25, -inf  ;;  %v10758_v50 = vpop.f32.mrb[146].mxu1  ;;  %v14529_v29 = vsel %vm663_vm3, %v5724_v40, -1e+30 }
0x15f7   : > { %v5727_v46 = vpop.f32.mrb[147].mxu1  ;;  %5841 = vmax.xlane.f32.xlu0 %v5840_v62  ;;  %v5834_v26 = vsel %vm1566_vm4, %v14529_v29, -inf }
0x15f8   : > { %v5811_v45 = vsel %vm663_vm3, %v5727_v46, -1e+30 }
0x15f9   : > { %v5837_v20 = vsel %vm1566_vm4, %v5811_v45, -inf }
0x15fa   : > { %5838 = vmax.xlane.f32.xlu1 %v5837_v20 }
0x15fb   : > { %5835 = vmax.xlane.f32.xlu0 %v5834_v26 }
0x1602   : > { %v10765_v51 = vpop.f32.mrb[124].mxu0 }
0x1603   : > { %v5790_v32 = vpop.f32.mrb[125].mxu0  ;;  %v14544_v21 = vsel %vm663_vm3, %v10765_v51, -1e+30 }
0x1604   : > { %v14538_v6 = vsel %vm663_vm3, %v5790_v32, -1e+30  ;;  %v10766_v31 = vpop.f32.mrb[126].mxu0  ;;  %v5849_v48 = vsel %vm1566_vm4, %v14544_v21, -inf }
0x1605   : > { %v5843_v59 = vsel %vm1566_vm4, %v14538_v6, -inf  ;;  %v5793_v43 = vpop.f32.mrb[127].mxu0 }
0x1606   : > { %v14548_v54 = vsel %vm663_vm3, %v5793_v43, -1e+30  ;;  %5844 = vmax.xlane.f32.xlu1 %v5843_v59 }
0x1607   : > { %v5846_v34 = vsel %vm1566_vm4, %v14548_v54, -inf }
0x1608   : > { %5847 = vmax.xlane.f32.xlu0 %v5846_v34 }
0x160a   : > { %5850 = vmax.xlane.f32.xlu1 %v5849_v48 }
0x1652   : > { %v5818_v53 = vpop.xlane.xlu0 %5817 }
0x1653   : > { %v5852_v63 = vsub.f32 %v5804_v15, %v5818_v53 }
0x1654   : > { %v5821_v28 = vpop.xlane.xlu1 %5820 }
0x1655   : > { %v5853_v39 = vsub.f32 %v5805_v47, %v5821_v28  ;;  %v5864_v62 = vmul.f32 1.442695, %v5852_v63 }
0x1656   : > { %v5824_v17 = vpop.xlane.xlu0 %5823 }
0x1657   : > { %v5866_v8 = vmul.f32 1.442695, %v5853_v39  ;;  %v5854_v40 = vsub.f32 %v5806_v12, %v5824_v17 }
0x1659   : > { %11764 = vpow2.f32 %v5866_v8  ;;  %v5868_v50 = vmul.f32 1.442695, %v5854_v40 }
0x165b   : > { %11766 = vpow2.f32 %v5868_v50 }
0x165c   : > { %11768 = vpow2.f32 %v5864_v62 }
0x1663   : > { %v14554_v46 = vpop.eup %11764 }
0x1664   : > { %v5891_v20 = vsel %vm1566_vm4, %v14554_v46, 0.0 }
0x1665   : > { %v14558_v26 = vpop.eup %11766  ;;  %5892 = vadd.xlane.f32.xlu1 %v5891_v20 }
0x1666   : > { %v5894_v15 = vsel %vm1566_vm4, %v14558_v26, 0.0  ;;  %v14562_v47 = vpop.eup %11768 }
0x1667   : > { %5895 = vadd.xlane.f32.xlu0 %v5894_v15  ;;  %v5888_v12 = vsel %vm1566_vm4, %v14562_v47, 0.0 }
0x166b   : > { %5889 = vadd.xlane.f32.xlu0 %v5888_v12 }
0x167a   : > { %v5833_v51 = vpop.xlane.xlu1 %5832 }
0x167b   : > { %v5857_v32 = vsub.f32 %v14514_v56, %v5833_v51  ;;  %v5827_v31 = vpop.xlane.xlu0 %5826 }
0x167c   : > { %v5855_v59 = vsub.f32 %v5807_v1, %v5827_v31 }
0x167d   : > { %v5874_v43 = vmul.f32 1.442695, %v5857_v32 }
0x167e   : > { %v5870_v34 = vmul.f32 1.442695, %v5855_v59 }
0x167f   : > { %11770 = vpow2.f32 %v5874_v43  ;;  %v5830_v48 = vpop.xlane.xlu0 %5829 }
0x1680   : > { %v5856_v53 = vsub.f32 %v5808_v0, %v5830_v48  ;;  %11772 = vpow2.f32 %v5870_v34 }
0x1682   : > { %v5872_v28 = vmul.f32 1.442695, %v5856_v53 }
0x1684   : > { %11774 = vpow2.f32 %v5872_v28  ;;  %v5842_v63 = vpop.xlane.xlu0 %5841 }
0x1685   : > { %v5860_v39 = vsub.f32 %v5812_v25, %v5842_v63 }
0x1687   : > { %v5880_v17 = vmul.f32 1.442695, %v5860_v39  ;;  %v5839_v8 = vpop.xlane.xlu1 %5838 }
0x1688   : > { %v5859_v40 = vsub.f32 %v5811_v45, %v5839_v8  ;;  %v5836_v62 = vpop.xlane.xlu0 %5835 }
0x1689   : > { %v14567_v50 = vpop.eup %11770  ;;  %11776 = vpow2.f32 %v5880_v17  ;;  %v5858_v56 = vsub.f32 %v14529_v29, %v5836_v62 }
0x168a   : > { %v5878_v1 = vmul.f32 1.442695, %v5859_v40  ;;  %v5903_v20 = vsel %vm1566_vm4, %v14567_v50, 0.0  ;;  %v14572_v15 = vpop.eup %11772 }
0x168b   : > { %v5876_v0 = vmul.f32 1.442695, %v5858_v56  ;;  %5904 = vadd.xlane.f32.xlu1 %v5903_v20  ;;  %v5897_v45 = vsel %vm1566_vm4, %v14572_v15, 0.0 }
0x168c   : > { %11778 = vpow2.f32 %v5878_v1 }
0x168d   : > { %11780 = vpow2.f32 %v5876_v0 }
0x168e   : > { %v14574_v25 = vpop.eup %11774 }
0x168f   : > { %5898 = vadd.xlane.f32.xlu1 %v5897_v45  ;;  %v5900_v12 = vsel %vm1566_vm4, %v14574_v25, 0.0 }
0x1690   : > { %5901 = vadd.xlane.f32.xlu0 %v5900_v12 }
0x1693   : > { %v14580_v29 = vpop.eup %11776  ;;  %v5845_v51 = vpop.xlane.xlu1 %5844 }
0x1694   : > { %v5912_v32 = vsel %vm1566_vm4, %v14580_v29, 0.0  ;;  %v5861_v43 = vsub.f32 %v14538_v6, %v5845_v51 }
0x1695   : > { %5913 = vadd.xlane.f32.xlu0 %v5912_v32  ;;  %v5848_v31 = vpop.xlane.xlu0 %5847 }
0x1696   : > { %v14584_v59 = vpop.eup %11778  ;;  %v5862_v34 = vsub.f32 %v14548_v54, %v5848_v31  ;;  %v5882_v8 = vmul.f32 1.442695, %v5861_v43 }
0x1697   : > { %v14588_v48 = vpop.eup %11780  ;;  %v5851_v53 = vpop.xlane.xlu1 %5850  ;;  %v5909_v28 = vsel %vm1566_vm4, %v14584_v59, 0.0 }
0x1698   : > { %v5884_v63 = vmul.f32 1.442695, %v5862_v34  ;;  %v5863_v39 = vsub.f32 %v14544_v21, %v5851_v53  ;;  %5910 = vadd.xlane.f32.xlu1 %v5909_v28  ;;  %v5906_v17 = vsel %vm1566_vm4, %v14588_v48, 0.0  ;;  %v5492_v53 = vadd.f32 %v14414_v35, %v14392_v60 }
0x1699   : > { %5907 = vadd.xlane.f32.xlu0 %v5906_v17 }
0x169a   : > { %11782 = vpow2.f32 %v5884_v63  ;;  %v5886_v40 = vmul.f32 1.442695, %v5863_v39  ;;  %v14645_v39 = vpack.c.bf16 %v5492_v53, %v5492_v53 }
0x169c   : > { %11784 = vpow2.f32 %v5886_v40 }
0x169d   : > { %11786 = vpow2.f32 %v5882_v8 }
0x16a4   : > { %v14595_v6 = vpop.eup %11782 }
0x16a5   : > { %v5918_v54 = vsel %vm1566_vm4, %v14595_v6, 0.0 }
0x16a6   : > { %v14599_v62 = vpop.eup %11784  ;;  %5919 = vadd.xlane.f32.xlu0 %v5918_v54 }
0x16a7   : > { %v5921_v21 = vsel %vm1566_vm4, %v14599_v62, 0.0  ;;  %v14603_v56 = vpop.eup %11786 }
0x16a8   : > { %5922 = vadd.xlane.f32.xlu1 %v5921_v21  ;;  %v5915_v1 = vsel %vm1566_vm4, %v14603_v56, 0.0 }
0x16ac   : > { %5916 = vadd.xlane.f32.xlu1 %v5915_v1 }
0x16bc   : > { %6188 = vrot.lane.b32.xlu0 %v14396_v27, %s16255_s23 }
0x16bd   : > { %6256 = vrot.lane.b32.xlu1 %v14412_v2, %s16255_s23 }
0x16c0   : > { %6184 = vrot.lane.b32.xlu0 %v14396_v27, %s16256_s26 }
0x16c1   : > { %6190 = vrot.lane.b32.xlu1 %v14406_v57, %s16255_s23 }
0x16c4   : > { %6186 = vrot.lane.b32.xlu0 %v14406_v57, %s16256_s26 }
0x16c5   : > { %6258 = vrot.lane.b32.xlu1 %v14420_v7, %s16255_s23 }
0x16c8   : > { %6392 = vrot.lane.b32.xlu0 %v14442_v49, %s16255_s23 }
0x16c9   : > { %6324 = vrot.lane.b32.xlu1 %v14426_v52, %s16255_s23 }
0x16cc   : > { %6326 = vrot.lane.b32.xlu0 %v14436_v11, %s16255_s23 }
0x16cd   : > { %6252 = vrot.lane.b32.xlu1 %v14412_v2, %s16256_s26 }
0x16d0   : > { %6320 = vrot.lane.b32.xlu0 %v14426_v52, %s16256_s26 }
0x16d1   : > { %6254 = vrot.lane.b32.xlu1 %v14420_v7, %s16256_s26 }
0x16d4   : > { %6388 = vrot.lane.b32.xlu0 %v14442_v49, %s16256_s26 }
0x16d5   : > { %6394 = vrot.lane.b32.xlu1 %v14450_v41, %s16255_s23 }
0x16d9   : > { %6322 = vrot.lane.b32.xlu1 %v14436_v11, %s16256_s26 }
0x16dd   : > { %6390 = vrot.lane.b32.xlu1 %v14450_v41, %s16256_s26 }
0x16f2   : > { %v5893_v20 = vpop.xlane.xlu1 %5892 }
0x16f4   : > { %v5896_v0 = vpop.xlane.xlu0 %5895 }
0x16f5   : > { %11788 = vrcp.f32 %v5896_v0 }
0x16f6   : > { %11790 = vrcp.f32 %v5893_v20 }
0x16f8   : > { %v5890_v45 = vpop.xlane.xlu0 %5889 }
0x16f9   : > { %11792 = vrcp.f32 %v5890_v45 }
0x16ff   : > { %v11789_v12 = vpop.eup %11788 }
0x1700   : > { %v11791_v51 = vpop.eup %11790  ;;  %v5938_v31 = vmul.f32 %v11789_v12, %v14558_v26  ;;  %v6020_v26 = vsel %vm1713_vm2, %v14645_v39, 0  ;;  %v5522_v12 = vadd.f32 %v14444_v23, %v14392_v60 }
0x1701   : > { %v5937_v34 = vmul.f32 %v11791_v51, %v14554_v46 }
0x1702   : > { %v5949_v63 = vpack.c.bf16 %v5938_v31, %v5938_v31 }
0x1703   : > { %v11793_v32 = vpop.eup %11792 }
0x1704   : > { %v5936_v43 = vmul.f32 %v11793_v32, %v14562_v47 }
0x1706   : > { %v5948_v28 = vpack.c.bf16 %v5937_v34, %v5936_v43  ;;  %v14660_v43 = vpack.c.bf16 %v5522_v12, %v5522_v12 }
0x1708   : > { %10771 = vmatprep.mubr.msk.bf16.mxu1 %vm1566_vm4, %v5948_v28  ;;  %v6134_v23 = vsel %vm1713_vm2, %v14660_v43, 0 }
0x1709   : > { %10772 = vmatmul.mubr.msk.bf16.vlgmr.msra.gmra.mrb[148].mxu1 %vm1566_vm4, %v5949_v63 }
0x170a   : > { %10776 = vmatpush3.bf16.msra.mxu1 %v14416_v61 }
0x170b   : > { %11080 = vmatprep.subr.msk.bf16.mxu1 %vm1713_vm2, %v14645_v39 }
0x170e   : > { %10778 = vmatpush3.bf16.msra.mxu1 %v6020_v26 }
0x170f   : > { %10791 = vmatprep.subr.bf16.mxu1 %v14446_v5 }
0x1718   : > { %v5905_v35 = vpop.xlane.xlu1 %5904 }
0x1719   : > { %11794 = vrcp.f32 %v5905_v35 }
0x171c   : > { %v5899_v46 = vpop.xlane.xlu1 %5898 }
0x171d   : > { %11796 = vrcp.f32 %v5899_v46  ;;  %v5902_v47 = vpop.xlane.xlu0 %5901 }
0x171e   : > { %11798 = vrcp.f32 %v5902_v47 }
0x1722   : > { %v5914_v17 = vpop.xlane.xlu0 %5913 }
0x1723   : > { %11800 = vrcp.f32 %v5914_v17  ;;  %v11795_v8 = vpop.eup %11794 }
0x1724   : > { %v5941_v0 = vmul.f32 %v11795_v8, %v14567_v50 }
0x1725   : > { %v5911_v40 = vpop.xlane.xlu1 %5910 }
0x1726   : > { %11802 = vrcp.f32 %v5911_v40  ;;  %v5908_v54 = vpop.xlane.xlu0 %5907  ;;  %v5951_v32 = vpack.c.bf16 %v5941_v0, %v5941_v0 }
0x1727   : > { %v11797_v21 = vpop.eup %11796  ;;  %11804 = vrcp.f32 %v5908_v54 }
0x1728   : > { %v11799_v1 = vpop.eup %11798  ;;  %v5939_v20 = vmul.f32 %v11797_v21, %v14572_v15 }
0x1729   : > { %v5940_v45 = vmul.f32 %v11799_v1, %v14574_v25 }
0x172b   : > { %v5950_v51 = vpack.c.bf16 %v5940_v45, %v5939_v20 }
0x172d   : > { %10779 = vmatprep.mubr.msk.bf16.mxu1 %vm1566_vm4, %v5950_v51  ;;  %v11801_v31 = vpop.eup %11800 }
0x172e   : > { %10780 = vmatmul.mubr.msk.bf16.vlgmr.msra.gmra.mrb[152].mxu1 %vm1566_vm4, %v5951_v32  ;;  %v5944_v60 = vmul.f32 %v11801_v31, %v14580_v29 }
0x172f   : > { %10792 = vmatpush3.bf16.msra.mxu1 %v14446_v5 }
0x1730   : > { %v11803_v34 = vpop.eup %11802  ;;  %11082 = vmatprep.subr.msk.bf16.mxu1 %vm1713_vm2, %v14660_v43  ;;  %v5953_v26 = vpack.c.bf16 %v5944_v60, %v5944_v60 }
0x1731   : > { %v11805_v50 = vpop.eup %11804  ;;  %v5943_v15 = vmul.f32 %v11803_v34, %v14584_v59 }
0x1732   : > { %v5942_v25 = vmul.f32 %v11805_v50, %v14588_v48 }
0x1733   : > { %10794 = vmatpush3.bf16.msra.mxu1 %v6134_v23  ;;  %v5920_v53 = vpop.xlane.xlu0 %5919 }
0x1734   : > { %v5952_v28 = vpack.c.bf16 %v5943_v15, %v5942_v25 }
0x1735   : > { %v5923_v63 = vpop.xlane.xlu1 %5922 }
0x1736   : > { %10787 = vmatprep.mubr.msk.bf16.mxu0 %vm1566_vm4, %v5952_v28  ;;  %11806 = vrcp.f32 %v5923_v63 }
0x1737   : > { %v6189_v35 = vpop.permute.xlu0 %6188  ;;  %10788 = vmatmul.mubr.msk.bf16.vlgmr.msra.gmra.mrb[128].mxu0 %vm1566_vm4, %v5953_v26  ;;  %11808 = vrcp.f32 %v5920_v53 }
0x1738   : > { %11083 = vmatprep.subr.msk.bf16.mxu0 %vm1293_vm1, %v6189_v35  ;;  %v6199_v29 = vsel %vm1293_vm1, %v6189_v35, 0 }
0x1739   : > { %10800 = vmatpush3.bf16.xpose.msra.mxu0 %v6199_v29  ;;  %v5917_v59 = vpop.xlane.xlu1 %5916 }
0x173a   : > { %11810 = vrcp.f32 %v5917_v59 }
0x173b   : > { %v6185_v48 = vpop.permute.xlu0 %6184 }
0x173c   : > { %10803 = vmatprep.mubr.msk.bf16.mxu0 %vm1293_vm1, %v6185_v48 }
0x173d   : > { %v6257_v46 = vpop.permute.xlu1 %6256 }
0x173e   : > { %11085 = vmatprep.subr.msk.bf16.mxu1 %vm1293_vm1, %v6257_v46  ;;  %v6267_v50 = vsel %vm1293_vm1, %v6257_v46, 0 }
0x173f   : > { %v6187_v47 = vpop.permute.xlu0 %6186 }
0x1740   : > { %v11807_v17 = vpop.eup %11806 }
0x1741   : > { %v6191_v8 = vpop.permute.xlu1 %6190  ;;  %v11809_v40 = vpop.eup %11808  ;;  %v5947_v20 = vmul.f32 %v11807_v17, %v14599_v62 }
0x1742   : > { %11084 = vmatprep.subr.msk.bf16.mxu0 %vm1293_vm1, %v6191_v8  ;;  %v6202_v54 = vsel %vm1293_vm1, %v6191_v8, 0  ;;  %v5946_v12 = vmul.f32 %v11809_v40, %v14595_v6 }
0x1743   : > { %v6393_v21 = vpop.permute.xlu0 %6392  ;;  %10802 = vmatpush3.bf16.xpose.msra.mxu0 %v6202_v54  ;;  %v5955_v31 = vpack.c.bf16 %v5947_v20, %v5947_v20 }
0x1744   : > { %v11811_v1 = vpop.eup %11810  ;;  %v6403_v28 = vsel %vm1293_vm1, %v6393_v21, 0 }
0x1745   : > { %v6259_v0 = vpop.permute.xlu1 %6258  ;;  %v5945_v45 = vmul.f32 %v11811_v1, %v14603_v56 }
0x1746   : > { %v6270_v60 = vsel %vm1293_vm1, %v6259_v0, 0 }
0x1747   : > { %v6327_v51 = vpop.permute.xlu0 %6326  ;;  %v5954_v32 = vpack.c.bf16 %v5946_v12, %v5945_v45 }
0x1748   : > { %v6338_v23 = vsel %vm1293_vm1, %v6327_v51, 0 }
0x1749   : > { %10795 = vmatprep.mubr.msk.bf16.mxu1 %vm1566_vm4, %v5954_v32  ;;  %v6325_v34 = vpop.permute.xlu1 %6324 }
0x174a   : > { %10796 = vmatmul.mubr.msk.bf16.vlgmr.msra.gmra.mrb[156].mxu1 %vm1566_vm4, %v5955_v31  ;;  %10804 = vmatmul.mubr.msk.bf16.vlgmr.msra.gmra.mrb[132].mxu0 %vm1293_vm1, %v6187_v47  ;;  %v6335_v15 = vsel %vm1293_vm1, %v6325_v34, 0 }
0x174b   : > { %10808 = vmatpush3.bf16.xpose.msra.mxu1 %v6267_v50  ;;  %11087 = vmatprep.subr.msk.bf16.mxu0 %vm1293_vm1, %v6325_v34  ;;  %v6321_v62 = vpop.permute.xlu0 %6320 }
0x174c   : > { %11086 = vmatprep.subr.msk.bf16.mxu1 %vm1293_vm1, %v6259_v0  ;;  %10816 = vmatpush3.bf16.xpose.msra.mxu0 %v6335_v15 }
0x174d   : > { %11088 = vmatprep.subr.msk.bf16.mxu0 %vm1293_vm1, %v6327_v51  ;;  %10819 = vmatprep.mubr.msk.bf16.mxu0 %vm1293_vm1, %v6321_v62  ;;  %v6253_v6 = vpop.permute.xlu1 %6252 }
0x174e   : > { %10811 = vmatprep.mubr.msk.bf16.mxu1 %vm1293_vm1, %v6253_v6 }
0x174f   : > { %v6389_v63 = vpop.permute.xlu0 %6388 }
0x1751   : > { %v6255_v56 = vpop.permute.xlu1 %6254 }
0x1753   : > { %10810 = vmatpush3.bf16.xpose.msra.mxu1 %v6270_v60 }
0x1754   : > { %10818 = vmatpush3.bf16.xpose.msra.mxu0 %v6338_v23  ;;  %11089 = vmatprep.subr.msk.bf16.mxu1 %vm1293_vm1, %v6393_v21 }
0x1755   : > { %v6395_v25 = vpop.permute.xlu1 %6394 }
0x1756   : > { %v6406_v26 = vsel %vm1293_vm1, %v6395_v25, 0 }
0x1759   : > { %v6323_v53 = vpop.permute.xlu1 %6322 }
0x175a   : > { %10812 = vmatmul.mubr.msk.bf16.vlgmr.msra.gmra.mrb[160].mxu1 %vm1293_vm1, %v6255_v56 }
0x175b   : > { %10820 = vmatmul.mubr.msk.bf16.vlgmr.msra.gmra.mrb[136].mxu0 %vm1293_vm1, %v6323_v53  ;;  %10824 = vmatpush3.bf16.xpose.msra.mxu1 %v6403_v28 }
0x175c   : > { %10827 = vmatprep.mubr.msk.bf16.mxu1 %vm1293_vm1, %v6389_v63  ;;  %11090 = vmatprep.subr.msk.bf16.mxu1 %vm1293_vm1, %v6395_v25 }
0x175d   : > { %v6391_v35 = vpop.permute.xlu1 %6390 }
0x1763   : > { %10826 = vmatpush3.bf16.xpose.msra.mxu1 %v6406_v26 }
0x176a   : > { %10828 = vmatmul.mubr.msk.bf16.vlgmr.msra.gmra.mrb[164].mxu1 %vm1293_vm1, %v6391_v35 }
0x17dc   : > { %v14702_v29 = vpop.f32.mrb[148].mxu1 }
0x17dd   : > { %v14704_v59 = vpop.f32.mrb[149].mxu1 }
0x17de   : > { %v10774_v48 = vpop.f32.mrb[150].mxu1 }
0x17df   : > { %v14706_v46 = vpop.f32.mrb[151].mxu1 }
0x1801   : > { %v14708_v47 = vpop.f32.mrb[152].mxu1 }
0x1802   : > { %v14710_v17 = vpop.f32.mrb[153].mxu1 }
0x1803   : > { %v10782_v8 = vpop.f32.mrb[154].mxu1 }
0x1804   : > { %v14712_v40 = vpop.f32.mrb[155].mxu1 }
0x180a   : > { %v14714_v54 = vpop.f32.mrb[128].mxu0 }
0x180b   : > { %16257 = vst [vmem:[#allocation17_spill] sm:$0xff] %v14714_v54  ;;  %v14716_v21 = vpop.f32.mrb[129].mxu0 }
0x180c   : > { %16258 = vst [vmem:[#allocation22_spill] sm:$0xff] %v14716_v21  ;;  %v10790_v1 = vpop.f32.mrb[130].mxu0 }
0x180d   : > { %v14718_v20 = vpop.f32.mrb[131].mxu0 }
0x180e   : > { %16259 = vst [vmem:[#allocation20_spill] sm:$0xff] %v14718_v20 }
0x181d   : > { %v14720_v0 = vpop.f32.mrb[156].mxu1  ;;  %v10805_v45 = vpop.f32.mrb[132].mxu0 }
0x181e   : > { %16260 = vst [vmem:[#allocation23_spill] sm:$0xff] %v14720_v0  ;;  %v14724_v12 = vsel %vm663_vm3, %v10805_v45, -1e+30  ;;  %v14726_v51 = vpop.f32.mrb[157].mxu1  ;;  %v6238_v32 = vpop.f32.mrb[133].mxu0 }
0x181f   : > { %16261 = vst [vmem:[#allocation21_spill] sm:$0xff] %v14726_v51  ;;  %v6474_v31 = vsel %vm1566_vm4, %v14724_v12, -inf  ;;  %v10798_v34 = vpop.f32.mrb[158].mxu1  ;;  %v10806_v50 = vpop.f32.mrb[134].mxu0  ;;  %v14732_v15 = vsel %vm663_vm3, %v6238_v32, -1e+30 }
0x1820   : > { %v14734_v62 = vpop.f32.mrb[159].mxu1  ;;  %6475 = vmax.xlane.f32.xlu0 %v6474_v31  ;;  %v6241_v6 = vpop.f32.mrb[135].mxu0  ;;  %v6468_v23 = vsel %vm1566_vm4, %v14732_v15, -inf }
0x1821   : > { %16262 = vst [vmem:[#allocation26_spill] sm:$0xff] %v14734_v62  ;;  %v6457_v56 = vsel %vm663_vm3, %v6241_v6, -1e+30 }
0x1822   : > { %v6471_v60 = vsel %vm1566_vm4, %v6457_v56, -inf }
0x1823   : > { %6472 = vmax.xlane.f32.xlu1 %v6471_v60 }
0x1824   : > { %6469 = vmax.xlane.f32.xlu0 %v6468_v23 }
0x182d   : > { %v10813_v25 = vpop.f32.mrb[160].mxu1 }
0x182e   : > { %v14743_v53 = vsel %vm663_vm3, %v10813_v25, -1e+30  ;;  %v6306_v28 = vpop.f32.mrb[161].mxu1  ;;  %v10821_v63 = vpop.f32.mrb[136].mxu0 }
0x182f   : > { %v6483_v26 = vsel %vm1566_vm4, %v14743_v53, -inf  ;;  %v14749_v35 = vsel %vm663_vm3, %v6306_v28, -1e+30  ;;  %v10814_v48 = vpop.f32.mrb[162].mxu1  ;;  %v6374_v1 = vpop.f32.mrb[137].mxu0 }
0x1830   : > { %v6477_v8 = vsel %vm1566_vm4, %v14749_v35, -inf  ;;  %6484 = vmax.xlane.f32.xlu1 %v6483_v26  ;;  %v6309_v45 = vpop.f32.mrb[163].mxu1  ;;  %v10822_v31 = vpop.f32.mrb[138].mxu0  ;;  %v14767_v23 = vsel %vm663_vm3, %v10821_v63, -1e+30 }
0x1831   : > { %v14755_v32 = vsel %vm663_vm3, %v6309_v45, -1e+30  ;;  %6478 = vmax.xlane.f32.xlu0 %v6477_v8  ;;  %v6377_v34 = vpop.f32.mrb[139].mxu0  ;;  %v6492_v25 = vsel %vm1566_vm4, %v14767_v23, -inf  ;;  %v14773_v28 = vsel %vm663_vm3, %v6374_v1, -1e+30 }
0x1832   : > { %v14759_v50 = vsel %vm663_vm3, %v6377_v34, -1e+30  ;;  %v6480_v6 = vsel %vm1566_vm4, %v14755_v32, -inf  ;;  %v6486_v26 = vsel %vm1566_vm4, %v14773_v28, -inf }
0x1833   : > { %v6489_v60 = vsel %vm1566_vm4, %v14759_v50, -inf }
0x1834   : > { %6490 = vmax.xlane.f32.xlu1 %v6489_v60 }
0x1835   : > { %6481 = vmax.xlane.f32.xlu0 %v6480_v6 }
0x1839   : > { %6493 = vmax.xlane.f32.xlu0 %v6492_v25 }
0x183d   : > { %6487 = vmax.xlane.f32.xlu0 %v6486_v26  ;;  %v10829_v48 = vpop.f32.mrb[164].mxu1 }
0x183e   : > { %v6442_v8 = vpop.f32.mrb[165].mxu1  ;;  %v14785_v1 = vsel %vm663_vm3, %v10829_v48, -1e+30 }
0x183f   : > { %v14779_v63 = vsel %vm663_vm3, %v6442_v8, -1e+30  ;;  %v10830_v45 = vpop.f32.mrb[166].mxu1  ;;  %v6501_v25 = vsel %vm1566_vm4, %v14785_v1, -inf }
0x1840   : > { %v6495_v31 = vsel %vm1566_vm4, %v14779_v63, -inf  ;;  %v6445_v34 = vpop.f32.mrb[167].mxu1 }
0x1841   : > { %v14789_v6 = vsel %vm663_vm3, %v6445_v34, -1e+30  ;;  %6496 = vmax.xlane.f32.xlu1 %v6495_v31 }
0x1842   : > { %v6498_v60 = vsel %vm1566_vm4, %v14789_v6, -inf }
0x1843   : > { %6499 = vmax.xlane.f32.xlu0 %v6498_v60 }
0x1845   : > { %6502 = vmax.xlane.f32.xlu1 %v6501_v25 }
0x1856   : > { %6674 = vrot.lane.b32.xlu1 %v14416_v61, %s16256_s26 }
0x1859   : > { %6610 = vrot.lane.b32.xlu0 %v14398_v44, %s16256_s26 }
0x185a   : > { %6612 = vrot.lane.b32.xlu1 %v14479_v24, %s16256_s26 }
0x185d   : > { %6738 = vrot.lane.b32.xlu0 %v14428_v58, %s16256_s26 }
0x185e   : > { %6676 = vrot.lane.b32.xlu1 %v14645_v39, %s16256_s26 }
0x1861   : > { %6740 = vrot.lane.b32.xlu0 %v14494_v22, %s16256_s26 }
0x1862   : > { %6802 = vrot.lane.b32.xlu1 %v14446_v5, %s16256_s26 }
0x1866   : > { %6804 = vrot.lane.b32.xlu1 %v14660_v43, %s16256_s26 }
0x18ad   : > { %v6476_v26 = vpop.xlane.xlu0 %6475 }
0x18ae   : > { %v6506_v48 = vsub.f32 %v14724_v12, %v6476_v26 }
0x18b0   : > { %v6520_v8 = vmul.f32 1.442695, %v6506_v48  ;;  %v6473_v45 = vpop.xlane.xlu1 %6472 }
0x18b1   : > { %v6505_v31 = vsub.f32 %v6457_v56, %v6473_v45  ;;  %v6470_v34 = vpop.xlane.xlu0 %6469 }
0x18b2   : > { %11812 = vpow2.f32 %v6520_v8  ;;  %v6504_v60 = vsub.f32 %v14732_v15, %v6470_v34 }
0x18b3   : > { %v6518_v25 = vmul.f32 1.442695, %v6505_v31 }
0x18b4   : > { %v6516_v14 = vmul.f32 1.442695, %v6504_v60 }
0x18b5   : > { %11814 = vpow2.f32 %v6518_v25 }
0x18b6   : > { %11816 = vpow2.f32 %v6516_v14 }
0x18bc   : > { %v14813_v30 = vpop.eup %11812 }
0x18bd   : > { %v6485_v3 = vpop.xlane.xlu1 %6484  ;;  %v6546_v18 = vsel %vm1566_vm4, %v14813_v30, 0.0 }
0x18be   : > { %v6509_v42 = vsub.f32 %v14743_v53, %v6485_v3  ;;  %v6479_v12 = vpop.xlane.xlu0 %6478  ;;  %6547 = vadd.xlane.f32.xlu0 %v6546_v18 }
0x18bf   : > { %v14818_v26 = vpop.eup %11814  ;;  %v6507_v56 = vsub.f32 %v14749_v35, %v6479_v12 }
0x18c0   : > { %v14821_v48 = vpop.eup %11816  ;;  %v6526_v15 = vmul.f32 1.442695, %v6509_v42  ;;  %v6543_v14 = vsel %vm1566_vm4, %v14818_v26, 0.0 }
0x18c1   : > { %v6522_v8 = vmul.f32 1.442695, %v6507_v56  ;;  %6544 = vadd.xlane.f32.xlu1 %v6543_v14  ;;  %v6540_v45 = vsel %vm1566_vm4, %v14821_v48, 0.0  ;;  %v6491_v31 = vpop.xlane.xlu1 %6490 }
0x18c2   : > { %11818 = vpow2.f32 %v6526_v15  ;;  %v6482_v3 = vpop.xlane.xlu0 %6481  ;;  %6541 = vadd.xlane.f32.xlu0 %v6540_v45  ;;  %v6511_v18 = vsub.f32 %v14759_v50, %v6491_v31 }
0x18c3   : > { %11820 = vpow2.f32 %v6522_v8  ;;  %v6508_v35 = vsub.f32 %v14755_v32, %v6482_v3 }
0x18c4   : > { %v6530_v53 = vmul.f32 1.442695, %v6511_v18 }
0x18c5   : > { %v6524_v60 = vmul.f32 1.442695, %v6508_v35 }
0x18c6   : > { %v6494_v34 = vpop.xlane.xlu0 %6493  ;;  %11822 = vpow2.f32 %v6530_v53 }
0x18c7   : > { %v6512_v42 = vsub.f32 %v14767_v23, %v6494_v34 }
0x18c9   : > { %v6532_v25 = vmul.f32 1.442695, %v6512_v42 }
0x18ca   : > { %v6488_v12 = vpop.xlane.xlu0 %6487 }
0x18cb   : > { %11824 = vpow2.f32 %v6532_v25  ;;  %v6510_v56 = vsub.f32 %v14773_v28, %v6488_v12 }
0x18cc   : > { %v14831_v15 = vpop.eup %11818  ;;  %11826 = vpow2.f32 %v6524_v60 }
0x18cd   : > { %v6528_v14 = vmul.f32 1.442695, %v6510_v56  ;;  %v6555_v50 = vsel %vm1566_vm4, %v14831_v15, 0.0  ;;  %v14835_v8 = vpop.eup %11820 }
0x18ce   : > { %6556 = vadd.xlane.f32.xlu1 %v6555_v50  ;;  %v6497_v32 = vpop.xlane.xlu1 %6496  ;;  %v6549_v28 = vsel %vm1566_vm4, %v14835_v8, 0.0 }
0x18cf   : > { %11828 = vpow2.f32 %v6528_v14  ;;  %v6513_v23 = vsub.f32 %v14779_v63, %v6497_v32 }
0x18d0   : > { %v6500_v45 = vpop.xlane.xlu0 %6499  ;;  %v14841_v3 = vpop.eup %11822 }
0x18d1   : > { %v6514_v31 = vsub.f32 %v14789_v6, %v6500_v45  ;;  %v6534_v60 = vmul.f32 1.442695, %v6513_v23  ;;  %v6561_v63 = vsel %vm1566_vm4, %v14841_v3, 0.0 }
0x18d2   : > { %6550 = vadd.xlane.f32.xlu1 %v6549_v28  ;;  %v6503_v18 = vpop.xlane.xlu1 %6502 }
0x18d3   : > { %v6536_v53 = vmul.f32 1.442695, %v6514_v31  ;;  %v6515_v35 = vsub.f32 %v14785_v1, %v6503_v18 }
0x18d4   : > { %v6611_v34 = vpop.permute.xlu0 %6610 }
0x18d5   : > { %v14844_v42 = vpop.eup %11824  ;;  %11830 = vpow2.f32 %v6536_v53  ;;  %v6538_v25 = vmul.f32 1.442695, %v6515_v35  ;;  %10831 = vmatprep.subr.bf16.mxu0 %v6611_v34 }
0x18d6   : > { %10832 = vmatpush3.bf16.msra.mxu0 %v6611_v34  ;;  %6562 = vadd.xlane.f32.xlu1 %v6561_v63  ;;  %v6675_v6 = vpop.permute.xlu1 %6674  ;;  %v6564_v12 = vsel %vm1566_vm4, %v14844_v42, 0.0  ;;  %v14850_v56 = vpop.eup %11826 }
0x18d7   : > { %11832 = vpow2.f32 %v6538_v25  ;;  %6565 = vadd.xlane.f32.xlu0 %v6564_v12  ;;  %10839 = vmatprep.subr.bf16.mxu1 %v6675_v6  ;;  %v6552_v14 = vsel %vm1566_vm4, %v14850_v56, 0.0 }
0x18d8   : > { %10840 = vmatpush3.bf16.msra.mxu1 %v6675_v6  ;;  %11834 = vpow2.f32 %v6534_v60  ;;  %v6739_v45 = vpop.permute.xlu0 %6738 }
0x18d9   : > { %v14854_v50 = vpop.eup %11828 }
0x18da   : > { %v6613_v1 = vpop.permute.xlu1 %6612  ;;  %v6558_v31 = vsel %vm1566_vm4, %v14854_v50, 0.0 }
0x18db   : > { %6553 = vadd.xlane.f32.xlu0 %v6552_v14  ;;  %11091 = vmatprep.subr.msk.bf16.mxu0 %vm1713_vm2, %v6613_v1  ;;  %v6622_v32 = vsel %vm1713_vm2, %v6613_v1, 0 }
0x18dc   : > { %10834 = vmatpush3.bf16.msra.mxu0 %v6622_v32  ;;  %v6741_v6 = vpop.permute.xlu0 %6740 }
0x18dd   : > { %10847 = vmatprep.subr.bf16.mxu0 %v6739_v45 }
0x18de   : > { %v6677_v23 = vpop.permute.xlu1 %6676 }
0x18df   : > { %v14860_v28 = vpop.eup %11830  ;;  %6559 = vadd.xlane.f32.xlu0 %v6558_v31  ;;  %11092 = vmatprep.subr.msk.bf16.mxu1 %vm1713_vm2, %v6677_v23  ;;  %v6686_v18 = vsel %vm1713_vm2, %v6677_v23, 0 }
0x18e0   : > { %10842 = vmatpush3.bf16.msra.mxu1 %v6686_v18  ;;  %v6570_v34 = vsel %vm1566_vm4, %v14860_v28, 0.0 }
0x18e1   : > { %v14864_v53 = vpop.eup %11832 }
0x18e2   : > { %v14866_v35 = vpop.permute.xlu1 %6802  ;;  %v6573_v60 = vsel %vm1566_vm4, %v14864_v53, 0.0  ;;  %v14872_v25 = vpop.eup %11834 }
0x18e3   : > { %6571 = vadd.xlane.f32.xlu0 %v6570_v34  ;;  %6574 = vadd.xlane.f32.xlu1 %v6573_v60  ;;  %v6567_v63 = vsel %vm1566_vm4, %v14872_v25, 0.0 }
0x18e4   : > { %10855 = vmatprep.subr.bf16.mxu1 %v14866_v35 }
0x18e6   : > { %v14909_v12 = vpop.permute.xlu1 %6804 }
0x18e7   : > { %6568 = vadd.xlane.f32.xlu1 %v6567_v63 }
0x18f8   : > { %6936 = vrot.lane.b32.xlu1 %v14412_v2, %s16214_s28 }
0x18f9   : > { %6868 = vrot.lane.b32.xlu0 %v14396_v27, %s16214_s28 }
0x18fc   : > { %6938 = vrot.lane.b32.xlu1 %v14420_v7, %s16214_s28 }
0x18fd   : > { %6870 = vrot.lane.b32.xlu0 %v14406_v57, %s16214_s28 }
0x1900   : > { %7004 = vrot.lane.b32.xlu1 %v14426_v52, %s16214_s28 }
0x1901   : > { %6864 = vrot.lane.b32.xlu0 %v14396_v27, %s16263_s21 }
0x1904   : > { %6932 = vrot.lane.b32.xlu1 %v14412_v2, %s16263_s21 }
0x1905   : > { %6866 = vrot.lane.b32.xlu0 %v14406_v57, %s16263_s21 }
0x1908   : > { %6934 = vrot.lane.b32.xlu1 %v14420_v7, %s16263_s21 }
0x1909   : > { %7072 = vrot.lane.b32.xlu0 %v14442_v49, %s16214_s28 }
0x190c   : > { %7074 = vrot.lane.b32.xlu1 %v14450_v41, %s16214_s28 }
0x190d   : > { %7006 = vrot.lane.b32.xlu0 %v14436_v11, %s16214_s28 }
0x1910   : > { %7002 = vrot.lane.b32.xlu1 %v14436_v11, %s16263_s21 }
0x1911   : > { %7000 = vrot.lane.b32.xlu0 %v14426_v52, %s16263_s21 }
0x1914   : > { %7070 = vrot.lane.b32.xlu1 %v14450_v41, %s16263_s21 }
0x1915   : > { %7068 = vrot.lane.b32.xlu0 %v14442_v49, %s16263_s21 }
0x194b   : > { %v6548_v1 = vpop.xlane.xlu0 %6547 }
0x194c   : > { %11836 = vrcp.f32 %v6548_v1 }
0x194e   : > { %v6545_v14 = vpop.xlane.xlu1 %6544 }
0x194f   : > { %11838 = vrcp.f32 %v6545_v14  ;;  %v6542_v32 = vpop.xlane.xlu0 %6541 }
0x1950   : > { %11840 = vrcp.f32 %v6542_v32  ;;  %v6750_v32 = vsel %vm1713_vm2, %v6741_v6, 0 }
0x1956   : > { %v11837_v23 = vpop.eup %11836 }
0x1957   : > { %v6590_v60 = vmul.f32 %v11837_v23, %v14813_v30 }
0x1959   : > { %v11839_v31 = vpop.eup %11838  ;;  %v6601_v13 = vpack.c.bf16 %v6590_v60, %v6590_v60 }
0x195a   : > { %v11841_v18 = vpop.eup %11840  ;;  %v6589_v34 = vmul.f32 %v11839_v31, %v14818_v26 }
0x195b   : > { %v6588_v63 = vmul.f32 %v11841_v18, %v14821_v48  ;;  %v6557_v55 = vpop.xlane.xlu1 %6556 }
0x195c   : > { %11842 = vrcp.f32 %v6557_v55 }
0x195d   : > { %v6600_v16 = vpack.c.bf16 %v6589_v34, %v6588_v63 }
0x195f   : > { %10835 = vmatprep.mubr.msk.bf16.mxu0 %vm1566_vm4, %v6600_v16  ;;  %v6551_v1 = vpop.xlane.xlu1 %6550 }
0x1960   : > { %10836 = vmatmul.mubr.msk.bf16.vlgmr.msra.gmra.mrb[140].mxu0 %vm1566_vm4, %v6601_v13  ;;  %11844 = vrcp.f32 %v6551_v1 }
0x1961   : > { %10848 = vmatpush3.bf16.msra.mxu0 %v6739_v45 }
0x1962   : > { %11093 = vmatprep.subr.msk.bf16.mxu0 %vm1713_vm2, %v6741_v6 }
0x1963   : > { %v6563_v30 = vpop.xlane.xlu1 %6562 }
0x1964   : > { %v6566_v14 = vpop.xlane.xlu0 %6565 }
0x1965   : > { %10850 = vmatpush3.bf16.msra.mxu0 %v6750_v32 }
0x1966   : > { %v11843_v16 = vpop.eup %11842 }
0x1967   : > { %v6593_v18 = vmul.f32 %v11843_v16, %v14831_v15 }
0x1968   : > { %v6554_v26 = vpop.xlane.xlu0 %6553 }
0x1969   : > { %11846 = vrcp.f32 %v6554_v26 }
0x196a   : > { %11848 = vrcp.f32 %v6566_v14  ;;  %v11845_v45 = vpop.eup %11844 }
0x196b   : > { %11850 = vrcp.f32 %v6563_v30  ;;  %v6591_v60 = vmul.f32 %v11845_v45, %v14835_v8  ;;  %v6603_v30 = vpack.c.bf16 %v6593_v18, %v6593_v18 }
0x196c   : > { %v6560_v48 = vpop.xlane.xlu0 %6559 }
0x196d   : > { %11852 = vrcp.f32 %v6560_v48 }
0x1970   : > { %v6572_v23 = vpop.xlane.xlu0 %6571  ;;  %v6575_v13 = vpop.xlane.xlu1 %6574 }
0x1971   : > { %11854 = vrcp.f32 %v6575_v13 }
0x1972   : > { %11856 = vrcp.f32 %v6572_v23 }
0x1973   : > { %v11847_v31 = vpop.eup %11846 }
0x1974   : > { %v11849_v6 = vpop.eup %11848  ;;  %v6869_v34 = vpop.permute.xlu0 %6868  ;;  %v6592_v63 = vmul.f32 %v11847_v31, %v14850_v56 }
0x1975   : > { %v6569_v55 = vpop.xlane.xlu1 %6568  ;;  %v11851_v1 = vpop.eup %11850  ;;  %11095 = vmatprep.subr.msk.bf16.mxu0 %vm1293_vm1, %v6869_v34  ;;  %v6596_v26 = vmul.f32 %v11849_v6, %v14844_v42 }
0x1976   : > { %11858 = vrcp.f32 %v6569_v55  ;;  %v6602_v14 = vpack.c.bf16 %v6592_v63, %v6591_v60  ;;  %v6595_v23 = vmul.f32 %v11851_v1, %v14841_v3  ;;  %v6814_v3 = vsel %vm1713_vm2, %v14909_v12, 0 }
0x1977   : > { %v11853_v32 = vpop.eup %11852  ;;  %v6605_v56 = vpack.c.bf16 %v6596_v26, %v6596_v26 }
0x1978   : > { %v6871_v48 = vpop.permute.xlu0 %6870  ;;  %10843 = vmatprep.mubr.msk.bf16.mxu1 %vm1566_vm4, %v6602_v14  ;;  %v6594_v16 = vmul.f32 %v11853_v32, %v14854_v50  ;;  %v6879_v50 = vsel %vm1293_vm1, %v6869_v34, 0 }
0x1979   : > { %v6937_v15 = vpop.permute.xlu1 %6936  ;;  %10844 = vmatmul.mubr.msk.bf16.vlgmr.msra.gmra.mrb[168].mxu1 %vm1566_vm4, %v6603_v30  ;;  %v6882_v32 = vsel %vm1293_vm1, %v6871_v48, 0 }
0x197a   : > { %10856 = vmatpush3.bf16.msra.mxu1 %v14866_v35  ;;  %v6604_v8 = vpack.c.bf16 %v6595_v23, %v6594_v16 }
0x197b   : > { %11094 = vmatprep.subr.msk.bf16.mxu1 %vm1713_vm2, %v14909_v12  ;;  %v11855_v13 = vpop.eup %11854 }
0x197c   : > { %v6865_v45 = vpop.permute.xlu0 %6864  ;;  %10851 = vmatprep.mubr.msk.bf16.mxu0 %vm1566_vm4, %v6604_v8  ;;  %v11857_v31 = vpop.eup %11856  ;;  %v6599_v18 = vmul.f32 %v11855_v13, %v14864_v53  ;;  %v6947_v53 = vsel %vm1293_vm1, %v6937_v15, 0 }
0x197d   : > { %v6939_v42 = vpop.permute.xlu1 %6938  ;;  %10852 = vmatmul.mubr.msk.bf16.vlgmr.msra.gmra.mrb[144].mxu0 %vm1566_vm4, %v6605_v56  ;;  %v6598_v63 = vmul.f32 %v11857_v31, %v14860_v28 }
0x197e   : > { %10858 = vmatpush3.bf16.msra.mxu1 %v6814_v3  ;;  %10864 = vmatpush3.bf16.xpose.msra.mxu0 %v6879_v50  ;;  %v6607_v1 = vpack.c.bf16 %v6599_v18, %v6599_v18  ;;  %v6950_v26 = vsel %vm1293_vm1, %v6939_v42, 0 }
0x197f   : > { %11096 = vmatprep.subr.msk.bf16.mxu0 %vm1293_vm1, %v6871_v48  ;;  %10867 = vmatprep.mubr.msk.bf16.mxu0 %vm1293_vm1, %v6865_v45 }
0x1980   : > { %v11859_v35 = vpop.eup %11858  ;;  %11097 = vmatprep.subr.msk.bf16.mxu1 %vm1293_vm1, %v6937_v15  ;;  %v6867_v6 = vpop.permute.xlu0 %6866 }
0x1981   : > { %v7005_v55 = vpop.permute.xlu1 %7004  ;;  %v6597_v60 = vmul.f32 %v11859_v35, %v14872_v25 }
0x1982   : > { %v7015_v30 = vsel %vm1293_vm1, %v7005_v55, 0 }
0x1983   : > { %v6606_v12 = vpack.c.bf16 %v6598_v63, %v6597_v60 }
0x1984   : > { %v7073_v34 = vpop.permute.xlu0 %7072 }
0x1985   : > { %10859 = vmatprep.mubr.msk.bf16.mxu1 %vm1566_vm4, %v6606_v12  ;;  %v6933_v14 = vpop.permute.xlu1 %6932  ;;  %v7083_v8 = vsel %vm1293_vm1, %v7073_v34, 0 }
0x1986   : > { %10860 = vmatmul.mubr.msk.bf16.vlgmr.msra.gmra.mrb[172].mxu1 %vm1566_vm4, %v6607_v1  ;;  %10866 = vmatpush3.bf16.xpose.msra.mxu0 %v6882_v32 }
0x1987   : > { %10875 = vmatprep.mubr.msk.bf16.mxu1 %vm1293_vm1, %v6933_v14  ;;  %10872 = vmatpush3.bf16.xpose.msra.mxu1 %v6947_v53 }
0x1988   : > { %11099 = vmatprep.subr.msk.bf16.mxu0 %vm1293_vm1, %v7005_v55  ;;  %11098 = vmatprep.subr.msk.bf16.mxu1 %vm1293_vm1, %v6939_v42  ;;  %v7007_v28 = vpop.permute.xlu0 %7006 }
0x1989   : > { %v6935_v48 = vpop.permute.xlu1 %6934  ;;  %v7018_v15 = vsel %vm1293_vm1, %v7007_v28, 0 }
0x198c   : > { %v7001_v25 = vpop.permute.xlu0 %7000 }
0x198d   : > { %10868 = vmatmul.mubr.msk.bf16.vlgmr.msra.gmra.mrb[148].mxu0 %vm1293_vm1, %v6867_v6  ;;  %v7075_v16 = vpop.permute.xlu1 %7074 }
0x198e   : > { %10880 = vmatpush3.bf16.xpose.msra.mxu0 %v7015_v30  ;;  %10883 = vmatprep.mubr.msk.bf16.mxu0 %vm1293_vm1, %v7001_v25  ;;  %v7086_v13 = vsel %vm1293_vm1, %v7075_v16, 0 }
0x198f   : > { %10874 = vmatpush3.bf16.xpose.msra.mxu1 %v6950_v26  ;;  %11100 = vmatprep.subr.msk.bf16.mxu0 %vm1293_vm1, %v7007_v28 }
0x1990   : > { %11101 = vmatprep.subr.msk.bf16.mxu1 %vm1293_vm1, %v7073_v34  ;;  %v7069_v23 = vpop.permute.xlu0 %7068 }
0x1991   : > { %v7003_v56 = vpop.permute.xlu1 %7002 }
0x1995   : > { %v7071_v45 = vpop.permute.xlu1 %7070 }
0x1996   : > { %10876 = vmatmul.mubr.msk.bf16.vlgmr.msra.gmra.mrb[176].mxu1 %vm1293_vm1, %v6935_v48  ;;  %10882 = vmatpush3.bf16.xpose.msra.mxu0 %v7018_v15 }
0x1997   : > { %10888 = vmatpush3.bf16.xpose.msra.mxu1 %v7083_v8  ;;  %10891 = vmatprep.mubr.msk.bf16.mxu1 %vm1293_vm1, %v7069_v23 }
0x1998   : > { %11102 = vmatprep.subr.msk.bf16.mxu1 %vm1293_vm1, %v7075_v16 }
0x199d   : > { %10884 = vmatmul.mubr.msk.bf16.vlgmr.msra.gmra.mrb[152].mxu0 %vm1293_vm1, %v7003_v56 }
0x199f   : > { %10890 = vmatpush3.bf16.xpose.msra.mxu1 %v7086_v13 }
0x19a6   : > { %10892 = vmatmul.mubr.msk.bf16.vlgmr.msra.gmra.mrb[180].mxu1 %vm1293_vm1, %v7071_v45 }
0x1a33   : > { %v14962_v42 = vpop.f32.mrb[140].mxu0 }
0x1a34   : > { %v14964_v31 = vpop.f32.mrb[141].mxu0 }
0x1a35   : > { %v10838_v3 = vpop.f32.mrb[142].mxu0 }
0x1a36   : > { %v14966_v50 = vpop.f32.mrb[143].mxu0 }
0x1a4c   : > { %v14970_v18 = vpop.f32.mrb[168].mxu1 }
0x1a4d   : > { %v14972_v6 = vpop.f32.mrb[169].mxu1 }
0x1a4e   : > { %v10846_v60 = vpop.f32.mrb[170].mxu1 }
0x1a4f   : > { %v14976_v63 = vpop.f32.mrb[171].mxu1 }
0x1a50   : > { %v14980_v1 = vpop.f32.mrb[144].mxu0 }
0x1a51   : > { %v14982_v34 = vpop.f32.mrb[145].mxu0 }
0x1a52   : > { %v10854_v14 = vpop.f32.mrb[146].mxu0 }
0x1a53   : > { %v14984_v32 = vpop.f32.mrb[147].mxu0 }
0x1a59   : > { %v14988_v28 = vpop.f32.mrb[172].mxu1 }
0x1a5a   : > { %v14990_v25 = vpop.f32.mrb[173].mxu1 }
0x1a5b   : > { %v10862_v26 = vpop.f32.mrb[174].mxu1 }
0x1a5c   : > { %v14994_v48 = vpop.f32.mrb[175].mxu1 }
0x1a60   : > { %v10869_v16 = vpop.f32.mrb[148].mxu0 }
0x1a61   : > { %v7138_v23 = vsel %vm663_vm3, %v10869_v16, -1e+30  ;;  %v6918_v8 = vpop.f32.mrb[149].mxu0 }
0x1a62   : > { %v7154_v56 = vsel %vm1566_vm4, %v7138_v23, -inf  ;;  %v10870_v13 = vpop.f32.mrb[150].mxu0  ;;  %v15003_v45 = vsel %vm663_vm3, %v6918_v8, -1e+30 }
0x1a63   : > { %7155 = vmax.xlane.f32.xlu0 %v7154_v56  ;;  %v6921_v3 = vpop.f32.mrb[151].mxu0  ;;  %v7148_v26 = vsel %vm1566_vm4, %v15003_v45, -inf }
0x1a64   : > { %v7137_v60 = vsel %vm663_vm3, %v6921_v3, -1e+30 }
0x1a65   : > { %v7151_v14 = vsel %vm1566_vm4, %v7137_v60, -inf }
0x1a66   : > { %7152 = vmax.xlane.f32.xlu1 %v7151_v14 }
0x1a67   : > { %7149 = vmax.xlane.f32.xlu0 %v7148_v26 }
0x1a69   : > { %v10877_v16 = vpop.f32.mrb[176].mxu1 }
0x1a6a   : > { %v7141_v13 = vsel %vm663_vm3, %v10877_v16, -1e+30  ;;  %v6986_v15 = vpop.f32.mrb[177].mxu1 }
0x1a6b   : > { %v7163_v8 = vsel %vm1566_vm4, %v7141_v13, -inf  ;;  %v7139_v56 = vsel %vm663_vm3, %v6986_v15, -1e+30  ;;  %v10878_v30 = vpop.f32.mrb[178].mxu1 }
0x1a6c   : > { %v7157_v3 = vsel %vm1566_vm4, %v7139_v56, -inf  ;;  %7164 = vmax.xlane.f32.xlu1 %v7163_v8  ;;  %v6989_v53 = vpop.f32.mrb[179].mxu1 }
0x1a6d   : > { %v15018_v12 = vsel %vm663_vm3, %v6989_v53, -1e+30  ;;  %7158 = vmax.xlane.f32.xlu0 %v7157_v3 }
0x1a6e   : > { %v7160_v14 = vsel %vm1566_vm4, %v15018_v12, -inf }
0x1a70   : > { %v10885_v26 = vpop.f32.mrb[152].mxu0 }
0x1a71   : > { %v15024_v16 = vsel %vm663_vm3, %v10885_v26, -1e+30  ;;  %7161 = vmax.xlane.f32.xlu0 %v7160_v14  ;;  %v7054_v15 = vpop.f32.mrb[153].mxu0 }
0x1a72   : > { %v10886_v30 = vpop.f32.mrb[154].mxu0  ;;  %v7172_v8 = vsel %vm1566_vm4, %v15024_v16, -inf  ;;  %v15034_v3 = vsel %vm663_vm3, %v7054_v15, -1e+30 }
0x1a73   : > { %v7057_v55 = vpop.f32.mrb[155].mxu0  ;;  %v7166_v14 = vsel %vm1566_vm4, %v15034_v3, -inf }
0x1a74   : > { %v15030_v53 = vsel %vm663_vm3, %v7057_v55, -1e+30 }
0x1a75   : > { %v7169_v35 = vsel %vm1566_vm4, %v15030_v53, -inf  ;;  %7173 = vmax.xlane.f32.xlu0 %v7172_v8 }
0x1a76   : > { %7170 = vmax.xlane.f32.xlu1 %v7169_v35 }
0x1a79   : > { %7167 = vmax.xlane.f32.xlu0 %v7166_v14  ;;  %v10893_v26 = vpop.f32.mrb[180].mxu1 }
0x1a7a   : > { %v7122_v30 = vpop.f32.mrb[181].mxu1  ;;  %v15048_v4 = vsel %vm663_vm3, %v10893_v26, -1e+30 }
0x1a7b   : > { %v15042_v33 = vsel %vm663_vm3, %v7122_v30, -1e+30  ;;  %v10894_v55 = vpop.f32.mrb[182].mxu1  ;;  %v7181_v14 = vsel %vm1566_vm4, %v15048_v4, -inf }
0x1a7c   : > { %v7175_v15 = vsel %vm1566_vm4, %v15042_v33, -inf  ;;  %v7125_v10 = vpop.f32.mrb[183].mxu1 }
0x1a7d   : > { %v15052_v35 = vsel %vm663_vm3, %v7125_v10, -1e+30  ;;  %7176 = vmax.xlane.f32.xlu1 %v7175_v15 }
0x1a7e   : > { %v7178_v8 = vsel %vm1566_vm4, %v15052_v35, -inf }
0x1a7f   : > { %7179 = vmax.xlane.f32.xlu0 %v7178_v8 }
0x1a81   : > { %7182 = vmax.xlane.f32.xlu1 %v7181_v14 }
0x1a92   : > { %7350 = vrot.lane.b32.xlu1 %v14416_v61, %s16263_s21 }
0x1a95   : > { %7288 = vrot.lane.b32.xlu0 %v14398_v44, %s16263_s21 }
0x1a96   : > { %7290 = vrot.lane.b32.xlu1 %v14479_v24, %s16263_s21 }
0x1a99   : > { %7412 = vrot.lane.b32.xlu0 %v14428_v58, %s16263_s21 }
0x1a9a   : > { %7352 = vrot.lane.b32.xlu1 %v14645_v39, %s16263_s21 }
0x1a9d   : > { %7414 = vrot.lane.b32.xlu0 %v14494_v22, %s16263_s21 }
0x1a9e   : > { %7474 = vrot.lane.b32.xlu1 %v14446_v5, %s16263_s21 }
0x1aa2   : > { %7476 = vrot.lane.b32.xlu1 %v14660_v43, %s16263_s21 }
0x1af0   : > { %v7156_v10 = vpop.xlane.xlu0 %7155 }
0x1af1   : > { %v7186_v26 = vsub.f32 %v7138_v23, %v7156_v10 }
0x1af3   : > { %v7200_v30 = vmul.f32 1.442695, %v7186_v26  ;;  %v7153_v55 = vpop.xlane.xlu1 %7152 }
0x1af4   : > { %v7185_v15 = vsub.f32 %v7137_v60, %v7153_v55  ;;  %v7150_v8 = vpop.xlane.xlu0 %7149 }
0x1af5   : > { %11860 = vpow2.f32 %v7200_v30  ;;  %v7184_v14 = vsub.f32 %v15003_v45, %v7150_v8 }
0x1af6   : > { %v7198_v19 = vmul.f32 1.442695, %v7185_v15 }
0x1af7   : > { %v7196_v9 = vmul.f32 1.442695, %v7184_v14 }
0x1af8   : > { %11862 = vpow2.f32 %v7198_v19 }
0x1af9   : > { %11864 = vpow2.f32 %v7196_v9  ;;  %v7165_v38 = vpop.xlane.xlu1 %7164 }
0x1afa   : > { %v7189_v62 = vsub.f32 %v7141_v13, %v7165_v38  ;;  %v7159_v0 = vpop.xlane.xlu0 %7158 }
0x1afb   : > { %v7187_v54 = vsub.f32 %v7139_v56, %v7159_v0 }
0x1afc   : > { %v7206_v51 = vmul.f32 1.442695, %v7189_v62 }
0x1afd   : > { %v7202_v21 = vmul.f32 1.442695, %v7187_v54 }
0x1afe   : > { %11866 = vpow2.f32 %v7206_v51  ;;  %v7162_v20 = vpop.xlane.xlu0 %7161 }
0x1aff   : > { %v15075_v23 = vpop.eup %11860  ;;  %11868 = vpow2.f32 %v7202_v21  ;;  %v7188_v45 = vsub.f32 %v15018_v12, %v7162_v20 }
0x1b00   : > { %v7226_v60 = vsel %vm1566_vm4, %v15075_v23, 0.0 }
0x1b01   : > { %7227 = vadd.xlane.f32.xlu0 %v7226_v60  ;;  %v7204_v62 = vmul.f32 1.442695, %v7188_v45 }
0x1b02   : > { %v15080_v10 = vpop.eup %11862  ;;  %v7174_v9 = vpop.xlane.xlu0 %7173 }
0x1b03   : > { %v15082_v19 = vpop.eup %11864  ;;  %v7192_v38 = vsub.f32 %v15024_v16, %v7174_v9  ;;  %v7171_v0 = vpop.xlane.xlu1 %7170  ;;  %v7223_v54 = vsel %vm1566_vm4, %v15080_v10, 0.0 }
0x1b04   : > { %v7191_v51 = vsub.f32 %v15030_v53, %v7171_v0  ;;  %7224 = vadd.xlane.f32.xlu1 %v7223_v54  ;;  %v7220_v21 = vsel %vm1566_vm4, %v15082_v19, 0.0 }
0x1b05   : > { %v7212_v20 = vmul.f32 1.442695, %v7192_v38  ;;  %7221 = vadd.xlane.f32.xlu0 %v7220_v21 }
0x1b06   : > { %v7210_v12 = vmul.f32 1.442695, %v7191_v51  ;;  %v7168_v13 = vpop.xlane.xlu0 %7167 }
0x1b07   : > { %11870 = vpow2.f32 %v7212_v20  ;;  %v7190_v56 = vsub.f32 %v15034_v3, %v7168_v13 }
0x1b08   : > { %v15091_v26 = vpop.eup %11866  ;;  %11872 = vpow2.f32 %v7210_v12 }
0x1b09   : > { %11874 = vpow2.f32 %v7204_v62  ;;  %v7208_v16 = vmul.f32 1.442695, %v7190_v56  ;;  %v7235_v53 = vsel %vm1566_vm4, %v15091_v26, 0.0  ;;  %v15095_v30 = vpop.eup %11868 }
0x1b0a   : > { %7236 = vadd.xlane.f32.xlu1 %v7235_v53  ;;  %v7177_v55 = vpop.xlane.xlu1 %7176  ;;  %v7229_v3 = vsel %vm1566_vm4, %v15095_v30, 0.0 }
0x1b0b   : > { %11876 = vpow2.f32 %v7208_v16  ;;  %v7193_v8 = vsub.f32 %v15042_v33, %v7177_v55 }
0x1b0c   : > { %v7180_v15 = vpop.xlane.xlu0 %7179 }
0x1b0d   : > { %v7194_v14 = vsub.f32 %v15052_v35, %v7180_v15  ;;  %v7214_v54 = vmul.f32 1.442695, %v7193_v8 }
0x1b0e   : > { %7230 = vadd.xlane.f32.xlu1 %v7229_v3  ;;  %v7183_v60 = vpop.xlane.xlu1 %7182 }
0x1b0f   : > { %v7216_v45 = vmul.f32 1.442695, %v7194_v14  ;;  %v7195_v9 = vsub.f32 %v15048_v4, %v7183_v60 }
0x1b10   : > { %v7289_v38 = vpop.permute.xlu0 %7288 }
0x1b11   : > { %v15102_v0 = vpop.eup %11870  ;;  %11878 = vpow2.f32 %v7216_v45  ;;  %v7218_v51 = vmul.f32 1.442695, %v7195_v9  ;;  %10895 = vmatprep.subr.bf16.mxu0 %v7289_v38 }
0x1b12   : > { %v15104_v21 = vpop.eup %11872  ;;  %10896 = vmatpush3.bf16.msra.mxu0 %v7289_v38  ;;  %v7351_v33 = vpop.permute.xlu1 %7350  ;;  %v7244_v35 = vsel %vm1566_vm4, %v15102_v0, 0.0 }
0x1b13   : > { %v15108_v62 = vpop.eup %11874  ;;  %11880 = vpow2.f32 %v7218_v51  ;;  %7245 = vadd.xlane.f32.xlu0 %v7244_v35  ;;  %10903 = vmatprep.subr.bf16.mxu1 %v7351_v33  ;;  %v7241_v4 = vsel %vm1566_vm4, %v15104_v21, 0.0 }
0x1b14   : > { %7242 = vadd.xlane.f32.xlu1 %v7241_v4  ;;  %10904 = vmatpush3.bf16.msra.mxu1 %v7351_v33  ;;  %11882 = vpow2.f32 %v7214_v54  ;;  %v7232_v12 = vsel %vm1566_vm4, %v15108_v62, 0.0  ;;  %v7413_v16 = vpop.permute.xlu0 %7412 }
0x1b15   : > { %v15114_v13 = vpop.eup %11876 }
0x1b16   : > { %v7291_v20 = vpop.permute.xlu1 %7290  ;;  %v7238_v55 = vsel %vm1566_vm4, %v15114_v13, 0.0 }
0x1b17   : > { %7233 = vadd.xlane.f32.xlu0 %v7232_v12  ;;  %11103 = vmatprep.subr.msk.bf16.mxu0 %vm1713_vm2, %v7291_v20  ;;  %v7300_v56 = vsel %vm1713_vm2, %v7291_v20, 0 }
0x1b18   : > { %10898 = vmatpush3.bf16.msra.mxu0 %v7300_v56 }
0x1b19   : > { %10911 = vmatprep.subr.bf16.mxu0 %v7413_v16 }
0x1b1a   : > { %v7353_v53 = vpop.permute.xlu1 %7352 }
0x1b1b   : > { %v15120_v15 = vpop.eup %11878  ;;  %7239 = vadd.xlane.f32.xlu0 %v7238_v55  ;;  %11104 = vmatprep.subr.msk.bf16.mxu1 %vm1713_vm2, %v7353_v53  ;;  %v7362_v8 = vsel %vm1713_vm2, %v7353_v53, 0 }
0x1b1c   : > { %10906 = vmatpush3.bf16.msra.mxu1 %v7362_v8  ;;  %v7250_v60 = vsel %vm1566_vm4, %v15120_v15, 0.0 }
0x1b1d   : > { %v15124_v14 = vpop.eup %11880 }
0x1b1e   : > { %v15126_v3 = vpop.permute.xlu1 %7474  ;;  %v7253_v45 = vsel %vm1566_vm4, %v15124_v14, 0.0  ;;  %v15132_v9 = vpop.eup %11882 }
0x1b1f   : > { %7251 = vadd.xlane.f32.xlu0 %v7250_v60  ;;  %7254 = vadd.xlane.f32.xlu1 %v7253_v45  ;;  %v7247_v38 = vsel %vm1566_vm4, %v15132_v9, 0.0 }
0x1b20   : > { %10919 = vmatprep.subr.bf16.mxu1 %v15126_v3 }
0x1b23   : > { %7248 = vadd.xlane.f32.xlu1 %v7247_v38 }
0x1b34   : > { %7608 = vrot.lane.b32.xlu1 %v14412_v2, %s16212_s30 }
0x1b35   : > { %7540 = vrot.lane.b32.xlu0 %v14396_v27, %s16212_s30 }
0x1b38   : > { %7610 = vrot.lane.b32.xlu1 %v14420_v7, %s16212_s30 }
0x1b39   : > { %7542 = vrot.lane.b32.xlu0 %v14406_v57, %s16212_s30 }
0x1b3c   : > { %7538 = vrot.lane.b32.xlu1 %v14406_v57, %s16264_s27  ;;  %v15169_v57 = vpop.permute.xlu1 %7476 }
0x1b3d   : > { %7536 = vrot.lane.b32.xlu0 %v14396_v27, %s16264_s27  ;;  %v7415_v27 = vpop.permute.xlu0 %7414 }
0x1b40   : > { %7604 = vrot.lane.b32.xlu1 %v14412_v2, %s16264_s27 }
0x1b41   : > { %7676 = vrot.lane.b32.xlu0 %v14426_v52, %s16212_s30 }
0x1b44   : > { %7678 = vrot.lane.b32.xlu1 %v14436_v11, %s16212_s30 }
0x1b45   : > { %7606 = vrot.lane.b32.xlu0 %v14420_v7, %s16264_s27 }
0x1b48   : > { %7674 = vrot.lane.b32.xlu1 %v14436_v11, %s16264_s27 }
0x1b49   : > { %7672 = vrot.lane.b32.xlu0 %v14426_v52, %s16264_s27 }
0x1b4c   : > { %7746 = vrot.lane.b32.xlu1 %v14450_v41, %s16212_s30 }
0x1b4d   : > { %7744 = vrot.lane.b32.xlu0 %v14442_v49, %s16212_s30 }
0x1b50   : > { %7742 = vrot.lane.b32.xlu1 %v14450_v41, %s16264_s27 }
0x1b51   : > { %7740 = vrot.lane.b32.xlu0 %v14442_v49, %s16264_s27 }
0x1b8e   : > { %v7228_v2 = vpop.xlane.xlu0 %7227 }
0x1b8f   : > { %11884 = vrcp.f32 %v7228_v2 }
0x1b91   : > { %v7225_v7 = vpop.xlane.xlu1 %7224 }
0x1b92   : > { %11886 = vrcp.f32 %v7225_v7  ;;  %v7222_v52 = vpop.xlane.xlu0 %7221 }
0x1b93   : > { %11888 = vrcp.f32 %v7222_v52 }
0x1b97   : > { %v7237_v54 = vpop.xlane.xlu1 %7236 }
0x1b98   : > { %11890 = vrcp.f32 %v7237_v54 }
0x1b99   : > { %v11885_v11 = vpop.eup %11884 }
0x1b9a   : > { %v7270_v41 = vmul.f32 %v11885_v11, %v15075_v23  ;;  %v7424_v23 = vsel %vm1713_vm2, %v7415_v27, 0 }
0x1b9b   : > { %v7231_v49 = vpop.xlane.xlu1 %7230 }
0x1b9c   : > { %v11887_v51 = vpop.eup %11886  ;;  %v7281_v56 = vpack.c.bf16 %v7270_v41, %v7270_v41  ;;  %11892 = vrcp.f32 %v7231_v49 }
0x1b9d   : > { %v11889_v33 = vpop.eup %11888  ;;  %v7269_v35 = vmul.f32 %v11887_v51, %v15080_v10 }
0x1b9e   : > { %v7268_v4 = vmul.f32 %v11889_v33, %v15082_v19 }
0x1ba0   : > { %v7246_v20 = vpop.xlane.xlu0 %7245  ;;  %v7280_v12 = vpack.c.bf16 %v7269_v35, %v7268_v4 }
0x1ba1   : > { %v7243_v53 = vpop.xlane.xlu1 %7242 }
0x1ba2   : > { %10899 = vmatprep.mubr.msk.bf16.mxu0 %vm1566_vm4, %v7280_v12  ;;  %v11891_v19 = vpop.eup %11890 }
0x1ba3   : > { %10900 = vmatmul.mubr.msk.bf16.vlgmr.msra.gmra.mrb[156].mxu0 %vm1566_vm4, %v7281_v56 }
0x1ba4   : > { %10912 = vmatpush3.bf16.msra.mxu0 %v7413_v16  ;;  %v7234_v55 = vpop.xlane.xlu0 %7233  ;;  %v7273_v16 = vmul.f32 %v11891_v19, %v15091_v26 }
0x1ba5   : > { %11894 = vrcp.f32 %v7234_v55  ;;  %11105 = vmatprep.subr.msk.bf16.mxu0 %vm1713_vm2, %v7415_v27 }
0x1ba6   : > { %11896 = vrcp.f32 %v7246_v20  ;;  %v11893_v45 = vpop.eup %11892  ;;  %v7283_v35 = vpack.c.bf16 %v7273_v16, %v7273_v16 }
0x1ba7   : > { %11898 = vrcp.f32 %v7243_v53  ;;  %v7271_v11 = vmul.f32 %v11893_v45, %v15095_v30 }
0x1ba8   : > { %10914 = vmatpush3.bf16.msra.mxu0 %v7424_v23  ;;  %v7240_v10 = vpop.xlane.xlu0 %7239 }
0x1ba9   : > { %11900 = vrcp.f32 %v7240_v10 }
0x1bac   : > { %v7252_v8 = vpop.xlane.xlu0 %7251  ;;  %v7255_v60 = vpop.xlane.xlu1 %7254 }
0x1bad   : > { %11902 = vrcp.f32 %v7255_v60 }
0x1bae   : > { %11904 = vrcp.f32 %v7252_v8 }
0x1baf   : > { %v11895_v38 = vpop.eup %11894 }
0x1bb0   : > { %v11897_v2 = vpop.eup %11896  ;;  %v7541_v7 = vpop.permute.xlu0 %7540  ;;  %v7272_v54 = vmul.f32 %v11895_v38, %v15108_v62 }
0x1bb1   : > { %v7249_v52 = vpop.xlane.xlu1 %7248  ;;  %v11899_v27 = vpop.eup %11898  ;;  %11107 = vmatprep.subr.msk.bf16.mxu0 %vm1293_vm1, %v7541_v7  ;;  %v7276_v41 = vmul.f32 %v11897_v2, %v15102_v0  ;;  %v7551_v55 = vsel %vm1293_vm1, %v7541_v7, 0 }
0x1bb2   : > { %11906 = vrcp.f32 %v7249_v52  ;;  %v7282_v51 = vpack.c.bf16 %v7272_v54, %v7271_v11  ;;  %v7275_v20 = vmul.f32 %v11899_v27, %v15104_v21  ;;  %v7486_v21 = vsel %vm1713_vm2, %v15169_v57, 0 }
0x1bb3   : > { %v11901_v33 = vpop.eup %11900  ;;  %v7285_v62 = vpack.c.bf16 %v7276_v41, %v7276_v41 }
0x1bb4   : > { %v7543_v4 = vpop.permute.xlu0 %7542  ;;  %10907 = vmatprep.mubr.msk.bf16.mxu1 %vm1566_vm4, %v7282_v51  ;;  %v7274_v49 = vmul.f32 %v11901_v33, %v15114_v13 }
0x1bb5   : > { %v7609_v26 = vpop.permute.xlu1 %7608  ;;  %10908 = vmatmul.mubr.msk.bf16.vlgmr.msra.gmra.mrb[184].mxu1 %vm1566_vm4, %v7283_v35 }
0x1bb6   : > { %10920 = vmatpush3.bf16.msra.mxu1 %v15126_v3  ;;  %v7284_v30 = vpack.c.bf16 %v7275_v20, %v7274_v49  ;;  %v7619_v16 = vsel %vm1293_vm1, %v7609_v26, 0 }
0x1bb7   : > { %11106 = vmatprep.subr.msk.bf16.mxu1 %vm1713_vm2, %v15169_v57  ;;  %v11903_v12 = vpop.eup %11902 }
0x1bb8   : > { %v7537_v56 = vpop.permute.xlu0 %7536  ;;  %10915 = vmatprep.mubr.msk.bf16.mxu0 %vm1566_vm4, %v7284_v30  ;;  %v11905_v53 = vpop.eup %11904  ;;  %v7279_v3 = vmul.f32 %v11903_v12, %v15124_v14  ;;  %v7554_v14 = vsel %vm1293_vm1, %v7543_v4, 0 }
0x1bb9   : > { %v7611_v0 = vpop.permute.xlu1 %7610  ;;  %10916 = vmatmul.mubr.msk.bf16.vlgmr.msra.gmra.mrb[160].mxu0 %vm1566_vm4, %v7285_v62  ;;  %v7278_v8 = vmul.f32 %v11905_v53, %v15120_v15 }
0x1bba   : > { %10922 = vmatpush3.bf16.msra.mxu1 %v7486_v21  ;;  %10928 = vmatpush3.bf16.xpose.msra.mxu0 %v7551_v55  ;;  %v7287_v45 = vpack.c.bf16 %v7279_v3, %v7279_v3  ;;  %v7622_v7 = vsel %vm1293_vm1, %v7611_v0, 0 }
0x1bbb   : > { %11108 = vmatprep.subr.msk.bf16.mxu0 %vm1293_vm1, %v7543_v4  ;;  %10931 = vmatprep.mubr.msk.bf16.mxu0 %vm1293_vm1, %v7537_v56 }
0x1bbc   : > { %v11907_v13 = vpop.eup %11906  ;;  %11109 = vmatprep.subr.msk.bf16.mxu1 %vm1293_vm1, %v7609_v26  ;;  %v7677_v23 = vpop.permute.xlu0 %7676 }
0x1bbd   : > { %v7539_v10 = vpop.permute.xlu1 %7538  ;;  %v7277_v19 = vmul.f32 %v11907_v13, %v15132_v9  ;;  %v7687_v2 = vsel %vm1293_vm1, %v7677_v23, 0 }
0x1bbf   : > { %v7286_v60 = vpack.c.bf16 %v7278_v8, %v7277_v19 }
0x1bc0   : > { %v7607_v57 = vpop.permute.xlu0 %7606 }
0x1bc1   : > { %10923 = vmatprep.mubr.msk.bf16.mxu1 %vm1566_vm4, %v7286_v60  ;;  %v7605_v38 = vpop.permute.xlu1 %7604 }
0x1bc2   : > { %10924 = vmatmul.mubr.msk.bf16.vlgmr.msra.gmra.mrb[188].mxu1 %vm1566_vm4, %v7287_v45  ;;  %10930 = vmatpush3.bf16.xpose.msra.mxu0 %v7554_v14 }
0x1bc3   : > { %10939 = vmatprep.mubr.msk.bf16.mxu1 %vm1293_vm1, %v7605_v38  ;;  %10936 = vmatpush3.bf16.xpose.msra.mxu1 %v7619_v16 }
0x1bc4   : > { %11111 = vmatprep.subr.msk.bf16.mxu0 %vm1293_vm1, %v7677_v23  ;;  %11110 = vmatprep.subr.msk.bf16.mxu1 %vm1293_vm1, %v7611_v0  ;;  %v7673_v15 = vpop.permute.xlu0 %7672 }
0x1bc5   : > { %v7679_v9 = vpop.permute.xlu1 %7678 }
0x1bc6   : > { %v7690_v54 = vsel %vm1293_vm1, %v7679_v9, 0 }
0x1bc8   : > { %v7745_v52 = vpop.permute.xlu0 %7744 }
0x1bc9   : > { %10932 = vmatmul.mubr.msk.bf16.vlgmr.msra.gmra.mrb[164].mxu0 %vm1293_vm1, %v7539_v10  ;;  %v7675_v11 = vpop.permute.xlu1 %7674  ;;  %v7755_v27 = vsel %vm1293_vm1, %v7745_v52, 0 }
0x1bca   : > { %10944 = vmatpush3.bf16.xpose.msra.mxu0 %v7687_v2  ;;  %10947 = vmatprep.mubr.msk.bf16.mxu0 %vm1293_vm1, %v7673_v15 }
0x1bcb   : > { %10938 = vmatpush3.bf16.xpose.msra.mxu1 %v7622_v7  ;;  %11112 = vmatprep.subr.msk.bf16.mxu0 %vm1293_vm1, %v7679_v9 }
0x1bcc   : > { %11113 = vmatprep.subr.msk.bf16.mxu1 %vm1293_vm1, %v7745_v52  ;;  %v7741_v51 = vpop.permute.xlu0 %7740 }
0x1bcd   : > { %v7747_v33 = vpop.permute.xlu1 %7746 }
0x1bce   : > { %v7758_v35 = vsel %vm1293_vm1, %v7747_v33, 0 }
0x1bd1   : > { %v7743_v41 = vpop.permute.xlu1 %7742 }
0x1bd2   : > { %10940 = vmatmul.mubr.msk.bf16.vlgmr.msra.gmra.mrb[192].mxu1 %vm1293_vm1, %v7607_v57  ;;  %10946 = vmatpush3.bf16.xpose.msra.mxu0 %v7690_v54 }
0x1bd3   : > { %10952 = vmatpush3.bf16.xpose.msra.mxu1 %v7755_v27  ;;  %10955 = vmatprep.mubr.msk.bf16.mxu1 %vm1293_vm1, %v7741_v51 }
0x1bd4   : > { %11114 = vmatprep.subr.msk.bf16.mxu1 %vm1293_vm1, %v7747_v33 }
0x1bd9   : > { %10948 = vmatmul.mubr.msk.bf16.vlgmr.msra.gmra.mrb[168].mxu0 %vm1293_vm1, %v7675_v11 }
0x1bdb   : > { %10954 = vmatpush3.bf16.xpose.msra.mxu1 %v7758_v35 }
0x1be2   : > { %10956 = vmatmul.mubr.msk.bf16.vlgmr.msra.gmra.mrb[196].mxu1 %vm1293_vm1, %v7743_v41 }
0x1c76   : > { %v15222_v4 = vpop.f32.mrb[156].mxu0 }
0x1c77   : > { %v15224_v26 = vpop.f32.mrb[157].mxu0 }
0x1c78   : > { %v10902_v49 = vpop.f32.mrb[158].mxu0 }
0x1c79   : > { %v15226_v20 = vpop.f32.mrb[159].mxu0 }
0x1c88   : > { %v15230_v62 = vpop.f32.mrb[184].mxu1 }
0x1c89   : > { %v15232_v12 = vpop.f32.mrb[185].mxu1 }
0x1c8a   : > { %v10910_v0 = vpop.f32.mrb[186].mxu1 }
0x1c8b   : > { %v15236_v53 = vpop.f32.mrb[187].mxu1 }
0x1c8c   : > { %v15240_v21 = vpop.f32.mrb[160].mxu0 }
0x1c8d   : > { %v15242_v13 = vpop.f32.mrb[161].mxu0 }
0x1c8e   : > { %v10918_v3 = vpop.f32.mrb[162].mxu0 }
0x1c8f   : > { %v15244_v23 = vpop.f32.mrb[163].mxu0 }
0x1c95   : > { %v15248_v19 = vpop.f32.mrb[188].mxu1 }
0x1c96   : > { %v15250_v8 = vpop.f32.mrb[189].mxu1 }
0x1c97   : > { %v10926_v45 = vpop.f32.mrb[190].mxu1 }
0x1c98   : > { %v15254_v57 = vpop.f32.mrb[191].mxu1 }
0x1c9c   : > { %v10933_v14 = vpop.f32.mrb[164].mxu0 }
0x1c9d   : > { %v7810_v16 = vsel %vm663_vm3, %v10933_v14, -1e+30  ;;  %v7590_v15 = vpop.f32.mrb[165].mxu0 }
0x1c9e   : > { %v7826_v9 = vsel %vm1566_vm4, %v7810_v16, -inf  ;;  %v10934_v2 = vpop.f32.mrb[166].mxu0  ;;  %v7808_v7 = vsel %vm663_vm3, %v7590_v15, -1e+30 }
0x1c9f   : > { %7827 = vmax.xlane.f32.xlu0 %v7826_v9  ;;  %v7593_v52 = vpop.f32.mrb[167].mxu0  ;;  %v7820_v27 = vsel %vm1566_vm4, %v7808_v7, -inf }
0x1ca0   : > { %v7809_v11 = vsel %vm663_vm3, %v7593_v52, -1e+30 }
0x1ca1   : > { %v7823_v54 = vsel %vm1566_vm4, %v7809_v11, -inf }
0x1ca2   : > { %7824 = vmax.xlane.f32.xlu1 %v7823_v54 }
0x1ca3   : > { %7821 = vmax.xlane.f32.xlu0 %v7820_v27 }
0x1ca5   : > { %v10941_v51 = vpop.f32.mrb[192].mxu1 }
0x1ca6   : > { %v7813_v33 = vsel %vm663_vm3, %v10941_v51, -1e+30  ;;  %v7658_v35 = vpop.f32.mrb[193].mxu1 }
0x1ca7   : > { %v7835_v41 = vsel %vm1566_vm4, %v7813_v33, -inf  ;;  %v7811_v49 = vsel %vm663_vm3, %v7658_v35, -1e+30  ;;  %v10942_v0 = vpop.f32.mrb[194].mxu1 }
0x1ca8   : > { %v7829_v3 = vsel %vm1566_vm4, %v7811_v49, -inf  ;;  %7836 = vmax.xlane.f32.xlu1 %v7835_v41  ;;  %v7661_v45 = vpop.f32.mrb[195].mxu1 }
0x1ca9   : > { %v15275_v14 = vsel %vm663_vm3, %v7661_v45, -1e+30  ;;  %7830 = vmax.xlane.f32.xlu0 %v7829_v3 }
0x1caa   : > { %v7832_v15 = vsel %vm1566_vm4, %v15275_v14, -inf }
0x1cac   : > { %v10949_v9 = vpop.f32.mrb[168].mxu0 }
0x1cad   : > { %v15281_v2 = vsel %vm663_vm3, %v10949_v9, -1e+30  ;;  %7833 = vmax.xlane.f32.xlu0 %v7832_v15  ;;  %v7726_v52 = vpop.f32.mrb[169].mxu0 }
0x1cae   : > { %v10950_v54 = vpop.f32.mrb[170].mxu0  ;;  %v7844_v51 = vsel %vm1566_vm4, %v15281_v2, -inf  ;;  %v15287_v35 = vsel %vm663_vm3, %v7726_v52, -1e+30 }
0x1caf   : > { %v7729_v27 = vpop.f32.mrb[171].mxu0  ;;  %v7838_v41 = vsel %vm1566_vm4, %v15287_v35, -inf }
0x1cb0   : > { %v15303_v54 = vsel %vm663_vm3, %v7729_v27, -1e+30 }
0x1cb1   : > { %7845 = vmax.xlane.f32.xlu0 %v7844_v51  ;;  %v7841_v51 = vsel %vm1566_vm4, %v15303_v54, -inf }
0x1cb5   : > { %7839 = vmax.xlane.f32.xlu0 %v7838_v41  ;;  %v10957_v0 = vpop.f32.mrb[196].mxu1 }
0x1cb6   : > { %v7794_v3 = vpop.f32.mrb[197].mxu1  ;;  %v15309_v41 = vsel %vm663_vm3, %v10957_v0, -1e+30 }
0x1cb7   : > { %v10958_v45 = vpop.f32.mrb[198].mxu1 }
0x1cb8   : > { %v7797_v9 = vpop.f32.mrb[199].mxu1  ;;  %v15315_v45 = vsel %vm663_vm3, %v7794_v3, -1e+30 }
0x1cb9   : > { %v15293_v15 = vsel %vm663_vm3, %v7797_v9, -1e+30  ;;  %7960 = vrot.lane.b32.xlu1 %v14398_v44, %s16264_s27  ;;  %v7853_v44 = vsel %vm1566_vm4, %v15309_v41, -inf }
0x1cba   : > { %v7850_v52 = vsel %vm1566_vm4, %v15293_v15, -inf }
0x1cbb   : > { %7851 = vmax.xlane.f32.xlu0 %v7850_v52 }
0x1cd1   : > { %8022 = vrot.lane.b32.xlu0 %v14416_v61, %s16264_s27  ;;  %v7847_v61 = vsel %vm1566_vm4, %v15315_v45, -inf }
0x1cdd   : > { %7842 = vmax.xlane.f32.xlu1 %v7841_v51 }
0x1ce1   : > { %7854 = vmax.xlane.f32.xlu1 %v7853_v44 }
0x1ce5   : > { %7848 = vmax.xlane.f32.xlu1 %v7847_v61 }
0x1cf6   : > { %7962 = vrot.lane.b32.xlu1 %v14479_v24, %s16264_s27 }
0x1cfa   : > { %8024 = vrot.lane.b32.xlu1 %v14645_v39, %s16264_s27 }
0x1d2c   : > { %v7828_v27 = vpop.xlane.xlu0 %7827 }
0x1d2d   : > { %v7858_v0 = vsub.f32 %v7810_v16, %v7828_v27 }
0x1d2f   : > { %v7872_v9 = vmul.f32 1.442695, %v7858_v0  ;;  %v7825_v52 = vpop.xlane.xlu1 %7824 }
0x1d30   : > { %v7857_v51 = vsub.f32 %v7809_v11, %v7825_v52  ;;  %v7822_v38 = vpop.xlane.xlu0 %7821 }
0x1d31   : > { %11908 = vpow2.f32 %v7872_v9  ;;  %v7856_v37 = vsub.f32 %v7808_v7, %v7822_v38 }
0x1d32   : > { %v7870_v3 = vmul.f32 1.442695, %v7857_v51 }
0x1d33   : > { %v7868_v44 = vmul.f32 1.442695, %v7856_v37 }
0x1d34   : > { %11910 = vpow2.f32 %v7870_v3 }
0x1d35   : > { %11912 = vpow2.f32 %v7868_v44  ;;  %v7837_v60 = vpop.xlane.xlu1 %7836 }
0x1d36   : > { %v7861_v61 = vsub.f32 %v7813_v33, %v7837_v60  ;;  %v7831_v10 = vpop.xlane.xlu0 %7830 }
0x1d37   : > { %v7859_v55 = vsub.f32 %v7811_v49, %v7831_v10 }
0x1d38   : > { %v7878_v24 = vmul.f32 1.442695, %v7861_v61 }
0x1d39   : > { %v7874_v56 = vmul.f32 1.442695, %v7859_v55  ;;  %v7961_v30 = vpop.permute.xlu1 %7960 }
0x1d3a   : > { %11914 = vpow2.f32 %v7878_v24  ;;  %v7834_v39 = vpop.xlane.xlu0 %7833  ;;  %10959 = vmatprep.subr.bf16.mxu0 %v7961_v30 }
0x1d3b   : > { %v15323_v16 = vpop.eup %11908  ;;  %10960 = vmatpush3.bf16.msra.mxu0 %v7961_v30  ;;  %11916 = vpow2.f32 %v7874_v56  ;;  %v7860_v7 = vsub.f32 %v15275_v14, %v7834_v39 }
0x1d3c   : > { %v7898_v38 = vsel %vm1566_vm4, %v15323_v16, 0.0 }
0x1d3d   : > { %7899 = vadd.xlane.f32.xlu0 %v7898_v38  ;;  %v7876_v56 = vmul.f32 1.442695, %v7860_v7 }
0x1d3e   : > { %v15328_v11 = vpop.eup %11910  ;;  %v7846_v60 = vpop.xlane.xlu0 %7845 }
0x1d3f   : > { %v15330_v10 = vpop.eup %11912  ;;  %v7864_v55 = vsub.f32 %v15281_v2, %v7846_v60  ;;  %v7895_v33 = vsel %vm1566_vm4, %v15328_v11, 0.0 }
0x1d40   : > { %7896 = vadd.xlane.f32.xlu1 %v7895_v33  ;;  %v7892_v30 = vsel %vm1566_vm4, %v15330_v10, 0.0 }
0x1d41   : > { %v7884_v49 = vmul.f32 1.442695, %v7864_v55  ;;  %7893 = vadd.xlane.f32.xlu0 %v7892_v30 }
0x1d42   : > { %v7840_v27 = vpop.xlane.xlu0 %7839 }
0x1d43   : > { %11918 = vpow2.f32 %v7884_v49  ;;  %v7862_v14 = vsub.f32 %v15287_v35, %v7840_v27 }
0x1d44   : > { %v15338_v0 = vpop.eup %11914  ;;  %11920 = vpow2.f32 %v7876_v56 }
0x1d45   : > { %v7880_v9 = vmul.f32 1.442695, %v7862_v14  ;;  %v7907_v2 = vsel %vm1566_vm4, %v15338_v0, 0.0  ;;  %v15342_v52 = vpop.eup %11916 }
0x1d46   : > { %7908 = vadd.xlane.f32.xlu1 %v7907_v2  ;;  %v7901_v37 = vsel %vm1566_vm4, %v15342_v52, 0.0 }
0x1d47   : > { %11922 = vpow2.f32 %v7880_v9 }
0x1d48   : > { %v7852_v51 = vpop.xlane.xlu0 %7851 }
0x1d49   : > { %v7866_v55 = vsub.f32 %v15293_v15, %v7852_v51 }
0x1d4a   : > { %7902 = vadd.xlane.f32.xlu1 %v7901_v37 }
0x1d4b   : > { %v7888_v49 = vmul.f32 1.442695, %v7866_v55  ;;  %v16265_v55 = vpack.i.bf16 %v14966_v50, %v14964_v31 }
0x1d4c   : > { %v8023_v3 = vpop.permute.xlu0 %8022 }
0x1d4d   : > { %v15346_v44 = vpop.eup %11918  ;;  %10967 = vmatprep.subr.bf16.mxu1 %v8023_v3 }
0x1d4e   : > { %10968 = vmatpush3.bf16.msra.mxu1 %v8023_v3  ;;  %v7916_v35 = vsel %vm1566_vm4, %v15346_v44, 0.0  ;;  %v15350_v61 = vpop.eup %11920 }
0x1d4f   : > { %7917 = vadd.xlane.f32.xlu0 %v7916_v35  ;;  %v7904_v24 = vsel %vm1566_vm4, %v15350_v61, 0.0 }
0x1d51   : > { %v15354_v39 = vpop.eup %11922 }
0x1d52   : > { %v7910_v38 = vsel %vm1566_vm4, %v15354_v39, 0.0 }
0x1d53   : > { %7905 = vadd.xlane.f32.xlu0 %v7904_v24 }
0x1d57   : > { %7911 = vadd.xlane.f32.xlu0 %v7910_v38 }
0x1d6a   : > { %v7843_v7 = vpop.xlane.xlu1 %7842 }
0x1d6b   : > { %v7863_v60 = vsub.f32 %v15303_v54, %v7843_v7 }
0x1d6d   : > { %v7882_v33 = vmul.f32 1.442695, %v7863_v60 }
0x1d6e   : > { %v7855_v30 = vpop.xlane.xlu1 %7854 }
0x1d6f   : > { %11924 = vpow2.f32 %v7882_v33  ;;  %v7867_v56 = vsub.f32 %v15309_v41, %v7855_v30  ;;  %v16266_v33 = vpack.i.bf16 %v14972_v6, %v14962_v42 }
0x1d71   : > { %v7890_v27 = vmul.f32 1.442695, %v7867_v56 }
0x1d72   : > { %v7849_v14 = vpop.xlane.xlu1 %7848 }
0x1d73   : > { %11926 = vpow2.f32 %v7890_v27  ;;  %v7865_v9 = vsub.f32 %v15315_v45, %v7849_v14 }
0x1d74   : > { %11928 = vpow2.f32 %v7888_v49 }
0x1d75   : > { %v7886_v2 = vmul.f32 1.442695, %v7865_v9 }
0x1d76   : > { %v7963_v37 = vpop.permute.xlu1 %7962 }
0x1d77   : > { %11930 = vpow2.f32 %v7886_v2  ;;  %v7972_v3 = vsel %vm1713_vm2, %v7963_v37, 0  ;;  %11115 = vmatprep.subr.msk.bf16.mxu0 %vm1713_vm2, %v7963_v37 }
0x1d78   : > { %10962 = vmatpush3.bf16.msra.mxu0 %v7972_v3 }
0x1d79   : > { %v15364_v15 = vpop.eup %11924 }
0x1d7a   : > { %v8025_v54 = vpop.permute.xlu1 %8024  ;;  %v7913_v41 = vsel %vm1566_vm4, %v15364_v15, 0.0 }
0x1d7b   : > { %v8034_v51 = vsel %vm1713_vm2, %v8025_v54, 0  ;;  %7914 = vadd.xlane.f32.xlu1 %v7913_v41  ;;  %11116 = vmatprep.subr.msk.bf16.mxu1 %vm1713_vm2, %v8025_v54 }
0x1d7c   : > { %10970 = vmatpush3.bf16.msra.mxu1 %v8034_v51 }
0x1d7d   : > { %v15370_v45 = vpop.eup %11926 }
0x1d7e   : > { %v7925_v35 = vsel %vm1566_vm4, %v15370_v45, 0.0  ;;  %v15374_v24 = vpop.eup %11928 }
0x1d7f   : > { %7926 = vadd.xlane.f32.xlu0 %v7925_v35  ;;  %v7922_v7 = vsel %vm1566_vm4, %v15374_v24, 0.0 }
0x1d81   : > { %v15376_v38 = vpop.eup %11930 }
0x1d82   : > { %v7919_v60 = vsel %vm1566_vm4, %v15376_v38, 0.0 }
0x1d83   : > { %7923 = vadd.xlane.f32.xlu0 %v7922_v7  ;;  %7920 = vadd.xlane.f32.xlu1 %v7919_v60 }
0x1d94   : > { %8086 = vrot.lane.b32.xlu1 %v14494_v22, %s16264_s27 }
0x1d98   : > { %8146 = vrot.lane.b32.xlu1 %v14446_v5, %s16264_s27  ;;  %v16267_v5 = vpack.i.bf16 %v15226_v20, %v15224_v26 }
0x1d99   : > { %8084 = vrot.lane.b32.xlu0 %v14428_v58, %s16264_s27  ;;  %v16268_v58 = vpack.i.bf16 %v15232_v12, %v15222_v4 }
0x1d9c   : > { %8148 = vrot.lane.b32.xlu1 %v14660_v43, %s16264_s27 }
0x1d9d   : > { %11259 = vrot.lane.b32.xlu0 %v16265_v55, %s16212_s30 }
0x1da0   : > { %11264 = vrot.lane.b32.xlu1 %v16266_v33, %s16212_s30 }
0x1da1   : > { %11269 = vrot.lane.b32.xlu0 %v16267_v5, %s16214_s28 }
0x1da4   : > { %11274 = vrot.lane.b32.xlu1 %v16268_v58, %s16214_s28 }
0x1dca   : > { %v7900_v22 = vpop.xlane.xlu0 %7899 }
0x1dcb   : > { %11932 = vrcp.f32 %v7900_v22 }
0x1dcd   : > { %v7897_v43 = vpop.xlane.xlu1 %7896 }
0x1dce   : > { %11934 = vrcp.f32 %v7897_v43  ;;  %v7894_v31 = vpop.xlane.xlu0 %7893 }
0x1dcf   : > { %11936 = vrcp.f32 %v7894_v31 }
0x1dd3   : > { %v7909_v30 = vpop.xlane.xlu1 %7908 }
0x1dd4   : > { %11938 = vrcp.f32 %v7909_v30 }
0x1dd5   : > { %v11933_v50 = vpop.eup %11932 }
0x1dd6   : > { %v7942_v56 = vmul.f32 %v11933_v50, %v15323_v16 }
0x1dd7   : > { %v7903_v49 = vpop.xlane.xlu1 %7902 }
0x1dd8   : > { %v11935_v42 = vpop.eup %11934  ;;  %v7953_v12 = vpack.c.bf16 %v7942_v56, %v7942_v56  ;;  %11940 = vrcp.f32 %v7903_v49 }
0x1dd9   : > { %v11937_v6 = vpop.eup %11936  ;;  %v7941_v26 = vmul.f32 %v11935_v42, %v15328_v11 }
0x1dda   : > { %v7940_v20 = vmul.f32 %v11937_v6, %v15330_v10 }
0x1ddc   : > { %v7918_v27 = vpop.xlane.xlu0 %7917  ;;  %v7952_v4 = vpack.c.bf16 %v7941_v26, %v7940_v20 }
0x1dde   : > { %10963 = vmatprep.mubr.msk.bf16.mxu0 %vm1566_vm4, %v7952_v4  ;;  %v11939_v9 = vpop.eup %11938 }
0x1ddf   : > { %10964 = vmatmul.mubr.msk.bf16.vlgmr.msra.gmra.mrb[172].mxu0 %vm1566_vm4, %v7953_v12  ;;  %v7945_v16 = vmul.f32 %v11939_v9, %v15338_v0  ;;  %v11418_v9 = vld [vmem:[%s16083_s7 + $0x30] sm:$0xff]  }
0x1de0   : > { %v7906_v14 = vpop.xlane.xlu0 %7905 }
0x1de1   : > { %11942 = vrcp.f32 %v7906_v14  ;;  %v7955_v54 = vpack.c.bf16 %v7945_v16, %v7945_v16  ;;  %v16269_v16 = vpack.i.bf16 %v14970_v18, %v14976_v63  ;;  %v16271_v18 = vpack.i.bf16 %v14984_v32, %v14982_v34 }
0x1de2   : > { %v11941_v2 = vpop.eup %11940  ;;  %v16272_v63 = vpack.i.bf16 %v14990_v25, %v14980_v1 }
0x1de3   : > { %v7943_v11 = vmul.f32 %v11941_v2, %v15342_v52 }
0x1de4   : > { %v7912_v41 = vpop.xlane.xlu0 %7911 }
0x1de5   : > { %11944 = vrcp.f32 %v7912_v41 }
0x1deb   : > { %v11943_v37 = vpop.eup %11942 }
0x1dec   : > { %v7944_v10 = vmul.f32 %v11943_v37, %v15350_v61  ;;  %v11419_v37 = vld [vmem:[%s16083_s7 + $0x38] sm:$0xff]  }
0x1dee   : > { %v7954_v3 = vpack.c.bf16 %v7944_v10, %v7943_v11  ;;  %v16270_v11 = vpack.i.bf16 %v15230_v62, %v15236_v53  ;;  %v16273_v62 = vpack.i.bf16 %v15244_v23, %v15242_v13  ;;  %v16274_v53 = vpack.i.bf16 %v15250_v8, %v15240_v21 }
0x1def   : > { %v11945_v0 = vpop.eup %11944  ;;  %v16275_v21 = vpack.i.bf16 %v14988_v28, %v14994_v48  ;;  %v16276_v13 = vpack.i.bf16 %v15248_v19, %v15254_v57 }
0x1df0   : > { %10971 = vmatprep.mubr.msk.bf16.mxu1 %vm1566_vm4, %v7954_v3  ;;  %v7946_v5 = vmul.f32 %v11945_v0, %v15354_v39 }
0x1df1   : > { %10972 = vmatmul.mubr.msk.bf16.vlgmr.msra.gmra.mrb[200].mxu1 %vm1566_vm4, %v7955_v54 }
0x1e08   : > { %v7915_v51 = vpop.xlane.xlu1 %7914 }
0x1e09   : > { %11946 = vrcp.f32 %v7915_v51 }
0x1e0a   : > { %11948 = vrcp.f32 %v7918_v27 }
0x1e0c   : > { %v7927_v35 = vpop.xlane.xlu0 %7926 }
0x1e0d   : > { %11950 = vrcp.f32 %v7927_v35 }
0x1e10   : > { %v7924_v7 = vpop.xlane.xlu0 %7923  ;;  %v7921_v60 = vpop.xlane.xlu1 %7920 }
0x1e11   : > { %11952 = vrcp.f32 %v7924_v7 }
0x1e12   : > { %11954 = vrcp.f32 %v7921_v60 }
0x1e13   : > { %v11947_v52 = vpop.eup %11946 }
0x1e14   : > { %v11949_v61 = vpop.eup %11948  ;;  %v8085_v55 = vpop.permute.xlu0 %8084  ;;  %v7947_v58 = vmul.f32 %v11947_v52, %v15364_v15 }
0x1e15   : > { %v8087_v33 = vpop.permute.xlu1 %8086  ;;  %10975 = vmatprep.subr.bf16.mxu0 %v8085_v55  ;;  %v7948_v43 = vmul.f32 %v11949_v61, %v15346_v44 }
0x1e16   : > { %10976 = vmatpush3.bf16.msra.mxu0 %v8085_v55  ;;  %v7956_v22 = vpack.c.bf16 %v7947_v58, %v7946_v5  ;;  %v8096_v30 = vsel %vm1713_vm2, %v8087_v33, 0 }
0x1e17   : > { %11117 = vmatprep.subr.msk.bf16.mxu0 %vm1713_vm2, %v8087_v33  ;;  %v11951_v50 = vpop.eup %11950  ;;  %v7957_v39 = vpack.c.bf16 %v7948_v43, %v7948_v43 }
0x1e18   : > { %10979 = vmatprep.mubr.msk.bf16.mxu0 %vm1566_vm4, %v7956_v22  ;;  %v7951_v15 = vmul.f32 %v11951_v50, %v15370_v45  ;;  %v11416_v45 = vld [vmem:[%s16083_s7 + $0x20] sm:$0xff]   ;;  %v11260_v23 = vpop.permute.xlu0 %11259 }
0x1e19   : > { %v8147_v31 = vpop.permute.xlu1 %8146  ;;  %v11262_v5 = vunpack.i.h.bf16 %v11260_v23  ;;  %v11261_v58 = vunpack.i.l.bf16 %v11260_v23 }
0x1e1a   : > { %10983 = vmatprep.subr.bf16.mxu1 %v8147_v31  ;;  %10978 = vmatpush3.bf16.msra.mxu0 %v8096_v30  ;;  %v7959_v27 = vpack.c.bf16 %v7951_v15, %v7951_v15 }
0x1e1b   : > { %10984 = vmatpush3.bf16.msra.mxu1 %v8147_v31  ;;  %v11953_v42 = vpop.eup %11952  ;;  %10991 = vmatprep.subr.bf16.mxu0 %v11416_v45  ;;  %v8353_v50 = vsel %vm1293_vm1, %v14706_v46, %v11262_v5  ;;  %v8352_v28 = vsel %vm1293_vm1, %v14704_v59, %v11261_v58 }
0x1e1c   : > { %v11955_v6 = vpop.eup %11954  ;;  %v7950_v26 = vmul.f32 %v11953_v42, %v15374_v24  ;;  %v11270_v8 = vpop.permute.xlu0 %11269 }
0x1e1d   : > { %v8149_v56 = vpop.permute.xlu1 %8148  ;;  %10980 = vmatmul.mubr.msk.bf16.vlgmr.msra.gmra.mrb[176].mxu0 %vm1566_vm4, %v7957_v39  ;;  %v7949_v20 = vmul.f32 %v11955_v6, %v15376_v38  ;;  %v11417_v38 = vld [vmem:[%s16083_s7 + $0x28] sm:$0xff]   ;;  %v11272_v22 = vunpack.i.h.bf16 %v11270_v8  ;;  %v11271_v43 = vunpack.i.l.bf16 %v11270_v8 }
0x1e1e   : > { %v8158_v44 = vsel %vm1713_vm2, %v8149_v56, 0  ;;  %11118 = vmatprep.subr.msk.bf16.mxu1 %vm1713_vm2, %v8149_v56  ;;  %10992 = vmatpush3.bf16.msra.mxu0 %v11416_v45 }
0x1e1f   : > { %10986 = vmatpush3.bf16.msra.mxu1 %v8158_v44  ;;  %v7958_v49 = vpack.c.bf16 %v7950_v26, %v7949_v20  ;;  %10993 = vmatprep.subr.bf16.mxu0 %v11417_v38  ;;  %v8364_v19 = vsel %vm4116_vm5, %v8352_v28, %v11271_v43  ;;  %v8365_v57 = vsel %vm4116_vm5, %v8353_v50, %v11272_v22 }
0x1e21   : > { %10987 = vmatprep.mubr.msk.bf16.mxu1 %vm1566_vm4, %v7958_v49  ;;  %v11265_v15 = vpop.permute.xlu1 %11264 }
0x1e22   : > { %10988 = vmatmul.mubr.msk.bf16.vlgmr.msra.gmra.mrb[204].mxu1 %vm1566_vm4, %v7959_v27  ;;  %10994 = vmatpush3.bf16.msra.mxu0 %v11417_v38  ;;  %v11267_v46 = vunpack.i.h.bf16 %v11265_v15  ;;  %v11266_v44 = vunpack.i.l.bf16 %v11265_v15 }
0x1e23   : > { %8872 = vmatprep.mubr.bf16.mxu1 %v16211_v36  ;;  %10995 = vmatprep.subr.bf16.mxu0 %v11418_v9 }
0x1e25   : > { %v11275_v26 = vpop.permute.xlu1 %11274 }
0x1e26   : > { %10996 = vmatpush3.bf16.msra.mxu0 %v11418_v9  ;;  %v11277_v59 = vunpack.i.h.bf16 %v11275_v26  ;;  %v11276_v49 = vunpack.i.l.bf16 %v11275_v26 }
0x1e27   : > { %10997 = vmatprep.subr.bf16.mxu0 %v11419_v37 }
0x1e2a   : > { %10998 = vmatpush3.bf16.msra.mxu0 %v11419_v37 }
0x1eb2   : > { %v10965_v24 = vpop.f32.mrb[172].mxu0 }
0x1eb3   : > { %v8008_v4 = vpop.f32.mrb[173].mxu0 }
0x1eb4   : > { %v10966_v12 = vpop.f32.mrb[174].mxu0 }
0x1eb5   : > { %v8011_v14 = vpop.f32.mrb[175].mxu0  ;;  %v8355_v12 = vsel %vm1293_vm1, %v14710_v17, %v11267_v46 }
0x1eb6   : > { %v11278_v2 = vpack.i.bf16 %v8011_v14, %v8008_v4  ;;  %v8354_v14 = vsel %vm1293_vm1, %v14702_v29, %v11266_v44 }
0x1eb7   : > { %v8366_v37 = vsel %vm4116_vm5, %v8354_v14, %v11276_v49  ;;  %v16282_v14 = vld [vmem:[#allocation26_spill] sm:$0xff] }
0x1eb8   : > { %11279 = vrot.lane.b32.xlu0 %v11278_v2, %s16255_s23 }
0x1ebc   : > { %11289 = vrot.lane.b32.xlu0 %v16269_v16, %s16212_s30  ;;  %v8367_v16 = vsel %vm4116_vm5, %v8355_v12, %v11277_v59 }
0x1ec0   : > { %11299 = vrot.lane.b32.xlu0 %v16270_v11, %s16214_s28 }
0x1ec4   : > { %v10973_v10 = vpop.f32.mrb[200].mxu1 }
0x1ec5   : > { %v8070_v3 = vpop.f32.mrb[201].mxu1 }
0x1ec6   : > { %v11283_v54 = vpack.i.bf16 %v8070_v3, %v10965_v24  ;;  %v10974_v41 = vpop.f32.mrb[202].mxu1 }
0x1ec7   : > { %v8073_v51 = vpop.f32.mrb[203].mxu1 }
0x1ec8   : > { %v11308_v35 = vpack.i.bf16 %v10973_v10, %v8073_v51  ;;  %11284 = vrot.lane.b32.xlu1 %v11283_v54, %s16255_s23 }
0x1eca   : > { %11309 = vrot.lane.b32.xlu0 %v11308_v35, %s16255_s23 }
0x1ecc   : > { %11294 = vrot.lane.b32.xlu1 %v16271_v18, %s16212_s30 }
0x1ece   : > { %11319 = vrot.lane.b32.xlu0 %v16272_v63, %s16212_s30 }
0x1ed0   : > { %11304 = vrot.lane.b32.xlu1 %v16273_v62, %s16214_s28 }
0x1ed2   : > { %11329 = vrot.lane.b32.xlu0 %v16274_v53, %s16214_s28 }
0x1ef0   : > { %v10981_v7 = vpop.f32.mrb[176].mxu0 }
0x1ef1   : > { %v8132_v60 = vpop.f32.mrb[177].mxu0 }
0x1ef2   : > { %v10982_v0 = vpop.f32.mrb[178].mxu0 }
0x1ef3   : > { %v8135_v34 = vpop.f32.mrb[179].mxu0 }
0x1ef4   : > { %v11313_v32 = vpack.i.bf16 %v8135_v34, %v8132_v60 }
0x1ef5   : > { %v10989_v52 = vpop.f32.mrb[204].mxu1 }
0x1ef6   : > { %v8194_v61 = vpop.f32.mrb[205].mxu1  ;;  %11314 = vrot.lane.b32.xlu1 %v11313_v32, %s16255_s23 }
0x1ef7   : > { %v11338_v1 = vpack.i.bf16 %v8194_v61, %v10981_v7  ;;  %v10990_v25 = vpop.f32.mrb[206].mxu1 }
0x1ef8   : > { %v8197_v55 = vpop.f32.mrb[207].mxu1 }
0x1ef9   : > { %v11343_v33 = vpack.i.bf16 %v10989_v52, %v8197_v55  ;;  %11339 = vrot.lane.b32.xlu0 %v11338_v1, %s16255_s23  ;;  %v16277_v1 = vld [vmem:[#allocation20_spill] sm:$0xff]  ;;  %v16278_v55 = vld [vmem:[#allocation22_spill] sm:$0xff] }
0x1efa   : > { %11324 = vrot.lane.b32.xlu1 %v16275_v21, %s16212_s30 }
0x1efe   : > { %11334 = vrot.lane.b32.xlu1 %v16276_v13, %s16214_s28  ;;  %s16299_s28 = sld [smem:[#allocation39_spill]] }
0x1f02   : > { %11344 = vrot.lane.b32.xlu1 %v11343_v33, %s16255_s23  ;;  %s650_s23 = sand.u32 1, %s12086_s25  }
0x1f03   : > { %s9726_s27 = sshll.u32 %s650_s23, 2  ;;  %s9650_s4 = scalar_lea.sflag [#allocation3], %s650_s23 }
0x1f04   : > { %s652_s20 = scalar_lea.vmem [#allocation2], %s9726_s27  ;;  %s16034_s0 = scalar_lea.hbm %s16299_s28, %s10070_s22 }
0x1f05   : > { %s9663_s26 = sshll.u32 %s652_s20, 4  ;;  %s12106_s27 = smov [#allocation2]   ;;  %s16036_s26 = int_to_ptr.vmem [resolvable:$true] %s9663_s26 }
0x1f06   : > { %s12032_s3 = scalar_lea.vmem %s16036_s26, 64  ;;  %s12036_s24 = sshll.u32 %s12106_s27, 4  ;;  %s12037_s24 = int_to_ptr.vmem [resolvable:$false] %s12036_s24 }
0x1f07   : > { %p12033_p11 = scmp.ne.s32.totalorder %s16036_s26, %s12032_s3  ;;  %p12039_p0 = scmp.lt.s32.totalorder %s16036_s26, %s12037_s24 }
0x1f09   : > { %p12034_p12 = pnand %p12033_p11, %p12255_p5 }
0x1f0b   : > { %p12035_p13 = pneg %p12034_p12 }
0x1f2a   : > { %v11280_v31 = vpop.permute.xlu0 %11279 }
0x1f2b   : > { %v11282_v48 = vunpack.i.h.bf16 %v11280_v31  ;;  %v11281_v30 = vunpack.i.l.bf16 %v11280_v31  ;;  %v16279_v31 = vld [vmem:[#allocation21_spill] sm:$0xff] }
0x1f2d   : > { %v8377_v42 = vsel %vm4129_vm6, %v8365_v57, %v11282_v48  ;;  %v8376_v39 = vsel %vm4129_vm6, %v8364_v19, %v11281_v30  ;;  %v16280_v19 = vld [vmem:[#allocation17_spill] sm:$0xff] }
0x1f2e   : > { %v8388_v6 = vpack.c.bf16 %v8377_v42, %v8376_v39  ;;  %v11290_v56 = vpop.permute.xlu0 %11289 }
0x1f2f   : > { %v11292_v27 = vunpack.i.h.bf16 %v11290_v56  ;;  %v11291_v45 = vunpack.i.l.bf16 %v11290_v56 }
0x1f30   : > { %10999 = vmatprep.mubr.msk.bf16.mxu0 %vm799_vm0, %v8388_v6 }
0x1f31   : > { %v8357_v11 = vsel %vm1293_vm1, %v14708_v47, %v11292_v27  ;;  %v8356_v10 = vsel %vm1293_vm1, %v14712_v40, %v11291_v45 }
0x1f32   : > { %v11300_v20 = vpop.permute.xlu0 %11299 }
0x1f33   : > { %v11302_v24 = vunpack.i.h.bf16 %v11300_v20  ;;  %v11301_v4 = vunpack.i.l.bf16 %v11300_v20 }
0x1f35   : > { %v8368_v29 = vsel %vm4116_vm5, %v8356_v10, %v11301_v4  ;;  %v8369_v35 = vsel %vm4116_vm5, %v8357_v11, %v11302_v24 }
0x1f3a   : > { %v11285_v38 = vpop.permute.xlu1 %11284 }
0x1f3b   : > { %v11287_v9 = vunpack.i.h.bf16 %v11285_v38  ;;  %v11286_v2 = vunpack.i.l.bf16 %v11285_v38  ;;  %v16281_v38 = vld [vmem:[#allocation23_spill] sm:$0xff] }
0x1f3c   : > { %v11310_v3 = vpop.permute.xlu0 %11309 }
0x1f3d   : > { %v8378_v54 = vsel %vm4129_vm6, %v8366_v37, %v11286_v2  ;;  %v8379_v17 = vsel %vm4129_vm6, %v8367_v16, %v11287_v9  ;;  %v11312_v41 = vunpack.i.h.bf16 %v11310_v3  ;;  %v11311_v51 = vunpack.i.l.bf16 %v11310_v3 }
0x1f3e   : > { %v8389_v18 = vpack.c.bf16 %v8379_v17, %v8378_v54  ;;  %v11295_v40 = vpop.permute.xlu1 %11294 }
0x1f3f   : > { %v8381_v63 = vsel %vm4129_vm6, %v8369_v35, %v11312_v41  ;;  %v8380_v62 = vsel %vm4129_vm6, %v8368_v29, %v11311_v51  ;;  %v11297_v60 = vunpack.i.h.bf16 %v11295_v40  ;;  %v11296_v0 = vunpack.i.l.bf16 %v11295_v40  ;;  %v9981_v41 = vld [vmem:[%s16084_s8 + $0x1] ss:$0 sm:$0xff] }
0x1f40   : > { %v8390_v47 = vpack.c.bf16 %v8381_v63, %v8380_v62  ;;  %11000 = vmatmul.mubr.msk.bf16.vlgmr.msra.gmra.mrb[180].mxu0 %vm799_vm0, %v8389_v18  ;;  %v11320_v53 = vpop.permute.xlu0 %11319  ;;  %v16283_v29 = vld [vmem:[#allocation27_spill] sm:$0xff]  ;;  %v16284_v18 = vld [vmem:[#allocation28_spill] sm:$0xff] }
0x1f41   : > { %v11322_v61 = vunpack.i.h.bf16 %v11320_v53  ;;  %v8359_v25 = vsel %vm1293_vm1, %v16277_v1, %v11297_v60  ;;  %v8358_v33 = vsel %vm1293_vm1, %v16278_v55, %v11296_v0  ;;  %v11321_v21 = vunpack.i.l.bf16 %v11320_v53  ;;  %v16285_v53 = vld [vmem:[#allocation30_spill] sm:$0xff]  ;;  %v16286_v0 = vld [vmem:[#allocation29_spill] sm:$0xff] }
0x1f42   : > { %11003 = vmatprep.mubr.msk.bf16.mxu0 %vm799_vm0, %v8390_v47  ;;  %v11305_v7 = vpop.permute.xlu1 %11304 }
0x1f43   : > { %v11307_v34 = vunpack.i.h.bf16 %v11305_v7  ;;  %v11306_v32 = vunpack.i.l.bf16 %v11305_v7  ;;  %v8361_v50 = vsel %vm1293_vm1, %v16279_v31, %v11322_v61  ;;  %v8360_v57 = vsel %vm1293_vm1, %v16280_v19, %v11321_v21  ;;  %v16289_v31 = vld [vmem:[#allocation13_spill] sm:$0xff] }
0x1f44   : > { %v11330_v52 = vpop.permute.xlu0 %11329 }
0x1f45   : > { %v11332_v23 = vunpack.i.h.bf16 %v11330_v52  ;;  %v11331_v8 = vunpack.i.l.bf16 %v11330_v52  ;;  %v8370_v22 = vsel %vm4116_vm5, %v8358_v33, %v11306_v32  ;;  %v8371_v43 = vsel %vm4116_vm5, %v8359_v25, %v11307_v34 }
0x1f47   : > { %v8372_v56 = vsel %vm4116_vm5, %v8360_v57, %v11331_v8  ;;  %v8373_v26 = vsel %vm4116_vm5, %v8361_v50, %v11332_v23  ;;  %v16288_v8 = vld [vmem:[#allocation31_spill] sm:$0xff] }
0x1f68   : > { %v11315_v13 = vpop.permute.xlu1 %11314 }
0x1f69   : > { %v11317_v5 = vunpack.i.h.bf16 %v11315_v13  ;;  %v11316_v58 = vunpack.i.l.bf16 %v11315_v13  ;;  %v16287_v13 = vld [vmem:[#allocation12_spill] sm:$0xff] }
0x1f6b   : > { %v8382_v28 = vsel %vm4129_vm6, %v8370_v22, %v11316_v58  ;;  %v8383_v48 = vsel %vm4129_vm6, %v8371_v43, %v11317_v5  ;;  %v11340_v30 = vpop.permute.xlu0 %11339 }
0x1f6c   : > { %v8391_v42 = vpack.c.bf16 %v8383_v48, %v8382_v28  ;;  %v11342_v39 = vunpack.i.h.bf16 %v11340_v30  ;;  %v11341_v6 = vunpack.i.l.bf16 %v11340_v30  ;;  %v11325_v15 = vpop.permute.xlu1 %11324  ;;  %v16290_v28 = vld [vmem:[#allocation14_spill] sm:$0xff] }
0x1f6d   : > { %v11327_v49 = vunpack.i.h.bf16 %v11325_v15  ;;  %v11326_v27 = vunpack.i.l.bf16 %v11325_v15 }
0x1f6e   : > { %v8385_v46 = vsel %vm4129_vm6, %v8373_v26, %v11342_v39  ;;  %v8384_v44 = vsel %vm4129_vm6, %v8372_v56, %v11341_v6  ;;  %11004 = vmatmul.mubr.msk.bf16.gmra.mrb[184].mxu0 %vm799_vm0, %v8391_v42  ;;  %v16291_v26 = vld [vmem:[#allocation16_spill] sm:$0xff] }
0x1f6f   : > { %v8392_v20 = vpack.c.bf16 %v8385_v46, %v8384_v44  ;;  %v8363_v12 = vsel %vm1293_vm1, %v16281_v38, %v11327_v49  ;;  %v8362_v9 = vsel %vm1293_vm1, %v16282_v14, %v11326_v27 }
0x1f70   : > { %v11335_v59 = vpop.permute.xlu1 %11334 }
0x1f71   : > { %11007 = vmatprep.mubr.msk.bf16.mxu0 %vm799_vm0, %v8392_v20  ;;  %v11337_v45 = vunpack.i.h.bf16 %v11335_v59  ;;  %v11336_v24 = vunpack.i.l.bf16 %v11335_v59  ;;  %v16292_v20 = vld [vmem:[#allocation15_spill] sm:$0xff] }
0x1f73   : > { %v8374_v16 = vsel %vm4116_vm5, %v8362_v9, %v11336_v24  ;;  %v8375_v11 = vsel %vm4116_vm5, %v8363_v12, %v11337_v45  ;;  %v16293_v45 = vld [vmem:[#allocation19_spill] sm:$0xff]  ;;  %v16294_v12 = vld [vmem:[#allocation18_spill] sm:$0xff] }
0x1f74   : > { %v11345_v4 = vpop.permute.xlu1 %11344 }
0x1f75   : > { %v11347_v2 = vunpack.i.h.bf16 %v11345_v4  ;;  %v11346_v37 = vunpack.i.l.bf16 %v11345_v4 }
0x1f77   : > { %v8386_v10 = vsel %vm4129_vm6, %v8374_v16, %v11346_v37  ;;  %v8387_v3 = vsel %vm4129_vm6, %v8375_v11, %v11347_v2 }
0x1f78   : > { %v8393_v54 = vpack.c.bf16 %v8387_v3, %v8386_v10 }
0x1f7a   : > { %11008 = vmatmul.mubr.msk.bf16.gmra.mrb[188].mxu0 %vm799_vm0, %v8393_v54 }
0x2013   : > { %v11001_v17 = vpop.f32.mrb[180].mxu0 }
0x2014   : > { %v8479_v51 = vpop.f32.mrb[181].mxu0  ;;  %v8528_v35 = vadd.f32 %v11001_v17, %v16283_v29 }
0x2015   : > { %v8526_v63 = vadd.f32 %v8479_v51, %v16284_v18  ;;  %v11002_v62 = vpop.f32.mrb[182].mxu0 }
0x2016   : > { %v8482_v47 = vpop.f32.mrb[183].mxu0  ;;  %v8548_v60 = vadd.f32 %v9981_v41, %v8528_v35  ;;  %v8529_v34 = vadd.f32 %v11002_v62, %v16286_v0 }
0x2017   : > { %v15540_v40 = vadd.f32 %v9981_v41, %v8526_v63  ;;  %v8527_v7 = vadd.f32 %v8482_v47, %v16285_v53 }
0x2018   : > { %v15547_v1 = vadd.f32 %v9981_v41, %v8529_v34  ;;  %v8568_v25 = vsel %vm799_vm0, %v8548_v60, 0.0 }
0x2019   : > { %v8547_v32 = vadd.f32 %v9981_v41, %v8527_v7  ;;  %v8562_v52 = vsel %vm799_vm0, %v15540_v40, 0.0 }
0x201a   : > { %8563 = vadd.xlane.f32.xlu0 %v8562_v52  ;;  %v8571_v55 = vsel %vm799_vm0, %v15547_v1, 0.0 }
0x201b   : > { %v8565_v61 = vsel %vm799_vm0, %v8547_v32, 0.0 }
0x201c   : > { %8566 = vadd.xlane.f32.xlu1 %v8565_v61  ;;  %v11422_v61 = vld [vmem:[%s16087_s11 + $0x44] ss:$8 sps:$4 sm:$0xff]  }
0x201d   : > { %8840 = vmatprep.subr.bf16.mxu1 %v11422_v61  ;;  %v15677_v61 = vld [vmem:[%s16085_s9 + $0x1] ss:$0 sm:$0xff] }
0x201e   : > { %8569 = vadd.xlane.f32.xlu0 %v8568_v25  ;;  %v11420_v25 = vld [vmem:[%s16087_s11 + $0x40] ss:$8 sps:$4 sm:$0xff]  }
0x201f   : > { %8841 = vmatpush1.bf16.msra.mxu1 %v11420_v25 }
0x2022   : > { %8572 = vadd.xlane.f32.xlu0 %v8571_v55  ;;  %v11425_v55 = vld [vmem:[%s16087_s11 + $0x54] ss:$8 sps:$4 sm:$0xff]  }
0x2023   : > { %8842 = vmatprep.subr.bf16.mxu1 %v11425_v55 }
0x2041   : > { %v11005_v33 = vpop.f32.mrb[184].mxu0 }
0x2042   : > { %v8495_v21 = vpop.f32.mrb[185].mxu0  ;;  %v8532_v23 = vadd.f32 %v11005_v33, %v16287_v13  ;;  %v11423_v33 = vld [vmem:[%s16087_s11 + $0x50] ss:$8 sps:$4 sm:$0xff]   ;;  %v11426_v13 = vld [vmem:[%s16087_s11 + $0x60] ss:$8 sps:$4 sm:$0xff]  }
0x2043   : > { %v8530_v5 = vadd.f32 %v8495_v21, %v16288_v8  ;;  %v11006_v58 = vpop.f32.mrb[186].mxu0  ;;  %8843 = vmatpush1.bf16.msra.mxu1 %v11423_v33  ;;  %v11428_v21 = vld [vmem:[%s16087_s11 + $0x64] ss:$8 sps:$4 sm:$0xff]   ;;  %v11429_v8 = vld [vmem:[%s16087_s11 + $0x70] ss:$8 sps:$4 sm:$0xff]  }
0x2044   : > { %v8498_v22 = vpop.f32.mrb[187].mxu0  ;;  %v8533_v50 = vadd.f32 %v11006_v58, %v16289_v31  ;;  %v15558_v30 = vadd.f32 %v9981_v41, %v8532_v23  ;;  %8844 = vmatprep.subr.bf16.mxu1 %v11428_v21  ;;  %v11431_v23 = vld [vmem:[%s16087_s11 + $0x74] ss:$8 sps:$4 sm:$0xff]  }
0x2045   : > { %v15554_v43 = vadd.f32 %v9981_v41, %v8530_v5  ;;  %v8531_v48 = vadd.f32 %v8498_v22, %v16290_v28 }
0x2046   : > { %v15564_v42 = vadd.f32 %v9981_v41, %v8533_v50  ;;  %v8580_v6 = vsel %vm799_vm0, %v15558_v30, 0.0 }
0x2047   : > { %v15560_v19 = vadd.f32 %v9981_v41, %v8531_v48  ;;  %v8574_v57 = vsel %vm799_vm0, %v15554_v43, 0.0  ;;  %8845 = vmatpush1.bf16.msra.mxu1 %v11426_v13 }
0x2048   : > { %8575 = vadd.xlane.f32.xlu0 %v8574_v57  ;;  %v8583_v56 = vsel %vm799_vm0, %v15564_v42, 0.0  ;;  %8846 = vmatprep.subr.bf16.mxu1 %v11431_v23  ;;  %v15685_v23 = vld [vmem:[%s16086_s10 + $0x1] ss:$0 sm:$0xff] }
0x2049   : > { %v8577_v39 = vsel %vm799_vm0, %v15560_v19, 0.0 }
0x204a   : > { %8578 = vadd.xlane.f32.xlu1 %v8577_v39 }
0x204b   : > { %8847 = vmatpush1.bf16.msra.mxu1 %v11429_v8 }
0x204c   : > { %8581 = vadd.xlane.f32.xlu0 %v8580_v6 }
0x204d   : > { %v11009_v15 = vpop.f32.mrb[188].mxu0 }
0x204e   : > { %v8536_v46 = vadd.f32 %v11009_v15, %v16291_v26  ;;  %8584 = vadd.xlane.f32.xlu1 %v8583_v56  ;;  %v8511_v44 = vpop.f32.mrb[189].mxu0 }
0x204f   : > { %v8534_v59 = vadd.f32 %v8511_v44, %v16292_v20  ;;  %v11010_v49 = vpop.f32.mrb[190].mxu0 }
0x2050   : > { %v15574_v27 = vadd.f32 %v9981_v41, %v8536_v46  ;;  %v8537_v24 = vadd.f32 %v11010_v49, %v16293_v45  ;;  %v8514_v4 = vpop.f32.mrb[191].mxu0 }
0x2051   : > { %v15577_v38 = vadd.f32 %v9981_v41, %v8534_v59  ;;  %v8535_v14 = vadd.f32 %v8514_v4, %v16294_v12 }
0x2052   : > { %v15580_v9 = vadd.f32 %v9981_v41, %v8537_v24 }
0x2053   : > { %v15582_v2 = vadd.f32 %v9981_v41, %v8535_v14  ;;  %v8586_v37 = vsel %vm799_vm0, %v15577_v38, 0.0 }
0x2054   : > { %8587 = vadd.xlane.f32.xlu0 %v8586_v37 }
0x2055   : > { %v8589_v16 = vsel %vm799_vm0, %v15582_v2, 0.0 }
0x2056   : > { %8590 = vadd.xlane.f32.xlu1 %v8589_v16 }
0x20a7   : > { %v8564_v11 = vpop.xlane.xlu0 %8563 }
0x20a8   : > { %v8598_v10 = vmul.f32 0.015625, %v8564_v11 }
0x20a9   : > { %v8567_v3 = vpop.xlane.xlu1 %8566 }
0x20aa   : > { %v15589_v54 = vsub.f32 %v15540_v40, %v8598_v10  ;;  %v8599_v17 = vmul.f32 0.015625, %v8567_v3  ;;  %v8595_v3 = vsel %vm799_vm0, %v15580_v9, 0.0 }
0x20ab   : > { %v8570_v51 = vpop.xlane.xlu0 %8569 }
0x20ac   : > { %v15591_v29 = vsub.f32 %v8547_v32, %v8599_v17  ;;  %v8600_v41 = vmul.f32 0.015625, %v8570_v51  ;;  %v8622_v35 = vmul.f32 %v15589_v54, %v15589_v54 }
0x20ae   : > { %v15595_v18 = vsub.f32 %v8548_v60, %v8600_v41  ;;  %v8634_v63 = vsel %vm799_vm0, %v8622_v35, 0.0  ;;  %v8623_v62 = vmul.f32 %v15591_v29, %v15591_v29 }
0x20af   : > { %v8573_v47 = vpop.xlane.xlu0 %8572  ;;  %8635 = vadd.xlane.f32.xlu0 %v8634_v63 }
0x20b0   : > { %v8601_v53 = vmul.f32 0.015625, %v8573_v47  ;;  %v8637_v7 = vsel %vm799_vm0, %v8623_v62, 0.0  ;;  %v8624_v0 = vmul.f32 %v15595_v18, %v15595_v18 }
0x20b1   : > { %8638 = vadd.xlane.f32.xlu1 %v8637_v7 }
0x20b2   : > { %v15604_v34 = vsub.f32 %v15547_v1, %v8601_v53  ;;  %v8640_v60 = vsel %vm799_vm0, %v8624_v0, 0.0 }
0x20b3   : > { %8641 = vadd.xlane.f32.xlu0 %v8640_v60 }
0x20b4   : > { %v8625_v32 = vmul.f32 %v15604_v34, %v15604_v34 }
0x20b6   : > { %v8643_v52 = vsel %vm799_vm0, %v8625_v32, 0.0 }
0x20b7   : > { %8644 = vadd.xlane.f32.xlu1 %v8643_v52 }
0x20d5   : > { %v8576_v5 = vpop.xlane.xlu0 %8575 }
0x20d6   : > { %v8602_v58 = vmul.f32 0.015625, %v8576_v5 }
0x20d7   : > { %v8579_v22 = vpop.xlane.xlu1 %8578 }
0x20d8   : > { %v15635_v31 = vsub.f32 %v15554_v43, %v8602_v58  ;;  %v8603_v50 = vmul.f32 0.015625, %v8579_v22 }
0x20d9   : > { %v8582_v28 = vpop.xlane.xlu0 %8581 }
0x20da   : > { %v15638_v48 = vsub.f32 %v15560_v19, %v8603_v50  ;;  %v8604_v57 = vmul.f32 0.015625, %v8582_v28  ;;  %v8626_v39 = vmul.f32 %v15635_v31, %v15635_v31 }
0x20db   : > { %v8585_v6 = vpop.xlane.xlu1 %8584 }
0x20dc   : > { %v15643_v15 = vsub.f32 %v15558_v30, %v8604_v57  ;;  %v8605_v56 = vmul.f32 0.015625, %v8585_v6  ;;  %v8646_v26 = vsel %vm799_vm0, %v8626_v39, 0.0  ;;  %v8627_v43 = vmul.f32 %v15638_v48, %v15638_v48 }
0x20dd   : > { %8647 = vadd.xlane.f32.xlu0 %v8646_v26 }
0x20de   : > { %v15649_v46 = vsub.f32 %v15564_v42, %v8605_v56  ;;  %v8649_v19 = vsel %vm799_vm0, %v8627_v43, 0.0  ;;  %v8628_v44 = vmul.f32 %v15643_v15, %v15643_v15 }
0x20df   : > { %8650 = vadd.xlane.f32.xlu1 %v8649_v19 }
0x20e0   : > { %v8652_v20 = vsel %vm799_vm0, %v8628_v44, 0.0  ;;  %v8629_v59 = vmul.f32 %v15649_v46, %v15649_v46 }
0x20e1   : > { %8653 = vadd.xlane.f32.xlu0 %v8652_v20  ;;  %v8588_v49 = vpop.xlane.xlu0 %8587 }
0x20e2   : > { %v8606_v45 = vmul.f32 0.015625, %v8588_v49  ;;  %v8655_v24 = vsel %vm799_vm0, %v8629_v59, 0.0 }
0x20e3   : > { %8656 = vadd.xlane.f32.xlu1 %v8655_v24  ;;  %v8591_v4 = vpop.xlane.xlu1 %8590 }
0x20e4   : > { %v15659_v42 = vsub.f32 %v15577_v38, %v8606_v45  ;;  %v8607_v12 = vmul.f32 0.015625, %v8591_v4  ;;  %v8592_v38 = vsel %vm799_vm0, %v15574_v27, 0.0 }
0x20e6   : > { %v15662_v14 = vsub.f32 %v15582_v2, %v8607_v12  ;;  %v8630_v37 = vmul.f32 %v15659_v42, %v15659_v42 }
0x20e8   : > { %v8658_v16 = vsel %vm799_vm0, %v8630_v37, 0.0  ;;  %v8631_v11 = vmul.f32 %v15662_v14, %v15662_v14 }
0x20e9   : > { %8659 = vadd.xlane.f32.xlu0 %v8658_v16 }
0x20ea   : > { %v8661_v10 = vsel %vm799_vm0, %v8631_v11, 0.0 }
0x20eb   : > { %8662 = vadd.xlane.f32.xlu1 %v8661_v10 }
0x20ed   : > { %8593 = vadd.xlane.f32.xlu0 %v8592_v38 }
0x20ef   : > { %8596 = vadd.xlane.f32.xlu1 %v8595_v3 }
0x213c   : > { %v8636_v17 = vpop.xlane.xlu0 %8635 }
0x213d   : > { %v8670_v51 = vmul.f32 0.015625, %v8636_v17 }
0x213e   : > { %v8639_v41 = vpop.xlane.xlu1 %8638 }
0x213f   : > { %v8682_v35 = vadd.f32 1e-06, %v8670_v51  ;;  %v8671_v63 = vmul.f32 0.015625, %v8639_v41 }
0x2140   : > { %v8642_v62 = vpop.xlane.xlu0 %8641 }
0x2141   : > { %11956 = vrsqrt.f32 %v8682_v35  ;;  %v8683_v47 = vadd.f32 1e-06, %v8671_v63  ;;  %v8672_v53 = vmul.f32 0.015625, %v8642_v62 }
0x2143   : > { %11958 = vrsqrt.f32 %v8683_v47  ;;  %v8684_v7 = vadd.f32 1e-06, %v8672_v53 }
0x2144   : > { %v8645_v0 = vpop.xlane.xlu1 %8644 }
0x2145   : > { %11960 = vrsqrt.f32 %v8684_v7  ;;  %v8673_v60 = vmul.f32 0.015625, %v8645_v0 }
0x2147   : > { %v8685_v32 = vadd.f32 1e-06, %v8673_v60 }
0x2149   : > { %11962 = vrsqrt.f32 %v8685_v32 }
0x214b   : > { %v11957_v52 = vpop.eup %11956 }
0x214c   : > { %v8706_v25 = vmul.f32 %v11957_v52, %v15589_v54 }
0x214d   : > { %v11959_v55 = vpop.eup %11958 }
0x214e   : > { %v8724_v33 = vmul.f32 %v15677_v61, %v8706_v25  ;;  %v8707_v21 = vmul.f32 %v11959_v55, %v15591_v29 }
0x214f   : > { %v11961_v13 = vpop.eup %11960 }
0x2150   : > { %v8725_v8 = vmul.f32 %v15677_v61, %v8707_v21  ;;  %v8708_v5 = vmul.f32 %v11961_v13, %v15595_v18  ;;  %v8742_v58 = vadd.f32 %v15685_v23, %v8724_v33 }
0x2152   : > { %v8743_v22 = vadd.f32 %v15685_v23, %v8725_v8  ;;  %v8726_v29 = vmul.f32 %v15677_v61, %v8708_v5 }
0x2153   : > { %v11963_v54 = vpop.eup %11962 }
0x2154   : > { %v8709_v50 = vmul.f32 %v11963_v54, %v15604_v34  ;;  %v8754_v28 = vpack.c.bf16 %v8743_v22, %v8742_v58  ;;  %v8744_v18 = vadd.f32 %v15685_v23, %v8726_v29 }
0x2156   : > { %10003 = vmatmul.mubr.msk.bf16.vlgmr.msra.gmra.mrb[208].mxu1 %vm799_vm0, %v8754_v28  ;;  %v8727_v57 = vmul.f32 %v15677_v61, %v8709_v50 }
0x2157   : > { %8882 = vmatprep.mubr.bf16.mxu1 %v16211_v36 }
0x2158   : > { %v8745_v39 = vadd.f32 %v15685_v23, %v8727_v57  ;;  %v11434_v57 = vld [vmem:[%s16089_s13 + $0xc8] sm:$0xff]  }
0x215a   : > { %v8755_v6 = vpack.c.bf16 %v8745_v39, %v8744_v18  ;;  %v11435_v39 = vld [vmem:[%s16089_s13 + $0x88] sm:$0xff]   ;;  %v11437_v18 = vld [vmem:[%s16089_s13 + $0x90] sm:$0xff]  }
0x215e   : > { %10004 = vmatmul.mubr.msk.bf16.gmra.mrb[212].mxu1 %vm799_vm0, %v8755_v6  ;;  %v11438_v6 = vld [vmem:[%s16089_s13 + $0xd8] sm:$0xff]  }
0x215f   : > { %8892 = vmatprep.mubr.bf16.mxu1 %v16211_v36 }
0x216a   : > { %v8648_v56 = vpop.xlane.xlu0 %8647 }
0x216b   : > { %v8674_v34 = vmul.f32 0.015625, %v8648_v56  ;;  %v11439_v56 = vld [vmem:[%s16089_s13 + $0x98] sm:$0xff]  }
0x216c   : > { %v8651_v26 = vpop.xlane.xlu1 %8650 }
0x216d   : > { %v8686_v43 = vadd.f32 1e-06, %v8674_v34  ;;  %v8675_v19 = vmul.f32 0.015625, %v8651_v26  ;;  %v11440_v34 = vld [vmem:[%s16089_s13 + $0xe0] sm:$0xff]  }
0x216e   : > { %v8654_v44 = vpop.xlane.xlu0 %8653  ;;  %v11441_v26 = vld [vmem:[%s16089_s13 + $0xa0] sm:$0xff]  }
0x216f   : > { %11964 = vrsqrt.f32 %v8686_v43  ;;  %v8687_v20 = vadd.f32 1e-06, %v8675_v19  ;;  %v8676_v59 = vmul.f32 0.015625, %v8654_v44  ;;  %v11442_v43 = vld [vmem:[%s16089_s13 + $0xe8] sm:$0xff]   ;;  %v11444_v44 = vld [vmem:[%s16089_s13 + $0xf0] sm:$0xff]  }
0x2170   : > { %v8657_v49 = vpop.xlane.xlu1 %8656  ;;  %v11443_v19 = vld [vmem:[%s16089_s13 + $0xa8] sm:$0xff]  }
0x2171   : > { %11966 = vrsqrt.f32 %v8687_v20  ;;  %v8688_v45 = vadd.f32 1e-06, %v8676_v59  ;;  %v8677_v24 = vmul.f32 0.015625, %v8657_v49  ;;  %v11445_v20 = vld [vmem:[%s16089_s13 + $0xb0] sm:$0xff]   ;;  %v11446_v59 = vld [vmem:[%s16089_s13 + $0xf8] sm:$0xff]  }
0x2172   : > { %v11447_v49 = vld [vmem:[%s16089_s13 + $0xb8] sm:$0xff]  }
0x2173   : > { %11968 = vrsqrt.f32 %v8688_v45  ;;  %v8689_v4 = vadd.f32 1e-06, %v8677_v24  ;;  %v9994_v45 = vld [vmem:[%s16088_s12 + $0x2] sm:$0x3]  ;;  %v16295_v24 = vld [vmem:[#allocation24_spill] sm:$0xff] }
0x2175   : > { %11970 = vrsqrt.f32 %v8689_v4  ;;  %v15782_v4 = vrot.slane %v9994_v45, %v16295_v24 }
0x2176   : > { %v8660_v12 = vpop.xlane.xlu0 %8659 }
0x2177   : > { %v8678_v37 = vmul.f32 0.015625, %v8660_v12  ;;  %v16296_v12 = vld [vmem:[#allocation25_spill] sm:$0xff] }
0x2178   : > { %v8663_v16 = vpop.xlane.xlu1 %8662 }
0x2179   : > { %v11965_v11 = vpop.eup %11964  ;;  %v8690_v10 = vadd.f32 1e-06, %v8678_v37  ;;  %v8679_v38 = vmul.f32 0.015625, %v8663_v16  ;;  %v15785_v37 = vrot.slane %v9994_v45, %v16296_v12 }
0x217a   : > { %v8710_v3 = vmul.f32 %v11965_v11, %v15635_v31  ;;  %v8594_v17 = vpop.xlane.xlu0 %8593 }
0x217b   : > { %v11967_v51 = vpop.eup %11966  ;;  %11972 = vrsqrt.f32 %v8690_v10  ;;  %v8691_v41 = vadd.f32 1e-06, %v8679_v38  ;;  %v8608_v35 = vmul.f32 0.015625, %v8594_v17 }
0x217c   : > { %v8711_v63 = vmul.f32 %v11967_v51, %v15638_v48  ;;  %v8728_v62 = vmul.f32 %v15677_v61, %v8710_v3 }
0x217d   : > { %v11969_v47 = vpop.eup %11968  ;;  %11974 = vrsqrt.f32 %v8691_v41  ;;  %v15704_v53 = vsub.f32 %v15574_v27, %v8608_v35 }
0x217e   : > { %v8729_v7 = vmul.f32 %v15677_v61, %v8711_v63  ;;  %v8712_v60 = vmul.f32 %v11969_v47, %v15643_v15  ;;  %v8746_v52 = vadd.f32 %v15685_v23, %v8728_v62 }
0x217f   : > { %v11971_v0 = vpop.eup %11970  ;;  %v8632_v31 = vmul.f32 %v15704_v53, %v15704_v53 }
0x2180   : > { %v8713_v32 = vmul.f32 %v11971_v0, %v15649_v46  ;;  %v8747_v48 = vadd.f32 %v15685_v23, %v8729_v7  ;;  %v8730_v33 = vmul.f32 %v15677_v61, %v8712_v60 }
0x2181   : > { %v8664_v25 = vsel %vm799_vm0, %v8632_v31, 0.0 }
0x2182   : > { %8665 = vadd.xlane.f32.xlu1 %v8664_v25  ;;  %v8756_v55 = vpack.c.bf16 %v8747_v48, %v8746_v52  ;;  %v8731_v27 = vmul.f32 %v15677_v61, %v8713_v32  ;;  %v8748_v5 = vadd.f32 %v15685_v23, %v8730_v33 }
0x2184   : > { %10005 = vmatmul.mubr.msk.bf16.gmra.mrb[216].mxu1 %vm799_vm0, %v8756_v55  ;;  %v8749_v15 = vadd.f32 %v15685_v23, %v8731_v27 }
0x2185   : > { %v11973_v21 = vpop.eup %11972  ;;  %8902 = vmatprep.mubr.bf16.mxu1 %v16211_v36 }
0x2186   : > { %v8714_v13 = vmul.f32 %v11973_v21, %v15659_v42  ;;  %v8757_v58 = vpack.c.bf16 %v8749_v15, %v8748_v5  ;;  %v11432_v42 = vld [vmem:[%s16089_s13 + $0xc0] sm:$0xff]  }
0x2187   : > { %v11975_v46 = vpop.eup %11974  ;;  %10402 = vmatprep.subr.bf16.mxu0 %v11432_v42 }
0x2188   : > { %v8715_v8 = vmul.f32 %v11975_v46, %v15662_v14  ;;  %v8732_v54 = vmul.f32 %v15677_v61, %v8714_v13  ;;  %v11433_v14 = vld [vmem:[%s16089_s13 + $0x80] sm:$0xff]  }
0x2189   : > { %10403 = vmatpush3.bf16.msra.mxu0 %v11433_v14 }
0x218a   : > { %v8733_v22 = vmul.f32 %v15677_v61, %v8715_v8  ;;  %v8750_v28 = vadd.f32 %v15685_v23, %v8732_v54  ;;  %10404 = vmatprep.subr.bf16.mxu0 %v11434_v57 }
0x218c   : > { %10006 = vmatmul.mubr.msk.bf16.gmra.mrb[220].mxu1 %vm799_vm0, %v8757_v58  ;;  %v8751_v50 = vadd.f32 %v15685_v23, %v8733_v22 }
0x218d   : > { %8912 = vmatprep.mubr.bf16.mxu1 %v16211_v36  ;;  %10405 = vmatpush3.bf16.msra.mxu0 %v11435_v39 }
0x218e   : > { %v8758_v29 = vpack.c.bf16 %v8751_v50, %v8750_v28 }
0x2194   : > { %10007 = vmatmul.mubr.msk.bf16.gmra.mrb[224].mxu1 %vm799_vm0, %v8758_v29 }
0x2195   : > { %8922 = vmatprep.mubr.bf16.mxu1 %v16211_v36  ;;  %v11436_v36 = vld [vmem:[%s16089_s13 + $0xd0] sm:$0xff]  }
0x2196   : > { %10406 = vmatprep.subr.bf16.mxu0 %v11436_v36 }
0x2197   : > { %10407 = vmatpush3.bf16.msra.mxu0 %v11437_v18 }
0x2198   : > { %10408 = vmatprep.subr.bf16.mxu0 %v11438_v6 }
0x219b   : > { %10409 = vmatpush3.bf16.msra.mxu0 %v11439_v56 }
0x219c   : > { %10410 = vmatprep.subr.bf16.mxu0 %v11440_v34 }
0x219f   : > { %10411 = vmatpush3.bf16.msra.mxu0 %v11441_v26 }
0x21a0   : > { %10412 = vmatprep.subr.bf16.mxu0 %v11442_v43 }
0x21a3   : > { %10413 = vmatpush3.bf16.msra.mxu0 %v11443_v19 }
0x21a4   : > { %10414 = vmatprep.subr.bf16.mxu0 %v11444_v44 }
0x21a7   : > { %10415 = vmatpush3.bf16.msra.mxu0 %v11445_v20 }
0x21a8   : > { %10416 = vmatprep.subr.bf16.mxu0 %v11446_v59 }
0x21ab   : > { %10417 = vmatpush3.bf16.msra.mxu0 %v11447_v49 }
0x2229   : > { %v8874_v16 = vpop.f32.mrb[208].mxu1 }
0x222a   : > { %v15788_v11 = vadd.f32 %v8874_v16, %v15782_v4  ;;  %v8876_v10 = vpop.f32.mrb[209].mxu1 }
0x222b   : > { %v15791_v38 = vadd.f32 %v8876_v10, %v15785_v37  ;;  %v8878_v3 = vpop.f32.mrb[210].mxu1 }
0x222c   : > { %v8933_v17 = vmul.f32 %v15788_v11, %v15788_v11  ;;  %v15796_v51 = vadd.f32 %v8878_v3, %v15782_v4  ;;  %v8880_v41 = vpop.f32.mrb[211].mxu1 }
0x222d   : > { %v8934_v35 = vmul.f32 %v15791_v38, %v15791_v38  ;;  %v15801_v63 = vadd.f32 %v8880_v41, %v15785_v37 }
0x222e   : > { %v8957_v62 = vmul.f32 %v8933_v17, %v15788_v11  ;;  %v8935_v47 = vmul.f32 %v15796_v51, %v15796_v51 }
0x222f   : > { %v8958_v7 = vmul.f32 %v8934_v35, %v15791_v38  ;;  %v8936_v0 = vmul.f32 %v15801_v63, %v15801_v63 }
0x2230   : > { %v8981_v31 = vmul.f32 0.044715, %v8957_v62  ;;  %v8959_v60 = vmul.f32 %v8935_v47, %v15796_v51 }
0x2231   : > { %v8982_v32 = vmul.f32 0.044715, %v8958_v7  ;;  %v8960_v52 = vmul.f32 %v8936_v0, %v15801_v63  ;;  %v8884_v48 = vpop.f32.mrb[212].mxu1 }
0x2232   : > { %v9005_v25 = vadd.f32 %v8981_v31, %v15788_v11  ;;  %v8983_v55 = vmul.f32 0.044715, %v8959_v60  ;;  %v15813_v27 = vadd.f32 %v8884_v48, %v15782_v4  ;;  %v8886_v33 = vpop.f32.mrb[213].mxu1 }
0x2233   : > { %v9006_v21 = vadd.f32 %v8982_v32, %v15791_v38  ;;  %v8984_v15 = vmul.f32 0.044715, %v8960_v52  ;;  %v15817_v46 = vadd.f32 %v8886_v33, %v15785_v37  ;;  %v8888_v13 = vpop.f32.mrb[214].mxu1 }
0x2234   : > { %v9029_v8 = vmul.f32 0.7978846, %v9005_v25  ;;  %v9007_v5 = vadd.f32 %v8983_v55, %v15796_v51  ;;  %v8937_v58 = vmul.f32 %v15813_v27, %v15813_v27  ;;  %v15823_v22 = vadd.f32 %v8888_v13, %v15782_v4  ;;  %v8890_v54 = vpop.f32.mrb[215].mxu1 }
0x2235   : > { %v9030_v50 = vmul.f32 0.7978846, %v9006_v21  ;;  %v9008_v28 = vadd.f32 %v8984_v15, %v15801_v63  ;;  %v8938_v29 = vmul.f32 %v15817_v46, %v15817_v46  ;;  %v15829_v42 = vadd.f32 %v8890_v54, %v15785_v37 }
0x2236   : > { %11976 = vtanh.f32 %v9029_v8  ;;  %v9031_v14 = vmul.f32 0.7978846, %v9007_v5  ;;  %v8961_v57 = vmul.f32 %v8937_v58, %v15813_v27  ;;  %v8939_v39 = vmul.f32 %v15823_v22, %v15823_v22 }
0x2237   : > { %11978 = vtanh.f32 %v9030_v50  ;;  %v9032_v36 = vmul.f32 0.7978846, %v9008_v28  ;;  %v8962_v18 = vmul.f32 %v8938_v29, %v15817_v46  ;;  %v8940_v6 = vmul.f32 %v15829_v42, %v15829_v42 }
0x2238   : > { %11980 = vtanh.f32 %v9031_v14  ;;  %v8985_v56 = vmul.f32 0.044715, %v8961_v57  ;;  %v8963_v34 = vmul.f32 %v8939_v39, %v15823_v22 }
0x2239   : > { %11982 = vtanh.f32 %v9032_v36  ;;  %v8986_v26 = vmul.f32 0.044715, %v8962_v18  ;;  %v8964_v43 = vmul.f32 %v8940_v6, %v15829_v42 }
0x223a   : > { %v9009_v19 = vadd.f32 %v8985_v56, %v15813_v27  ;;  %v8987_v44 = vmul.f32 0.044715, %v8963_v34 }
0x223b   : > { %v9010_v20 = vadd.f32 %v8986_v26, %v15817_v46  ;;  %v8988_v59 = vmul.f32 0.044715, %v8964_v43 }
0x223c   : > { %v9033_v49 = vmul.f32 0.7978846, %v9009_v19  ;;  %v9011_v45 = vadd.f32 %v8987_v44, %v15823_v22 }
0x223d   : > { %v9034_v24 = vmul.f32 0.7978846, %v9010_v20  ;;  %v9012_v12 = vadd.f32 %v8988_v59, %v15829_v42 }
0x223e   : > { %11984 = vtanh.f32 %v9033_v49  ;;  %v9035_v16 = vmul.f32 0.7978846, %v9011_v45 }
0x223f   : > { %11986 = vtanh.f32 %v9034_v24  ;;  %v9036_v10 = vmul.f32 0.7978846, %v9012_v12 }
0x2240   : > { %v11977_v3 = vpop.eup %11976  ;;  %11988 = vtanh.f32 %v9035_v16 }
0x2241   : > { %v11979_v17 = vpop.eup %11978  ;;  %v9077_v41 = vadd.f32 1.0, %v11977_v3  ;;  %11990 = vtanh.f32 %v9036_v10 }
0x2242   : > { %v11981_v35 = vpop.eup %11980  ;;  %v9078_v62 = vadd.f32 1.0, %v11979_v17 }
0x2243   : > { %v11983_v47 = vpop.eup %11982  ;;  %v9101_v7 = vmul.f32 0.5, %v9077_v41  ;;  %v9079_v0 = vadd.f32 1.0, %v11981_v35 }
0x2244   : > { %v9080_v31 = vadd.f32 1.0, %v11983_v47  ;;  %v9102_v60 = vmul.f32 0.5, %v9078_v62 }
0x2245   : > { %v9103_v32 = vmul.f32 0.5, %v9079_v0  ;;  %v9125_v48 = vmul.f32 %v9101_v7, %v15788_v11 }
0x2246   : > { %v9104_v52 = vmul.f32 0.5, %v9080_v31  ;;  %v9126_v33 = vmul.f32 %v9102_v60, %v15791_v38 }
0x2247   : > { %v9127_v25 = vmul.f32 %v9103_v32, %v15796_v51 }
0x2248   : > { %v11985_v55 = vpop.eup %11984  ;;  %v9128_v21 = vmul.f32 %v9104_v52, %v15801_v63 }
0x2249   : > { %v11987_v15 = vpop.eup %11986  ;;  %v9149_v13 = vpack.c.bf16 %v9127_v25, %v9125_v48  ;;  %v9081_v8 = vadd.f32 1.0, %v11985_v55 }
0x224a   : > { %v11989_v5 = vpop.eup %11988  ;;  %v9150_v58 = vpack.c.bf16 %v9128_v21, %v9126_v33  ;;  %v9082_v54 = vadd.f32 1.0, %v11987_v15 }
0x224b   : > { %v11991_v50 = vpop.eup %11990  ;;  %v9083_v28 = vadd.f32 1.0, %v11989_v5  ;;  %v9105_v29 = vmul.f32 0.5, %v9081_v8 }
0x224c   : > { %9322 = vmatprep.mubr.bf16.mxu0 %v9150_v58  ;;  %v9084_v14 = vadd.f32 1.0, %v11991_v50  ;;  %v9106_v57 = vmul.f32 0.5, %v9082_v54 }
0x224d   : > { %9323 = vmatmul.mubr.bf16.vlgmr.msra.gmra.mrb[192].mxu0 %v9149_v13  ;;  %v9107_v11 = vmul.f32 0.5, %v9083_v28  ;;  %v9129_v39 = vmul.f32 %v9105_v29, %v15813_v27 }
0x224e   : > { %v9108_v51 = vmul.f32 0.5, %v9084_v14  ;;  %v9130_v63 = vmul.f32 %v9106_v57, %v15817_v46 }
0x224f   : > { %v9131_v38 = vmul.f32 %v9107_v11, %v15823_v22 }
0x2250   : > { %v9132_v36 = vmul.f32 %v9108_v51, %v15829_v42 }
0x2251   : > { %v9151_v18 = vpack.c.bf16 %v9131_v38, %v9129_v39 }
0x2252   : > { %v9152_v6 = vpack.c.bf16 %v9132_v36, %v9130_v63 }
0x2254   : > { %9329 = vmatprep.mubr.bf16.mxu0 %v9152_v6 }
0x2255   : > { %9330 = vmatmul.mubr.bf16.gmra.mrb[196].mxu0 %v9151_v18 }
0x2257   : > { %v8894_v56 = vpop.f32.mrb[216].mxu1 }
0x2258   : > { %v15852_v34 = vadd.f32 %v8894_v56, %v15782_v4  ;;  %v8896_v26 = vpop.f32.mrb[217].mxu1 }
0x2259   : > { %v15855_v43 = vadd.f32 %v8896_v26, %v15785_v37  ;;  %v8898_v19 = vpop.f32.mrb[218].mxu1 }
0x225a   : > { %v8941_v27 = vmul.f32 %v15852_v34, %v15852_v34  ;;  %v15860_v46 = vadd.f32 %v8898_v19, %v15782_v4  ;;  %v8900_v22 = vpop.f32.mrb[219].mxu1 }
0x225b   : > { %v8942_v42 = vmul.f32 %v15855_v43, %v15855_v43  ;;  %v15865_v44 = vadd.f32 %v8900_v22, %v15785_v37 }
0x225c   : > { %v8965_v20 = vmul.f32 %v8941_v27, %v15852_v34  ;;  %v8943_v59 = vmul.f32 %v15860_v46, %v15860_v46 }
0x225d   : > { %v8966_v49 = vmul.f32 %v8942_v42, %v15855_v43  ;;  %v8944_v45 = vmul.f32 %v15865_v44, %v15865_v44 }
0x225e   : > { %v8989_v24 = vmul.f32 0.044715, %v8965_v20  ;;  %v8967_v12 = vmul.f32 %v8943_v59, %v15860_v46 }
0x225f   : > { %v8990_v16 = vmul.f32 0.044715, %v8966_v49  ;;  %v8968_v10 = vmul.f32 %v8944_v45, %v15865_v44  ;;  %v8904_v3 = vpop.f32.mrb[220].mxu1 }
0x2260   : > { %v9013_v17 = vadd.f32 %v8989_v24, %v15852_v34  ;;  %v8991_v41 = vmul.f32 0.044715, %v8967_v12  ;;  %v15877_v35 = vadd.f32 %v8904_v3, %v15782_v4  ;;  %v8906_v62 = vpop.f32.mrb[221].mxu1 }
0x2261   : > { %v9014_v47 = vadd.f32 %v8990_v16, %v15855_v43  ;;  %v8992_v7 = vmul.f32 0.044715, %v8968_v10  ;;  %v15881_v0 = vadd.f32 %v8906_v62, %v15785_v37  ;;  %v8908_v31 = vpop.f32.mrb[222].mxu1 }
0x2262   : > { %v9037_v60 = vmul.f32 0.7978846, %v9013_v17  ;;  %v9015_v32 = vadd.f32 %v8991_v41, %v15860_v46  ;;  %v8945_v52 = vmul.f32 %v15877_v35, %v15877_v35  ;;  %v15887_v48 = vadd.f32 %v8908_v31, %v15782_v4  ;;  %v8910_v25 = vpop.f32.mrb[223].mxu1 }
0x2263   : > { %v9038_v55 = vmul.f32 0.7978846, %v9014_v47  ;;  %v9016_v33 = vadd.f32 %v8992_v7, %v15865_v44  ;;  %v8946_v21 = vmul.f32 %v15881_v0, %v15881_v0  ;;  %v15893_v15 = vadd.f32 %v8910_v25, %v15785_v37 }
0x2264   : > { %11992 = vtanh.f32 %v9037_v60  ;;  %v9039_v13 = vmul.f32 0.7978846, %v9015_v32  ;;  %v8969_v8 = vmul.f32 %v8945_v52, %v15877_v35  ;;  %v8947_v5 = vmul.f32 %v15887_v48, %v15887_v48 }
0x2265   : > { %11994 = vtanh.f32 %v9038_v55  ;;  %v9040_v58 = vmul.f32 0.7978846, %v9016_v33  ;;  %v8970_v54 = vmul.f32 %v8946_v21, %v15881_v0  ;;  %v8948_v50 = vmul.f32 %v15893_v15, %v15893_v15 }
0x2266   : > { %11996 = vtanh.f32 %v9039_v13  ;;  %v8993_v28 = vmul.f32 0.044715, %v8969_v8  ;;  %v8971_v29 = vmul.f32 %v8947_v5, %v15887_v48 }
0x2267   : > { %11998 = vtanh.f32 %v9040_v58  ;;  %v8994_v14 = vmul.f32 0.044715, %v8970_v54  ;;  %v8972_v57 = vmul.f32 %v8948_v50, %v15893_v15  ;;  %v8914_v11 = vpop.f32.mrb[224].mxu1 }
0x2268   : > { %v9017_v51 = vadd.f32 %v8993_v28, %v15877_v35  ;;  %v8995_v39 = vmul.f32 0.044715, %v8971_v29  ;;  %v15905_v38 = vadd.f32 %v8914_v11, %v15782_v4  ;;  %v8916_v63 = vpop.f32.mrb[225].mxu1 }
0x2269   : > { %v9018_v36 = vadd.f32 %v8994_v14, %v15881_v0  ;;  %v8996_v18 = vmul.f32 0.044715, %v8972_v57  ;;  %v15909_v6 = vadd.f32 %v8916_v63, %v15785_v37  ;;  %v8918_v56 = vpop.f32.mrb[226].mxu1 }
0x226a   : > { %v9041_v26 = vmul.f32 0.7978846, %v9017_v51  ;;  %v9019_v19 = vadd.f32 %v8995_v39, %v15887_v48  ;;  %v8949_v27 = vmul.f32 %v15905_v38, %v15905_v38  ;;  %v15915_v22 = vadd.f32 %v8918_v56, %v15782_v4  ;;  %v8920_v42 = vpop.f32.mrb[227].mxu1 }
0x226b   : > { %v9042_v20 = vmul.f32 0.7978846, %v9018_v36  ;;  %v9020_v59 = vadd.f32 %v8996_v18, %v15893_v15  ;;  %v8950_v49 = vmul.f32 %v15909_v6, %v15909_v6  ;;  %v15921_v45 = vadd.f32 %v8920_v42, %v15785_v37 }
0x226c   : > { %12000 = vtanh.f32 %v9041_v26  ;;  %v9043_v24 = vmul.f32 0.7978846, %v9019_v19  ;;  %v8973_v12 = vmul.f32 %v8949_v27, %v15905_v38  ;;  %v8951_v16 = vmul.f32 %v15915_v22, %v15915_v22 }
0x226d   : > { %12002 = vtanh.f32 %v9042_v20  ;;  %v9044_v10 = vmul.f32 0.7978846, %v9020_v59  ;;  %v8974_v3 = vmul.f32 %v8950_v49, %v15909_v6  ;;  %v8952_v17 = vmul.f32 %v15921_v45, %v15921_v45 }
0x226e   : > { %v11993_v41 = vpop.eup %11992  ;;  %12004 = vtanh.f32 %v9043_v24  ;;  %v8997_v62 = vmul.f32 0.044715, %v8973_v12  ;;  %v8975_v47 = vmul.f32 %v8951_v16, %v15915_v22 }
0x226f   : > { %v11995_v7 = vpop.eup %11994  ;;  %12006 = vtanh.f32 %v9044_v10  ;;  %v8998_v31 = vmul.f32 0.044715, %v8974_v3  ;;  %v8976_v60 = vmul.f32 %v8952_v17, %v15921_v45  ;;  %v9085_v32 = vadd.f32 1.0, %v11993_v41 }
0x2270   : > { %v11997_v52 = vpop.eup %11996  ;;  %v9021_v25 = vadd.f32 %v8997_v62, %v15905_v38  ;;  %v8999_v55 = vmul.f32 0.044715, %v8975_v47  ;;  %v9086_v33 = vadd.f32 1.0, %v11995_v7 }
0x2271   : > { %v11999_v21 = vpop.eup %11998  ;;  %v9022_v13 = vadd.f32 %v8998_v31, %v15909_v6  ;;  %v9000_v8 = vmul.f32 0.044715, %v8976_v60  ;;  %v9087_v5 = vadd.f32 1.0, %v11997_v52  ;;  %v9109_v58 = vmul.f32 0.5, %v9085_v32 }
0x2272   : > { %v9045_v54 = vmul.f32 0.7978846, %v9021_v25  ;;  %v9023_v50 = vadd.f32 %v8999_v55, %v15915_v22  ;;  %v9088_v28 = vadd.f32 1.0, %v11999_v21  ;;  %v9110_v29 = vmul.f32 0.5, %v9086_v33 }
0x2273   : > { %v9046_v14 = vmul.f32 0.7978846, %v9022_v13  ;;  %v9024_v57 = vadd.f32 %v9000_v8, %v15921_v45  ;;  %v9111_v11 = vmul.f32 0.5, %v9087_v5  ;;  %v9133_v36 = vmul.f32 %v9109_v58, %v15852_v34 }
0x2274   : > { %12008 = vtanh.f32 %v9045_v54  ;;  %v9047_v51 = vmul.f32 0.7978846, %v9023_v50  ;;  %v9112_v39 = vmul.f32 0.5, %v9088_v28  ;;  %v9134_v26 = vmul.f32 %v9110_v29, %v15855_v43 }
0x2275   : > { %12010 = vtanh.f32 %v9046_v14  ;;  %v9048_v63 = vmul.f32 0.7978846, %v9024_v57  ;;  %v9135_v18 = vmul.f32 %v9111_v11, %v15860_v46 }
0x2276   : > { %v12001_v56 = vpop.eup %12000  ;;  %12012 = vtanh.f32 %v9047_v51  ;;  %v9136_v19 = vmul.f32 %v9112_v39, %v15865_v44 }
0x2277   : > { %v12003_v27 = vpop.eup %12002  ;;  %12014 = vtanh.f32 %v9048_v63  ;;  %v9153_v42 = vpack.c.bf16 %v9135_v18, %v9133_v36  ;;  %v9089_v20 = vadd.f32 1.0, %v12001_v56 }
0x2278   : > { %v12005_v59 = vpop.eup %12004  ;;  %v9154_v49 = vpack.c.bf16 %v9136_v19, %v9134_v26  ;;  %v9090_v24 = vadd.f32 1.0, %v12003_v27 }
0x2279   : > { %v12007_v12 = vpop.eup %12006  ;;  %v9091_v16 = vadd.f32 1.0, %v12005_v59  ;;  %v9113_v10 = vmul.f32 0.5, %v9089_v20 }
0x227a   : > { %9336 = vmatprep.mubr.bf16.mxu0 %v9154_v49  ;;  %v9092_v34 = vadd.f32 1.0, %v12007_v12  ;;  %v9114_v3 = vmul.f32 0.5, %v9090_v24  ;;  %v10058_v24 = vld [vmem:[%s16090_s14 + $0x1] ss:$0 sm:$0xff] }
0x227b   : > { %9337 = vmatmul.mubr.bf16.gmra.mrb[200].mxu0 %v9153_v42  ;;  %v9115_v46 = vmul.f32 0.5, %v9091_v16  ;;  %v9137_v43 = vmul.f32 %v9113_v10, %v15877_v35  ;;  %v8597_v16 = vpop.xlane.xlu1 %8596 }
0x227c   : > { %v9116_v17 = vmul.f32 0.5, %v9092_v34  ;;  %v9138_v62 = vmul.f32 %v9114_v3, %v15881_v0 }
0x227d   : > { %v9139_v44 = vmul.f32 %v9115_v46, %v15887_v48 }
0x227e   : > { %v12009_v41 = vpop.eup %12008  ;;  %v9140_v47 = vmul.f32 %v9116_v17, %v15893_v15 }
0x227f   : > { %v12011_v7 = vpop.eup %12010  ;;  %v9155_v31 = vpack.c.bf16 %v9139_v44, %v9137_v43  ;;  %v9093_v60 = vadd.f32 1.0, %v12009_v41  ;;  %v8609_v44 = vmul.f32 0.015625, %v8597_v16 }
0x2280   : > { %v12013_v32 = vpop.eup %12012  ;;  %v9156_v52 = vpack.c.bf16 %v9140_v47, %v9138_v62  ;;  %v9094_v25 = vadd.f32 1.0, %v12011_v7 }
0x2281   : > { %v12015_v55 = vpop.eup %12014  ;;  %v9095_v33 = vadd.f32 1.0, %v12013_v32  ;;  %v9117_v21 = vmul.f32 0.5, %v9093_v60  ;;  %v8621_v7 = vsub.f32 %v15580_v9, %v8609_v44 }
0x2282   : > { %9342 = vmatprep.mubr.bf16.mxu0 %v9156_v52  ;;  %v9096_v13 = vadd.f32 1.0, %v12015_v55  ;;  %v9118_v8 = vmul.f32 0.5, %v9094_v25  ;;  %v8666_v55 = vpop.xlane.xlu1 %8665 }
0x2283   : > { %9343 = vmatmul.mubr.bf16.gmra.mrb[204].mxu0 %v9155_v31  ;;  %v9119_v35 = vmul.f32 0.5, %v9095_v33  ;;  %v9141_v5 = vmul.f32 %v9117_v21, %v15905_v38  ;;  %v8633_v25 = vmul.f32 %v8621_v7, %v8621_v7  ;;  %v8680_v33 = vmul.f32 0.015625, %v8666_v55 }
0x2284   : > { %v9120_v48 = vmul.f32 0.5, %v9096_v13  ;;  %v9142_v15 = vmul.f32 %v9118_v8, %v15909_v6 }
0x2285   : > { %v9143_v0 = vmul.f32 %v9119_v35, %v15915_v22  ;;  %v8692_v21 = vadd.f32 1e-06, %v8680_v33 }
0x2286   : > { %v9144_v58 = vmul.f32 %v9120_v48, %v15921_v45 }
0x2287   : > { %v9157_v54 = vpack.c.bf16 %v9143_v0, %v9141_v5  ;;  %12016 = vrsqrt.f32 %v8692_v21 }
0x2288   : > { %v9158_v50 = vpack.c.bf16 %v9144_v58, %v9142_v15 }
0x228a   : > { %9349 = vmatprep.mubr.bf16.mxu0 %v9158_v50 }
0x228b   : > { %9350 = vmatmul.mubr.bf16.gmra.mrb[208].mxu0 %v9157_v54 }
0x2320   : > { %v10418_v28 = vpop.f32.mrb[192].mxu0 }
0x2321   : > { %v10419_v29 = vpop.f32.mrb[193].mxu0 }
0x2322   : > { %v10420_v14 = vadd.f32 %v10419_v29, %v10418_v28  ;;  %v10421_v57 = vpop.f32.mrb[194].mxu0 }
0x2323   : > { %v10422_v11 = vpop.f32.mrb[195].mxu0 }
0x2324   : > { %v9363_v17 = vadd.f32 %v10420_v14, %v15540_v40 }
0x2328   : > { %v10424_v51 = vpop.f32.mrb[196].mxu0 }
0x2329   : > { %v10425_v39 = vpop.f32.mrb[197].mxu0 }
0x232a   : > { %v10427_v63 = vpop.f32.mrb[198].mxu0 }
0x232b   : > { %v10428_v36 = vpop.f32.mrb[199].mxu0 }
0x232c   : > { %v10429_v38 = vadd.f32 %v10428_v36, %v10427_v63 }
0x232e   : > { %v9364_v20 = vadd.f32 %v10429_v38, %v15547_v1 }
0x2330   : > { %v9376_v10 = vadd.f32 %v10058_v24, %v9364_v20 }
0x2332   : > { %v9385_v41 = vrot.slane %v9376_v10, 7 }
0x234e   : > { %v10430_v18 = vpop.f32.mrb[200].mxu0 }
0x234f   : > { %v10431_v22 = vpop.f32.mrb[201].mxu0  ;;  %v12017_v18 = vpop.eup %12016 }
0x2350   : > { %v10433_v56 = vpop.f32.mrb[202].mxu0 }
0x2351   : > { %v10434_v6 = vpop.f32.mrb[203].mxu0 }
0x2352   : > { %v8716_v6 = vmul.f32 %v12017_v18, %v15704_v53 }
0x2356   : > { %v10436_v26 = vpop.f32.mrb[204].mxu0 }
0x2357   : > { %v10437_v45 = vpop.f32.mrb[205].mxu0 }
0x2358   : > { %v10438_v19 = vadd.f32 %v10437_v45, %v10436_v26  ;;  %v10439_v27 = vpop.f32.mrb[206].mxu0 }
0x2359   : > { %v10440_v42 = vpop.f32.mrb[207].mxu0 }
0x235a   : > { %v9365_v59 = vadd.f32 %v10438_v19, %v15558_v30  ;;  %v9375_v30 = vadd.f32 %v10058_v24, %v9363_v17  ;;  %v8734_v19 = vmul.f32 %v15677_v61, %v8716_v6 }
0x235c   : > { %v9377_v3 = vadd.f32 %v10058_v24, %v9365_v59  ;;  %v9387_v60 = vsel %vm9386_vm7, %v9385_v41, %v9375_v30  ;;  %v8752_v42 = vadd.f32 %v15685_v23, %v8734_v19 }
0x235e   : > { %v10442_v49 = vpop.f32.mrb[208].mxu0  ;;  %v9388_v62 = vrot.slane %v9377_v3, 6 }
0x235f   : > { %v10443_v12 = vpop.f32.mrb[209].mxu0 }
0x2360   : > { %v10445_v34 = vpop.f32.mrb[210].mxu0  ;;  %v9390_v32 = vsel %vm9389_vm8, %v9388_v62, %v9387_v60  ;;  %v10060_v62 = vld [vmem:[%s16092_s16] ss:$0 sm:$0xff] }
0x2361   : > { %v10446_v46 = vpop.f32.mrb[211].mxu0 }
0x2362   : > { %v10447_v43 = vadd.f32 %v10446_v46, %v10445_v34 }
0x2364   : > { %v9366_v1 = vadd.f32 %v10447_v43, %v15582_v2  ;;  %v8667_v2 = vsel %vm799_vm0, %v8633_v25, 0.0 }
0x2366   : > { %v9378_v47 = vadd.f32 %v10058_v24, %v9366_v1 }
0x2368   : > { %v9391_v31 = vrot.slane %v9378_v47, 5 }
0x236a   : > { %v9393_v40 = vsel %vm9392_vm9, %v9391_v31, %v9390_v32 }
0x236b   : > { %v9396_v52 = vsel %vm9395_vm10, %v9393_v40, 0.0 }
0x236c   : > { %9397 = vadd.xlane.f32.xlu0 %v9396_v52 }
0x2370   : > { %8668 = vadd.xlane.f32.xlu0 %v8667_v2 }
0x23f9   : > { %v9398_v9 = vpop.xlane.xlu0 %9397 }
0x23fa   : > { %v9399_v13 = vmul.f32 0.015625, %v9398_v9 }
0x23fc   : > { %v9401_v8 = vrot.slane %v9399_v13, 1  ;;  %v9402_v35 = vrot.slane %v9399_v13, 2  ;;  %v9403_v48 = vrot.slane %v9399_v13, 3  ;;  %v9408_v0 = vsub.f32 %v9375_v30, %v9399_v13 }
0x23fd   : > { %v8669_v5 = vpop.xlane.xlu0 %8668 }
0x23fe   : > { %v9409_v15 = vsub.f32 %v9376_v10, %v9401_v8  ;;  %v9410_v58 = vsub.f32 %v9377_v3, %v9402_v35  ;;  %v8681_v54 = vmul.f32 0.015625, %v8669_v5  ;;  %v9411_v50 = vsub.f32 %v9378_v47, %v9403_v48 }
0x23ff   : > { %v9412_v11 = vmul.f32 %v9408_v0, %v9408_v0 }
0x2400   : > { %v8693_v28 = vadd.f32 1e-06, %v8681_v54  ;;  %v9413_v29 = vmul.f32 %v9409_v15, %v9409_v15  ;;  %v9414_v14 = vmul.f32 %v9410_v58, %v9410_v58  ;;  %v9415_v57 = vmul.f32 %v9411_v50, %v9411_v50 }
0x2402   : > { %12018 = vrsqrt.f32 %v8693_v28  ;;  %v9420_v51 = vrot.slane %v9413_v29, 7  ;;  %v9422_v39 = vrot.slane %v9414_v14, 6  ;;  %v9424_v36 = vrot.slane %v9415_v57, 5 }
0x2404   : > { %v9421_v63 = vsel %vm9386_vm7, %v9420_v51, %v9412_v11 }
0x2405   : > { %v9423_v38 = vsel %vm9389_vm8, %v9422_v39, %v9421_v63 }
0x2406   : > { %v9425_v22 = vsel %vm9392_vm9, %v9424_v36, %v9423_v38 }
0x2407   : > { %v9427_v56 = vsel %vm9395_vm10, %v9425_v22, 0.0 }
0x2408   : > { %9428 = vadd.xlane.f32.xlu1 %v9427_v56 }
0x240c   : > { %v12019_v26 = vpop.eup %12018 }
0x240d   : > { %v8717_v45 = vmul.f32 %v12019_v26, %v8621_v7 }
0x240f   : > { %v8735_v27 = vmul.f32 %v15677_v61, %v8717_v45  ;;  %v10059_v61 = vld [vmem:[%s16091_s15] ss:$0 sm:$0xff] }
0x2411   : > { %v8753_v20 = vadd.f32 %v15685_v23, %v8735_v27 }
0x2413   : > { %v8759_v59 = vpack.c.bf16 %v8753_v20, %v8752_v42 }
0x2415   : > { %10008 = vmatmul.mubr.msk.bf16.gmra.mrb[228].mxu1 %vm799_vm0, %v8759_v59 }
0x2495   : > { %v9429_v49 = vpop.xlane.xlu1 %9428 }
0x2496   : > { %v9430_v24 = vmul.f32 0.015625, %v9429_v49 }
0x2498   : > { %v9431_v12 = vadd.f32 1e-06, %v9430_v24 }
0x249a   : > { %12020 = vrsqrt.f32 %v9431_v12 }
0x24a4   : > { %v12021_v16 = vpop.eup %12020 }
0x24a5   : > { %v9434_v10 = vrot.slane %v12021_v16, 1  ;;  %v9435_v53 = vrot.slane %v12021_v16, 2  ;;  %v9436_v34 = vrot.slane %v12021_v16, 3  ;;  %v9441_v3 = vmul.f32 %v12021_v16, %v9408_v0 }
0x24a7   : > { %v9442_v46 = vmul.f32 %v9434_v10, %v9409_v15  ;;  %v9443_v17 = vmul.f32 %v9435_v53, %v9410_v58  ;;  %v9444_v43 = vmul.f32 %v9436_v34, %v9411_v50  ;;  %v9451_v23 = vmul.f32 %v10059_v61, %v9441_v3 }
0x24a9   : > { %v9452_v44 = vmul.f32 %v10059_v61, %v9442_v46  ;;  %v9453_v41 = vmul.f32 %v10059_v61, %v9443_v17  ;;  %v9454_v1 = vmul.f32 %v10059_v61, %v9444_v43  ;;  %v15982_v31 = vadd.f32 %v10060_v62, %v9451_v23 }
0x24ab   : > { %v15976_v30 = vadd.f32 %v10060_v62, %v9452_v44  ;;  %v15978_v47 = vadd.f32 %v10060_v62, %v9453_v41  ;;  %v15980_v7 = vadd.f32 %v10060_v62, %v9454_v1 }
0x24ad   : > { %v9471_v60 = vrot.slane %v15976_v30, 7  ;;  %v9473_v32 = vrot.slane %v15978_v47, 6  ;;  %v9475_v52 = vrot.slane %v15980_v7, 5 }
0x24af   : > { %v9472_v40 = vsel %vm9386_vm7, %v9471_v60, %v15982_v31 }
0x24b0   : > { %v9474_v25 = vsel %vm9389_vm8, %v9473_v32, %v9472_v40 }
0x24b1   : > { %v9476_v2 = vsel %vm9392_vm9, %v9475_v52, %v9474_v25 }
0x24b2   : > { %v9478_v55 = vsel %vm9395_vm10, %v9476_v2, 0.0 }
0x24b3   : > { %9479 = vadd.xlane.f32.xlu0 %v9478_v55 }
0x24e8   : > { %v8924_v33 = vpop.f32.mrb[228].mxu1 }
0x24e9   : > { %v8925_v21 = vadd.f32 %v8924_v33, %v15782_v4  ;;  %v8926_v9 = vpop.f32.mrb[229].mxu1 }
0x24ea   : > { %v8927_v13 = vadd.f32 %v8926_v9, %v15785_v37  ;;  %v8928_v8 = vpop.f32.mrb[230].mxu1 }
0x24eb   : > { %v8953_v35 = vmul.f32 %v8925_v21, %v8925_v21  ;;  %v8929_v48 = vadd.f32 %v8928_v8, %v15782_v4  ;;  %v8930_v5 = vpop.f32.mrb[231].mxu1 }
0x24ec   : > { %v8954_v0 = vmul.f32 %v8927_v13, %v8927_v13  ;;  %v8931_v15 = vadd.f32 %v8930_v5, %v15785_v37 }
0x24ed   : > { %v8977_v58 = vmul.f32 %v8953_v35, %v8925_v21  ;;  %v8955_v54 = vmul.f32 %v8929_v48, %v8929_v48  ;;  %v11450_v35 = vld [vmem:[%s16095_s19 + $0x10] sm:$0xff]  }
0x24ee   : > { %v8978_v50 = vmul.f32 %v8954_v0, %v8927_v13  ;;  %v8956_v28 = vmul.f32 %v8931_v15, %v8931_v15 }
0x24ef   : > { %v9001_v29 = vmul.f32 0.044715, %v8977_v58  ;;  %v8979_v14 = vmul.f32 %v8955_v54, %v8929_v48 }
0x24f0   : > { %v9002_v57 = vmul.f32 0.044715, %v8978_v50  ;;  %v8980_v11 = vmul.f32 %v8956_v28, %v8931_v15 }
0x24f1   : > { %v9025_v51 = vadd.f32 %v9001_v29, %v8925_v21  ;;  %v9003_v39 = vmul.f32 0.044715, %v8979_v14  ;;  %v10061_v14 = vld [vmem:[%s16093_s17] ss:$0 sm:$0xff] }
0x24f2   : > { %v9026_v63 = vadd.f32 %v9002_v57, %v8927_v13  ;;  %v9004_v36 = vmul.f32 0.044715, %v8980_v11 }
0x24f3   : > { %v9049_v38 = vmul.f32 0.7978846, %v9025_v51  ;;  %v9027_v18 = vadd.f32 %v9003_v39, %v8929_v48 }
0x24f4   : > { %v9050_v22 = vmul.f32 0.7978846, %v9026_v63  ;;  %v9028_v4 = vadd.f32 %v9004_v36, %v8931_v15  ;;  %v10062_v63 = vld [vmem:[%s16094_s18] ss:$0 sm:$0xff] }
0x24f5   : > { %12022 = vtanh.f32 %v9049_v38  ;;  %v9051_v56 = vmul.f32 0.7978846, %v9027_v18 }
0x24f6   : > { %12024 = vtanh.f32 %v9050_v22  ;;  %v9052_v37 = vmul.f32 0.7978846, %v9028_v4 }
0x24f7   : > { %12026 = vtanh.f32 %v9051_v56 }
0x24f8   : > { %12028 = vtanh.f32 %v9052_v37 }
0x24ff   : > { %v12023_v6 = vpop.eup %12022 }
0x2500   : > { %v12025_v26 = vpop.eup %12024  ;;  %v9097_v45 = vadd.f32 1.0, %v12023_v6 }
0x2501   : > { %v12027_v19 = vpop.eup %12026  ;;  %v9098_v27 = vadd.f32 1.0, %v12025_v26 }
0x2502   : > { %v12029_v42 = vpop.eup %12028  ;;  %v9099_v20 = vadd.f32 1.0, %v12027_v19  ;;  %v9121_v59 = vmul.f32 0.5, %v9097_v45 }
0x2503   : > { %v9100_v49 = vadd.f32 1.0, %v12029_v42  ;;  %v9122_v24 = vmul.f32 0.5, %v9098_v27 }
0x2504   : > { %v9123_v12 = vmul.f32 0.5, %v9099_v20  ;;  %v9145_v10 = vmul.f32 %v9121_v59, %v8925_v21 }
0x2505   : > { %v9124_v16 = vmul.f32 0.5, %v9100_v49  ;;  %v9146_v34 = vmul.f32 %v9122_v24, %v8927_v13 }
0x2506   : > { %v9147_v53 = vmul.f32 %v9123_v12, %v8929_v48  ;;  %v11451_v48 = vld [vmem:[%s16095_s19 + $0x18] sm:$0xff]  }
0x2507   : > { %v9148_v3 = vmul.f32 %v9124_v16, %v8931_v15 }
0x2508   : > { %v9159_v61 = vpack.c.bf16 %v9147_v53, %v9145_v10 }
0x2509   : > { %v9160_v46 = vpack.c.bf16 %v9148_v3, %v9146_v34 }
0x250b   : > { %9356 = vmatprep.mubr.bf16.mxu0 %v9160_v46 }
0x250c   : > { %9357 = vmatmul.mubr.bf16.gmra.mrb[212].mxu0 %v9159_v61 }
0x2540   : > { %v9480_v17 = vpop.xlane.xlu0 %9479 }
0x2541   : > { %v9481_v43 = vmul.f32 0.015625, %v9480_v17 }
0x2543   : > { %v9483_v23 = vrot.slane %v9481_v43, 1  ;;  %v9484_v44 = vrot.slane %v9481_v43, 2  ;;  %v9485_v41 = vrot.slane %v9481_v43, 3  ;;  %v9490_v1 = vsub.f32 %v15982_v31, %v9481_v43  ;;  %v10063_v43 = vld [vmem:[%s16297_s5] ss:$0 sm:$0xff]  ;;  %s12038_s5 = scalar_lea.vmem %s12037_s24, 128 }
0x2544   : > { %p12040_p1 = scmp.lt.s32.totalorder %s12038_s5, %s12032_s3 }
0x2545   : > { %v9491_v62 = vsub.f32 %v15976_v30, %v9483_v23  ;;  %v9492_v60 = vsub.f32 %v15978_v47, %v9484_v44  ;;  %v9493_v32 = vsub.f32 %v15980_v7, %v9485_v41  ;;  %v9494_v2 = vmul.f32 %v9490_v1, %v9490_v1  ;;  %v11448_v30 = vld [vmem:[%s16095_s19] sm:$0xff]   ;;  %v11449_v7 = vld [vmem:[%s16095_s19 + $0x8] sm:$0xff]  }
0x2546   : > { %v12104_v47 = vmov 0.0   ;;  %p12041_p2 = por %p12040_p1, %p12039_p0 }
0x2547   : > { %v9495_v40 = vmul.f32 %v9491_v62, %v9491_v62  ;;  %v9496_v52 = vmul.f32 %v9492_v60, %v9492_v60  ;;  %v9497_v25 = vmul.f32 %v9493_v32, %v9493_v32  ;;  %11011 = vmatprep.subr.bf16.mxu1 %v12104_v47  ;;  %11019 = vmatprep.mubr.msk.bf16.mxu1 %vm12105_vm11, %v12104_v47 }
0x2548   : > { %11012 = vmatpush3.bf16.msra.mxu1 %v11448_v30  ;;  %p12042_p3 = pnand %p12041_p2, %p12035_p13 }
0x2549   : > { %v9502_v55 = vrot.slane %v9495_v40, 7  ;;  %v9504_v33 = vrot.slane %v9496_v52, 6  ;;  %v9506_v9 = vrot.slane %v9497_v25, 5  ;;  %11013 = vmatprep.subr.bf16.mxu1 %v12104_v47 }
0x254b   : > { %v9503_v21 = vsel %vm9386_vm7, %v9502_v55, %v9494_v2 }
0x254c   : > { %v9505_v13 = vsel %vm9389_vm8, %v9504_v33, %v9503_v21  ;;  %11014 = vmatpush3.bf16.msra.mxu1 %v11449_v7 }
0x254d   : > { %v9507_v8 = vsel %vm9392_vm9, %v9506_v9, %v9505_v13  ;;  %11015 = vmatprep.subr.bf16.mxu1 %v12104_v47 }
0x254e   : > { %v9509_v31 = vsel %vm9395_vm10, %v9507_v8, 0.0 }
0x254f   : > { %9510 = vadd.xlane.f32.xlu1 %v9509_v31 }
0x2550   : > { %11016 = vmatpush3.bf16.msra.mxu1 %v11450_v35 }
0x2551   : > { %11017 = vmatprep.subr.bf16.mxu1 %v12104_v47 }
0x2554   : > { %11018 = vmatpush3.bf16.msra.mxu1 %v11451_v48 }
0x25dc   : > { %v9511_v5 = vpop.xlane.xlu1 %9510 }
0x25dd   : > { %v9512_v0 = vmul.f32 0.015625, %v9511_v5 }
0x25df   : > { %v9513_v15 = vadd.f32 1e-05, %v9512_v0  ;;  %v10448_v58 = vpop.f32.mrb[212].mxu0 }
0x25e0   : > { %v10449_v54 = vpop.f32.mrb[213].mxu0 }
0x25e1   : > { %12030 = vrsqrt.f32 %v9513_v15  ;;  %v10451_v50 = vpop.f32.mrb[214].mxu0 }
0x25e2   : > { %v10452_v28 = vpop.f32.mrb[215].mxu0 }
0x25eb   : > { %v12031_v29 = vpop.eup %12030 }
0x25ec   : > { %v9516_v57 = vrot.slane %v12031_v29, 1  ;;  %v9517_v11 = vrot.slane %v12031_v29, 2  ;;  %v9518_v51 = vrot.slane %v12031_v29, 3  ;;  %v9523_v39 = vmul.f32 %v12031_v29, %v9490_v1 }
0x25ee   : > { %v9524_v36 = vmul.f32 %v9516_v57, %v9491_v62  ;;  %v9525_v38 = vmul.f32 %v9517_v11, %v9492_v60  ;;  %v9526_v18 = vmul.f32 %v9518_v51, %v9493_v32  ;;  %v9533_v22 = vmul.f32 %v10061_v14, %v9523_v39 }
0x25f0   : > { %v9534_v4 = vmul.f32 %v10061_v14, %v9524_v36  ;;  %v9535_v56 = vmul.f32 %v10061_v14, %v9525_v38  ;;  %v9536_v37 = vmul.f32 %v10061_v14, %v9526_v18  ;;  %v9543_v6 = vadd.f32 %v10062_v63, %v9533_v22 }
0x25f2   : > { %v9544_v26 = vadd.f32 %v10062_v63, %v9534_v4  ;;  %v9545_v45 = vadd.f32 %v10062_v63, %v9535_v56  ;;  %v9546_v19 = vadd.f32 %v10062_v63, %v9536_v37  ;;  %v9547_v27 = vpack.c.bf16 %v9543_v6, %v9543_v6 }
0x25f4   : > { %v9548_v42 = vpack.c.bf16 %v9544_v26, %v9544_v26  ;;  %v9549_v20 = vpack.c.bf16 %v9545_v45, %v9545_v45  ;;  %v9550_v59 = vpack.c.bf16 %v9546_v19, %v9546_v19  ;;  %v9570_v16 = vunpack.c.l.b16 %v9547_v27 }
0x25f6   : > { %v9571_v49 = vunpack.c.l.b16 %v9548_v42  ;;  %v9572_v24 = vunpack.c.l.b16 %v9549_v20  ;;  %v9573_v12 = vunpack.c.l.b16 %v9550_v59 }
0x25f8   : > { %v9574_v10 = vrot.slane %v9571_v49, 7  ;;  %v9576_v53 = vrot.slane %v9572_v24, 6  ;;  %v9578_v3 = vrot.slane %v9573_v12, 5 }
0x25fa   : > { %v9575_v34 = vsel %vm9386_vm7, %v9574_v10, %v9570_v16 }
0x25fb   : > { %v9577_v61 = vsel %vm9389_vm8, %v9576_v53, %v9575_v34 }
0x25fc   : > { %v9579_v46 = vsel %vm9392_vm9, %v9578_v3, %v9577_v61 }
0x25fd   : > { %v9580_v17 = vpack.c.b16 %v9579_v46, %v9579_v46 }
0x25ff   : > { %11020 = vmatmul.mubr.msk.bf16.vlgmr.msra.gmra.mrb[232].mxu1 %vm799_vm0, %v9580_v17 }
0x26d2   : > { %v9642_v23 = vpop.f32.mrb[232].mxu1 }
0x26d3   : > { %v9643_v44 = vadd.f32 %v10063_v43, %v9642_v23  ;;  %v11021_v41 = vpop.f32.mrb[233].mxu1 }
0x26d4   : > { %v9645_v1 = vpop.f32.mrb[234].mxu1 }
0x26d5   : > { %9648 = vst [vmem:[%s652_s20] sm:$0xf] %v9643_v44  ;;  %v11022_v62 = vpop.f32.mrb[235].mxu1 }
0x26d6   : > { %12045 = shalt.err (!%p12042_p3)
}
0x26d7   : > { %s12046_s23 = scalar_lea.hbm %s16034_s0, 64  ;;  %s12050_s21 = scalar_lea.hbm %s16299_s28, 128 }
0x26d8   : > { %p12047_p4 = scmp.ne.s32.totalorder %s16034_s0, %s12046_s23  ;;  %p12051_p9 = scmp.lt.u32.totalorder %s16034_s0, %s16299_s28 }
0x26d9   : > { %p12052_p10 = scmp.lt.u32.totalorder %s12050_s21, %s12046_s23  ;;  %p12054_p12 = scmp.lt.u32.totalorder %s12046_s23, %s16034_s0 }
0x26da   : > { %p12048_p7 = pnand %p12047_p4, %p12255_p5 }
0x26db   : > { %p12053_p11 = por %p12052_p10, %p12051_p9 }
0x26dc   : > { %p12049_p8 = pneg %p12048_p7 }
0x26dd   : > { %p12055_p13 = por %p12054_p12, %p12053_p11 }
0x26df   : > { %p12056_p0 = pnand %p12055_p13, %p12049_p8 }
0x26e1   : > { %12059 = shalt.err (!%p12056_p0)
}
0x26e2   : > { %11119 = dma.vmem_to_hbm [thread:$0]  (%p12255_p5), %s16036_s26, 64, %s16034_s0, %s9650_s4  }
0x26e3 PF: > { %s16300_s3 = sld [smem:[#allocation7_spill]]  ;;  %s16301_s24 = sld [smem:[#allocation5_spill]] }
0x26e9   : > { %p11125_p1 = scmp.ge.s32.totalorder %s16300_s3, 2  ;;  %s9675_s22 = sand.u32 1, %s16301_s24  }
0x26ea   : > { %s9676_s20 = scalar_lea.sflag [#allocation3], %s9675_s22 }
0x26eb   : > { %p11122_p2 = pnand %p11125_p1, %p12259_p6 }
0x26ed   : > { %12077 = dma.done.wait (!%p11122_p2), %s9676_s20, 64  }
0x26ee   : > { %12079 = vsyncadd (!%p11122_p2), %s9676_s20, 4294967232  ;;  %s16303_s27 = sld [smem:[#allocation8_spill]]  ;;  %s16304_s23 = sld [smem:[#allocation6_spill]] }
0x26ef   : > { %s16305_s26 = sld [smem:[#allocation9_spill]]  ;;  %s16306_s2 = smov %s12086_s25 }
0x26f4   : > { %p31_p3 = scmp.ge.s32.totalorder %s16303_s27, 4   ;;  %s16307_s25 = smov %s16304_s23 }
0x26f6   :  { %33 = sbr.rel (!%p31_p3) target bundleno = 12 (0xc), region = 151 }
0x26fd   :  { %9681 = vsyncpa [#allocation3], 1 }
0x26fe   :  { %9683 = vsyncpa [#allocation3 + $0x1], 1 }

</bundles_post_ra>
